<compile_context>
chip_gen: v7x
topology: tpu7x:2x2x1
jax: 0.10.0
libtpu: 0.0.40
codegen_flags: <defaults>
</compile_context>

<pallas_src>
import functools

import numpy as np

import jax
import jax.numpy as jnp
from jax import lax
from jax.experimental import pallas as pl
from jax.experimental.pallas import tpu as pltpu

EPS = 1e-5
CLASSES_NUM = 10
KS = 5            # conv kernel size
PAD = 2           # conv padding
H = W = 8         # input spatial size implied by the 16*4*4 flatten
HO = WO = 4       # spatial size after AvgPool2d(2)
S1 = H + PAD      # per-sample row stride in the stacked 8x8 slabs (8 data + 2 gap)
S4 = HO + PAD     # per-sample row stride in the stacked 4x4 slabs (4 data + 2 gap)


def _round_up(n, m):
    return ((n + m - 1) // m) * m


def _log_softmax(logits):
    m = jnp.max(logits, axis=1, keepdims=True)
    lse = m + jnp.log(jnp.sum(jnp.exp(logits - m), axis=1, keepdims=True))
    return logits - lse


# ---------------------------------------------------------------------------
# The fused kernel (one program = one block of `bt` batch samples).
# ---------------------------------------------------------------------------
def _fused_kernel(x_ref,
                  w1_ref, b1_ref,
                  w2_ref, b2_ref, s32_ref, t32_ref,
                  w3_ref, b3_ref,
                  pw_ref, s64_ref, t64_ref,
                  w4_ref, b4_ref,
                  wh_ref, bh_ref, dsc_ref, dsh_ref, wd2_ref, bd2_ref,
                  ph_ref, sall_ref, mask_ref,
                  out_ref,
                  pad2, pad3, pad4, acc1, acc2, acc3, acc4,
                  *, bt):
    f32 = jnp.float32
    R1 = bt * S1 - PAD          # rows produced by the conv1..conv3 matmuls
    R4 = bt * S4 - PAD          # rows produced by the conv4 matmuls
    mask = mask_ref[...]        # zeroes the 2 garbage rows per sample seam

    def conv_accum(src_rows, w_ref, acc_ref):
        # acc = sum_kh  src[kh : kh+rows, :] @ band[kh]   (f32 VMEM accumulator)
        acc_ref[...] = jnp.dot(src_rows(0), w_ref[0], preferred_element_type=f32)
        for kh in range(1, KS):
            acc_ref[...] += jnp.dot(src_rows(kh), w_ref[kh],
                                    preferred_element_type=f32)

    def write_padded(dst, val):
        # Interior rows [2:2+R1) get the (seam-masked) activations.  The 2 top /
        # 2 bottom border rows are cheaply re-zeroed every step (no reliance on
        # a step-0 init, which would be unsafe when the grid is core-split).
        dst[0:PAD, :] = jnp.zeros((PAD, dst.shape[1]), dst.dtype)
        dst[R1 + PAD:R1 + 2 * PAD, :] = jnp.zeros((PAD, dst.shape[1]), dst.dtype)
        dst[PAD:PAD + R1, :] = val.astype(dst.dtype)

    # conv1 (5->16) + relu1.  x_ref already is the zero-padded stacked slab.
    conv_accum(lambda kh: x_ref[kh:kh + R1, :], w1_ref, acc1)
    a = jnp.maximum(acc1[...] + b1_ref[...], 0.0)
    write_padded(pad2, a * mask)

    # conv2 (16->32) + relu2 + norm1 (eval BatchNorm2d folded affine)
    conv_accum(lambda kh: pad2[kh:kh + R1, :], w2_ref, acc2)
    a = jnp.maximum(acc2[...] + b2_ref[...], 0.0)
    a = a * s32_ref[...] + t32_ref[...]
    write_padded(pad3, a * mask)

    # conv3 (32->64) + relu3
    conv_accum(lambda kh: pad3[kh:kh + R1, :], w3_ref, acc3)
    a = jnp.maximum(acc3[...] + b3_ref[...], 0.0)                    # (R1, 512)

    # pool1: AvgPool2d(2) as two constant matmuls, norm2 folded affine.  The
    # row-pool matrix also scatters the pooled rows straight into conv4's
    # padded slab (its zero rows produce the slab's zero border/gap rows), so
    # pad4 needs no zero initialisation at all.
    pcols = jnp.dot(a.astype(pw_ref.dtype), pw_ref[...],
                    preferred_element_type=f32)                      # (R1, 256)
    pcols = pcols * s64_ref[...] + t64_ref[...]
    pad4[...] = jnp.dot(ph_ref[...], pcols.astype(ph_ref.dtype),
                        preferred_element_type=f32).astype(pad4.dtype)

    # conv4 (64->16) + relu4
    conv_accum(lambda kh: pad4[kh:kh + R4, :], w4_ref, acc4)
    a4 = jnp.maximum(acc4[...] + b4_ref[...], 0.0)                   # (R4, 64)

    # flatten + heads: gather every sample's 4 valid conv4 rows with one
    # constant 0/1 matmul, then contract against the flatten-permuted, fused
    # c_fc1/d_fc1 weight.  No flatten scratch, no masked partial stores.
    sel = jnp.dot(sall_ref[...], a4, preferred_element_type=f32)     # (4*bt, 64)
    hall = bh_ref[...]
    for h in range(HO):
        hall = hall + jnp.dot(sel[h * bt:(h + 1) * bt, :],
                              wh_ref[h * 64:(h + 1) * 64, :],
                              preferred_element_type=f32)            # (bt, 256)

    # class head: lanes [0:nc) hold real logits; lanes [nc:128) were biased to
    # -1e30 in bh so they vanish under the 128-lane log-softmax.
    cls = _log_softmax(hall[:, 0:128])

    # domain head (gradient reversal is identity in the forward pass):
    # d_fc1 (lanes 128:256, 100 real + zero pads) -> d_bn1 -> relu -> d_fc2.
    dh = jnp.maximum(hall[:, 128:256] * dsc_ref[...] + dsh_ref[...], 0.0)
    dl = jnp.dot(dh, wd2_ref[...], preferred_element_type=f32) + bd2_ref[...]
    dom = _log_softmax(dl)

    out_ref[:, 0:128] = cls
    out_ref[:, 128:256] = dom


# ---------------------------------------------------------------------------
# Structural (batch-block dependent) constants.
# ---------------------------------------------------------------------------
def _pool_place_matrix(bt):
    """(NR4, R1): averages AvgPool2d row pairs of the conv3 output and scatters
    each sample's 4 pooled rows straight into conv4's padded slab layout."""
    nr4, r1 = bt * S4 + PAD, bt * S1 - PAD
    m = np.zeros((nr4, r1), np.float32)
    for b in range(bt):
        for ho in range(HO):
            r = PAD + b * S4 + ho
            c = b * S1 + 2 * ho
            m[r, c] = m[r, c + 1] = 0.5
    return m


def _row_gather_matrix(bt):
    """(HO*bt, R4) 0/1 matrix selecting the 4 valid conv4 output rows of every
    sample (h-major rows so the head can take aligned bt-row slices)."""
    r4 = bt * S4 - PAD
    m = np.zeros((HO * bt, r4), np.float32)
    for h in range(HO):
        for b in range(bt):
            m[h * bt + b, b * S4 + h] = 1.0
    return m


def _row_mask(bt):
    """(R1, 1) mask zeroing the 2 garbage rows per sample that the shifted-row
    conv accumulation produces at the sample seams."""
    r1 = bt * S1 - PAD
    r = np.arange(r1)
    return ((r % S1) < H).astype(np.float32)[:, None]


# ---------------------------------------------------------------------------
# Wrapper.
# ---------------------------------------------------------------------------
_PARAM_ORDER = ("w1", "b1", "w2", "b2", "s32", "t32", "w3", "b3",
                "pw", "s64", "t64", "w4", "b4",
                "wh", "bh", "dsc", "dsh", "wd2", "bd2")


def _const_spec(shape):
    nd = len(shape)
    return pl.BlockSpec(shape, lambda i, _nd=nd: (0,) * _nd)


def cnn_model_forward(x_nchw, alpha, params, *, classes_num=CLASSES_NUM,
                      block_batch=16):
    del alpha   # ReverseLayerF only scales gradients; forward pass is identity.
    B = x_nchw.shape[0]
    assert x_nchw.shape[1:] == (5, H, W)

    bt = max(8, min(block_batch, _round_up(B, 8)))   # samples per grid step
    nblk = -(-B // bt)
    Bp = nblk * bt
    NR1 = bt * S1 + PAD          # stacked padded rows for the 8x8 layers
    R1 = bt * S1 - PAD
    NR4 = bt * S4 + PAD          # stacked padded rows for the 4x4 layer
    R4 = bt * S4 - PAD
    NR1p = _round_up(NR1, 8)     # sublane-align the input block rows

    # NCHW -> per-sample slab (rows = h, cols = (w, c)), then the stacked,
    # zero-row-padded block layout the kernel expects:
    #   [2 zero rows] + bt * [8 data rows + 2 zero rows] (+ alignment rows)
    x = jnp.transpose(x_nchw, (0, 2, 3, 1)).astype(jnp.float32).reshape(B, H, W * 5)
    x = jnp.pad(x, ((0, Bp - B), (0, PAD), (0, 0)))
    x = x.reshape(nblk, bt * S1, W * 5)
    x = jnp.pad(x, ((0, 0), (PAD, NR1p - NR1), (0, 0)))
    x = x.reshape(nblk * NR1p, W * 5).astype(jnp.bfloat16)

    ph = jnp.asarray(_pool_place_matrix(bt), jnp.bfloat16)
    sall = jnp.asarray(_row_gather_matrix(bt), jnp.float32)
    mask = jnp.asarray(_row_mask(bt), jnp.float32)

    args = [params[k] for k in _PARAM_ORDER] + [ph, sall, mask]
    in_specs = ([pl.BlockSpec((NR1p, W * 5), lambda i: (i, 0))]
                + [_const_spec(a.shape) for a in args])
    out_specs = pl.BlockSpec((bt, 256), lambda i: (i, 0))

    out = pl.pallas_call(
        functools.partial(_fused_kernel, bt=bt),
        grid=(nblk,),
        out_shape=jax.ShapeDtypeStruct((Bp, 256), jnp.float32),
        in_specs=in_specs,
        out_specs=out_specs,
        scratch_shapes=[
            pltpu.VMEM((NR1, W * 16), jnp.bfloat16),   # conv2 padded input slab
            pltpu.VMEM((NR1, W * 32), jnp.bfloat16),   # conv3 padded input slab
            pltpu.VMEM((NR4, WO * 64), jnp.bfloat16),  # conv4 padded input slab
            pltpu.VMEM((R1, W * 16), jnp.float32),     # conv1 f32 accumulator
            pltpu.VMEM((R1, W * 32), jnp.float32),     # conv2 f32 accumulator
            pltpu.VMEM((R1, W * 64), jnp.float32),     # conv3 f32 accumulator
            pltpu.VMEM((R4, WO * 16), jnp.float32),    # conv4 f32 accumulator
        ],
        compiler_params=pltpu.CompilerParams(
            dimension_semantics=("parallel",),      # batch blocks shard across TCs
            vmem_limit_bytes=32 * 1024 * 1024,
        ),
    )(x, *args)

    cls = out[:B, :classes_num]
    dom = out[:B, 128:128 + classes_num]
    return cls, dom


# ---------------------------------------------------------------------------
# Parameter construction (deterministic; shapes from the PyTorch __init__).
# ---------------------------------------------------------------------------
def _conv_band(wt_oihw, w_out):
    """Expand a (Cout, Cin, 5, 5) conv weight into per-kernel-row banded matmul
    weights of shape (5, w_out*Cin, w_out*Cout) with the kw padding folded in
    (out-of-range kw terms clipped), so for an unpadded-in-w slab S (rows = h,
    cols = (w, cin)) the SAME convolution is  out = sum_kh S[kh:kh+h, :] @ band[kh]
    with output columns ordered (w, cout)."""
    cout, cin = wt_oihw.shape[:2]
    band = np.zeros((KS, w_out * cin, w_out * cout), np.float32)
    w_khkwio = np.transpose(np.asarray(wt_oihw), (2, 3, 1, 0))   # (kh, kw, cin, cout)
    for kh in range(KS):
        for wo in range(w_out):
            for kw in range(KS):
                wi = wo + kw - PAD
                if 0 <= wi < w_out:
                    band[kh, wi * cin:(wi + 1) * cin,
                         wo * cout:(wo + 1) * cout] = w_khkwio[kh, kw]
    return band


def init_params(key, classes_num=CLASSES_NUM):
    """Returns (pallas_params, raw_params)."""
    ks = jax.random.split(key, 14)

    def conv_wb(kw_, kb_, cin, cout):
        w = jax.random.normal(kw_, (cout, cin, KS, KS), jnp.float32) / np.sqrt(cin * KS * KS)
        b = jax.random.normal(kb_, (cout,), jnp.float32) * 0.01
        return np.asarray(w), np.asarray(b)

    def lin_wb(kw_, kb_, fin, fout):
        w = jax.random.normal(kw_, (fout, fin), jnp.float32) / np.sqrt(fin)
        b = jax.random.normal(kb_, (fout,), jnp.float32) * 0.01
        return np.asarray(w), np.asarray(b)

    w1, b1 = conv_wb(ks[0], ks[1], 5, 16)
    w2, b2 = conv_wb(ks[2], ks[3], 16, 32)
    w3, b3 = conv_wb(ks[4], ks[5], 32, 64)
    w4, b4 = conv_wb(ks[6], ks[7], 64, 16)
    wc, bc = lin_wb(ks[8], ks[9], 16 * HO * WO, classes_num)
    wd1, bd1 = lin_wb(ks[10], ks[11], 16 * HO * WO, 100)
    wd2, bd2 = lin_wb(ks[12], ks[13], 100, classes_num)

    bn_s = np.float32(1.0 / np.sqrt(1.0 + EPS))   # eval BN: mean=0, var=1, gamma=1, beta=0
    NEG = np.float32(-1e30)                       # "masked logit lane" bias

    p = {}
    p["w1"], p["b1"] = _conv_band(w1, W), np.tile(b1, W)[None, :]
    p["w2"], p["b2"] = _conv_band(w2, W), np.tile(b2, W)[None, :]
    p["s32"] = np.full((1, W * 32), bn_s, np.float32)      # norm1 folded affine
    p["t32"] = np.zeros((1, W * 32), np.float32)
    p["w3"], p["b3"] = _conv_band(w3, W), np.tile(b3, W)[None, :]

    # AvgPool2d(2) column-pool matrix (rows pooled by the structural ph matrix).
    pw = np.zeros((W * 64, WO * 64), np.float32)
    half_eye = 0.5 * np.eye(64, dtype=np.float32)
    for wo in range(WO):
        for dw in range(2):
            wi = 2 * wo + dw
            pw[wi * 64:(wi + 1) * 64, wo * 64:(wo + 1) * 64] = half_eye
    p["pw"] = pw
    p["s64"] = np.full((1, WO * 64), bn_s, np.float32)     # norm2 folded affine
    p["t64"] = np.zeros((1, WO * 64), np.float32)

    p["w4"], p["b4"] = _conv_band(w4, WO), np.tile(b4, WO)[None, :]

    # Heads: fold PyTorch's NCHW flatten (c,h,w order) into the fc1 weight rows
    # (the in-kernel feature is (h,w,c) ordered), fuse c_fc1 + d_fc1 into one
    # (256, 256) matmul, and bias the unused class lanes to -1e30 so a dense
    # 128-lane log-softmax ignores them:
    #   cols [0:nc)    -> class logits,  cols [nc:128)   -> -1e30
    #   cols [128:228) -> domain hidden, cols [228:256)  -> exact zeros
    hh, ww, cc = np.meshgrid(np.arange(HO), np.arange(WO), np.arange(16),
                             indexing="ij")
    perm = (cc * (HO * WO) + hh * WO + ww).reshape(-1)     # ours(h,w,c) -> torch(c,h,w)
    wh = np.zeros((256, 256), np.float32)
    bh = np.zeros((1, 256), np.float32)
    wh[:, :classes_num] = wc.T[perm]
    bh[0, :classes_num] = bc
    bh[0, classes_num:128] = NEG
    wh[:, 128:228] = wd1.T[perm]
    bh[0, 128:228] = bd1
    p["wh"], p["bh"] = wh, bh

    dsc = np.ones((1, 128), np.float32)                    # d_bn1 folded affine (+pad)
    dsc[0, :100] = bn_s
    p["dsc"], p["dsh"] = dsc, np.zeros((1, 128), np.float32)

    wd2p = np.zeros((128, 128), np.float32)                # d_fc2, padded 100->128 / nc->128
    wd2p[:100, :classes_num] = wd2.T
    bd2p = np.full((1, 128), NEG, np.float32)
    bd2p[0, :classes_num] = bd2
    p["wd2"], p["bd2"] = wd2p, bd2p

    bf16_keys = ("w1", "w2", "w3", "w4", "pw")             # MXU operands only
    params = {k: jnp.asarray(v, jnp.bfloat16 if k in bf16_keys else jnp.float32)
              for k, v in p.items()}
    raw = {k: jnp.asarray(v) for k, v in
           dict(w1=w1, b1=b1, w2=w2, b2=b2, w3=w3, b3=b3, w4=w4, b4=b4,
                wc=wc, bc=bc, wd1=wd1, bd1=bd1, wd2=wd2, bd2=bd2).items()}
    return params, raw


# ---------------------------------------------------------------------------
# Pure-XLA reference of CNNModel.forward (eval mode), for validation.
# ---------------------------------------------------------------------------
def _reference_forward(x_nchw, raw):
    hp = lax.Precision.HIGHEST
    bn_s = 1.0 / jnp.sqrt(1.0 + EPS)

    def conv(h, w, b):
        y = lax.conv_general_dilated(
            h, w, window_strides=(1, 1), padding=((PAD, PAD), (PAD, PAD)),
            dimension_numbers=("NCHW", "OIHW", "NCHW"), precision=hp)
        return y + b[None, :, None, None]

    x = x_nchw.astype(jnp.float32)
    h = jax.nn.relu(conv(x, raw["w1"], raw["b1"]))                       # conv1+relu1
    h = jax.nn.relu(conv(h, raw["w2"], raw["b2"])) * bn_s                # conv2+relu2+norm1
    h = jax.nn.relu(conv(h, raw["w3"], raw["b3"]))                       # conv3+relu3
    b = h.shape[0]
    h = h.reshape(b, 64, HO, 2, WO, 2).mean(axis=(3, 5)) * bn_s          # pool1+norm2
    h = jax.nn.relu(conv(h, raw["w4"], raw["b4"]))                       # conv4+relu4
    feat = h.reshape(b, 16 * HO * WO)                                    # NCHW flatten
    cls = jax.nn.log_softmax(
        jnp.dot(feat, raw["wc"].T, precision=hp) + raw["bc"], axis=1)
    d = jnp.dot(feat, raw["wd1"].T, precision=hp) + raw["bd1"]
    d = jax.nn.relu(d * bn_s)                                            # d_bn1+d_relu1
    dom = jax.nn.log_softmax(
        jnp.dot(d, raw["wd2"].T, precision=hp) + raw["bd2"], axis=1)
    return cls, dom


if __name__ == "__main__":
    key = jax.random.PRNGKey(0)
    kx, kp = jax.random.split(key)
    params, raw = init_params(kp, classes_num=CLASSES_NUM)

    fwd = jax.jit(functools.partial(cnn_model_forward, params=params))
    ref = jax.jit(_reference_forward)
    alpha = 0.5

    # B=2 exercises a single grid step (bt=8, 6 zero-padded samples);
    # B=24 exercises a 2-step grid with bt=16 and a half-padded final block.
    for batch in (2, 24):
        x = jax.random.normal(jax.random.fold_in(kx, batch),
                              (batch, 5, H, W), jnp.float32)    # NCHW, like PyTorch
        class_out, domain_out = fwd(x, alpha)
        jax.block_until_ready((class_out, domain_out))

        assert class_out.shape == (batch, CLASSES_NUM)
        assert domain_out.shape == (batch, CLASSES_NUM)
        # log-softmax rows must (log-)sum to ~0
        assert jnp.allclose(jnp.sum(jnp.exp(class_out), axis=1), 1.0, atol=1e-3)
        assert jnp.allclose(jnp.sum(jnp.exp(domain_out), axis=1), 1.0, atol=1e-3)

        # Cross-check against the pure-f32 XLA reference (kernel uses bf16
        # matmul operands with f32 accumulation, hence the loose tolerance).
        ref_cls, ref_dom = ref(x, raw)
        err_c = float(jnp.max(jnp.abs(class_out - ref_cls)))
        err_d = float(jnp.max(jnp.abs(domain_out - ref_dom)))
        assert err_c < 0.15 and err_d < 0.15, (batch, err_c, err_d)

    print("KERNEL_OK")
</pallas_src>

<mosaic_0001>
module attributes {stable_mosaic.version = 11 : i64} {
  func.func @_fused_kernel(%arg0: i32, %arg1: memref<88x40xbf16, #tpu.memory_space<vmem>>, %arg2: memref<5x40x128xbf16, #tpu.memory_space<vmem>>, %arg3: memref<1x128xf32, #tpu.memory_space<vmem>>, %arg4: memref<5x128x256xbf16, #tpu.memory_space<vmem>>, %arg5: memref<1x256xf32, #tpu.memory_space<vmem>>, %arg6: memref<1x256xf32, #tpu.memory_space<vmem>>, %arg7: memref<1x256xf32, #tpu.memory_space<vmem>>, %arg8: memref<5x256x512xbf16, #tpu.memory_space<vmem>>, %arg9: memref<1x512xf32, #tpu.memory_space<vmem>>, %arg10: memref<512x256xbf16, #tpu.memory_space<vmem>>, %arg11: memref<1x256xf32, #tpu.memory_space<vmem>>, %arg12: memref<1x256xf32, #tpu.memory_space<vmem>>, %arg13: memref<5x256x64xbf16, #tpu.memory_space<vmem>>, %arg14: memref<1x64xf32, #tpu.memory_space<vmem>>, %arg15: memref<256x256xf32, #tpu.memory_space<vmem>>, %arg16: memref<1x256xf32, #tpu.memory_space<vmem>>, %arg17: memref<1x128xf32, #tpu.memory_space<vmem>>, %arg18: memref<1x128xf32, #tpu.memory_space<vmem>>, %arg19: memref<128x128xf32, #tpu.memory_space<vmem>>, %arg20: memref<1x128xf32, #tpu.memory_space<vmem>>, %arg21: memref<50x78xbf16, #tpu.memory_space<vmem>>, %arg22: memref<32x46xf32, #tpu.memory_space<vmem>>, %arg23: memref<78x1xf32, #tpu.memory_space<vmem>>, %arg24: memref<8x256xf32, #tpu.memory_space<vmem>>, %arg25: memref<82x128xbf16, #tpu.memory_space<vmem>>, %arg26: memref<82x256xbf16, #tpu.memory_space<vmem>>, %arg27: memref<50x256xbf16, #tpu.memory_space<vmem>>, %arg28: memref<78x128xf32, #tpu.memory_space<vmem>>, %arg29: memref<78x256xf32, #tpu.memory_space<vmem>>, %arg30: memref<78x512xf32, #tpu.memory_space<vmem>>, %arg31: memref<46x64xf32, #tpu.memory_space<vmem>>) attributes {dimension_semantics = [#tpu.dimension_semantics<parallel>], iteration_bounds = array<i64: 1>, scalar_prefetch = 0 : i64, scratch_operands = 7 : i64, tpu.core_type = #tpu.core_type<tc>, window_params = [{transform_indices = @transform_0, window_bounds = array<i64: 88, 40>}, {pipeline_mode = #tpu.pipeline_mode<synchronous>, transform_indices = @transform_1, window_bounds = array<i64: 5, 40, 128>}, {pipeline_mode = #tpu.pipeline_mode<synchronous>, transform_indices = @transform_2, window_bounds = array<i64: 1, 128>}, {pipeline_mode = #tpu.pipeline_mode<synchronous>, transform_indices = @transform_3, window_bounds = array<i64: 5, 128, 256>}, {pipeline_mode = #tpu.pipeline_mode<synchronous>, transform_indices = @transform_4, window_bounds = array<i64: 1, 256>}, {pipeline_mode = #tpu.pipeline_mode<synchronous>, transform_indices = @transform_5, window_bounds = array<i64: 1, 256>}, {pipeline_mode = #tpu.pipeline_mode<synchronous>, transform_indices = @transform_6, window_bounds = array<i64: 1, 256>}, {pipeline_mode = #tpu.pipeline_mode<synchronous>, transform_indices = @transform_7, window_bounds = array<i64: 5, 256, 512>}, {pipeline_mode = #tpu.pipeline_mode<synchronous>, transform_indices = @transform_8, window_bounds = array<i64: 1, 512>}, {pipeline_mode = #tpu.pipeline_mode<synchronous>, transform_indices = @transform_9, window_bounds = array<i64: 512, 256>}, {pipeline_mode = #tpu.pipeline_mode<synchronous>, transform_indices = @transform_10, window_bounds = array<i64: 1, 256>}, {pipeline_mode = #tpu.pipeline_mode<synchronous>, transform_indices = @transform_11, window_bounds = array<i64: 1, 256>}, {pipeline_mode = #tpu.pipeline_mode<synchronous>, transform_indices = @transform_12, window_bounds = array<i64: 5, 256, 64>}, {pipeline_mode = #tpu.pipeline_mode<synchronous>, transform_indices = @transform_13, window_bounds = array<i64: 1, 64>}, {pipeline_mode = #tpu.pipeline_mode<synchronous>, transform_indices = @transform_14, window_bounds = array<i64: 256, 256>}, {pipeline_mode = #tpu.pipeline_mode<synchronous>, transform_indices = @transform_15, window_bounds = array<i64: 1, 256>}, {pipeline_mode = #tpu.pipeline_mode<synchronous>, transform_indices = @transform_16, window_bounds = array<i64: 1, 128>}, {pipeline_mode = #tpu.pipeline_mode<synchronous>, transform_indices = @transform_17, window_bounds = array<i64: 1, 128>}, {pipeline_mode = #tpu.pipeline_mode<synchronous>, transform_indices = @transform_18, window_bounds = array<i64: 128, 128>}, {pipeline_mode = #tpu.pipeline_mode<synchronous>, transform_indices = @transform_19, window_bounds = array<i64: 1, 128>}, {pipeline_mode = #tpu.pipeline_mode<synchronous>, transform_indices = @transform_20, window_bounds = array<i64: 50, 78>}, {pipeline_mode = #tpu.pipeline_mode<synchronous>, transform_indices = @transform_21, window_bounds = array<i64: 32, 46>}, {pipeline_mode = #tpu.pipeline_mode<synchronous>, transform_indices = @transform_22, window_bounds = array<i64: 78, 1>}, {transform_indices = @transform_23, window_bounds = array<i64: 8, 256>}]} {
    %c0 = arith.constant 0 : index
    %c0_0 = arith.constant 0 : index
    %0 = vector.load %arg23[%c0, %c0_0] : memref<78x1xf32, #tpu.memory_space<vmem>>, vector<78x1xf32>
    %c0_1 = arith.constant 0 : index
    %c0_2 = arith.constant 0 : index
    %1 = vector.load %arg1[%c0_1, %c0_2] : memref<88x40xbf16, #tpu.memory_space<vmem>>, vector<78x40xbf16>
    %c0_3 = arith.constant 0 : index
    %c0_4 = arith.constant 0 : index
    %c0_5 = arith.constant 0 : index
    %2 = vector.load %arg2[%c0_3, %c0_4, %c0_5] : memref<5x40x128xbf16, #tpu.memory_space<vmem>>, vector<1x40x128xbf16>
    %3 = vector.shape_cast %2 : vector<1x40x128xbf16> to vector<40x128xbf16>
    %cst = arith.constant dense<0.000000e+00> : vector<78x128xf32>
    %4 = tpu.matmul %1, %3, %cst {dimension_numbers = #tpu.dot_dimension_numbers<[1], [0], [0], [1], [0, 0, 1, 1], [], []>} : vector<78x40xbf16>, vector<40x128xbf16>, vector<78x128xf32> -> vector<78x128xf32>
    %c0_6 = arith.constant 0 : index
    %c0_7 = arith.constant 0 : index
    %5 = vector.load %arg28[%c0_6, %c0_7] : memref<78x128xf32, #tpu.memory_space<vmem>>, vector<78x128xf32>
    tpu.vector_store %arg28[%c0_6, %c0_7], %4 {strides = array<i32>} : memref<78x128xf32, #tpu.memory_space<vmem>>, vector<78x128xf32>,
    %c0_8 = arith.constant 0 : index
    %c0_9 = arith.constant 0 : index
    %6 = vector.load %arg28[%c0_8, %c0_9] : memref<78x128xf32, #tpu.memory_space<vmem>>, vector<78x128xf32>
    %c1 = arith.constant 1 : index
    %c0_10 = arith.constant 0 : index
    %7 = vector.load %arg1[%c1, %c0_10] : memref<88x40xbf16, #tpu.memory_space<vmem>>, vector<78x40xbf16>
    %c1_11 = arith.constant 1 : index
    %c0_12 = arith.constant 0 : index
    %c0_13 = arith.constant 0 : index
    %8 = vector.load %arg2[%c1_11, %c0_12, %c0_13] : memref<5x40x128xbf16, #tpu.memory_space<vmem>>, vector<1x40x128xbf16>
    %9 = vector.shape_cast %8 : vector<1x40x128xbf16> to vector<40x128xbf16>
    %cst_14 = arith.constant dense<0.000000e+00> : vector<78x128xf32>
    %10 = tpu.matmul %7, %9, %cst_14 {dimension_numbers = #tpu.dot_dimension_numbers<[1], [0], [0], [1], [0, 0, 1, 1], [], []>} : vector<78x40xbf16>, vector<40x128xbf16>, vector<78x128xf32> -> vector<78x128xf32>
    %11 = arith.addf %6, %10 : vector<78x128xf32>
    %c0_15 = arith.constant 0 : index
    %c0_16 = arith.constant 0 : index
    %12 = vector.load %arg28[%c0_15, %c0_16] : memref<78x128xf32, #tpu.memory_space<vmem>>, vector<78x128xf32>
    tpu.vector_store %arg28[%c0_15, %c0_16], %11 {strides = array<i32>} : memref<78x128xf32, #tpu.memory_space<vmem>>, vector<78x128xf32>,
    %c0_17 = arith.constant 0 : index
    %c0_18 = arith.constant 0 : index
    %13 = vector.load %arg28[%c0_17, %c0_18] : memref<78x128xf32, #tpu.memory_space<vmem>>, vector<78x128xf32>
    %c2 = arith.constant 2 : index
    %c0_19 = arith.constant 0 : index
    %14 = vector.load %arg1[%c2, %c0_19] : memref<88x40xbf16, #tpu.memory_space<vmem>>, vector<78x40xbf16>
    %c2_20 = arith.constant 2 : index
    %c0_21 = arith.constant 0 : index
    %c0_22 = arith.constant 0 : index
    %15 = vector.load %arg2[%c2_20, %c0_21, %c0_22] : memref<5x40x128xbf16, #tpu.memory_space<vmem>>, vector<1x40x128xbf16>
    %16 = vector.shape_cast %15 : vector<1x40x128xbf16> to vector<40x128xbf16>
    %cst_23 = arith.constant dense<0.000000e+00> : vector<78x128xf32>
    %17 = tpu.matmul %14, %16, %cst_23 {dimension_numbers = #tpu.dot_dimension_numbers<[1], [0], [0], [1], [0, 0, 1, 1], [], []>} : vector<78x40xbf16>, vector<40x128xbf16>, vector<78x128xf32> -> vector<78x128xf32>
    %18 = arith.addf %13, %17 : vector<78x128xf32>
    %c0_24 = arith.constant 0 : index
    %c0_25 = arith.constant 0 : index
    %19 = vector.load %arg28[%c0_24, %c0_25] : memref<78x128xf32, #tpu.memory_space<vmem>>, vector<78x128xf32>
    tpu.vector_store %arg28[%c0_24, %c0_25], %18 {strides = array<i32>} : memref<78x128xf32, #tpu.memory_space<vmem>>, vector<78x128xf32>,
    %c0_26 = arith.constant 0 : index
    %c0_27 = arith.constant 0 : index
    %20 = vector.load %arg28[%c0_26, %c0_27] : memref<78x128xf32, #tpu.memory_space<vmem>>, vector<78x128xf32>
    %c3 = arith.constant 3 : index
    %c0_28 = arith.constant 0 : index
    %21 = vector.load %arg1[%c3, %c0_28] : memref<88x40xbf16, #tpu.memory_space<vmem>>, vector<78x40xbf16>
    %c3_29 = arith.constant 3 : index
    %c0_30 = arith.constant 0 : index
    %c0_31 = arith.constant 0 : index
    %22 = vector.load %arg2[%c3_29, %c0_30, %c0_31] : memref<5x40x128xbf16, #tpu.memory_space<vmem>>, vector<1x40x128xbf16>
    %23 = vector.shape_cast %22 : vector<1x40x128xbf16> to vector<40x128xbf16>
    %cst_32 = arith.constant dense<0.000000e+00> : vector<78x128xf32>
    %24 = tpu.matmul %21, %23, %cst_32 {dimension_numbers = #tpu.dot_dimension_numbers<[1], [0], [0], [1], [0, 0, 1, 1], [], []>} : vector<78x40xbf16>, vector<40x128xbf16>, vector<78x128xf32> -> vector<78x128xf32>
    %25 = arith.addf %20, %24 : vector<78x128xf32>
    %c0_33 = arith.constant 0 : index
    %c0_34 = arith.constant 0 : index
    %26 = vector.load %arg28[%c0_33, %c0_34] : memref<78x128xf32, #tpu.memory_space<vmem>>, vector<78x128xf32>
    tpu.vector_store %arg28[%c0_33, %c0_34], %25 {strides = array<i32>} : memref<78x128xf32, #tpu.memory_space<vmem>>, vector<78x128xf32>,
    %c0_35 = arith.constant 0 : index
    %c0_36 = arith.constant 0 : index
    %27 = vector.load %arg28[%c0_35, %c0_36] : memref<78x128xf32, #tpu.memory_space<vmem>>, vector<78x128xf32>
    %c4 = arith.constant 4 : index
    %c0_37 = arith.constant 0 : index
    %28 = vector.load %arg1[%c4, %c0_37] : memref<88x40xbf16, #tpu.memory_space<vmem>>, vector<78x40xbf16>
    %c4_38 = arith.constant 4 : index
    %c0_39 = arith.constant 0 : index
    %c0_40 = arith.constant 0 : index
    %29 = vector.load %arg2[%c4_38, %c0_39, %c0_40] : memref<5x40x128xbf16, #tpu.memory_space<vmem>>, vector<1x40x128xbf16>
    %30 = vector.shape_cast %29 : vector<1x40x128xbf16> to vector<40x128xbf16>
    %cst_41 = arith.constant dense<0.000000e+00> : vector<78x128xf32>
    %31 = tpu.matmul %28, %30, %cst_41 {dimension_numbers = #tpu.dot_dimension_numbers<[1], [0], [0], [1], [0, 0, 1, 1], [], []>} : vector<78x40xbf16>, vector<40x128xbf16>, vector<78x128xf32> -> vector<78x128xf32>
    %32 = arith.addf %27, %31 : vector<78x128xf32>
    %c0_42 = arith.constant 0 : index
    %c0_43 = arith.constant 0 : index
    %33 = vector.load %arg28[%c0_42, %c0_43] : memref<78x128xf32, #tpu.memory_space<vmem>>, vector<78x128xf32>
    tpu.vector_store %arg28[%c0_42, %c0_43], %32 {strides = array<i32>} : memref<78x128xf32, #tpu.memory_space<vmem>>, vector<78x128xf32>,
    %c0_44 = arith.constant 0 : index
    %c0_45 = arith.constant 0 : index
    %34 = vector.load %arg28[%c0_44, %c0_45] : memref<78x128xf32, #tpu.memory_space<vmem>>, vector<78x128xf32>
    %c0_46 = arith.constant 0 : index
    %c0_47 = arith.constant 0 : index
    %35 = vector.load %arg3[%c0_46, %c0_47] : memref<1x128xf32, #tpu.memory_space<vmem>>, vector<1x128xf32>
    %36 = vector.broadcast %35 : vector<1x128xf32> to vector<78x128xf32>
    %37 = arith.addf %34, %36 : vector<78x128xf32>
    %cst_48 = arith.constant 0.000000e+00 : f32
    %38 = vector.broadcast %cst_48 : f32 to vector<78x128xf32>
    %39 = arith.maximumf %37, %38 : vector<78x128xf32>
    %40 = vector.broadcast %0 : vector<78x1xf32> to vector<78x128xf32>
    %41 = arith.mulf %39, %40 : vector<78x128xf32>
    %cst_49 = arith.constant 0.000000e+00 : bf16
    %42 = vector.broadcast %cst_49 : bf16 to vector<2x128xbf16>
    %c0_50 = arith.constant 0 : index
    %c0_51 = arith.constant 0 : index
    %43 = vector.load %arg25[%c0_50, %c0_51] : memref<82x128xbf16, #tpu.memory_space<vmem>>, vector<2x128xbf16>
    tpu.vector_store %arg25[%c0_50, %c0_51], %42 {strides = array<i32>} : memref<82x128xbf16, #tpu.memory_space<vmem>>, vector<2x128xbf16>,
    %cst_52 = arith.constant 0.000000e+00 : bf16
    %44 = vector.broadcast %cst_52 : bf16 to vector<2x128xbf16>
    %c80 = arith.constant 80 : index
    %c0_53 = arith.constant 0 : index
    %45 = vector.load %arg25[%c80, %c0_53] : memref<82x128xbf16, #tpu.memory_space<vmem>>, vector<2x128xbf16>
    tpu.vector_store %arg25[%c80, %c0_53], %44 {strides = array<i32>} : memref<82x128xbf16, #tpu.memory_space<vmem>>, vector<2x128xbf16>,
    %46 = arith.truncf %41 : vector<78x128xf32> to vector<78x128xbf16>
    %c2_54 = arith.constant 2 : index
    %c0_55 = arith.constant 0 : index
    %47 = vector.load %arg25[%c2_54, %c0_55] : memref<82x128xbf16, #tpu.memory_space<vmem>>, vector<78x128xbf16>
    tpu.vector_store %arg25[%c2_54, %c0_55], %46 {strides = array<i32>} : memref<82x128xbf16, #tpu.memory_space<vmem>>, vector<78x128xbf16>,
    %c0_56 = arith.constant 0 : index
    %c0_57 = arith.constant 0 : index
    %48 = vector.load %arg25[%c0_56, %c0_57] : memref<82x128xbf16, #tpu.memory_space<vmem>>, vector<78x128xbf16>
    %c0_58 = arith.constant 0 : index
    %c0_59 = arith.constant 0 : index
    %c0_60 = arith.constant 0 : index
    %49 = vector.load %arg4[%c0_58, %c0_59, %c0_60] : memref<5x128x256xbf16, #tpu.memory_space<vmem>>, vector<1x128x256xbf16>
    %50 = vector.shape_cast %49 : vector<1x128x256xbf16> to vector<128x256xbf16>
    %cst_61 = arith.constant dense<0.000000e+00> : vector<78x256xf32>
    %51 = tpu.matmul %48, %50, %cst_61 {dimension_numbers = #tpu.dot_dimension_numbers<[1], [0], [0], [1], [0, 0, 1, 1], [], []>} : vector<78x128xbf16>, vector<128x256xbf16>, vector<78x256xf32> -> vector<78x256xf32>
    %c0_62 = arith.constant 0 : index
    %c0_63 = arith.constant 0 : index
    %52 = vector.load %arg29[%c0_62, %c0_63] : memref<78x256xf32, #tpu.memory_space<vmem>>, vector<78x256xf32>
    tpu.vector_store %arg29[%c0_62, %c0_63], %51 {strides = array<i32>} : memref<78x256xf32, #tpu.memory_space<vmem>>, vector<78x256xf32>,
    %c0_64 = arith.constant 0 : index
    %c0_65 = arith.constant 0 : index
    %53 = vector.load %arg29[%c0_64, %c0_65] : memref<78x256xf32, #tpu.memory_space<vmem>>, vector<78x256xf32>
    %c1_66 = arith.constant 1 : index
    %c0_67 = arith.constant 0 : index
    %54 = vector.load %arg25[%c1_66, %c0_67] : memref<82x128xbf16, #tpu.memory_space<vmem>>, vector<78x128xbf16>
    %c1_68 = arith.constant 1 : index
    %c0_69 = arith.constant 0 : index
    %c0_70 = arith.constant 0 : index
    %55 = vector.load %arg4[%c1_68, %c0_69, %c0_70] : memref<5x128x256xbf16, #tpu.memory_space<vmem>>, vector<1x128x256xbf16>
    %56 = vector.shape_cast %55 : vector<1x128x256xbf16> to vector<128x256xbf16>
    %cst_71 = arith.constant dense<0.000000e+00> : vector<78x256xf32>
    %57 = tpu.matmul %54, %56, %cst_71 {dimension_numbers = #tpu.dot_dimension_numbers<[1], [0], [0], [1], [0, 0, 1, 1], [], []>} : vector<78x128xbf16>, vector<128x256xbf16>, vector<78x256xf32> -> vector<78x256xf32>
    %58 = arith.addf %53, %57 : vector<78x256xf32>
    %c0_72 = arith.constant 0 : index
    %c0_73 = arith.constant 0 : index
    %59 = vector.load %arg29[%c0_72, %c0_73] : memref<78x256xf32, #tpu.memory_space<vmem>>, vector<78x256xf32>
    tpu.vector_store %arg29[%c0_72, %c0_73], %58 {strides = array<i32>} : memref<78x256xf32, #tpu.memory_space<vmem>>, vector<78x256xf32>,
    %c0_74 = arith.constant 0 : index
    %c0_75 = arith.constant 0 : index
    %60 = vector.load %arg29[%c0_74, %c0_75] : memref<78x256xf32, #tpu.memory_space<vmem>>, vector<78x256xf32>
    %c2_76 = arith.constant 2 : index
    %c0_77 = arith.constant 0 : index
    %61 = vector.load %arg25[%c2_76, %c0_77] : memref<82x128xbf16, #tpu.memory_space<vmem>>, vector<78x128xbf16>
    %c2_78 = arith.constant 2 : index
    %c0_79 = arith.constant 0 : index
    %c0_80 = arith.constant 0 : index
    %62 = vector.load %arg4[%c2_78, %c0_79, %c0_80] : memref<5x128x256xbf16, #tpu.memory_space<vmem>>, vector<1x128x256xbf16>
    %63 = vector.shape_cast %62 : vector<1x128x256xbf16> to vector<128x256xbf16>
    %cst_81 = arith.constant dense<0.000000e+00> : vector<78x256xf32>
    %64 = tpu.matmul %61, %63, %cst_81 {dimension_numbers = #tpu.dot_dimension_numbers<[1], [0], [0], [1], [0, 0, 1, 1], [], []>} : vector<78x128xbf16>, vector<128x256xbf16>, vector<78x256xf32> -> vector<78x256xf32>
    %65 = arith.addf %60, %64 : vector<78x256xf32>
    %c0_82 = arith.constant 0 : index
    %c0_83 = arith.constant 0 : index
    %66 = vector.load %arg29[%c0_82, %c0_83] : memref<78x256xf32, #tpu.memory_space<vmem>>, vector<78x256xf32>
    tpu.vector_store %arg29[%c0_82, %c0_83], %65 {strides = array<i32>} : memref<78x256xf32, #tpu.memory_space<vmem>>, vector<78x256xf32>,
    %c0_84 = arith.constant 0 : index
    %c0_85 = arith.constant 0 : index
    %67 = vector.load %arg29[%c0_84, %c0_85] : memref<78x256xf32, #tpu.memory_space<vmem>>, vector<78x256xf32>
    %c3_86 = arith.constant 3 : index
    %c0_87 = arith.constant 0 : index
    %68 = vector.load %arg25[%c3_86, %c0_87] : memref<82x128xbf16, #tpu.memory_space<vmem>>, vector<78x128xbf16>
    %c3_88 = arith.constant 3 : index
    %c0_89 = arith.constant 0 : index
    %c0_90 = arith.constant 0 : index
    %69 = vector.load %arg4[%c3_88, %c0_89, %c0_90] : memref<5x128x256xbf16, #tpu.memory_space<vmem>>, vector<1x128x256xbf16>
    %70 = vector.shape_cast %69 : vector<1x128x256xbf16> to vector<128x256xbf16>
    %cst_91 = arith.constant dense<0.000000e+00> : vector<78x256xf32>
    %71 = tpu.matmul %68, %70, %cst_91 {dimension_numbers = #tpu.dot_dimension_numbers<[1], [0], [0], [1], [0, 0, 1, 1], [], []>} : vector<78x128xbf16>, vector<128x256xbf16>, vector<78x256xf32> -> vector<78x256xf32>
    %72 = arith.addf %67, %71 : vector<78x256xf32>
    %c0_92 = arith.constant 0 : index
    %c0_93 = arith.constant 0 : index
    %73 = vector.load %arg29[%c0_92, %c0_93] : memref<78x256xf32, #tpu.memory_space<vmem>>, vector<78x256xf32>
    tpu.vector_store %arg29[%c0_92, %c0_93], %72 {strides = array<i32>} : memref<78x256xf32, #tpu.memory_space<vmem>>, vector<78x256xf32>,
    %c0_94 = arith.constant 0 : index
    %c0_95 = arith.constant 0 : index
    %74 = vector.load %arg29[%c0_94, %c0_95] : memref<78x256xf32, #tpu.memory_space<vmem>>, vector<78x256xf32>
    %c4_96 = arith.constant 4 : index
    %c0_97 = arith.constant 0 : index
    %75 = vector.load %arg25[%c4_96, %c0_97] : memref<82x128xbf16, #tpu.memory_space<vmem>>, vector<78x128xbf16>
    %c4_98 = arith.constant 4 : index
    %c0_99 = arith.constant 0 : index
    %c0_100 = arith.constant 0 : index
    %76 = vector.load %arg4[%c4_98, %c0_99, %c0_100] : memref<5x128x256xbf16, #tpu.memory_space<vmem>>, vector<1x128x256xbf16>
    %77 = vector.shape_cast %76 : vector<1x128x256xbf16> to vector<128x256xbf16>
    %cst_101 = arith.constant dense<0.000000e+00> : vector<78x256xf32>
    %78 = tpu.matmul %75, %77, %cst_101 {dimension_numbers = #tpu.dot_dimension_numbers<[1], [0], [0], [1], [0, 0, 1, 1], [], []>} : vector<78x128xbf16>, vector<128x256xbf16>, vector<78x256xf32> -> vector<78x256xf32>
    %79 = arith.addf %74, %78 : vector<78x256xf32>
    %c0_102 = arith.constant 0 : index
    %c0_103 = arith.constant 0 : index
    %80 = vector.load %arg29[%c0_102, %c0_103] : memref<78x256xf32, #tpu.memory_space<vmem>>, vector<78x256xf32>
    tpu.vector_store %arg29[%c0_102, %c0_103], %79 {strides = array<i32>} : memref<78x256xf32, #tpu.memory_space<vmem>>, vector<78x256xf32>,
    %c0_104 = arith.constant 0 : index
    %c0_105 = arith.constant 0 : index
    %81 = vector.load %arg29[%c0_104, %c0_105] : memref<78x256xf32, #tpu.memory_space<vmem>>, vector<78x256xf32>
    %c0_106 = arith.constant 0 : index
    %c0_107 = arith.constant 0 : index
    %82 = vector.load %arg5[%c0_106, %c0_107] : memref<1x256xf32, #tpu.memory_space<vmem>>, vector<1x256xf32>
    %83 = vector.broadcast %82 : vector<1x256xf32> to vector<78x256xf32>
    %84 = arith.addf %81, %83 : vector<78x256xf32>
    %cst_108 = arith.constant 0.000000e+00 : f32
    %85 = vector.broadcast %cst_108 : f32 to vector<78x256xf32>
    %86 = arith.maximumf %84, %85 : vector<78x256xf32>
    %c0_109 = arith.constant 0 : index
    %c0_110 = arith.constant 0 : index
    %87 = vector.load %arg6[%c0_109, %c0_110] : memref<1x256xf32, #tpu.memory_space<vmem>>, vector<1x256xf32>
    %88 = vector.broadcast %87 : vector<1x256xf32> to vector<78x256xf32>
    %89 = arith.mulf %86, %88 : vector<78x256xf32>
    %c0_111 = arith.constant 0 : index
    %c0_112 = arith.constant 0 : index
    %90 = vector.load %arg7[%c0_111, %c0_112] : memref<1x256xf32, #tpu.memory_space<vmem>>, vector<1x256xf32>
    %91 = vector.broadcast %90 : vector<1x256xf32> to vector<78x256xf32>
    %92 = arith.addf %89, %91 : vector<78x256xf32>
    %93 = vector.broadcast %0 : vector<78x1xf32> to vector<78x256xf32>
    %94 = arith.mulf %92, %93 : vector<78x256xf32>
    %cst_113 = arith.constant 0.000000e+00 : bf16
    %95 = vector.broadcast %cst_113 : bf16 to vector<2x256xbf16>
    %c0_114 = arith.constant 0 : index
    %c0_115 = arith.constant 0 : index
    %96 = vector.load %arg26[%c0_114, %c0_115] : memref<82x256xbf16, #tpu.memory_space<vmem>>, vector<2x256xbf16>
    tpu.vector_store %arg26[%c0_114, %c0_115], %95 {strides = array<i32>} : memref<82x256xbf16, #tpu.memory_space<vmem>>, vector<2x256xbf16>,
    %cst_116 = arith.constant 0.000000e+00 : bf16
    %97 = vector.broadcast %cst_116 : bf16 to vector<2x256xbf16>
    %c80_117 = arith.constant 80 : index
    %c0_118 = arith.constant 0 : index
    %98 = vector.load %arg26[%c80_117, %c0_118] : memref<82x256xbf16, #tpu.memory_space<vmem>>, vector<2x256xbf16>
    tpu.vector_store %arg26[%c80_117, %c0_118], %97 {strides = array<i32>} : memref<82x256xbf16, #tpu.memory_space<vmem>>, vector<2x256xbf16>,
    %99 = arith.truncf %94 : vector<78x256xf32> to vector<78x256xbf16>
    %c2_119 = arith.constant 2 : index
    %c0_120 = arith.constant 0 : index
    %100 = vector.load %arg26[%c2_119, %c0_120] : memref<82x256xbf16, #tpu.memory_space<vmem>>, vector<78x256xbf16>
    tpu.vector_store %arg26[%c2_119, %c0_120], %99 {strides = array<i32>} : memref<82x256xbf16, #tpu.memory_space<vmem>>, vector<78x256xbf16>,
    %c0_121 = arith.constant 0 : index
    %c0_122 = arith.constant 0 : index
    %101 = vector.load %arg26[%c0_121, %c0_122] : memref<82x256xbf16, #tpu.memory_space<vmem>>, vector<78x256xbf16>
    %c0_123 = arith.constant 0 : index
    %c0_124 = arith.constant 0 : index
    %c0_125 = arith.constant 0 : index
    %102 = vector.load %arg8[%c0_123, %c0_124, %c0_125] : memref<5x256x512xbf16, #tpu.memory_space<vmem>>, vector<1x256x512xbf16>
    %103 = vector.shape_cast %102 : vector<1x256x512xbf16> to vector<256x512xbf16>
    %cst_126 = arith.constant dense<0.000000e+00> : vector<78x512xf32>
    %104 = tpu.matmul %101, %103, %cst_126 {dimension_numbers = #tpu.dot_dimension_numbers<[1], [0], [0], [1], [0, 0, 1, 1], [], []>} : vector<78x256xbf16>, vector<256x512xbf16>, vector<78x512xf32> -> vector<78x512xf32>
    %c0_127 = arith.constant 0 : index
    %c0_128 = arith.constant 0 : index
    %105 = vector.load %arg30[%c0_127, %c0_128] : memref<78x512xf32, #tpu.memory_space<vmem>>, vector<78x512xf32>
    tpu.vector_store %arg30[%c0_127, %c0_128], %104 {strides = array<i32>} : memref<78x512xf32, #tpu.memory_space<vmem>>, vector<78x512xf32>,
    %c0_129 = arith.constant 0 : index
    %c0_130 = arith.constant 0 : index
    %106 = vector.load %arg30[%c0_129, %c0_130] : memref<78x512xf32, #tpu.memory_space<vmem>>, vector<78x512xf32>
    %c1_131 = arith.constant 1 : index
    %c0_132 = arith.constant 0 : index
    %107 = vector.load %arg26[%c1_131, %c0_132] : memref<82x256xbf16, #tpu.memory_space<vmem>>, vector<78x256xbf16>
    %c1_133 = arith.constant 1 : index
    %c0_134 = arith.constant 0 : index
    %c0_135 = arith.constant 0 : index
    %108 = vector.load %arg8[%c1_133, %c0_134, %c0_135] : memref<5x256x512xbf16, #tpu.memory_space<vmem>>, vector<1x256x512xbf16>
    %109 = vector.shape_cast %108 : vector<1x256x512xbf16> to vector<256x512xbf16>
    %cst_136 = arith.constant dense<0.000000e+00> : vector<78x512xf32>
    %110 = tpu.matmul %107, %109, %cst_136 {dimension_numbers = #tpu.dot_dimension_numbers<[1], [0], [0], [1], [0, 0, 1, 1], [], []>} : vector<78x256xbf16>, vector<256x512xbf16>, vector<78x512xf32> -> vector<78x512xf32>
    %111 = arith.addf %106, %110 : vector<78x512xf32>
    %c0_137 = arith.constant 0 : index
    %c0_138 = arith.constant 0 : index
    %112 = vector.load %arg30[%c0_137, %c0_138] : memref<78x512xf32, #tpu.memory_space<vmem>>, vector<78x512xf32>
    tpu.vector_store %arg30[%c0_137, %c0_138], %111 {strides = array<i32>} : memref<78x512xf32, #tpu.memory_space<vmem>>, vector<78x512xf32>,
    %c0_139 = arith.constant 0 : index
    %c0_140 = arith.constant 0 : index
    %113 = vector.load %arg30[%c0_139, %c0_140] : memref<78x512xf32, #tpu.memory_space<vmem>>, vector<78x512xf32>
    %c2_141 = arith.constant 2 : index
    %c0_142 = arith.constant 0 : index
    %114 = vector.load %arg26[%c2_141, %c0_142] : memref<82x256xbf16, #tpu.memory_space<vmem>>, vector<78x256xbf16>
    %c2_143 = arith.constant 2 : index
    %c0_144 = arith.constant 0 : index
    %c0_145 = arith.constant 0 : index
    %115 = vector.load %arg8[%c2_143, %c0_144, %c0_145] : memref<5x256x512xbf16, #tpu.memory_space<vmem>>, vector<1x256x512xbf16>
    %116 = vector.shape_cast %115 : vector<1x256x512xbf16> to vector<256x512xbf16>
    %cst_146 = arith.constant dense<0.000000e+00> : vector<78x512xf32>
    %117 = tpu.matmul %114, %116, %cst_146 {dimension_numbers = #tpu.dot_dimension_numbers<[1], [0], [0], [1], [0, 0, 1, 1], [], []>} : vector<78x256xbf16>, vector<256x512xbf16>, vector<78x512xf32> -> vector<78x512xf32>
    %118 = arith.addf %113, %117 : vector<78x512xf32>
    %c0_147 = arith.constant 0 : index
    %c0_148 = arith.constant 0 : index
    %119 = vector.load %arg30[%c0_147, %c0_148] : memref<78x512xf32, #tpu.memory_space<vmem>>, vector<78x512xf32>
    tpu.vector_store %arg30[%c0_147, %c0_148], %118 {strides = array<i32>} : memref<78x512xf32, #tpu.memory_space<vmem>>, vector<78x512xf32>,
    %c0_149 = arith.constant 0 : index
    %c0_150 = arith.constant 0 : index
    %120 = vector.load %arg30[%c0_149, %c0_150] : memref<78x512xf32, #tpu.memory_space<vmem>>, vector<78x512xf32>
    %c3_151 = arith.constant 3 : index
    %c0_152 = arith.constant 0 : index
    %121 = vector.load %arg26[%c3_151, %c0_152] : memref<82x256xbf16, #tpu.memory_space<vmem>>, vector<78x256xbf16>
    %c3_153 = arith.constant 3 : index
    %c0_154 = arith.constant 0 : index
    %c0_155 = arith.constant 0 : index
    %122 = vector.load %arg8[%c3_153, %c0_154, %c0_155] : memref<5x256x512xbf16, #tpu.memory_space<vmem>>, vector<1x256x512xbf16>
    %123 = vector.shape_cast %122 : vector<1x256x512xbf16> to vector<256x512xbf16>
    %cst_156 = arith.constant dense<0.000000e+00> : vector<78x512xf32>
    %124 = tpu.matmul %121, %123, %cst_156 {dimension_numbers = #tpu.dot_dimension_numbers<[1], [0], [0], [1], [0, 0, 1, 1], [], []>} : vector<78x256xbf16>, vector<256x512xbf16>, vector<78x512xf32> -> vector<78x512xf32>
    %125 = arith.addf %120, %124 : vector<78x512xf32>
    %c0_157 = arith.constant 0 : index
    %c0_158 = arith.constant 0 : index
    %126 = vector.load %arg30[%c0_157, %c0_158] : memref<78x512xf32, #tpu.memory_space<vmem>>, vector<78x512xf32>
    tpu.vector_store %arg30[%c0_157, %c0_158], %125 {strides = array<i32>} : memref<78x512xf32, #tpu.memory_space<vmem>>, vector<78x512xf32>,
    %c0_159 = arith.constant 0 : index
    %c0_160 = arith.constant 0 : index
    %127 = vector.load %arg30[%c0_159, %c0_160] : memref<78x512xf32, #tpu.memory_space<vmem>>, vector<78x512xf32>
    %c4_161 = arith.constant 4 : index
    %c0_162 = arith.constant 0 : index
    %128 = vector.load %arg26[%c4_161, %c0_162] : memref<82x256xbf16, #tpu.memory_space<vmem>>, vector<78x256xbf16>
    %c4_163 = arith.constant 4 : index
    %c0_164 = arith.constant 0 : index
    %c0_165 = arith.constant 0 : index
    %129 = vector.load %arg8[%c4_163, %c0_164, %c0_165] : memref<5x256x512xbf16, #tpu.memory_space<vmem>>, vector<1x256x512xbf16>
    %130 = vector.shape_cast %129 : vector<1x256x512xbf16> to vector<256x512xbf16>
    %cst_166 = arith.constant dense<0.000000e+00> : vector<78x512xf32>
    %131 = tpu.matmul %128, %130, %cst_166 {dimension_numbers = #tpu.dot_dimension_numbers<[1], [0], [0], [1], [0, 0, 1, 1], [], []>} : vector<78x256xbf16>, vector<256x512xbf16>, vector<78x512xf32> -> vector<78x512xf32>
    %132 = arith.addf %127, %131 : vector<78x512xf32>
    %c0_167 = arith.constant 0 : index
    %c0_168 = arith.constant 0 : index
    %133 = vector.load %arg30[%c0_167, %c0_168] : memref<78x512xf32, #tpu.memory_space<vmem>>, vector<78x512xf32>
    tpu.vector_store %arg30[%c0_167, %c0_168], %132 {strides = array<i32>} : memref<78x512xf32, #tpu.memory_space<vmem>>, vector<78x512xf32>,
    %c0_169 = arith.constant 0 : index
    %c0_170 = arith.constant 0 : index
    %134 = vector.load %arg30[%c0_169, %c0_170] : memref<78x512xf32, #tpu.memory_space<vmem>>, vector<78x512xf32>
    %c0_171 = arith.constant 0 : index
    %c0_172 = arith.constant 0 : index
    %135 = vector.load %arg9[%c0_171, %c0_172] : memref<1x512xf32, #tpu.memory_space<vmem>>, vector<1x512xf32>
    %136 = vector.broadcast %135 : vector<1x512xf32> to vector<78x512xf32>
    %137 = arith.addf %134, %136 : vector<78x512xf32>
    %cst_173 = arith.constant 0.000000e+00 : f32
    %138 = vector.broadcast %cst_173 : f32 to vector<78x512xf32>
    %139 = arith.maximumf %137, %138 : vector<78x512xf32>
    %140 = arith.truncf %139 : vector<78x512xf32> to vector<78x512xbf16>
    %c0_174 = arith.constant 0 : index
    %c0_175 = arith.constant 0 : index
    %141 = vector.load %arg10[%c0_174, %c0_175] : memref<512x256xbf16, #tpu.memory_space<vmem>>, vector<512x256xbf16>
    %cst_176 = arith.constant dense<0.000000e+00> : vector<78x256xf32>
    %142 = tpu.matmul %140, %141, %cst_176 {dimension_numbers = #tpu.dot_dimension_numbers<[1], [0], [0], [1], [0, 0, 1, 1], [], []>} : vector<78x512xbf16>, vector<512x256xbf16>, vector<78x256xf32> -> vector<78x256xf32>
    %c0_177 = arith.constant 0 : index
    %c0_178 = arith.constant 0 : index
    %143 = vector.load %arg11[%c0_177, %c0_178] : memref<1x256xf32, #tpu.memory_space<vmem>>, vector<1x256xf32>
    %144 = vector.broadcast %143 : vector<1x256xf32> to vector<78x256xf32>
    %145 = arith.mulf %142, %144 : vector<78x256xf32>
    %c0_179 = arith.constant 0 : index
    %c0_180 = arith.constant 0 : index
    %146 = vector.load %arg12[%c0_179, %c0_180] : memref<1x256xf32, #tpu.memory_space<vmem>>, vector<1x256xf32>
    %147 = vector.broadcast %146 : vector<1x256xf32> to vector<78x256xf32>
    %148 = arith.addf %145, %147 : vector<78x256xf32>
    %c0_181 = arith.constant 0 : index
    %c0_182 = arith.constant 0 : index
    %149 = vector.load %arg21[%c0_181, %c0_182] : memref<50x78xbf16, #tpu.memory_space<vmem>>, vector<50x78xbf16>
    %150 = arith.truncf %148 : vector<78x256xf32> to vector<78x256xbf16>
    %cst_183 = arith.constant dense<0.000000e+00> : vector<50x256xf32>
    %151 = tpu.matmul %149, %150, %cst_183 {dimension_numbers = #tpu.dot_dimension_numbers<[1], [0], [0], [1], [0, 0, 1, 1], [], []>} : vector<50x78xbf16>, vector<78x256xbf16>, vector<50x256xf32> -> vector<50x256xf32>
    %152 = arith.truncf %151 : vector<50x256xf32> to vector<50x256xbf16>
    %c0_184 = arith.constant 0 : index
    %c0_185 = arith.constant 0 : index
    %153 = vector.load %arg27[%c0_184, %c0_185] : memref<50x256xbf16, #tpu.memory_space<vmem>>, vector<50x256xbf16>
    tpu.vector_store %arg27[%c0_184, %c0_185], %152 {strides = array<i32>} : memref<50x256xbf16, #tpu.memory_space<vmem>>, vector<50x256xbf16>,
    %c0_186 = arith.constant 0 : index
    %c0_187 = arith.constant 0 : index
    %154 = vector.load %arg27[%c0_186, %c0_187] : memref<50x256xbf16, #tpu.memory_space<vmem>>, vector<46x256xbf16>
    %c0_188 = arith.constant 0 : index
    %c0_189 = arith.constant 0 : index
    %c0_190 = arith.constant 0 : index
    %155 = vector.load %arg13[%c0_188, %c0_189, %c0_190] : memref<5x256x64xbf16, #tpu.memory_space<vmem>>, vector<1x256x64xbf16>
    %156 = vector.shape_cast %155 : vector<1x256x64xbf16> to vector<256x64xbf16>
    %cst_191 = arith.constant dense<0.000000e+00> : vector<46x64xf32>
    %157 = tpu.matmul %154, %156, %cst_191 {dimension_numbers = #tpu.dot_dimension_numbers<[1], [0], [0], [1], [0, 0, 1, 1], [], []>} : vector<46x256xbf16>, vector<256x64xbf16>, vector<46x64xf32> -> vector<46x64xf32>
    %c0_192 = arith.constant 0 : index
    %c0_193 = arith.constant 0 : index
    %158 = vector.load %arg31[%c0_192, %c0_193] : memref<46x64xf32, #tpu.memory_space<vmem>>, vector<46x64xf32>
    tpu.vector_store %arg31[%c0_192, %c0_193], %157 {strides = array<i32>} : memref<46x64xf32, #tpu.memory_space<vmem>>, vector<46x64xf32>,
    %c0_194 = arith.constant 0 : index
    %c0_195 = arith.constant 0 : index
    %159 = vector.load %arg31[%c0_194, %c0_195] : memref<46x64xf32, #tpu.memory_space<vmem>>, vector<46x64xf32>
    %c1_196 = arith.constant 1 : index
    %c0_197 = arith.constant 0 : index
    %160 = vector.load %arg27[%c1_196, %c0_197] : memref<50x256xbf16, #tpu.memory_space<vmem>>, vector<46x256xbf16>
    %c1_198 = arith.constant 1 : index
    %c0_199 = arith.constant 0 : index
    %c0_200 = arith.constant 0 : index
    %161 = vector.load %arg13[%c1_198, %c0_199, %c0_200] : memref<5x256x64xbf16, #tpu.memory_space<vmem>>, vector<1x256x64xbf16>
    %162 = vector.shape_cast %161 : vector<1x256x64xbf16> to vector<256x64xbf16>
    %cst_201 = arith.constant dense<0.000000e+00> : vector<46x64xf32>
    %163 = tpu.matmul %160, %162, %cst_201 {dimension_numbers = #tpu.dot_dimension_numbers<[1], [0], [0], [1], [0, 0, 1, 1], [], []>} : vector<46x256xbf16>, vector<256x64xbf16>, vector<46x64xf32> -> vector<46x64xf32>
    %164 = arith.addf %159, %163 : vector<46x64xf32>
    %c0_202 = arith.constant 0 : index
    %c0_203 = arith.constant 0 : index
    %165 = vector.load %arg31[%c0_202, %c0_203] : memref<46x64xf32, #tpu.memory_space<vmem>>, vector<46x64xf32>
    tpu.vector_store %arg31[%c0_202, %c0_203], %164 {strides = array<i32>} : memref<46x64xf32, #tpu.memory_space<vmem>>, vector<46x64xf32>,
    %c0_204 = arith.constant 0 : index
    %c0_205 = arith.constant 0 : index
    %166 = vector.load %arg31[%c0_204, %c0_205] : memref<46x64xf32, #tpu.memory_space<vmem>>, vector<46x64xf32>
    %c2_206 = arith.constant 2 : index
    %c0_207 = arith.constant 0 : index
    %167 = vector.load %arg27[%c2_206, %c0_207] : memref<50x256xbf16, #tpu.memory_space<vmem>>, vector<46x256xbf16>
    %c2_208 = arith.constant 2 : index
    %c0_209 = arith.constant 0 : index
    %c0_210 = arith.constant 0 : index
    %168 = vector.load %arg13[%c2_208, %c0_209, %c0_210] : memref<5x256x64xbf16, #tpu.memory_space<vmem>>, vector<1x256x64xbf16>
    %169 = vector.shape_cast %168 : vector<1x256x64xbf16> to vector<256x64xbf16>
    %cst_211 = arith.constant dense<0.000000e+00> : vector<46x64xf32>
    %170 = tpu.matmul %167, %169, %cst_211 {dimension_numbers = #tpu.dot_dimension_numbers<[1], [0], [0], [1], [0, 0, 1, 1], [], []>} : vector<46x256xbf16>, vector<256x64xbf16>, vector<46x64xf32> -> vector<46x64xf32>
    %171 = arith.addf %166, %170 : vector<46x64xf32>
    %c0_212 = arith.constant 0 : index
    %c0_213 = arith.constant 0 : index
    %172 = vector.load %arg31[%c0_212, %c0_213] : memref<46x64xf32, #tpu.memory_space<vmem>>, vector<46x64xf32>
    tpu.vector_store %arg31[%c0_212, %c0_213], %171 {strides = array<i32>} : memref<46x64xf32, #tpu.memory_space<vmem>>, vector<46x64xf32>,
    %c0_214 = arith.constant 0 : index
    %c0_215 = arith.constant 0 : index
    %173 = vector.load %arg31[%c0_214, %c0_215] : memref<46x64xf32, #tpu.memory_space<vmem>>, vector<46x64xf32>
    %c3_216 = arith.constant 3 : index
    %c0_217 = arith.constant 0 : index
    %174 = vector.load %arg27[%c3_216, %c0_217] : memref<50x256xbf16, #tpu.memory_space<vmem>>, vector<46x256xbf16>
    %c3_218 = arith.constant 3 : index
    %c0_219 = arith.constant 0 : index
    %c0_220 = arith.constant 0 : index
    %175 = vector.load %arg13[%c3_218, %c0_219, %c0_220] : memref<5x256x64xbf16, #tpu.memory_space<vmem>>, vector<1x256x64xbf16>
    %176 = vector.shape_cast %175 : vector<1x256x64xbf16> to vector<256x64xbf16>
    %cst_221 = arith.constant dense<0.000000e+00> : vector<46x64xf32>
    %177 = tpu.matmul %174, %176, %cst_221 {dimension_numbers = #tpu.dot_dimension_numbers<[1], [0], [0], [1], [0, 0, 1, 1], [], []>} : vector<46x256xbf16>, vector<256x64xbf16>, vector<46x64xf32> -> vector<46x64xf32>
    %178 = arith.addf %173, %177 : vector<46x64xf32>
    %c0_222 = arith.constant 0 : index
    %c0_223 = arith.constant 0 : index
    %179 = vector.load %arg31[%c0_222, %c0_223] : memref<46x64xf32, #tpu.memory_space<vmem>>, vector<46x64xf32>
    tpu.vector_store %arg31[%c0_222, %c0_223], %178 {strides = array<i32>} : memref<46x64xf32, #tpu.memory_space<vmem>>, vector<46x64xf32>,
    %c0_224 = arith.constant 0 : index
    %c0_225 = arith.constant 0 : index
    %180 = vector.load %arg31[%c0_224, %c0_225] : memref<46x64xf32, #tpu.memory_space<vmem>>, vector<46x64xf32>
    %c4_226 = arith.constant 4 : index
    %c0_227 = arith.constant 0 : index
    %181 = vector.load %arg27[%c4_226, %c0_227] : memref<50x256xbf16, #tpu.memory_space<vmem>>, vector<46x256xbf16>
    %c4_228 = arith.constant 4 : index
    %c0_229 = arith.constant 0 : index
    %c0_230 = arith.constant 0 : index
    %182 = vector.load %arg13[%c4_228, %c0_229, %c0_230] : memref<5x256x64xbf16, #tpu.memory_space<vmem>>, vector<1x256x64xbf16>
    %183 = vector.shape_cast %182 : vector<1x256x64xbf16> to vector<256x64xbf16>
    %cst_231 = arith.constant dense<0.000000e+00> : vector<46x64xf32>
    %184 = tpu.matmul %181, %183, %cst_231 {dimension_numbers = #tpu.dot_dimension_numbers<[1], [0], [0], [1], [0, 0, 1, 1], [], []>} : vector<46x256xbf16>, vector<256x64xbf16>, vector<46x64xf32> -> vector<46x64xf32>
    %185 = arith.addf %180, %184 : vector<46x64xf32>
    %c0_232 = arith.constant 0 : index
    %c0_233 = arith.constant 0 : index
    %186 = vector.load %arg31[%c0_232, %c0_233] : memref<46x64xf32, #tpu.memory_space<vmem>>, vector<46x64xf32>
    tpu.vector_store %arg31[%c0_232, %c0_233], %185 {strides = array<i32>} : memref<46x64xf32, #tpu.memory_space<vmem>>, vector<46x64xf32>,
    %c0_234 = arith.constant 0 : index
    %c0_235 = arith.constant 0 : index
    %187 = vector.load %arg31[%c0_234, %c0_235] : memref<46x64xf32, #tpu.memory_space<vmem>>, vector<46x64xf32>
    %c0_236 = arith.constant 0 : index
    %c0_237 = arith.constant 0 : index
    %188 = vector.load %arg14[%c0_236, %c0_237] : memref<1x64xf32, #tpu.memory_space<vmem>>, vector<1x64xf32>
    %189 = vector.broadcast %188 : vector<1x64xf32> to vector<46x64xf32>
    %190 = arith.addf %187, %189 : vector<46x64xf32>
    %cst_238 = arith.constant 0.000000e+00 : f32
    %191 = vector.broadcast %cst_238 : f32 to vector<46x64xf32>
    %192 = arith.maximumf %190, %191 : vector<46x64xf32>
    %c0_239 = arith.constant 0 : index
    %c0_240 = arith.constant 0 : index
    %193 = vector.load %arg22[%c0_239, %c0_240] : memref<32x46xf32, #tpu.memory_space<vmem>>, vector<32x46xf32>
    %cst_241 = arith.constant dense<0.000000e+00> : vector<32x64xf32>
    %194 = tpu.matmul %193, %192, %cst_241 {dimension_numbers = #tpu.dot_dimension_numbers<[1], [0], [0], [1], [0, 0, 1, 1], [], []>} : vector<32x46xf32>, vector<46x64xf32>, vector<32x64xf32> -> vector<32x64xf32>
    %c0_242 = arith.constant 0 : index
    %c0_243 = arith.constant 0 : index
    %195 = vector.load %arg16[%c0_242, %c0_243] : memref<1x256xf32, #tpu.memory_space<vmem>>, vector<1x256xf32>
    %196 = vector.extract_strided_slice %194 {offsets = [0, 0], sizes = [8, 64], strides = [1, 1]} : vector<32x64xf32> to vector<8x64xf32>
    %c0_244 = arith.constant 0 : index
    %c0_245 = arith.constant 0 : index
    %197 = vector.load %arg15[%c0_244, %c0_245] : memref<256x256xf32, #tpu.memory_space<vmem>>, vector<64x256xf32>
    %cst_246 = arith.constant dense<0.000000e+00> : vector<8x256xf32>
    %198 = tpu.matmul %196, %197, %cst_246 {dimension_numbers = #tpu.dot_dimension_numbers<[1], [0], [0], [1], [0, 0, 1, 1], [], []>} : vector<8x64xf32>, vector<64x256xf32>, vector<8x256xf32> -> vector<8x256xf32>
    %199 = vector.broadcast %195 : vector<1x256xf32> to vector<8x256xf32>
    %200 = arith.addf %199, %198 : vector<8x256xf32>
    %201 = vector.extract_strided_slice %194 {offsets = [8, 0], sizes = [8, 64], strides = [1, 1]} : vector<32x64xf32> to vector<8x64xf32>
    %c64 = arith.constant 64 : index
    %c0_247 = arith.constant 0 : index
    %202 = vector.load %arg15[%c64, %c0_247] : memref<256x256xf32, #tpu.memory_space<vmem>>, vector<64x256xf32>
    %cst_248 = arith.constant dense<0.000000e+00> : vector<8x256xf32>
    %203 = tpu.matmul %201, %202, %cst_248 {dimension_numbers = #tpu.dot_dimension_numbers<[1], [0], [0], [1], [0, 0, 1, 1], [], []>} : vector<8x64xf32>, vector<64x256xf32>, vector<8x256xf32> -> vector<8x256xf32>
    %204 = arith.addf %200, %203 : vector<8x256xf32>
    %205 = vector.extract_strided_slice %194 {offsets = [16, 0], sizes = [8, 64], strides = [1, 1]} : vector<32x64xf32> to vector<8x64xf32>
    %c128 = arith.constant 128 : index
    %c0_249 = arith.constant 0 : index
    %206 = vector.load %arg15[%c128, %c0_249] : memref<256x256xf32, #tpu.memory_space<vmem>>, vector<64x256xf32>
    %cst_250 = arith.constant dense<0.000000e+00> : vector<8x256xf32>
    %207 = tpu.matmul %205, %206, %cst_250 {dimension_numbers = #tpu.dot_dimension_numbers<[1], [0], [0], [1], [0, 0, 1, 1], [], []>} : vector<8x64xf32>, vector<64x256xf32>, vector<8x256xf32> -> vector<8x256xf32>
    %208 = arith.addf %204, %207 : vector<8x256xf32>
    %209 = vector.extract_strided_slice %194 {offsets = [24, 0], sizes = [8, 64], strides = [1, 1]} : vector<32x64xf32> to vector<8x64xf32>
    %c192 = arith.constant 192 : index
    %c0_251 = arith.constant 0 : index
    %210 = vector.load %arg15[%c192, %c0_251] : memref<256x256xf32, #tpu.memory_space<vmem>>, vector<64x256xf32>
    %cst_252 = arith.constant dense<0.000000e+00> : vector<8x256xf32>
    %211 = tpu.matmul %209, %210, %cst_252 {dimension_numbers = #tpu.dot_dimension_numbers<[1], [0], [0], [1], [0, 0, 1, 1], [], []>} : vector<8x64xf32>, vector<64x256xf32>, vector<8x256xf32> -> vector<8x256xf32>
    %212 = arith.addf %208, %211 : vector<8x256xf32>
    %213 = vector.extract_strided_slice %212 {offsets = [0, 0], sizes = [8, 128], strides = [1, 1]} : vector<8x256xf32> to vector<8x128xf32>
    %cst_253 = arith.constant dense<0xFF800000> : vector<8xf32>
    %214 = vector.multi_reduction <maximumf>, %213, %cst_253 [1] : vector<8x128xf32> to vector<8xf32>
    %215 = vector.shape_cast %214 : vector<8xf32> to vector<8x1xf32>
    %216 = vector.broadcast %215 : vector<8x1xf32> to vector<8x128xf32>
    %217 = arith.subf %213, %216 : vector<8x128xf32>
    %218 = math.exp %217 : vector<8x128xf32>
    %cst_254 = arith.constant dense<0.000000e+00> : vector<8xf32>
    %219 = vector.multi_reduction <add>, %218, %cst_254 [1] : vector<8x128xf32> to vector<8xf32>
    %220 = vector.shape_cast %219 : vector<8xf32> to vector<8x1xf32>
    %221 = math.log %220 : vector<8x1xf32>
    %222 = arith.addf %215, %221 : vector<8x1xf32>
    %223 = vector.broadcast %222 : vector<8x1xf32> to vector<8x128xf32>
    %224 = arith.subf %213, %223 : vector<8x128xf32>
    %225 = vector.extract_strided_slice %212 {offsets = [0, 128], sizes = [8, 128], strides = [1, 1]} : vector<8x256xf32> to vector<8x128xf32>
    %c0_255 = arith.constant 0 : index
    %c0_256 = arith.constant 0 : index
    %226 = vector.load %arg17[%c0_255, %c0_256] : memref<1x128xf32, #tpu.memory_space<vmem>>, vector<1x128xf32>
    %227 = vector.broadcast %226 : vector<1x128xf32> to vector<8x128xf32>
    %228 = arith.mulf %225, %227 : vector<8x128xf32>
    %c0_257 = arith.constant 0 : index
    %c0_258 = arith.constant 0 : index
    %229 = vector.load %arg18[%c0_257, %c0_258] : memref<1x128xf32, #tpu.memory_space<vmem>>, vector<1x128xf32>
    %230 = vector.broadcast %229 : vector<1x128xf32> to vector<8x128xf32>
    %231 = arith.addf %228, %230 : vector<8x128xf32>
    %cst_259 = arith.constant 0.000000e+00 : f32
    %232 = vector.broadcast %cst_259 : f32 to vector<8x128xf32>
    %233 = arith.maximumf %231, %232 : vector<8x128xf32>
    %c0_260 = arith.constant 0 : index
    %c0_261 = arith.constant 0 : index
    %234 = vector.load %arg19[%c0_260, %c0_261] : memref<128x128xf32, #tpu.memory_space<vmem>>, vector<128x128xf32>
    %cst_262 = arith.constant dense<0.000000e+00> : vector<8x128xf32>
    %235 = tpu.matmul %233, %234, %cst_262 {dimension_numbers = #tpu.dot_dimension_numbers<[1], [0], [0], [1], [0, 0, 1, 1], [], []>} : vector<8x128xf32>, vector<128x128xf32>, vector<8x128xf32> -> vector<8x128xf32>
    %c0_263 = arith.constant 0 : index
    %c0_264 = arith.constant 0 : index
    %236 = vector.load %arg20[%c0_263, %c0_264] : memref<1x128xf32, #tpu.memory_space<vmem>>, vector<1x128xf32>
    %237 = vector.broadcast %236 : vector<1x128xf32> to vector<8x128xf32>
    %238 = arith.addf %235, %237 : vector<8x128xf32>
    %cst_265 = arith.constant dense<0xFF800000> : vector<8xf32>
    %239 = vector.multi_reduction <maximumf>, %238, %cst_265 [1] : vector<8x128xf32> to vector<8xf32>
    %240 = vector.shape_cast %239 : vector<8xf32> to vector<8x1xf32>
    %241 = vector.broadcast %240 : vector<8x1xf32> to vector<8x128xf32>
    %242 = arith.subf %238, %241 : vector<8x128xf32>
    %243 = math.exp %242 : vector<8x128xf32>
    %cst_266 = arith.constant dense<0.000000e+00> : vector<8xf32>
    %244 = vector.multi_reduction <add>, %243, %cst_266 [1] : vector<8x128xf32> to vector<8xf32>
    %245 = vector.shape_cast %244 : vector<8xf32> to vector<8x1xf32>
    %246 = math.log %245 : vector<8x1xf32>
    %247 = arith.addf %240, %246 : vector<8x1xf32>
    %248 = vector.broadcast %247 : vector<8x1xf32> to vector<8x128xf32>
    %249 = arith.subf %238, %248 : vector<8x128xf32>
    %c0_267 = arith.constant 0 : index
    %c0_268 = arith.constant 0 : index
    %250 = vector.load %arg24[%c0_267, %c0_268] : memref<8x256xf32, #tpu.memory_space<vmem>>, vector<8x128xf32>
    tpu.vector_store %arg24[%c0_267, %c0_268], %224 {strides = array<i32>} : memref<8x256xf32, #tpu.memory_space<vmem>>, vector<8x128xf32>,
    %c0_269 = arith.constant 0 : index
    %c128_270 = arith.constant 128 : index
    %251 = vector.load %arg24[%c0_269, %c128_270] : memref<8x256xf32, #tpu.memory_space<vmem>>, vector<8x128xf32>
    tpu.vector_store %arg24[%c0_269, %c128_270], %249 {strides = array<i32>} : memref<8x256xf32, #tpu.memory_space<vmem>>, vector<8x128xf32>,
    return
  }
  func.func @transform_0(%arg0: i32) -> (i32, i32) {
    %c0_i32 = arith.constant 0 : i32
    %c0_i32_0 = arith.constant 0 : i32
    return %arg0, %c0_i32 : i32, i32
  }
  func.func @transform_1(%arg0: i32) -> (i32, i32, i32) {
    %c0_i32 = arith.constant 0 : i32
    %c0_i32_0 = arith.constant 0 : i32
    %c0_i32_1 = arith.constant 0 : i32
    %c0_i32_2 = arith.constant 0 : i32
    return %c0_i32, %c0_i32_0, %c0_i32_1 : i32, i32, i32
  }
  func.func @transform_2(%arg0: i32) -> (i32, i32) {
    %c0_i32 = arith.constant 0 : i32
    %c0_i32_0 = arith.constant 0 : i32
    %c0_i32_1 = arith.constant 0 : i32
    return %c0_i32, %c0_i32_0 : i32, i32
  }
  func.func @transform_3(%arg0: i32) -> (i32, i32, i32) {
    %c0_i32 = arith.constant 0 : i32
    %c0_i32_0 = arith.constant 0 : i32
    %c0_i32_1 = arith.constant 0 : i32
    %c0_i32_2 = arith.constant 0 : i32
    return %c0_i32, %c0_i32_0, %c0_i32_1 : i32, i32, i32
  }
  func.func @transform_4(%arg0: i32) -> (i32, i32) {
    %c0_i32 = arith.constant 0 : i32
    %c0_i32_0 = arith.constant 0 : i32
    %c0_i32_1 = arith.constant 0 : i32
    return %c0_i32, %c0_i32_0 : i32, i32
  }
  func.func @transform_5(%arg0: i32) -> (i32, i32) {
    %c0_i32 = arith.constant 0 : i32
    %c0_i32_0 = arith.constant 0 : i32
    %c0_i32_1 = arith.constant 0 : i32
    return %c0_i32, %c0_i32_0 : i32, i32
  }
  func.func @transform_6(%arg0: i32) -> (i32, i32) {
    %c0_i32 = arith.constant 0 : i32
    %c0_i32_0 = arith.constant 0 : i32
    %c0_i32_1 = arith.constant 0 : i32
    return %c0_i32, %c0_i32_0 : i32, i32
  }
  func.func @transform_7(%arg0: i32) -> (i32, i32, i32) {
    %c0_i32 = arith.constant 0 : i32
    %c0_i32_0 = arith.constant 0 : i32
    %c0_i32_1 = arith.constant 0 : i32
    %c0_i32_2 = arith.constant 0 : i32
    return %c0_i32, %c0_i32_0, %c0_i32_1 : i32, i32, i32
  }
  func.func @transform_8(%arg0: i32) -> (i32, i32) {
    %c0_i32 = arith.constant 0 : i32
    %c0_i32_0 = arith.constant 0 : i32
    %c0_i32_1 = arith.constant 0 : i32
    return %c0_i32, %c0_i32_0 : i32, i32
  }
  func.func @transform_9(%arg0: i32) -> (i32, i32) {
    %c0_i32 = arith.constant 0 : i32
    %c0_i32_0 = arith.constant 0 : i32
    %c0_i32_1 = arith.constant 0 : i32
    return %c0_i32, %c0_i32_0 : i32, i32
  }
  func.func @transform_10(%arg0: i32) -> (i32, i32) {
    %c0_i32 = arith.constant 0 : i32
    %c0_i32_0 = arith.constant 0 : i32
    %c0_i32_1 = arith.constant 0 : i32
    return %c0_i32, %c0_i32_0 : i32, i32
  }
  func.func @transform_11(%arg0: i32) -> (i32, i32) {
    %c0_i32 = arith.constant 0 : i32
    %c0_i32_0 = arith.constant 0 : i32
    %c0_i32_1 = arith.constant 0 : i32
    return %c0_i32, %c0_i32_0 : i32, i32
  }
  func.func @transform_12(%arg0: i32) -> (i32, i32, i32) {
    %c0_i32 = arith.constant 0 : i32
    %c0_i32_0 = arith.constant 0 : i32
    %c0_i32_1 = arith.constant 0 : i32
    %c0_i32_2 = arith.constant 0 : i32
    return %c0_i32, %c0_i32_0, %c0_i32_1 : i32, i32, i32
  }
  func.func @transform_13(%arg0: i32) -> (i32, i32) {
    %c0_i32 = arith.constant 0 : i32
    %c0_i32_0 = arith.constant 0 : i32
    %c0_i32_1 = arith.constant 0 : i32
    return %c0_i32, %c0_i32_0 : i32, i32
  }
  func.func @transform_14(%arg0: i32) -> (i32, i32) {
    %c0_i32 = arith.constant 0 : i32
    %c0_i32_0 = arith.constant 0 : i32
    %c0_i32_1 = arith.constant 0 : i32
    return %c0_i32, %c0_i32_0 : i32, i32
  }
  func.func @transform_15(%arg0: i32) -> (i32, i32) {
    %c0_i32 = arith.constant 0 : i32
    %c0_i32_0 = arith.constant 0 : i32
    %c0_i32_1 = arith.constant 0 : i32
    return %c0_i32, %c0_i32_0 : i32, i32
  }
  func.func @transform_16(%arg0: i32) -> (i32, i32) {
    %c0_i32 = arith.constant 0 : i32
    %c0_i32_0 = arith.constant 0 : i32
    %c0_i32_1 = arith.constant 0 : i32
    return %c0_i32, %c0_i32_0 : i32, i32
  }
  func.func @transform_17(%arg0: i32) -> (i32, i32) {
    %c0_i32 = arith.constant 0 : i32
    %c0_i32_0 = arith.constant 0 : i32
    %c0_i32_1 = arith.constant 0 : i32
    return %c0_i32, %c0_i32_0 : i32, i32
  }
  func.func @transform_18(%arg0: i32) -> (i32, i32) {
    %c0_i32 = arith.constant 0 : i32
    %c0_i32_0 = arith.constant 0 : i32
    %c0_i32_1 = arith.constant 0 : i32
    return %c0_i32, %c0_i32_0 : i32, i32
  }
  func.func @transform_19(%arg0: i32) -> (i32, i32) {
    %c0_i32 = arith.constant 0 : i32
    %c0_i32_0 = arith.constant 0 : i32
    %c0_i32_1 = arith.constant 0 : i32
    return %c0_i32, %c0_i32_0 : i32, i32
  }
  func.func @transform_20(%arg0: i32) -> (i32, i32) {
    %c0_i32 = arith.constant 0 : i32
    %c0_i32_0 = arith.constant 0 : i32
    %c0_i32_1 = arith.constant 0 : i32
    return %c0_i32, %c0_i32_0 : i32, i32
  }
  func.func @transform_21(%arg0: i32) -> (i32, i32) {
    %c0_i32 = arith.constant 0 : i32
    %c0_i32_0 = arith.constant 0 : i32
    %c0_i32_1 = arith.constant 0 : i32
    return %c0_i32, %c0_i32_0 : i32, i32
  }
  func.func @transform_22(%arg0: i32) -> (i32, i32) {
    %c0_i32 = arith.constant 0 : i32
    %c0_i32_0 = arith.constant 0 : i32
    %c0_i32_1 = arith.constant 0 : i32
    return %c0_i32, %c0_i32_0 : i32, i32
  }
  func.func @transform_23(%arg0: i32) -> (i32, i32) {
    %c0_i32 = arith.constant 0 : i32
    %c0_i32_0 = arith.constant 0 : i32
    return %arg0, %c0_i32 : i32, i32
  }
}

</mosaic_0001>

<bundles_post_ra>
// kernel: cnn_model_forward.1
= control target key start
LH: loop header
LB: loop body
LE: loop exit
PB: predicated region body
PF: predicated region fallthrough
CT: control target
= control target key end

     0   :  { %v12633_v0 = vmov 0.0   ;;  %vm12634_vm0 = vmmov 0   ;;  %vm156_vm1 = vcmask 1043456   ;;  %v12635_v4 = vmov 0   ;;  %s15979_s1 = inlined_call_operand.vmem [shape: bf16[5,40,128], index: 1, kind: input, shape index: {}]   ;;  %s15980_s0 = inlined_call_operand.vmem [shape: bf16[88,40], index: 0, kind: input, shape index: {}]   ;;  %s15981_s22 = inlined_call_operand.vmem [shape: f32[78,1], index: 22, kind: input, shape index: {}]   ;;  %s15982_s3 = inlined_call_operand.vmem [shape: bf16[5,128,256], index: 3, kind: input, shape index: {}]   ;;  %s15983_s2 = inlined_call_operand.vmem [shape: f32[1,128], index: 2, kind: input, shape index: {}]   ;;  %s15984_s7 = inlined_call_operand.vmem [shape: bf16[5,256,512], index: 7, kind: input, shape index: {}]   ;;  %s15985_s4 = inlined_call_operand.vmem [shape: f32[1,256], index: 4, kind: input, shape index: {}]   ;;  %s15986_s5 = inlined_call_operand.vmem [shape: f32[1,256], index: 5, kind: input, shape index: {}, may-alias: {5,10}]   ;;  %s15987_s6 = inlined_call_operand.vmem [shape: f32[1,256], index: 6, kind: input, shape index: {}, may-alias: {6,11}]   ;;  %s15988_s9 = inlined_call_operand.vmem [shape: bf16[512,256], index: 9, kind: input, shape index: {}]   ;;  %s15989_s8 = inlined_call_operand.vmem [shape: f32[1,512], index: 8, kind: input, shape index: {}]   ;;  %s15990_s20 = inlined_call_operand.vmem [shape: bf16[50,78], index: 20, kind: input, shape index: {}]   ;;  %s15991_s12 = inlined_call_operand.vmem [shape: bf16[5,256,64], index: 12, kind: input, shape index: {}]   ;;  %s15992_s10 = inlined_call_operand.vmem [shape: f32[1,256], index: 10, kind: input, shape index: {}, may-alias: {5,10}]   ;;  %s15993_s11 = inlined_call_operand.vmem [shape: f32[1,256], index: 11, kind: input, shape index: {}, may-alias: {6,11}]   ;;  %s15994_s21 = inlined_call_operand.vmem [shape: f32[32,46], index: 21, kind: input, shape index: {}]   ;;  %s15995_s14 = inlined_call_operand.vmem [shape: f32[256,256], index: 14, kind: input, shape index: {}]   ;;  %s15996_s13 = inlined_call_operand.vmem [shape: f32[1,64], index: 13, kind: input, shape index: {}]   ;;  %s15997_s18 = inlined_call_operand.vmem [shape: f32[128,128], index: 18, kind: input, shape index: {}]   ;;  %s15998_s15 = inlined_call_operand.vmem [shape: f32[1,256], index: 15, kind: input, shape index: {}]   ;;  %s15999_s16 = inlined_call_operand.vmem [shape: f32[1,128], index: 16, kind: input, shape index: {}]   ;;  %s16000_s17 = inlined_call_operand.vmem [shape: f32[1,128], index: 17, kind: input, shape index: {}]   ;;  %s16001_s19 = inlined_call_operand.vmem [shape: f32[1,128], index: 19, kind: input, shape index: {}]   ;;  %s16002_s23 = inlined_call_operand.vmem [shape: f32[8,256], index: 23, kind: output, shape index: {}]  }
   0x1   :  { %16008 = sst [smem:[#allocation9_spill]] %s15979_s1  ;;  %11227 = vmatprep.subr.bf16.mxu1 %v12633_v0  ;;  %11233 = vmatprep.mubr.msk.bf16.mxu1 %vm12634_vm0, %v12633_v0  ;;  %1168 = vst [vmem:[#allocation2] sm:$0x1] %v12635_v4  ;;  %1169 = vst [vmem:[#allocation2 + $0x28] sm:$0x1] %v12635_v4  ;;  %vm140_vm2 = vcmask 326656  }
   0x2   :  { %16009 = sst [smem:[#allocation10_spill]] %s15980_s0  ;;  %s16016_s24 = sld [smem:[#allocation9_spill]]  ;;  %11279 = vmatprep.subr.bf16.mxu0 %v12633_v0  ;;  %11285 = vmatprep.mubr.msk.bf16.mxu0 %vm12634_vm0, %v12633_v0  ;;  %2882 = vst [vmem:[#allocation3] sm:$0x11] %v12635_v4  ;;  %2883 = vst [vmem:[#allocation3 + $0x50] sm:$0x11] %v12635_v4 }
   0x3   :  { %16010 = sst [smem:[#allocation11_spill]] %s15981_s22  ;;  %11737 = vset.pattern.permute.xlu0 %v12635_v4  ;;  %11738 = vset.pattern.permute.xlu1 %v12635_v4  ;;  %s16017_s27 = sld [smem:[#allocation10_spill]]  ;;  %vm511_vm3 = vcmask 1046528   ;;  %vm294_vm4 = vsmask.f32 7424  ;;  %vm933_vm5 = vcmask 1045504  }
   0x4   :  { %16011 = sst [smem:[#allocation12_spill]] %s15982_s3  ;;  %s16018_s3 = sld [smem:[#allocation11_spill]]  ;;  %vm702_vm6 = vsmask.f32 6400  ;;  %vm1200_vm7 = vcmask 1040384   ;;  %vm1201_vm8 = vcmask 1044484  }
   0x5   :  { %16012 = sst [smem:[#allocation13_spill]] %s15983_s2  ;;  %vm13138_vm9 = vmor %vm1200_vm7, %vm1201_vm8  ;;  %vm7595_vm10 = vcmask 637952   ;;  %vm7958_vm11 = vcmask 523264   ;;  %vm7964_vm12 = vcmask 521216   ;;  %vm9099_vm13 = vcmask 375808  }
   0x6   :  { %16013 = sst [smem:[#allocation14_spill]] %s15984_s7  ;;  %s16019_s7 = sld [smem:[#allocation12_spill]]  ;;  %vm12636_vm14 = vmmov 1  }
   0x7   :  { %16014 = sst [smem:[#allocation15_spill]] %s15985_s4  ;;  %s16023_s28 = sld [smem:[#allocation14_spill]]  ;;  %vm11419_vm15 = vmpackc.low %vm933_vm5, %vm12636_vm14 }
   0x8   :  { %16015 = sst [smem:[#allocation16_spill]] %s15986_s5  ;;  %v11739_v1 = vld [vmem:[%s16016_s24] sm:$0xff]   ;;  %v11740_v2 = vld [vmem:[%s16016_s24 + $0x8] sm:$0xff]   ;;  %v11741_v3 = vld [vmem:[%s16016_s24 + $0x10] ss:$0 sps:$4 sm:$0xff]   ;;  %s16024_s22 = sld [smem:[#allocation15_spill]] }
   0x9   :  { %11228 = vmatpush3.bf16.msra.mxu1 %v11739_v1  ;;  %v158_v5 = vsel %vm156_vm1, %v11741_v3, 0  ;;  %v11742_v6 = vld [vmem:[%s16017_s27] sm:$0xff]   ;;  %v11743_v7 = vld [vmem:[%s16016_s24 + $0x14] sm:$0xff]   ;;  %v11750_v8 = vld [vmem:[%s16016_s24 + $0x28] sm:$0xff]   ;;  %s16025_s5 = sld [smem:[#allocation16_spill]] }
   0xa   :  { %11229 = vmatprep.subr.bf16.mxu1 %v12633_v0  ;;  %11280 = vmatpush3.bf16.msra.mxu0 %v11750_v8  ;;  %v11753_v9 = vld [vmem:[%s16016_s24 + $0x30] sm:$0xff]   ;;  %v11746_v10 = vld [vmem:[%s16016_s24 + $0x1c] sm:$0xff]   ;;  %v11749_v11 = vld [vmem:[%s16016_s24 + $0x24] ss:$0 sps:$4 sm:$0xff]  }
   0xb   :  { %11281 = vmatprep.subr.bf16.mxu0 %v12633_v0  ;;  %v11754_v12 = vld [vmem:[%s16016_s24 + $0x38] ss:$0 sps:$4 sm:$0xff]   ;;  %v11757_v13 = vld [vmem:[%s16017_s27 + $0x8] sm:$0xff]   ;;  %v11756_v16 = vld [vmem:[%s16017_s27] sm:$0xfe]   ;;  %v365_v18 = vsel %vm156_vm1, %v11749_v11, 0 }
   0xc   :  { %v11744_v14 = vld [vmem:[%s16017_s27 + $0x8] sm:$0xff]   ;;  %v552_v15 = vsel %vm156_vm1, %v11754_v12, 0  ;;  %v513_v17 = vrot.slane %v11757_v13, 1  ;;  %v512_v19 = vrot.slane %v11756_v16, 1  ;;  %v11759_v20 = vld [vmem:[%s16017_s27 + $0x10] sm:$0xff]   ;;  %v11765_v25 = vld [vmem:[%s16016_s24 + $0x58] sm:$0xff]  }
   0xd   :  { %11230 = vmatpush3.bf16.msra.mxu1 %v11740_v2  ;;  %v11760_v21 = vld [vmem:[%s16016_s24 + $0x50] sm:$0xff]   ;;  %v515_v24 = vrot.slane %v11759_v20, 1  ;;  %v11763_v27 = vld [vmem:[%s16017_s27 + $0x18] sm:$0xff]   ;;  %v11770_v28 = vld [vmem:[%s16016_s24 + $0x60] ss:$0 sps:$4 sm:$0xff]  }
   0xe   :  { %11231 = vmatprep.subr.bf16.mxu1 %v12633_v0  ;;  %11282 = vmatpush3.bf16.msra.mxu0 %v11753_v9  ;;  %v514_v22 = vsel %vm511_vm3, %v512_v19, %v513_v17  ;;  %v11745_v23 = vld [vmem:[%s16017_s27 + $0x10] sm:$0xff]   ;;  %v11747_v29 = vld [vmem:[%s16017_s27 + $0x18] sm:$0xff]   ;;  %v517_v30 = vrot.slane %v11763_v27, 1  ;;  %v11751_v31 = vld [vmem:[%s16017_s27] sm:$0xff]   ;;  %v976_v32 = vsel %vm156_vm1, %v11770_v28, 0 }
   0xf   :  { %11283 = vmatprep.subr.bf16.mxu0 %v12633_v0  ;;  %v516_v26 = vsel %vm511_vm3, %v513_v17, %v515_v24  ;;  %v11752_v33 = vld [vmem:[%s16017_s27 + $0x8] sm:$0xff]   ;;  %v11766_v35 = vld [vmem:[%s16017_s27 + $0x20] sm:$0xff]   ;;  %v298_v36 = vshll.u32 %v11751_v31, 16  ;;  %v296_v38 = vshrl.u32 %v11751_v31, 16  ;;  %v77_v44 = vld [vmem:[%s16018_s3 + $0x10] sm:$0xff] }
  0x10   :  { %v518_v34 = vsel %vm511_vm3, %v515_v24, %v517_v30  ;;  %v11748_v37 = vld [vmem:[%s16017_s27 + $0x20] sm:$0x7f]   ;;  %v303_v39 = vshll.u32 %v11752_v33, 16  ;;  %v519_v40 = vrot.slane %v11766_v35, 1  ;;  %v76_v43 = vld [vmem:[%s16018_s3 + $0x8] sm:$0xff]  ;;  %1120 = vperm.xlu1 %11738, %v77_v44   ;;  %v11758_v48 = vld [vmem:[%s16017_s27 + $0x10] sm:$0xff]  }
  0x11   :  { %11232 = vmatpush3.bf16.msra.mxu1 %v158_v5  ;;  %v300_v41 = vrot.slane %v298_v36, 1  ;;  %v75_v42 = vld [vmem:[%s16018_s3] sm:$0xff]  ;;  %v78_v49 = vld [vmem:[%s16018_s3 + $0x18] sm:$0xff]  ;;  %v307_v53 = vshrl.u32 %v11752_v33, 16  ;;  %v311_v54 = vshll.u32 %v11758_v48, 16  ;;  %v80_v55 = vld [vmem:[%s16018_s3 + $0x28] sm:$0xff] }
  0x12   :  { %11253 = vmatprep.subr.bf16.mxu1 %v12633_v0  ;;  %11284 = vmatpush3.bf16.msra.mxu0 %v552_v15  ;;  %v520_v45 = vsel %vm511_vm3, %v517_v30, %v519_v40  ;;  %v305_v47 = vrot.slane %v303_v39, 1  ;;  %v79_v50 = vld [vmem:[%s16018_s3 + $0x20] sm:$0xff]  ;;  %v81_v56 = vld [vmem:[%s16018_s3 + $0x30] sm:$0xff]  ;;  %v11772_v58 = vld [vmem:[%s16017_s27 + $0x8] sm:$0xff]  }
  0x13   :  { %11331 = vmatprep.subr.bf16.mxu0 %v12633_v0  ;;  %1110 = vperm.xlu0 %11737, %v75_v42   ;;  %v301_v46 = vor.u32 %v300_v41, %v296_v38  ;;  %v11755_v52 = vld [vmem:[%s16016_s24 + $0x3c] sm:$0xff]   ;;  %v313_v60 = vrot.slane %v311_v54, 1  ;;  %v11762_v62 = vld [vmem:[%s16016_s24 + $0x44] sm:$0xff]   ;;  %v11767_v1 = vld [vmem:[%s16016_s24 + $0x4c] ss:$0 sps:$4 sm:$0xff]   ;;  %v935_v5 = vrot.slane %v11772_v58, 2 }
  0x14   :  { %11234 = vmatmul.mubr.msk.bf16.vlgmr.msra.gmra.mrb[0].mxu1 %vm140_vm2, %v11742_v6  ;;  %1125 = vperm.xlu1 %11738, %v78_v49   ;;  %v11771_v57 = vld [vmem:[%s16017_s27] sm:$0xfc]   ;;  %v309_v59 = vor.u32 %v307_v53, %v305_v47  ;;  %v11761_v61 = vld [vmem:[%s16017_s27 + $0x18] sm:$0xff]   ;;  %v84_v9 = vld [vmem:[%s16018_s3 + $0x48] sm:$0x3f] }
  0x15   :  { %11254 = vmatpush3.bf16.msra.mxu1 %v11743_v7  ;;  %11237 = vmatprep.mubr.msk.bf16.mxu1 %vm12634_vm0, %v12633_v0  ;;  %v306_v51 = vsel %vm294_vm4, %v301_v46, %v305_v47  ;;  %v82_v63 = vld [vmem:[%s16018_s3 + $0x38] sm:$0xff]  ;;  %v83_v2 = vld [vmem:[%s16018_s3 + $0x40] sm:$0xff]  ;;  %v934_v3 = vrot.slane %v11771_v57, 2  ;;  %v315_v7 = vshrl.u32 %v11758_v48, 16  ;;  %v319_v8 = vshll.u32 %v11761_v61, 16  ;;  %v11774_v12 = vld [vmem:[%s16017_s27 + $0x10] sm:$0xff]  }
  0x16   :  { %11255 = vmatprep.subr.bf16.mxu1 %v12633_v0  ;;  %11286 = vmatmul.mubr.msk.bf16.vlgmr.msra.gmra.mrb[0].mxu0 %vm140_vm2, %v514_v22  ;;  %v314_v6 = vsel %vm294_vm4, %v309_v59, %v313_v60  ;;  %v11764_v15 = vld [vmem:[%s16017_s27 + $0x20] sm:$0xff]   ;;  %v937_v16 = vrot.slane %v11774_v12, 2  ;;  %v11769_v27 = vld [vmem:[%s16017_s27 + $0x8] sm:$0xff]   ;;  %v11773_v41 = vld [vmem:[%s16017_s27 + $0x10] sm:$0xff]   ;;  %s16020_s3 = sld [smem:[#allocation13_spill]] }
  0x17   :  { %11289 = vmatprep.mubr.msk.bf16.mxu0 %vm12634_vm0, %v12633_v0  ;;  %11332 = vmatpush3.bf16.msra.mxu0 %v11760_v21  ;;  %v936_v11 = vsel %vm933_vm5, %v934_v3, %v935_v5  ;;  %v317_v13 = vor.u32 %v315_v7, %v313_v60  ;;  %v327_v19 = vshll.u32 %v11764_v15, 16  ;;  %v11776_v21 = vld [vmem:[%s16017_s27 + $0x18] sm:$0xff]   ;;  %v331_v28 = vshrl.u32 %v11764_v15, 16  ;;  %v11778_v30 = vld [vmem:[%s16017_s27 + $0x20] sm:$0xff]  }
  0x18   :  { %11333 = vmatprep.subr.bf16.mxu0 %v12633_v0  ;;  %1115 = vperm.xlu0 %11737, %v76_v43   ;;  %v938_v20 = vsel %vm933_vm5, %v935_v5, %v937_v16  ;;  %v939_v24 = vrot.slane %v11776_v21, 2  ;;  %v712_v33 = vshrl.u32 %v11769_v27, 16  ;;  %v941_v36 = vrot.slane %v11778_v30, 2  ;;  %v11780_v43 = vld [vmem:[%s16017_s27 + $0x28] ss:$0 sps:$4 sm:$0x11]  }
  0x19   :  { %11256 = vmatpush3.bf16.msra.mxu1 %v11746_v10  ;;  %1135 = vperm.xlu1 %11738, %v80_v55   ;;  %v783_v10 = vsel %vm156_vm1, %v11767_v1, 0  ;;  %v721_v46 = vshrl.u32 %v11773_v41, 16  ;;  %v724_v47 = vshll.u32 %v11773_v41, 16  ;;  %v943_v48 = vrot.slane %v11780_v43, 2  ;;  %v11777_v60 = vld [vmem:[%s16017_s27 + $0x20] sm:$0xff]  }
  0x1a   :  { %11257 = vmatprep.subr.bf16.mxu1 %v12633_v0  ;;  %v714_v39 = vrot.slane %v712_v33, 1  ;;  %v942_v42 = vsel %vm933_vm5, %v939_v24, %v941_v36  ;;  %v11781_v12 = vld [vmem:[%s16019_s7] ss:$8 sps:$4 sm:$0xff]   ;;  %v11789_v15 = vld [vmem:[%s16019_s7 + $0x24] ss:$8 sps:$4 sm:$0xff]  }
  0x1b   :  { %11334 = vmatpush3.bf16.msra.mxu0 %v11765_v25  ;;  %v944_v53 = vsel %vm933_vm5, %v941_v36, %v943_v48  ;;  %v11798_v21 = vld [vmem:[%s16019_s7 + $0x54] ss:$8 sps:$4 sm:$0xff]   ;;  %v11808_v30 = vld [vmem:[%s16019_s7 + $0x84] ss:$8 sps:$4 sm:$0xff]  }
  0x1c   :  { %11238 = vmatmul.mubr.msk.bf16.gmra.mrb[4].mxu1 %vm140_vm2, %v11744_v14  ;;  %11335 = vmatprep.subr.bf16.mxu0 %v12633_v0  ;;  %v321_v14 = vrot.slane %v319_v8, 1 }
  0x1d   :  { %11241 = vmatprep.mubr.msk.bf16.mxu1 %vm12634_vm0, %v12633_v0  ;;  %11258 = vmatpush3.bf16.msra.mxu1 %v365_v18  ;;  %v323_v18 = vshrl.u32 %v11761_v61, 16 }
  0x1e   :  { %11305 = vmatprep.subr.bf16.mxu1 %v12633_v0  ;;  %11290 = vmatmul.mubr.msk.bf16.gmra.mrb[4].mxu0 %vm140_vm2, %v516_v26  ;;  %v322_v17 = vsel %vm294_vm4, %v317_v13, %v321_v14  ;;  %v11768_v26 = vld [vmem:[%s16017_s27] sm:$0xfe]   ;;  %v11786_v13 = vld [vmem:[%s16019_s7 + $0x14] ss:$8 sps:$4 sm:$0xff]  }
  0x1f   :  { %11293 = vmatprep.mubr.msk.bf16.mxu0 %vm12634_vm0, %v12633_v0  ;;  %11336 = vmatpush3.bf16.msra.mxu0 %v976_v32  ;;  %v325_v22 = vor.u32 %v323_v18, %v321_v14  ;;  %v704_v31 = vshrl.u32 %v11768_v26, 16  ;;  %v707_v32 = vshll.u32 %v11768_v26, 16  ;;  %v11784_v14 = vld [vmem:[%s16019_s7 + $0x10] ss:$8 sps:$4 sm:$0xff]  }
  0x20   :  { %1130 = vperm.xlu0 %11737, %v79_v50   ;;  %1145 = vperm.xlu1 %11738, %v82_v63   ;;  %v723_v50 = vrot.slane %v721_v46, 1  ;;  %v742_v63 = vshll.u32 %v11777_v60, 16  ;;  %v11790_v18 = vld [vmem:[%s16019_s7 + $0x30] ss:$8 sps:$4 sm:$0xff]  }
  0x21   :  { %v709_v38 = vrot.slane %v707_v32, 2  ;;  %v11802_v26 = vld [vmem:[%s16019_s7 + $0x70] ss:$8 sps:$4 sm:$0xff]  }
  0x22   :  { %v744_v3 = vrot.slane %v742_v63, 2 }
  0x24   :  { %11242 = vmatmul.mubr.msk.bf16.gmra.mrb[8].mxu1 %vm140_vm2, %v11745_v23  ;;  %1140 = vperm.xlu0 %11737, %v81_v56   ;;  %v329_v23 = vrot.slane %v327_v19, 1  ;;  %v11795_v19 = vld [vmem:[%s16019_s7 + $0x44] ss:$8 sps:$4 sm:$0xff]  }
  0x25   :  { %11245 = vmatprep.mubr.msk.bf16.mxu1 %vm12634_vm0, %v12633_v0  ;;  %1155 = vperm.xlu1 %11738, %v84_v9  }
  0x26   :  { %11294 = vmatmul.mubr.msk.bf16.gmra.mrb[8].mxu0 %vm140_vm2, %v518_v34  ;;  %v330_v25 = vsel %vm294_vm4, %v325_v22, %v329_v23  ;;  %v715_v34 = vshll.u32 %v11769_v27, 16  ;;  %v333_v35 = vor.u32 %v331_v28, %v329_v23  ;;  %v11796_v22 = vld [vmem:[%s16019_s7 + $0x50] ss:$8 sps:$4 sm:$0xff]   ;;  %v11801_v23 = vld [vmem:[%s16019_s7 + $0x64] ss:$8 sps:$4 sm:$0xff]  }
  0x27   :  { %11297 = vmatprep.mubr.msk.bf16.mxu0 %vm12634_vm0, %v12633_v0 }
  0x28   :  { %1150 = vperm.xlu0 %11737, %v83_v2  }
  0x2c   :  { %11246 = vmatmul.mubr.msk.bf16.gmra.mrb[12].mxu1 %vm140_vm2, %v11747_v29  ;;  %v940_v29 = vsel %vm933_vm5, %v937_v16, %v939_v24  ;;  %v11787_v16 = vld [vmem:[%s16019_s7 + $0x20] ss:$8 sps:$4 sm:$0xff]  }
  0x2d   :  { %11249 = vmatprep.mubr.msk.bf16.mxu1 %vm12634_vm0, %v12633_v0  ;;  %v11799_v24 = vld [vmem:[%s16019_s7 + $0x60] ss:$8 sps:$4 sm:$0xff]  }
  0x2e   :  { %11298 = vmatmul.mubr.msk.bf16.gmra.mrb[12].mxu0 %vm140_vm2, %v520_v45 }
  0x2f   :  { %11301 = vmatprep.mubr.msk.bf16.mxu0 %vm12634_vm0, %v12633_v0 }
  0x34   :  { %11250 = vmatmul.mubr.msk.bf16.gmra.mrb[16].mxu1 %vm140_vm2, %v11748_v37  ;;  %v706_v37 = vrot.slane %v704_v31, 1 }
  0x35   :  { %11259 = vmatprep.mubr.msk.bf16.mxu1 %vm12634_vm0, %v12633_v0 }
  0x36   :  { %11302 = vmatmul.mubr.msk.bf16.gmra.mrb[16].mxu0 %vm140_vm2, %v519_v40  ;;  %v717_v40 = vrot.slane %v715_v34, 2  ;;  %v710_v44 = vor.u32 %v709_v38, %v706_v37 }
  0x37   :  { %11337 = vmatprep.mubr.msk.bf16.mxu0 %vm12634_vm0, %v12633_v0 }
  0x38   :  { %v718_v45 = vor.u32 %v717_v40, %v714_v39 }
  0x3a   :  { %v719_v49 = vsel %vm702_vm6, %v710_v44, %v718_v45 }
  0x3c   :  { %11260 = vmatmul.mubr.msk.bf16.vlgmr.msra.gmra.mrb[20].mxu1 %vm140_vm2, %v306_v51  ;;  %v726_v51 = vrot.slane %v724_v47, 2 }
  0x3d   :  { %11306 = vmatpush3.bf16.msra.mxu1 %v11755_v52  ;;  %11263 = vmatprep.mubr.msk.bf16.mxu1 %vm12634_vm0, %v12633_v0  ;;  %v11775_v52 = vld [vmem:[%s16017_s27 + $0x18] sm:$0xff]  }
  0x3e   :  { %11307 = vmatprep.subr.bf16.mxu1 %v12633_v0  ;;  %11338 = vmatmul.mubr.msk.bf16.vlgmr.msra.gmra.mrb[20].mxu0 %vm140_vm2, %v936_v11  ;;  %v727_v54 = vor.u32 %v726_v51, %v723_v50  ;;  %v730_v55 = vshrl.u32 %v11775_v52, 16  ;;  %v733_v56 = vshll.u32 %v11775_v52, 16  ;;  %v11783_v11 = vld [vmem:[%s16019_s7 + $0x4] ss:$8 sps:$4 sm:$0xff]  }
  0x3f   :  { %11341 = vmatprep.mubr.msk.bf16.mxu0 %vm12634_vm0, %v12633_v0 }
  0x40   :  { %v728_v57 = vsel %vm702_vm6, %v718_v45, %v727_v54  ;;  %v732_v58 = vrot.slane %v730_v55, 1  ;;  %v735_v59 = vrot.slane %v733_v56, 2 }
  0x41   :  { %11308 = vmatpush3.bf16.msra.mxu1 %v11762_v62  ;;  %v739_v62 = vshrl.u32 %v11777_v60, 16 }
  0x42   :  { %11309 = vmatprep.subr.bf16.mxu1 %v12633_v0  ;;  %v736_v61 = vor.u32 %v735_v59, %v732_v58 }
  0x43   :  { %v741_v2 = vrot.slane %v739_v62, 1 }
  0x44   :  { %11264 = vmatmul.mubr.msk.bf16.gmra.mrb[24].mxu1 %vm140_vm2, %v314_v6  ;;  %v737_v1 = vsel %vm702_vm6, %v727_v54, %v736_v61  ;;  %v11779_v6 = vld [vmem:[%s16017_s27 + $0x28] ss:$0 sps:$4 sm:$0x11]  }
  0x45   :  { %11267 = vmatprep.mubr.msk.bf16.mxu1 %vm12634_vm0, %v12633_v0  ;;  %11310 = vmatpush3.bf16.msra.mxu1 %v783_v10  ;;  %v745_v5 = vor.u32 %v744_v3, %v741_v2  ;;  %v748_v8 = vshll.u32 %v11779_v6, 16 }
  0x46   :  { %11342 = vmatmul.mubr.msk.bf16.gmra.mrb[24].mxu0 %vm140_vm2, %v938_v20  ;;  %1387 = vmatprep.subr.bf16.mxu1 %v11783_v11  ;;  %v11793_v20 = vld [vmem:[%s16019_s7 + $0x40] ss:$8 sps:$4 sm:$0xff]  }
  0x47   :  { %11345 = vmatprep.mubr.msk.bf16.mxu0 %vm12634_vm0, %v12633_v0  ;;  %v746_v7 = vsel %vm702_vm6, %v736_v61, %v745_v5  ;;  %v750_v9 = vrot.slane %v748_v8, 2 }
  0x49   :  { %v751_v10 = vsel %vm702_vm6, %v745_v5, %v750_v9 }
  0x4c   :  { %11268 = vmatmul.mubr.msk.bf16.gmra.mrb[28].mxu1 %vm140_vm2, %v322_v17  ;;  %v11792_v17 = vld [vmem:[%s16019_s7 + $0x34] ss:$8 sps:$4 sm:$0xff]  }
  0x4d   :  { %11271 = vmatprep.mubr.msk.bf16.mxu1 %vm12634_vm0, %v12633_v0 }
  0x4e   :  { %11346 = vmatmul.mubr.msk.bf16.gmra.mrb[28].mxu0 %vm140_vm2, %v940_v29 }
  0x4f   :  { %11349 = vmatprep.mubr.msk.bf16.mxu0 %vm12634_vm0, %v12633_v0 }
  0x54   :  { %11272 = vmatmul.mubr.msk.bf16.gmra.mrb[32].mxu1 %vm140_vm2, %v330_v25  ;;  %v11804_v25 = vld [vmem:[%s16019_s7 + $0x74] ss:$8 sps:$4 sm:$0xff]  }
  0x55   :  { %11275 = vmatprep.mubr.msk.bf16.mxu1 %vm12634_vm0, %v12633_v0 }
  0x56   :  { %11350 = vmatmul.mubr.msk.bf16.gmra.mrb[32].mxu0 %vm140_vm2, %v942_v42 }
  0x57   :  { %11353 = vmatprep.mubr.msk.bf16.mxu0 %vm12634_vm0, %v12633_v0 }
  0x5c   :  { %11276 = vmatmul.mubr.msk.bf16.gmra.mrb[36].mxu1 %vm140_vm2, %v333_v35 }
  0x5d   :  { %11311 = vmatprep.mubr.msk.bf16.mxu1 %vm12634_vm0, %v12633_v0 }
  0x5e   :  { %11354 = vmatmul.mubr.msk.bf16.gmra.mrb[36].mxu0 %vm140_vm2, %v944_v53 }
  0x64   :  { %11312 = vmatmul.mubr.msk.bf16.vlgmr.msra.gmra.mrb[40].mxu1 %vm140_vm2, %v719_v49 }
  0x65   :  { %11315 = vmatprep.mubr.msk.bf16.mxu1 %vm12634_vm0, %v12633_v0  ;;  %1388 = vmatpush1.bf16.msra.mxu1 %v11781_v12 }
  0x66   :  { %1389 = vmatprep.subr.bf16.mxu1 %v11786_v13 }
  0x69   :  { %1390 = vmatpush1.bf16.msra.mxu1 %v11784_v14 }
  0x6a   :  { %1391 = vmatprep.subr.bf16.mxu1 %v11789_v15 }
  0x6c   :  { %11316 = vmatmul.mubr.msk.bf16.gmra.mrb[44].mxu1 %vm140_vm2, %v728_v57 }
  0x6d   :  { %11319 = vmatprep.mubr.msk.bf16.mxu1 %vm12634_vm0, %v12633_v0  ;;  %1392 = vmatpush1.bf16.msra.mxu1 %v11787_v16 }
  0x6e   :  { %1393 = vmatprep.subr.bf16.mxu1 %v11792_v17 }
  0x71   :  { %1394 = vmatpush1.bf16.msra.mxu1 %v11790_v18 }
  0x72   :  { %1395 = vmatprep.subr.bf16.mxu1 %v11795_v19 }
  0x74   :  { %11320 = vmatmul.mubr.msk.bf16.gmra.mrb[48].mxu1 %vm140_vm2, %v737_v1 }
  0x75   :  { %11323 = vmatprep.mubr.msk.bf16.mxu1 %vm12634_vm0, %v12633_v0  ;;  %1396 = vmatpush1.bf16.msra.mxu1 %v11793_v20 }
  0x76   :  { %1397 = vmatprep.subr.bf16.mxu1 %v11798_v21 }
  0x79   :  { %1398 = vmatpush1.bf16.msra.mxu1 %v11796_v22 }
  0x7a   :  { %1399 = vmatprep.subr.bf16.mxu1 %v11801_v23 }
  0x7c   :  { %11324 = vmatmul.mubr.msk.bf16.gmra.mrb[52].mxu1 %vm140_vm2, %v746_v7 }
  0x7d   :  { %11327 = vmatprep.mubr.msk.bf16.mxu1 %vm12634_vm0, %v12633_v0  ;;  %1400 = vmatpush1.bf16.msra.mxu1 %v11799_v24 }
  0x7e   :  { %1401 = vmatprep.subr.bf16.mxu1 %v11804_v25 }
  0x81   :  { %1402 = vmatpush1.bf16.msra.mxu1 %v11802_v26 }
  0x82   :  { %1686 = vmatprep.subr.bf16.mxu1 %v11808_v30 }
  0x84   :  { %11328 = vmatmul.mubr.msk.bf16.gmra.mrb[56].mxu1 %vm140_vm2, %v751_v10 }
  0x85   :  { %1419 = vmatprep.mubr.bf16.mxu1 %v12635_v4 }
  0xe7   :  { %v194_v27 = vpop.f32.mrb[0].mxu1 }
  0xe8   :  { %v11235_v28 = vpop.f32.mrb[1].mxu1 }
  0xe9   :  { %v197_v29 = vpop.f32.mrb[2].mxu1  ;;  %v588_v36 = vpop.f32.mrb[0].mxu0 }
  0xea   :  { %v11236_v31 = vpop.f32.mrb[3].mxu1  ;;  %v11287_v37 = vpop.f32.mrb[1].mxu0 }
  0xeb   :  { %v591_v38 = vpop.f32.mrb[2].mxu0 }
  0xec   :  { %v11288_v39 = vpop.f32.mrb[3].mxu0 }
  0xef   :  { %v202_v32 = vpop.f32.mrb[4].mxu1 }
  0xf0   :  { %v11239_v33 = vpop.f32.mrb[5].mxu1 }
  0xf1   :  { %v205_v34 = vpop.f32.mrb[6].mxu1  ;;  %v596_v44 = vpop.f32.mrb[4].mxu0 }
  0xf2   :  { %v11240_v35 = vpop.f32.mrb[7].mxu1  ;;  %v11291_v45 = vpop.f32.mrb[5].mxu0 }
  0xf3   :  { %v599_v46 = vpop.f32.mrb[6].mxu0 }
  0xf4   :  { %v11292_v47 = vpop.f32.mrb[7].mxu0 }
  0xf7   :  { %v210_v40 = vpop.f32.mrb[8].mxu1 }
  0xf8   :  { %v11243_v41 = vpop.f32.mrb[9].mxu1 }
  0xf9   :  { %v213_v42 = vpop.f32.mrb[10].mxu1  ;;  %v604_v52 = vpop.f32.mrb[8].mxu0 }
  0xfa   :  { %v11244_v43 = vpop.f32.mrb[11].mxu1  ;;  %v11295_v53 = vpop.f32.mrb[9].mxu0 }
  0xfb   :  { %v607_v54 = vpop.f32.mrb[10].mxu0 }
  0xfc   :  { %v11296_v55 = vpop.f32.mrb[11].mxu0 }
  0xff   :  { %v218_v48 = vpop.f32.mrb[12].mxu1 }
 0x100   :  { %v11247_v49 = vpop.f32.mrb[13].mxu1 }
 0x101   :  { %v221_v50 = vpop.f32.mrb[14].mxu1  ;;  %v612_v60 = vpop.f32.mrb[12].mxu0 }
 0x102   :  { %v11248_v51 = vpop.f32.mrb[15].mxu1  ;;  %v11299_v61 = vpop.f32.mrb[13].mxu0 }
 0x103   :  { %v615_v62 = vpop.f32.mrb[14].mxu0 }
 0x104   :  { %v11300_v63 = vpop.f32.mrb[15].mxu0 }
 0x107   :  { %v226_v56 = vpop.f32.mrb[16].mxu1 }
 0x108   :  { %v11251_v57 = vpop.f32.mrb[17].mxu1 }
 0x109   :  { %v229_v58 = vpop.f32.mrb[18].mxu1  ;;  %v620_v9 = vpop.f32.mrb[16].mxu0 }
 0x10a   :  { %242 = vst [vmem:[#allocation5 + $0x48] sm:$0x3f] %v229_v58  ;;  %v11252_v59 = vpop.f32.mrb[19].mxu1  ;;  %v11303_v10 = vpop.f32.mrb[17].mxu0 }
 0x10b   :  { %v13085_v12 = vpop.f32.mrb[18].mxu0 }
 0x10c   :  { %v11304_v13 = vpop.f32.mrb[19].mxu0 }
 0x10f   :  { %v401_v1 = vpop.f32.mrb[20].mxu1 }
 0x110   :  { %v440_v2 = vadd.f32 %v401_v1, %v194_v27  ;;  %v11261_v3 = vpop.f32.mrb[21].mxu1 }
 0x111   :  { %v404_v5 = vpop.f32.mrb[22].mxu1  ;;  %v1012_v21 = vpop.f32.mrb[20].mxu0  ;;  %v252_v55 = vld [vmem:[#allocation5 + $0x48] sm:$0x3f] }
 0x112   :  { %v441_v6 = vadd.f32 %v404_v5, %v197_v29  ;;  %v11262_v7 = vpop.f32.mrb[23].mxu1  ;;  %v627_v8 = vadd.f32 %v588_v36, %v440_v2  ;;  %v11339_v22 = vpop.f32.mrb[21].mxu0 }
 0x113   :  { %v1015_v24 = vpop.f32.mrb[22].mxu0  ;;  %v13113_v5 = vpop.permute.xlu0 %1110 }
 0x114   :  { %v628_v11 = vadd.f32 %v591_v38, %v441_v6  ;;  %v11340_v25 = vpop.f32.mrb[23].mxu0 }
 0x117   :  { %v409_v14 = vpop.f32.mrb[24].mxu1 }
 0x118   :  { %v442_v15 = vadd.f32 %v409_v14, %v202_v32  ;;  %v11265_v16 = vpop.f32.mrb[25].mxu1 }
 0x119   :  { %v412_v17 = vpop.f32.mrb[26].mxu1  ;;  %v13093_v32 = vpop.f32.mrb[24].mxu0 }
 0x11a   :  { %v443_v18 = vadd.f32 %v412_v17, %v205_v34  ;;  %v11266_v19 = vpop.f32.mrb[27].mxu1  ;;  %v13087_v20 = vadd.f32 %v596_v44, %v442_v15  ;;  %v11343_v34 = vpop.f32.mrb[25].mxu0 }
 0x11b   :  { %v13097_v36 = vpop.f32.mrb[26].mxu0 }
 0x11c   :  { %v13089_v23 = vadd.f32 %v599_v46, %v443_v18  ;;  %v11344_v37 = vpop.f32.mrb[27].mxu0 }
 0x11f   :  { %v417_v26 = vpop.f32.mrb[28].mxu1 }
 0x120   :  { %v444_v27 = vadd.f32 %v417_v26, %v210_v40  ;;  %v11269_v28 = vpop.f32.mrb[29].mxu1 }
 0x121   :  { %v420_v29 = vpop.f32.mrb[30].mxu1 }
 0x122   :  { %v445_v30 = vadd.f32 %v420_v29, %v213_v42  ;;  %v11270_v31 = vpop.f32.mrb[31].mxu1  ;;  %v13091_v33 = vadd.f32 %v604_v52, %v444_v27  ;;  %v13101_v42 = vpop.f32.mrb[28].mxu0 }
 0x123   :  { %v11347_v46 = vpop.f32.mrb[29].mxu0 }
 0x124   :  { %v13095_v35 = vadd.f32 %v607_v54, %v445_v30  ;;  %v13105_v49 = vpop.f32.mrb[30].mxu0 }
 0x125   :  { %v11348_v51 = vpop.f32.mrb[31].mxu0 }
 0x127   :  { %v425_v38 = vpop.f32.mrb[32].mxu1 }
 0x128   :  { %v446_v39 = vadd.f32 %v425_v38, %v218_v48  ;;  %v11273_v41 = vpop.f32.mrb[33].mxu1 }
 0x129   :  { %v428_v43 = vpop.f32.mrb[34].mxu1 }
 0x12a   :  { %v447_v44 = vadd.f32 %v428_v43, %v221_v50  ;;  %v11274_v40 = vpop.f32.mrb[35].mxu1  ;;  %v13099_v45 = vadd.f32 %v612_v60, %v446_v39  ;;  %v13109_v50 = vpop.f32.mrb[32].mxu0  ;;  %v12006_v43 = vld [vmem:[%s16023_s28 + $0x148] ss:$16 sps:$4 sm:$0xff]  }
 0x12b   :  { %v11351_v60 = vpop.f32.mrb[33].mxu0 }
 0x12c   :  { %v13103_v47 = vadd.f32 %v615_v62, %v447_v44  ;;  %v13111_v61 = vpop.f32.mrb[34].mxu0 }
 0x12d   :  { %v11352_v62 = vpop.f32.mrb[35].mxu0 }
 0x12f   :  { %v433_v52 = vpop.f32.mrb[36].mxu1 }
 0x130   :  { %v448_v53 = vadd.f32 %v433_v52, %v226_v56  ;;  %v11277_v54 = vpop.f32.mrb[37].mxu1  ;;  %v13118_v56 = vld [vmem:[%s16020_s3] ss:$0 sm:$0xff] }
 0x131   :  { %v436_v57 = vpop.f32.mrb[38].mxu1  ;;  %v13120_v10 = vpop.f32.mrb[36].mxu0 }
 0x132   :  { %v449_v48 = vadd.f32 %v436_v57, %v252_v55  ;;  %v11278_v58 = vpop.f32.mrb[39].mxu1  ;;  %v13107_v59 = vadd.f32 %v620_v9, %v448_v53  ;;  %v11355_v14 = vpop.f32.mrb[37].mxu0 }
 0x133   :  { %v13124_v17 = vpop.f32.mrb[38].mxu0 }
 0x134   :  { %459 = vst [vmem:[#allocation5 + $0x48] sm:$0x3f] %v449_v48  ;;  %v11356_v18 = vpop.f32.mrb[39].mxu0 }
 0x137   :  { %v819_v63 = vpop.f32.mrb[40].mxu1 }
 0x138   :  { %v858_v1 = vadd.f32 %v819_v63, %v627_v8  ;;  %v11313_v2 = vpop.f32.mrb[41].mxu1 }
 0x139   :  { %v822_v3 = vpop.f32.mrb[42].mxu1 }
 0x13a   :  { %v859_v6 = vadd.f32 %v822_v3, %v628_v11  ;;  %v11314_v7 = vpop.f32.mrb[43].mxu1  ;;  %v1051_v9 = vadd.f32 %v1012_v21, %v858_v1  ;;  %v13127_v11 = vpop.permute.xlu0 %1115 }
 0x13b   :  { %v469_v13 = vld [vmem:[#allocation5 + $0x48] sm:$0x3f] }
 0x13c   :  { %v636_v15 = vadd.f32 %v13085_v12, %v469_v13  ;;  %v1052_v16 = vadd.f32 %v1015_v24, %v859_v6  ;;  %v1088_v8 = vadd.f32 %v13118_v56, %v1051_v9  ;;  %v13131_v24 = vpop.permute.xlu1 %1120  ;;  %v11806_v7 = vld [vmem:[%s16019_s7 + $0x80] ss:$8 sps:$4 sm:$0xff]  }
 0x13e   :  { %646 = vst [vmem:[#allocation5 + $0x48] sm:$0x3f] %v636_v15  ;;  %v1089_v19 = vadd.f32 %v13118_v56, %v1052_v16  ;;  %v1098_v22 = vmax.f32 %v1088_v8, 0.0 }
 0x13f   :  { %v827_v25 = vpop.f32.mrb[44].mxu1 }
 0x140   :  { %v860_v21 = vadd.f32 %v827_v25, %v13087_v20  ;;  %v11317_v26 = vpop.f32.mrb[45].mxu1  ;;  %v1099_v27 = vmax.f32 %v1089_v19, 0.0  ;;  %v1158_v28 = vmul.f32 %v13113_v5, %v1098_v22  ;;  %v13143_v52 = vpop.permute.xlu1 %1125 }
 0x141   :  { %v830_v12 = vpop.f32.mrb[46].mxu1 }
 0x142   :  { %v1159_v29 = vmul.f32 %v13127_v11, %v1099_v27  ;;  %v10963_v30 = vpack.c.bf16 %v1158_v28, %v1158_v28  ;;  %v861_v31 = vadd.f32 %v830_v12, %v13089_v23  ;;  %v11318_v34 = vpop.f32.mrb[47].mxu1  ;;  %v1053_v37 = vadd.f32 %v13093_v32, %v860_v21 }
 0x143   :  { %v11810_v34 = vld [vmem:[%s16019_s7 + $0x90] ss:$8 sps:$4 sm:$0xff]  }
 0x144   :  { %v10964_v38 = vpack.c.bf16 %v1159_v29, %v1159_v29  ;;  %v1203_v39 = vrot.slane %v10963_v30, 7  ;;  %v1054_v20 = vadd.f32 %v13097_v36, %v861_v31  ;;  %v1090_v41 = vadd.f32 %v13118_v56, %v1053_v37  ;;  %v13169_v26 = vpop.permute.xlu1 %1135 }
 0x146   :  { %v1204_v44 = vrot.slane %v1203_v39, 4  ;;  %v1205_v40 = vrot.slane %v10964_v38, 7  ;;  %1241 = vst [vmem:[#allocation2] sm:$0xe] %v1203_v39  ;;  %v1091_v46 = vadd.f32 %v13118_v56, %v1054_v20  ;;  %v1100_v51 = vmax.f32 %v1090_v41, 0.0 }
 0x147   :  { %v835_v23 = vpop.f32.mrb[48].mxu1 }
 0x148   :  { %v1206_v32 = vsel %vm13138_vm9, %v1204_v44, %v1205_v40  ;;  %v862_v36 = vadd.f32 %v835_v23, %v13091_v33  ;;  %v11321_v53 = vpop.f32.mrb[49].mxu1  ;;  %v1101_v54 = vmax.f32 %v1091_v46, 0.0  ;;  %v1160_v55 = vmul.f32 %v13131_v24, %v1100_v51 }
 0x149   :  { %1242 = vst [vmem:[#allocation2 + $0x4] sm:$0xf] %v1206_v32  ;;  %v838_v57 = vpop.f32.mrb[50].mxu1  ;;  %v1207_v33 = vrot.slane %v1205_v40, 4  ;;  %v11813_v40 = vld [vmem:[%s16019_s7 + $0xa0] ss:$8 sps:$4 sm:$0xff]  }
 0x14a   :  { %v1161_v48 = vmul.f32 %v13143_v52, %v1101_v54  ;;  %v863_v58 = vadd.f32 %v838_v57, %v13095_v35  ;;  %v11322_v60 = vpop.f32.mrb[51].mxu1  ;;  %v1055_v62 = vadd.f32 %v13101_v42, %v862_v36  ;;  %v10965_v63 = vpack.c.bf16 %v1160_v55, %v1160_v55  ;;  %v13158_v35 = vpop.permute.xlu0 %1130  ;;  %v11819_v32 = vld [vmem:[%s16019_s7 + $0xb4] ss:$8 sps:$4 sm:$0xff]   ;;  %v656_v57 = vld [vmem:[#allocation5 + $0x48] sm:$0x3f] }
 0x14c   :  { %v10966_v1 = vpack.c.bf16 %v1161_v48, %v1161_v48  ;;  %v1092_v2 = vadd.f32 %v13118_v56, %v1055_v62  ;;  %v1056_v3 = vadd.f32 %v13105_v49, %v863_v58  ;;  %v1208_v6 = vrot.slane %v10965_v63, 7  ;;  %v11812_v49 = vld [vmem:[%s16019_s7 + $0x94] ss:$8 sps:$4 sm:$0xff]   ;;  %v13196_v48 = vpop.permute.xlu1 %1145 }
 0x14e   :  { %v1211_v9 = vrot.slane %v10966_v1, 7  ;;  %v1102_v13 = vmax.f32 %v1092_v2, 0.0  ;;  %v1093_v14 = vadd.f32 %v13118_v56, %v1056_v3  ;;  %v1209_v42 = vsel %vm13138_vm9, %v1207_v33, %v1208_v6  ;;  %v13189_v51 = vpop.permute.xlu0 %1140 }
 0x14f   :  { %v1210_v15 = vrot.slane %v1208_v6, 4  ;;  %v843_v16 = vpop.f32.mrb[52].mxu1  ;;  %1243 = vst [vmem:[#allocation2 + $0x8] sm:$0xf] %v1209_v42 }
 0x150   :  { %v1162_v8 = vmul.f32 %v13158_v35, %v1102_v13  ;;  %v864_v18 = vadd.f32 %v843_v16, %v13099_v45  ;;  %v11325_v19 = vpop.f32.mrb[53].mxu1  ;;  %v1103_v22 = vmax.f32 %v1093_v14, 0.0  ;;  %v11805_v25 = vld [vmem:[#allocation2] sm:$0xff]   ;;  %v1213_v45 = vrot.slane %v1211_v9, 4 }
 0x151   :  { %v1212_v21 = vsel %vm13138_vm9, %v1210_v15, %v1211_v9  ;;  %v846_v27 = vpop.f32.mrb[54].mxu1  ;;  %1420 = vmatmul.mubr.bf16.vlgmr.msra.gmra.mrb[60].mxu1 %v11805_v25  ;;  %v11817_v9 = vld [vmem:[%s16019_s7 + $0xb0] ss:$8 sps:$4 sm:$0xff]  }
 0x152   :  { %1244 = vst [vmem:[#allocation2 + $0xc] sm:$0xf] %v1212_v21  ;;  %v10967_v28 = vpack.c.bf16 %v1162_v8, %v1162_v8  ;;  %v1163_v12 = vmul.f32 %v13169_v26, %v1103_v22  ;;  %v865_v29 = vadd.f32 %v846_v27, %v13103_v47  ;;  %v11326_v30 = vpop.f32.mrb[55].mxu1  ;;  %v1057_v31 = vadd.f32 %v13109_v50, %v864_v18  ;;  %v11815_v47 = vld [vmem:[%s16019_s7 + $0xa4] ss:$8 sps:$4 sm:$0xff]  }
 0x153   :  { %1687 = vmatpush1.bf16.msra.mxu1 %v11806_v7  ;;  %1429 = vmatprep.mubr.bf16.mxu1 %v12635_v4  ;;  %v11821_v8 = vld [vmem:[%s16019_s7 + $0xc0] ss:$8 sps:$4 sm:$0xff]   ;;  %v11826_v22 = vld [vmem:[%s16019_s7 + $0xd4] ss:$8 sps:$4 sm:$0xff]  }
 0x154   :  { %v1214_v37 = vrot.slane %v10967_v28, 7  ;;  %v10968_v38 = vpack.c.bf16 %v1163_v12, %v1163_v12  ;;  %v1094_v39 = vadd.f32 %v13118_v56, %v1057_v31  ;;  %v1058_v20 = vadd.f32 %v13111_v61, %v865_v29  ;;  %1688 = vmatprep.subr.bf16.mxu1 %v11812_v49  ;;  %v13212_v49 = vpop.permute.xlu0 %1150  ;;  %v11824_v29 = vld [vmem:[%s16019_s7 + $0xd0] ss:$8 sps:$4 sm:$0xff]   ;;  %v11830_v31 = vld [vmem:[%s16019_s7 + $0xe4] ss:$8 sps:$4 sm:$0xff]  }
 0x156   :  { %v1217_v50 = vrot.slane %v10968_v38, 7  ;;  %v1104_v41 = vmax.f32 %v1094_v39, 0.0  ;;  %v1095_v44 = vadd.f32 %v13118_v56, %v1058_v20  ;;  %v1215_v46 = vsel %vm13138_vm9, %v1213_v45, %v1214_v37  ;;  %v11831_v38 = vld [vmem:[%s16019_s7 + $0xf0] ss:$8 sps:$4 sm:$0xff]   ;;  %v11838_v20 = vld [vmem:[%s16019_s7 + $0x104] ss:$8 sps:$4 sm:$0xff]  }
 0x157   :  { %v851_v23 = vpop.f32.mrb[56].mxu1  ;;  %1689 = vmatpush1.bf16.msra.mxu1 %v11810_v34  ;;  %v1216_v61 = vrot.slane %v1214_v37, 4  ;;  %1245 = vst [vmem:[#allocation2 + $0x10] sm:$0xf] %v1215_v46  ;;  %v11833_v37 = vld [vmem:[%s16019_s7 + $0xf4] ss:$8 sps:$4 sm:$0xff]  }
 0x158   :  { %v1164_v36 = vmul.f32 %v13189_v51, %v1104_v41  ;;  %v866_v53 = vadd.f32 %v851_v23, %v13107_v59  ;;  %v11329_v54 = vpop.f32.mrb[57].mxu1  ;;  %v1105_v55 = vmax.f32 %v1095_v44, 0.0  ;;  %1690 = vmatprep.subr.bf16.mxu1 %v11815_v47  ;;  %v1219_v13 = vrot.slane %v1217_v50, 4  ;;  %v13247_v41 = vpop.permute.xlu1 %1155 }
 0x159   :  { %v854_v58 = vpop.f32.mrb[58].mxu1  ;;  %v11809_v60 = vld [vmem:[#allocation2 + $0x8] sm:$0xff]   ;;  %v1218_v62 = vsel %vm13138_vm9, %v1216_v61, %v1217_v50 }
 0x15a   :  { %v10969_v63 = vpack.c.bf16 %v1164_v36, %v1164_v36  ;;  %v1165_v1 = vmul.f32 %v13196_v48, %v1105_v55  ;;  %v867_v2 = vadd.f32 %v854_v58, %v656_v57  ;;  %v11330_v3 = vpop.f32.mrb[59].mxu1  ;;  %v1059_v33 = vadd.f32 %v13120_v10, %v866_v53  ;;  %1246 = vst [vmem:[#allocation2 + $0x14] sm:$0xf] %v1218_v62  ;;  %v11823_v10 = vld [vmem:[%s16019_s7 + $0xc4] ss:$8 sps:$4 sm:$0xff]  }
 0x15b   :  { %1430 = vmatmul.mubr.bf16.gmra.mrb[64].mxu1 %v11809_v60  ;;  %v11835_v36 = vld [vmem:[#allocation2 + $0x8] sm:$0xff]  }
 0x15c   :  { %v1220_v59 = vrot.slane %v10969_v63, 7  ;;  %v10970_v6 = vpack.c.bf16 %v1165_v1, %v1165_v1  ;;  %877 = vst [vmem:[#allocation5 + $0x48] sm:$0x3f] %v867_v2  ;;  %v1096_v7 = vadd.f32 %v13118_v56, %v1059_v33  ;;  %1439 = vmatprep.mubr.bf16.mxu1 %v12635_v4  ;;  %1691 = vmatpush1.bf16.msra.mxu1 %v11813_v40  ;;  %v1570_v55 = vshll.u32 %v11835_v36, 16  ;;  %v11836_v63 = vld [vmem:[%s16019_s7 + $0x100] ss:$8 sps:$4 sm:$0xff]  }
 0x15d   :  { %1692 = vmatprep.subr.bf16.mxu1 %v11819_v32  ;;  %v11834_v32 = vld [vmem:[#allocation2] sm:$0xff]   ;;  %v11842_v1 = vld [vmem:[%s16019_s7 + $0x114] ss:$8 sps:$4 sm:$0xff]   ;;  %v11840_v33 = vld [vmem:[%s16019_s7 + $0x110] ss:$8 sps:$4 sm:$0xff]  }
 0x15e   :  { %v1223_v14 = vrot.slane %v10970_v6, 7  ;;  %v1106_v42 = vmax.f32 %v1096_v7, 0.0  ;;  %v1221_v15 = vsel %vm13138_vm9, %v1219_v13, %v1220_v59  ;;  %v1222_v16 = vrot.slane %v1220_v59, 4  ;;  %v11845_v59 = vld [vmem:[%s16019_s7 + $0x124] ss:$8 sps:$4 sm:$0xff]  }
 0x15f   :  { %1247 = vst [vmem:[#allocation2 + $0x18] sm:$0xf] %v1221_v15  ;;  %v1565_v53 = vshll.u32 %v11834_v32, 16  ;;  %v1563_v57 = vshrl.u32 %v11834_v32, 16  ;;  %v1572_v58 = vrot.slane %v1570_v55, 1  ;;  %v1574_v6 = vshrl.u32 %v11835_v36, 16 }
 0x160   :  { %v1166_v18 = vmul.f32 %v13212_v49, %v1106_v42  ;;  %1693 = vmatpush1.bf16.msra.mxu1 %v11817_v9  ;;  %v1224_v19 = vsel %vm13138_vm9, %v1222_v16, %v1223_v14  ;;  %v1225_v30 = vrot.slane %v1223_v14, 4  ;;  %v11849_v14 = vld [vmem:[%s16019_s7 + $0x134] ss:$8 sps:$4 sm:$0xff]   ;;  %v11847_v16 = vld [vmem:[%s16019_s7 + $0x130] ss:$8 sps:$4 sm:$0xff]  }
 0x161   :  { %v11816_v25 = vld [vmem:[#allocation2 + $0x10] sm:$0xff]   ;;  %1248 = vst [vmem:[#allocation2 + $0x1c] sm:$0xf] %v1224_v19  ;;  %1694 = vmatprep.subr.bf16.mxu1 %v11823_v10  ;;  %v1576_v13 = vor.u32 %v1574_v6, %v1572_v58  ;;  %v11843_v10 = vld [vmem:[%s16019_s7 + $0x120] ss:$8 sps:$4 sm:$0xff]  }
 0x162   :  { %v10971_v21 = vpack.c.bf16 %v1166_v18, %v1166_v18  ;;  %v11839_v60 = vld [vmem:[#allocation2 + $0x10] sm:$0xff]   ;;  %v11874_v55 = vld [vmem:[%s16019_s7 + $0x1a4] ss:$8 sps:$4 sm:$0xff]  }
 0x163   :  { %v887_v27 = vld [vmem:[#allocation5 + $0x48] sm:$0x3f]  ;;  %1440 = vmatmul.mubr.bf16.gmra.mrb[68].mxu1 %v11816_v25  ;;  %v1578_v3 = vshll.u32 %v11839_v60, 16  ;;  %v1582_v18 = vshrl.u32 %v11839_v60, 16  ;;  %v11871_v32 = vld [vmem:[%s16019_s7 + $0x194] ss:$8 sps:$4 sm:$0xff]  }
 0x164   :  { %v1226_v28 = vrot.slane %v10971_v21, 7  ;;  %v1060_v12 = vadd.f32 %v13124_v17, %v887_v27  ;;  %1449 = vmatprep.mubr.bf16.mxu1 %v12635_v4  ;;  %1695 = vmatpush1.bf16.msra.mxu1 %v11821_v8  ;;  %v11828_v17 = vld [vmem:[%s16019_s7 + $0xe0] ss:$8 sps:$4 sm:$0xff]   ;;  %v11853_v8 = vld [vmem:[%s16019_s7 + $0x144] ss:$8 sps:$4 sm:$0xff]  }
 0x165   :  { %1696 = vmatprep.subr.bf16.mxu1 %v11826_v22  ;;  %v1580_v7 = vrot.slane %v1578_v3, 1  ;;  %v11851_v21 = vld [vmem:[%s16019_s7 + $0x140] ss:$8 sps:$4 sm:$0xff]   ;;  %v11856_v27 = vld [vmem:[%s16019_s7 + $0x154] ss:$8 sps:$4 sm:$0xff]  }
 0x166   :  { %1070 = vst [vmem:[#allocation5 + $0x48] sm:$0x3f] %v1060_v12  ;;  %v1227_v45 = vsel %vm13138_vm9, %v1225_v30, %v1226_v28  ;;  %v1228_v46 = vrot.slane %v1226_v28, 4  ;;  %v11859_v30 = vld [vmem:[%s16019_s7 + $0x164] ss:$8 sps:$4 sm:$0xff]  }
 0x167   :  { %1249 = vst [vmem:[#allocation2 + $0x20] sm:$0xf] %v1227_v45  ;;  %v1581_v42 = vsel %vm294_vm4, %v1576_v13, %v1580_v7  ;;  %v1584_v25 = vor.u32 %v1582_v18, %v1580_v7  ;;  %v11880_v3 = vld [vmem:[%s16019_s7 + $0x1c0] ss:$8 sps:$4 sm:$0xff]   ;;  %v11883_v7 = vld [vmem:[%s16019_s7 + $0x1d0] ss:$8 sps:$4 sm:$0xff]  }
 0x168   :  { %v11820_v34 = vld [vmem:[#allocation2 + $0x18] sm:$0xff]   ;;  %1697 = vmatpush1.bf16.msra.mxu1 %v11824_v29  ;;  %v11896_v18 = vld [vmem:[%s16019_s7 + $0x204] ss:$8 sps:$4 sm:$0xff]  }
 0x169   :  { %1698 = vmatprep.subr.bf16.mxu1 %v11830_v31  ;;  %v11846_v9 = vld [vmem:[#allocation2 + $0x18] sm:$0xff]  }
 0x16a   :  { %v1586_v15 = vshll.u32 %v11846_v9, 16  ;;  %v11854_v29 = vld [vmem:[%s16019_s7 + $0x150] ss:$8 sps:$4 sm:$0xff]   ;;  %v1590_v31 = vshrl.u32 %v11846_v9, 16  ;;  %v11888_v9 = vld [vmem:[%s16019_s7 + $0x1e4] ss:$8 sps:$4 sm:$0xff]  }
 0x16b   :  { %1450 = vmatmul.mubr.bf16.gmra.mrb[72].mxu1 %v11820_v34  ;;  %v11857_v34 = vld [vmem:[%s16019_s7 + $0x160] ss:$8 sps:$4 sm:$0xff]  }
 0x16c   :  { %1459 = vmatprep.mubr.bf16.mxu1 %v12635_v4  ;;  %1699 = vmatpush1.bf16.msra.mxu1 %v11828_v17  ;;  %v1588_v19 = vrot.slane %v1586_v15, 1  ;;  %v11893_v15 = vld [vmem:[#allocation2 + $0x8] sm:$0xff]  }
 0x16d   :  { %v1080_v39 = vld [vmem:[#allocation5 + $0x48] sm:$0x3f]  ;;  %1700 = vmatprep.subr.bf16.mxu1 %v11833_v37  ;;  %v11862_v37 = vld [vmem:[%s16019_s7 + $0x174] ss:$8 sps:$4 sm:$0xff]  }
 0x16e   :  { %v1097_v47 = vadd.f32 %v13118_v56, %v1080_v39  ;;  %v1567_v56 = vrot.slane %v1565_v53, 1  ;;  %v1589_v28 = vsel %vm294_vm4, %v1584_v25, %v1588_v19  ;;  %v1592_v17 = vor.u32 %v1590_v31, %v1588_v19  ;;  %v11860_v39 = vld [vmem:[%s16019_s7 + $0x170] ss:$8 sps:$4 sm:$0xff]  }
 0x16f   :  { %v11868_v53 = vld [vmem:[#allocation2 + $0x10] sm:$0xff]   ;;  %v2183_v19 = vshrl.u32 %v11893_v15, 16 }
 0x170   :  { %v1107_v50 = vmax.f32 %v1097_v47, 0.0  ;;  %1701 = vmatpush1.bf16.msra.mxu1 %v11831_v38  ;;  %v1568_v62 = vor.u32 %v1567_v56, %v1563_v57  ;;  %v1884_v56 = vrot.slane %v11868_v53, 1  ;;  %v11872_v57 = vld [vmem:[%s16019_s7 + $0x1a0] ss:$8 sps:$4 sm:$0xff]  }
 0x171   :  { %1975 = vmatprep.subr.bf16.mxu1 %v11838_v20  ;;  %v11867_v20 = vld [vmem:[%s16019_s7 + $0x184] ss:$8 sps:$4 sm:$0xff]  }
 0x172   :  { %v1167_v44 = vmul.f32 %v13247_v41, %v1107_v50  ;;  %v1573_v2 = vsel %vm294_vm4, %v1568_v62, %v1572_v58  ;;  %v11878_v58 = vld [vmem:[%s16019_s7 + $0x1b4] ss:$8 sps:$4 sm:$0xff]  }
 0x173   :  { %v11875_v62 = vld [vmem:[#allocation2 + $0x18] sm:$0xff]  }
 0x174   :  { %v10972_v40 = vpack.c.bf16 %v1167_v44, %v1167_v44  ;;  %v11864_v44 = vld [vmem:[#allocation2 + $0x8] sm:$0xff]  }
 0x176   :  { %v1229_v23 = vrot.slane %v10972_v40, 7  ;;  %v11863_v40 = vld [vmem:[#allocation2] sm:$0xfe]  }
 0x178   :  { %v1230_v61 = vsel %vm13138_vm9, %v1228_v46, %v1229_v23  ;;  %v1882_v46 = vrot.slane %v11864_v44, 1  ;;  %v1881_v23 = vrot.slane %v11863_v40, 1  ;;  %v11898_v44 = vld [vmem:[%s16019_s7 + $0x210] ss:$8 sps:$4 sm:$0xff]   ;;  %v11903_v40 = vld [vmem:[%s16019_s7 + $0x224] ss:$8 sps:$4 sm:$0xff]  }
 0x179   :  { %1250 = vst [vmem:[#allocation2 + $0x24] sm:$0xf] %v1230_v61  ;;  %v11865_v61 = vld [vmem:[%s16019_s7 + $0x180] ss:$8 sps:$4 sm:$0xff]  }
 0x17a   :  { %v1883_v36 = vsel %vm511_vm3, %v1881_v23, %v1882_v46  ;;  %v1885_v60 = vsel %vm511_vm3, %v1882_v46, %v1884_v56 }
 0x180   :  { %v11827_v54 = vld [vmem:[#allocation2 + $0x20] sm:$0x7f]  }
 0x181   :  { %1460 = vmatmul.mubr.bf16.gmra.mrb[76].mxu1 %v11827_v54  ;;  %v11850_v22 = vld [vmem:[#allocation2 + $0x20] sm:$0xff]   ;;  %v11869_v54 = vld [vmem:[%s16019_s7 + $0x190] ss:$8 sps:$4 sm:$0xff]  }
 0x182   :  { %1718 = vmatprep.mubr.bf16.mxu1 %v12635_v4  ;;  %v1594_v12 = vshll.u32 %v11850_v22, 16  ;;  %v1598_v47 = vshrl.u32 %v11850_v22, 16  ;;  %v11879_v6 = vld [vmem:[#allocation2 + $0x20] sm:$0xff]   ;;  %v2186_v22 = vshll.u32 %v11893_v15, 16 }
 0x183   :  { %v1888_v13 = vrot.slane %v11879_v6, 1  ;;  %v11912_v6 = vld [vmem:[%s16019_s7 + $0x250] ss:$8 sps:$4 sm:$0xff]  }
 0x184   :  { %v1596_v45 = vrot.slane %v1594_v12, 1  ;;  %v11897_v12 = vld [vmem:[#allocation2 + $0x10] sm:$0xff]  }
 0x186   :  { %v1597_v38 = vsel %vm294_vm4, %v1592_v17, %v1596_v45  ;;  %v1600_v50 = vor.u32 %v1598_v47, %v1596_v45  ;;  %v2192_v45 = vshrl.u32 %v11897_v12, 16  ;;  %v2195_v17 = vshll.u32 %v11897_v12, 16 }
 0x188   :  { %v2197_v47 = vrot.slane %v2195_v17, 2  ;;  %v11926_v17 = vld [vmem:[#allocation2 + $0x20] sm:$0xff]  }
 0x189   :  { %1719 = vmatmul.mubr.bf16.vlgmr.msra.gmra.mrb[60].mxu1 %v1573_v2  ;;  %v1886_v2 = vrot.slane %v11875_v62, 1 }
 0x18a   :  { %1976 = vmatpush1.bf16.msra.mxu1 %v11836_v63  ;;  %1728 = vmatprep.mubr.bf16.mxu1 %v12635_v4  ;;  %v11876_v63 = vld [vmem:[%s16019_s7 + $0x1b0] ss:$8 sps:$4 sm:$0xff]  }
 0x18b   :  { %1977 = vmatprep.subr.bf16.mxu1 %v11842_v1  ;;  %v11882_v1 = vld [vmem:[%s16019_s7 + $0x1c4] ss:$8 sps:$4 sm:$0xff]  }
 0x18e   :  { %1978 = vmatpush1.bf16.msra.mxu1 %v11840_v33  ;;  %v11885_v33 = vld [vmem:[%s16019_s7 + $0x1d4] ss:$8 sps:$4 sm:$0xff]  }
 0x18f   :  { %1979 = vmatprep.subr.bf16.mxu1 %v11845_v59  ;;  %v1887_v59 = vsel %vm511_vm3, %v1884_v56, %v1886_v2  ;;  %v11908_v56 = vld [vmem:[#allocation2 + $0x20] sm:$0xff]  }
 0x190   :  { %v2210_v62 = vshrl.u32 %v11908_v56, 16 }
 0x191   :  { %1729 = vmatmul.mubr.bf16.gmra.mrb[64].mxu1 %v1581_v42  ;;  %v1889_v42 = vsel %vm511_vm3, %v1886_v2, %v1888_v13  ;;  %v11914_v2 = vld [vmem:[%s16019_s7 + $0x254] ss:$8 sps:$4 sm:$0xff]  }
 0x192   :  { %1738 = vmatprep.mubr.bf16.mxu1 %v12635_v4  ;;  %1980 = vmatpush1.bf16.msra.mxu1 %v11843_v10  ;;  %v11886_v10 = vld [vmem:[%s16019_s7 + $0x1e0] ss:$8 sps:$4 sm:$0xff]  }
 0x193   :  { %1981 = vmatprep.subr.bf16.mxu1 %v11849_v14  ;;  %v11891_v14 = vld [vmem:[%s16019_s7 + $0x1f4] ss:$8 sps:$4 sm:$0xff]  }
 0x196   :  { %1982 = vmatpush1.bf16.msra.mxu1 %v11847_v16  ;;  %v11889_v16 = vld [vmem:[%s16019_s7 + $0x1f0] ss:$8 sps:$4 sm:$0xff]  }
 0x197   :  { %1983 = vmatprep.subr.bf16.mxu1 %v11853_v8  ;;  %v11892_v8 = vld [vmem:[#allocation2] sm:$0xfe]  }
 0x198   :  { %v2175_v25 = vshrl.u32 %v11892_v8, 16 }
 0x199   :  { %1739 = vmatmul.mubr.bf16.gmra.mrb[68].mxu1 %v1589_v28  ;;  %v2188_v28 = vrot.slane %v2186_v22, 2  ;;  %v11922_v22 = vld [vmem:[#allocation2] sm:$0xfc]  }
 0x19a   :  { %1748 = vmatprep.mubr.bf16.mxu1 %v12635_v4  ;;  %1984 = vmatpush1.bf16.msra.mxu1 %v11851_v21  ;;  %v2178_v21 = vshll.u32 %v11892_v8, 16 }
 0x19b   :  { %1985 = vmatprep.subr.bf16.mxu1 %v11856_v27  ;;  %v2185_v27 = vrot.slane %v2183_v19, 1  ;;  %v11923_v19 = vld [vmem:[#allocation2 + $0x8] sm:$0xff]  }
 0x19d   :  { %v2189_v31 = vor.u32 %v2188_v28, %v2185_v27  ;;  %v11924_v28 = vld [vmem:[#allocation2 + $0x10] sm:$0xff]  }
 0x19e   :  { %1986 = vmatpush1.bf16.msra.mxu1 %v11854_v29  ;;  %v2177_v29 = vrot.slane %v2175_v25, 1  ;;  %v2508_v25 = vrot.slane %v11923_v19, 2  ;;  %v2510_v12 = vrot.slane %v11924_v28, 2  ;;  %v11975_v19 = vld [vmem:[%s16023_s28 + $0x1e4] ss:$16 sps:$4 sm:$0xff]  }
 0x19f   :  { %1987 = vmatprep.subr.bf16.mxu1 %v11859_v30  ;;  %v2180_v30 = vrot.slane %v2178_v21, 2  ;;  %v2507_v21 = vrot.slane %v11922_v22, 2  ;;  %v11973_v22 = vld [vmem:[%s16023_s28 + $0x1e0] ss:$16 sps:$4 sm:$0xff]  }
 0x1a1   :  { %1749 = vmatmul.mubr.bf16.gmra.mrb[72].mxu1 %v1597_v38  ;;  %v11900_v38 = vld [vmem:[%s16019_s7 + $0x214] ss:$8 sps:$4 sm:$0xff]   ;;  %v2509_v27 = vsel %vm933_vm5, %v2507_v21, %v2508_v25 }
 0x1a2   :  { %1758 = vmatprep.mubr.bf16.mxu1 %v12635_v4  ;;  %1988 = vmatpush1.bf16.msra.mxu1 %v11857_v34  ;;  %v2181_v34 = vor.u32 %v2180_v30, %v2177_v29  ;;  %v2511_v29 = vsel %vm933_vm5, %v2508_v25, %v2510_v12  ;;  %v11925_v30 = vld [vmem:[#allocation2 + $0x18] sm:$0xff]  }
 0x1a3   :  { %1989 = vmatprep.subr.bf16.mxu1 %v11862_v37  ;;  %v11894_v37 = vld [vmem:[%s16019_s7 + $0x200] ss:$8 sps:$4 sm:$0xff]  }
 0x1a6   :  { %1990 = vmatpush1.bf16.msra.mxu1 %v11860_v39  ;;  %v2190_v39 = vsel %vm702_vm6, %v2181_v34, %v2189_v31  ;;  %v2514_v34 = vrot.slane %v11926_v17, 2 }
 0x1a7   :  { %2308 = vmatprep.subr.bf16.mxu1 %v11867_v20  ;;  %v2194_v20 = vrot.slane %v2192_v45, 1 }
 0x1a9   :  { %1759 = vmatmul.mubr.bf16.gmra.mrb[80].mxu1 %v1600_v50  ;;  %v11904_v50 = vld [vmem:[#allocation2 + $0x18] sm:$0xff]   ;;  %v2198_v46 = vor.u32 %v2197_v47, %v2194_v20  ;;  %v11928_v47 = vld [vmem:[%s16023_s28] ss:$16 sps:$4 sm:$0xff]  }
 0x1aa   :  { %2007 = vmatprep.mubr.bf16.mxu1 %v12635_v4  ;;  %v2201_v23 = vshrl.u32 %v11904_v50, 16 }
 0x1ab   :  { %v2199_v53 = vsel %vm702_vm6, %v2189_v31, %v2198_v46  ;;  %v2512_v31 = vrot.slane %v11925_v30, 2 }
 0x1ad   :  { %v2513_v45 = vsel %vm933_vm5, %v2510_v12, %v2512_v31 }
 0x1b1   :  { %2008 = vmatmul.mubr.bf16.vlgmr.msra.gmra.mrb[60].mxu1 %v1883_v36  ;;  %v11907_v36 = vld [vmem:[%s16019_s7 + $0x234] ss:$8 sps:$4 sm:$0xff]  }
 0x1b2   :  { %2309 = vmatpush1.bf16.msra.mxu1 %v11865_v61  ;;  %2017 = vmatprep.mubr.bf16.mxu1 %v12635_v4  ;;  %v2204_v61 = vshll.u32 %v11904_v50, 16  ;;  %v11930_v50 = vld [vmem:[%s16023_s28 + $0x4] ss:$16 sps:$4 sm:$0xff]  }
 0x1b3   :  { %2310 = vmatprep.subr.bf16.mxu1 %v11871_v32  ;;  %v11901_v32 = vld [vmem:[%s16019_s7 + $0x220] ss:$8 sps:$4 sm:$0xff]   ;;  %3426 = vmatprep.subr.bf16.mxu0 %v11930_v50 }
 0x1b4   :  { %3427 = vmatpush1.bf16.msra.mxu0 %v11928_v47 }
 0x1b6   :  { %2311 = vmatpush1.bf16.msra.mxu1 %v11869_v54  ;;  %v2203_v54 = vrot.slane %v2201_v23, 1  ;;  %v11934_v23 = vld [vmem:[%s16023_s28 + $0x40] ss:$16 sps:$4 sm:$0xff]  }
 0x1b7   :  { %2312 = vmatprep.subr.bf16.mxu1 %v11874_v55  ;;  %v2206_v55 = vrot.slane %v2204_v61, 2  ;;  %v11939_v61 = vld [vmem:[%s16023_s28 + $0x64] ss:$16 sps:$4 sm:$0xff]  }
 0x1b9   :  { %2018 = vmatmul.mubr.bf16.gmra.mrb[64].mxu1 %v1885_v60  ;;  %v2207_v60 = vor.u32 %v2206_v55, %v2203_v54  ;;  %v11943_v54 = vld [vmem:[%s16023_s28 + $0xa0] ss:$16 sps:$4 sm:$0xff]   ;;  %v11945_v55 = vld [vmem:[%s16023_s28 + $0xa4] ss:$16 sps:$4 sm:$0xff]  }
 0x1ba   :  { %2027 = vmatprep.mubr.bf16.mxu1 %v12635_v4  ;;  %2313 = vmatpush1.bf16.msra.mxu1 %v11872_v57  ;;  %v11905_v57 = vld [vmem:[%s16019_s7 + $0x230] ss:$8 sps:$4 sm:$0xff]  }
 0x1bb   :  { %2314 = vmatprep.subr.bf16.mxu1 %v11878_v58  ;;  %v11911_v58 = vld [vmem:[%s16019_s7 + $0x244] ss:$8 sps:$4 sm:$0xff]  }
 0x1be   :  { %2315 = vmatpush1.bf16.msra.mxu1 %v11876_v63  ;;  %v2213_v63 = vshll.u32 %v11908_v56, 16  ;;  %v11946_v56 = vld [vmem:[%s16023_s28 + $0xc0] ss:$16 sps:$4 sm:$0xff]  }
 0x1bf   :  { %2316 = vmatprep.subr.bf16.mxu1 %v11882_v1  ;;  %v11909_v1 = vld [vmem:[%s16019_s7 + $0x240] ss:$8 sps:$4 sm:$0xff]  }
 0x1c1   :  { %2028 = vmatmul.mubr.bf16.gmra.mrb[68].mxu1 %v1887_v59  ;;  %v2215_v59 = vrot.slane %v2213_v63, 2 }
 0x1c2   :  { %2037 = vmatprep.mubr.bf16.mxu1 %v12635_v4  ;;  %2317 = vmatpush1.bf16.msra.mxu1 %v11880_v3  ;;  %v2208_v3 = vsel %vm702_vm6, %v2198_v46, %v2207_v60  ;;  %v11936_v46 = vld [vmem:[%s16023_s28 + $0x44] ss:$16 sps:$4 sm:$0xff]  }
 0x1c3   :  { %2318 = vmatprep.subr.bf16.mxu1 %v11885_v33  ;;  %v2212_v33 = vrot.slane %v2210_v62, 1 }
 0x1c6   :  { %2319 = vmatpush1.bf16.msra.mxu1 %v11883_v7  ;;  %v11918_v7 = vld [vmem:[%s16019_s7 + $0x264] ss:$8 sps:$4 sm:$0xff]  }
 0x1c7   :  { %2320 = vmatprep.subr.bf16.mxu1 %v11888_v9  ;;  %v2216_v9 = vor.u32 %v2215_v59, %v2212_v33  ;;  %v11952_v33 = vld [vmem:[%s16023_s28 + $0x100] ss:$16 sps:$4 sm:$0xff]   ;;  %v11957_v59 = vld [vmem:[%s16023_s28 + $0x124] ss:$16 sps:$4 sm:$0xff]  }
 0x1c9   :  { %2038 = vmatmul.mubr.bf16.gmra.mrb[72].mxu1 %v1889_v42  ;;  %v2217_v42 = vsel %vm702_vm6, %v2207_v60, %v2216_v9 }
 0x1ca   :  { %2047 = vmatprep.mubr.bf16.mxu1 %v12635_v4  ;;  %2321 = vmatpush1.bf16.msra.mxu1 %v11886_v10  ;;  %v11916_v10 = vld [vmem:[%s16019_s7 + $0x260] ss:$8 sps:$4 sm:$0xff]  }
 0x1cb   :  { %2322 = vmatprep.subr.bf16.mxu1 %v11891_v14  ;;  %v11921_v14 = vld [vmem:[%s16019_s7 + $0x274] ss:$8 sps:$4 sm:$0xff]  }
 0x1ce   :  { %2323 = vmatpush1.bf16.msra.mxu1 %v11889_v16  ;;  %v11919_v16 = vld [vmem:[%s16019_s7 + $0x270] ss:$8 sps:$4 sm:$0xff]  }
 0x1cf   :  { %2603 = vmatprep.subr.bf16.mxu1 %v11896_v18 }
 0x1d1   :  { %2048 = vmatmul.mubr.bf16.gmra.mrb[84].mxu1 %v1888_v13  ;;  %v11915_v13 = vld [vmem:[#allocation2 + $0x28] ss:$0 sps:$4 sm:$0x11]  }
 0x1d2   :  { %2340 = vmatprep.mubr.bf16.mxu1 %v12635_v4  ;;  %v2219_v15 = vshll.u32 %v11915_v13, 16  ;;  %v11963_v13 = vld [vmem:[%s16023_s28 + $0x164] ss:$16 sps:$4 sm:$0xff]  }
 0x1d4   :  { %v2221_v8 = vrot.slane %v2219_v15, 2  ;;  %v11969_v15 = vld [vmem:[%s16023_s28 + $0x1a4] ss:$16 sps:$4 sm:$0xff]  }
 0x1d6   :  { %v2222_v18 = vsel %vm702_vm6, %v2216_v9, %v2221_v8  ;;  %v11958_v9 = vld [vmem:[%s16023_s28 + $0x140] ss:$16 sps:$4 sm:$0xff]   ;;  %v11972_v8 = vld [vmem:[%s16023_s28 + $0x1c4] ss:$16 sps:$4 sm:$0xff]  }
 0x1d9   :  { %2341 = vmatmul.mubr.bf16.vlgmr.msra.gmra.mrb[60].mxu1 %v2190_v39 }
 0x1da   :  { %2604 = vmatpush1.bf16.msra.mxu1 %v11894_v37  ;;  %2350 = vmatprep.mubr.bf16.mxu1 %v12635_v4  ;;  %v2515_v37 = vsel %vm933_vm5, %v2512_v31, %v2514_v34 }
 0x1db   :  { %2605 = vmatprep.subr.bf16.mxu1 %v11900_v38  ;;  %v11927_v38 = vld [vmem:[#allocation2 + $0x28] ss:$0 sps:$4 sm:$0x11]  }
 0x1dc   :  { %v2516_v39 = vrot.slane %v11927_v38, 2 }
 0x1de   :  { %2606 = vmatpush1.bf16.msra.mxu1 %v11898_v44  ;;  %v2517_v20 = vsel %vm933_vm5, %v2514_v34, %v2516_v39  ;;  %v11933_v44 = vld [vmem:[%s16023_s28 + $0x24] ss:$16 sps:$4 sm:$0xff]  }
 0x1df   :  { %2607 = vmatprep.subr.bf16.mxu1 %v11903_v40  ;;  %v11931_v40 = vld [vmem:[%s16023_s28 + $0x20] ss:$16 sps:$4 sm:$0xff]   ;;  %3428 = vmatprep.subr.bf16.mxu0 %v11933_v44 }
 0x1e0   :  { %3429 = vmatpush1.bf16.msra.mxu0 %v11931_v40 }
 0x1e1   :  { %2351 = vmatmul.mubr.bf16.gmra.mrb[64].mxu1 %v2199_v53  ;;  %3430 = vmatprep.subr.bf16.mxu0 %v11936_v46  ;;  %v11940_v53 = vld [vmem:[%s16023_s28 + $0x80] ss:$16 sps:$4 sm:$0xff]  }
 0x1e2   :  { %2360 = vmatprep.mubr.bf16.mxu1 %v12635_v4  ;;  %2608 = vmatpush1.bf16.msra.mxu1 %v11901_v32  ;;  %v11937_v32 = vld [vmem:[%s16023_s28 + $0x60] ss:$16 sps:$4 sm:$0xff]  }
 0x1e3   :  { %2609 = vmatprep.subr.bf16.mxu1 %v11907_v36  ;;  %v11942_v36 = vld [vmem:[%s16023_s28 + $0x84] ss:$16 sps:$4 sm:$0xff]  }
 0x1e4   :  { %3431 = vmatpush1.bf16.msra.mxu0 %v11934_v23 }
 0x1e5   :  { %3432 = vmatprep.subr.bf16.mxu0 %v11939_v61  ;;  %v2748_v61 = vlaneseq }
 0x1e6   :  { %2610 = vmatpush1.bf16.msra.mxu1 %v11905_v57  ;;  %v11948_v57 = vld [vmem:[%s16023_s28 + $0xc4] ss:$16 sps:$4 sm:$0xff]  }
 0x1e7   :  { %2611 = vmatprep.subr.bf16.mxu1 %v11911_v58 }
 0x1e8   :  { %3433 = vmatpush1.bf16.msra.mxu0 %v11937_v32  ;;  %v13530_v32 = vshrl.u32 %v2748_v61, 7 }
 0x1e9   :  { %2361 = vmatmul.mubr.bf16.gmra.mrb[68].mxu1 %v2208_v3  ;;  %3434 = vmatprep.subr.bf16.mxu0 %v11942_v36  ;;  %v11954_v3 = vld [vmem:[%s16023_s28 + $0x104] ss:$16 sps:$4 sm:$0xff]  }
 0x1ea   :  { %2370 = vmatprep.mubr.bf16.mxu1 %v12635_v4  ;;  %2612 = vmatpush1.bf16.msra.mxu1 %v11909_v1  ;;  %v11951_v1 = vld [vmem:[%s16023_s28 + $0xe4] ss:$16 sps:$4 sm:$0xff]  }
 0x1eb   :  { %2613 = vmatprep.subr.bf16.mxu1 %v11914_v2  ;;  %v11949_v2 = vld [vmem:[%s16023_s28 + $0xe0] ss:$16 sps:$4 sm:$0xff]  }
 0x1ec   :  { %3435 = vmatpush1.bf16.msra.mxu0 %v11940_v53 }
 0x1ed   :  { %3436 = vmatprep.subr.bf16.mxu0 %v11945_v55  ;;  %v13535_v55 = vsub.s32 0, %v13530_v32 }
 0x1ee   :  { %2614 = vmatpush1.bf16.msra.mxu1 %v11912_v6  ;;  %v11955_v6 = vld [vmem:[%s16023_s28 + $0x120] ss:$16 sps:$4 sm:$0xff]  }
 0x1ef   :  { %2615 = vmatprep.subr.bf16.mxu1 %v11918_v7  ;;  %v11960_v7 = vld [vmem:[%s16023_s28 + $0x144] ss:$16 sps:$4 sm:$0xff]  }
 0x1f0   :  { %3437 = vmatpush1.bf16.msra.mxu0 %v11943_v54 }
 0x1f1   :  { %2371 = vmatmul.mubr.bf16.gmra.mrb[72].mxu1 %v2217_v42  ;;  %3438 = vmatprep.subr.bf16.mxu0 %v11948_v57  ;;  %v11964_v42 = vld [vmem:[%s16023_s28 + $0x180] ss:$16 sps:$4 sm:$0xff]  }
 0x1f2   :  { %2380 = vmatprep.mubr.bf16.mxu1 %v12635_v4  ;;  %2616 = vmatpush1.bf16.msra.mxu1 %v11916_v10  ;;  %v11961_v10 = vld [vmem:[%s16023_s28 + $0x160] ss:$16 sps:$4 sm:$0xff]  }
 0x1f3   :  { %2617 = vmatprep.subr.bf16.mxu1 %v11921_v14  ;;  %v11966_v14 = vld [vmem:[%s16023_s28 + $0x184] ss:$16 sps:$4 sm:$0xff]  }
 0x1f4   :  { %3439 = vmatpush1.bf16.msra.mxu0 %v11946_v56 }
 0x1f5   :  { %3440 = vmatprep.subr.bf16.mxu0 %v11951_v1 }
 0x1f6   :  { %2618 = vmatpush1.bf16.msra.mxu1 %v11919_v16  ;;  %v11967_v16 = vld [vmem:[%s16023_s28 + $0x1a0] ss:$16 sps:$4 sm:$0xff]  }
 0x1f8   :  { %3441 = vmatpush1.bf16.msra.mxu0 %v11949_v2 }
 0x1f9   :  { %2381 = vmatmul.mubr.bf16.gmra.mrb[88].mxu1 %v2222_v18  ;;  %3442 = vmatprep.subr.bf16.mxu0 %v11954_v3  ;;  %v11970_v18 = vld [vmem:[%s16023_s28 + $0x1c0] ss:$16 sps:$4 sm:$0xff]  }
 0x1fa   :  { %2635 = vmatprep.mubr.bf16.mxu1 %v12635_v4 }
 0x1fc   :  { %3443 = vmatpush1.bf16.msra.mxu0 %v11952_v33 }
 0x1fd   :  { %3444 = vmatprep.subr.bf16.mxu0 %v11957_v59  ;;  %v2798_v59 = vld [vmem:[%s16025_s5] sm:$0x3] }
 0x200   :  { %3445 = vmatpush1.bf16.msra.mxu0 %v11955_v6 }
 0x201   :  { %2636 = vmatmul.mubr.bf16.vlgmr.msra.gmra.mrb[60].mxu1 %v2509_v27  ;;  %3446 = vmatprep.subr.bf16.mxu0 %v11960_v7  ;;  %v11978_v27 = vld [vmem:[%s16023_s28 + $0xc] ss:$16 sps:$4 sm:$0xff]  }
 0x202   :  { %2645 = vmatprep.mubr.bf16.mxu1 %v12635_v4 }
 0x204   :  { %3447 = vmatpush1.bf16.msra.mxu0 %v11958_v9  ;;  %v2830_v9 = vld [vmem:[%s15987_s6] sm:$0x3] }
 0x205   :  { %3448 = vmatprep.subr.bf16.mxu0 %v11963_v13 }
 0x208   :  { %3449 = vmatpush1.bf16.msra.mxu0 %v11961_v10  ;;  %v13559_v10 = vrot.slane %v2798_v59, %v13535_v55 }
 0x209   :  { %2646 = vmatmul.mubr.bf16.gmra.mrb[64].mxu1 %v2511_v29  ;;  %3450 = vmatprep.subr.bf16.mxu0 %v11966_v14 }
 0x20a   :  { %2655 = vmatprep.mubr.bf16.mxu1 %v12635_v4 }
 0x20c   :  { %3451 = vmatpush1.bf16.msra.mxu0 %v11964_v42 }
 0x20d   :  { %3452 = vmatprep.subr.bf16.mxu0 %v11969_v15 }
 0x210   :  { %3453 = vmatpush1.bf16.msra.mxu0 %v11967_v16 }
 0x211   :  { %2656 = vmatmul.mubr.bf16.gmra.mrb[68].mxu1 %v2513_v45  ;;  %3454 = vmatprep.subr.bf16.mxu0 %v11972_v8 }
 0x212   :  { %2665 = vmatprep.mubr.bf16.mxu1 %v12635_v4 }
 0x214   :  { %3455 = vmatpush1.bf16.msra.mxu0 %v11970_v18  ;;  %v13566_v18 = vrot.slane %v2830_v9, %v13535_v55 }
 0x215   :  { %3456 = vmatprep.subr.bf16.mxu0 %v11975_v19 }
 0x218   :  { %3457 = vmatpush1.bf16.msra.mxu0 %v11973_v22 }
 0x219   :  { %2666 = vmatmul.mubr.bf16.gmra.mrb[72].mxu1 %v2515_v37  ;;  %3509 = vmatprep.subr.bf16.mxu0 %v11978_v27 }
 0x21a   :  { %2675 = vmatprep.mubr.bf16.mxu1 %v12635_v4 }
 0x221   :  { %2676 = vmatmul.mubr.bf16.gmra.mrb[92].mxu1 %v2517_v20 }
 0x254   :  { %v1461_v58 = vpop.f32.mrb[76].mxu1 }
 0x255   :  { %v1463_v60 = vpop.f32.mrb[77].mxu1 }
 0x256   :  { %v1465_v62 = vpop.f32.mrb[78].mxu1 }
 0x257   :  { %1488 = vst [vmem:[#allocation6 + $0x90] sm:$0x3f] %v1465_v62  ;;  %v1467_v63 = vpop.f32.mrb[79].mxu1  ;;  %v13543_v62 = vsub.s32 1, %v13530_v32 }
 0x258   :  { %1489 = vst [vmem:[#allocation6 + $0x98] sm:$0x3f] %v1467_v63 }
 0x259   :  { %v13563_v15 = vrot.slane %v2798_v59, %v13543_v62 }
 0x25e   :  { %v1508_v21 = vld [vmem:[#allocation6 + $0x90] sm:$0x3f] }
 0x25f   :  { %v1509_v29 = vld [vmem:[#allocation6 + $0x98] sm:$0x3f] }
 0x27c   :  { %v1760_v25 = vpop.f32.mrb[80].mxu1 }
 0x27d   :  { %v1785_v28 = vadd.f32 %v1760_v25, %v1461_v58  ;;  %v1762_v12 = vpop.f32.mrb[81].mxu1 }
 0x27e   :  { %v1786_v30 = vadd.f32 %v1762_v12, %v1463_v60  ;;  %v1764_v31 = vpop.f32.mrb[82].mxu1  ;;  %v2746_v60 = vld [vmem:[%s16024_s22] sm:$0x3] }
 0x27f   :  { %v1787_v45 = vadd.f32 %v1764_v31, %v1508_v21  ;;  %v1766_v17 = vpop.f32.mrb[83].mxu1  ;;  %v13546_v33 = vrot.slane %v2746_v60, %v13535_v55  ;;  %v13552_v6 = vrot.slane %v2746_v60, %v13543_v62  ;;  %v13570_v21 = vrot.slane %v2830_v9, %v13543_v62 }
 0x280   :  { %v1788_v34 = vadd.f32 %v1766_v17, %v1509_v29 }
 0x281   :  { %1807 = vst [vmem:[#allocation6 + $0x90] sm:$0x3f] %v1787_v45 }
 0x282   :  { %1808 = vst [vmem:[#allocation6 + $0x98] sm:$0x3f] %v1788_v34 }
 0x288   :  { %v1827_v20 = vld [vmem:[#allocation6 + $0x90] sm:$0x3f] }
 0x289   :  { %v1828_v47 = vld [vmem:[#allocation6 + $0x98] sm:$0x3f] }
 0x2a4   :  { %v2049_v37 = vpop.f32.mrb[84].mxu1 }
 0x2a5   :  { %v2074_v38 = vadd.f32 %v2049_v37, %v1785_v28  ;;  %v2051_v39 = vpop.f32.mrb[85].mxu1 }
 0x2a6   :  { %v2075_v50 = vadd.f32 %v2051_v39, %v1786_v30  ;;  %v2053_v44 = vpop.f32.mrb[86].mxu1 }
 0x2a7   :  { %v2076_v40 = vadd.f32 %v2053_v44, %v1827_v20  ;;  %v2055_v46 = vpop.f32.mrb[87].mxu1 }
 0x2a8   :  { %v2077_v23 = vadd.f32 %v2055_v46, %v1828_v47 }
 0x2a9   :  { %2096 = vst [vmem:[#allocation6 + $0x90] sm:$0x3f] %v2076_v40 }
 0x2aa   :  { %2097 = vst [vmem:[#allocation6 + $0x98] sm:$0x3f] %v2077_v23 }
 0x2b0   :  { %v2116_v57 = vld [vmem:[#allocation6 + $0x90] sm:$0x3f] }
 0x2b1   :  { %v2117_v1 = vld [vmem:[#allocation6 + $0x98] sm:$0x3f] }
 0x2cc   :  { %v2382_v36 = vpop.f32.mrb[88].mxu1 }
 0x2cd   :  { %v13532_v53 = vadd.f32 %v2382_v36, %v2074_v38  ;;  %v2384_v54 = vpop.f32.mrb[89].mxu1 }
 0x2ce   :  { %v13537_v56 = vadd.f32 %v2384_v54, %v2075_v50  ;;  %v2386_v58 = vpop.f32.mrb[90].mxu1 }
 0x2cf   :  { %v2409_v63 = vadd.f32 %v2386_v58, %v2116_v57  ;;  %v2388_v2 = vpop.f32.mrb[91].mxu1 }
 0x2d0   :  { %v2410_v3 = vadd.f32 %v2388_v2, %v2117_v1 }
 0x2d1   :  { %2429 = vst [vmem:[#allocation6 + $0x90] sm:$0x3f] %v2409_v63 }
 0x2d2   :  { %2430 = vst [vmem:[#allocation6 + $0x98] sm:$0x3f] %v2410_v3 }
 0x2d4   :  { %v2637_v7 = vpop.f32.mrb[60].mxu1 }
 0x2d5   :  { %v2758_v13 = vadd.f32 %v13546_v33, %v2637_v7  ;;  %v2639_v14 = vpop.f32.mrb[61].mxu1 }
 0x2d6   :  { %v2759_v42 = vadd.f32 %v13552_v6, %v2639_v14  ;;  %v2641_v16 = vpop.f32.mrb[62].mxu1 }
 0x2d7   :  { %v2778_v8 = vmax.f32 %v2758_v13, 0.0  ;;  %v2760_v19 = vadd.f32 %v13546_v33, %v2641_v16  ;;  %v2643_v22 = vpop.f32.mrb[63].mxu1 }
 0x2d8   :  { %v2779_v25 = vmax.f32 %v2759_v42, 0.0  ;;  %v2761_v27 = vadd.f32 %v13552_v6, %v2643_v22 }
 0x2d9   :  { %v2810_v28 = vmul.f32 %v13559_v10, %v2778_v8  ;;  %v2780_v12 = vmax.f32 %v2760_v19, 0.0 }
 0x2da   :  { %v2811_v29 = vmul.f32 %v13563_v15, %v2779_v25  ;;  %v2781_v30 = vmax.f32 %v2761_v27, 0.0 }
 0x2db   :  { %v2842_v31 = vadd.f32 %v13566_v18, %v2810_v28  ;;  %v2812_v45 = vmul.f32 %v13559_v10, %v2780_v12 }
 0x2dc   :  { %v2843_v17 = vadd.f32 %v13570_v21, %v2811_v29  ;;  %v2813_v34 = vmul.f32 %v13563_v15, %v2781_v30  ;;  %v2647_v37 = vpop.f32.mrb[64].mxu1 }
 0x2dd   :  { %v2862_v38 = vmul.f32 %v2842_v31, %v13113_v5  ;;  %v2844_v39 = vadd.f32 %v13566_v18, %v2812_v45  ;;  %v2762_v20 = vadd.f32 %v13546_v33, %v2647_v37  ;;  %v2649_v47 = vpop.f32.mrb[65].mxu1 }
 0x2de   :  { %v2863_v50 = vmul.f32 %v2843_v17, %v13113_v5  ;;  %v2845_v44 = vadd.f32 %v13570_v21, %v2813_v34  ;;  %v2763_v40 = vadd.f32 %v13552_v6, %v2649_v47  ;;  %v2651_v46 = vpop.f32.mrb[66].mxu1 }
 0x2df   :  { %v2864_v23 = vmul.f32 %v2844_v39, %v13127_v11  ;;  %v2782_v61 = vmax.f32 %v2762_v20, 0.0  ;;  %v2764_v36 = vadd.f32 %v13546_v33, %v2651_v46  ;;  %v2653_v54 = vpop.f32.mrb[67].mxu1 }
 0x2e0   :  { %v2865_v57 = vmul.f32 %v2845_v44, %v13127_v11  ;;  %v2783_v58 = vmax.f32 %v2763_v40, 0.0  ;;  %v2765_v60 = vadd.f32 %v13552_v6, %v2653_v54  ;;  %v10973_v63 = vpack.c.bf16 %v2863_v50, %v2862_v38 }
 0x2e1   :  { %v2814_v1 = vmul.f32 %v13559_v10, %v2782_v61  ;;  %v2784_v5 = vmax.f32 %v2764_v36, 0.0 }
 0x2e2   :  { %v10974_v2 = vpack.c.bf16 %v2865_v57, %v2864_v23  ;;  %v2815_v3 = vmul.f32 %v13563_v15, %v2783_v58  ;;  %v2785_v59 = vmax.f32 %v2765_v60, 0.0  ;;  %v2934_v7 = vrot.slane %v10973_v63, 7 }
 0x2e3   :  { %v2846_v9 = vadd.f32 %v13566_v18, %v2814_v1  ;;  %v2816_v13 = vmul.f32 %v13559_v10, %v2784_v5  ;;  %v11976_v5 = vld [vmem:[%s16023_s28 + $0x8] ss:$16 sps:$4 sm:$0xff]  }
 0x2e4   :  { %v2847_v14 = vadd.f32 %v13570_v21, %v2815_v3  ;;  %v2817_v11 = vmul.f32 %v13563_v15, %v2785_v59  ;;  %v2657_v42 = vpop.f32.mrb[68].mxu1  ;;  %v2935_v16 = vrot.slane %v2934_v7, 4  ;;  %v2936_v8 = vrot.slane %v10974_v2, 7  ;;  %2972 = vst [vmem:[#allocation3] sm:$0xee] %v2934_v7 }
 0x2e5   :  { %v2866_v19 = vmul.f32 %v2846_v9, %v13131_v24  ;;  %v2848_v22 = vadd.f32 %v13566_v18, %v2816_v13  ;;  %v2766_v25 = vadd.f32 %v13546_v33, %v2657_v42  ;;  %v2659_v27 = vpop.f32.mrb[69].mxu1  ;;  %v11981_v9 = vld [vmem:[%s16023_s28 + $0x2c] ss:$16 sps:$4 sm:$0xff]  }
 0x2e6   :  { %v2867_v28 = vmul.f32 %v2847_v14, %v13131_v24  ;;  %v2849_v12 = vadd.f32 %v13570_v21, %v2817_v11  ;;  %v2767_v29 = vadd.f32 %v13552_v6, %v2659_v27  ;;  %v2661_v30 = vpop.f32.mrb[70].mxu1  ;;  %v13603_v31 = vsel %vm13138_vm9, %v2935_v16, %v2936_v8 }
 0x2e7   :  { %v2868_v45 = vmul.f32 %v2848_v22, %v13143_v52  ;;  %v2786_v17 = vmax.f32 %v2766_v25, 0.0  ;;  %v2768_v34 = vadd.f32 %v13546_v33, %v2661_v30  ;;  %v2663_v37 = vpop.f32.mrb[71].mxu1  ;;  %2973 = vst [vmem:[#allocation3 + $0x8] sm:$0xff] %v13603_v31  ;;  %v2938_v57 = vrot.slane %v2936_v8, 4 }
 0x2e8   :  { %v10975_v38 = vpack.c.bf16 %v2867_v28, %v2866_v19  ;;  %v2869_v24 = vmul.f32 %v2849_v12, %v13143_v52  ;;  %v2787_v39 = vmax.f32 %v2767_v29, 0.0  ;;  %v2769_v20 = vadd.f32 %v13552_v6, %v2663_v37 }
 0x2e9   :  { %v2818_v47 = vmul.f32 %v13559_v10, %v2786_v17  ;;  %v2788_v50 = vmax.f32 %v2768_v34, 0.0 }
 0x2ea   :  { %v10976_v44 = vpack.c.bf16 %v2869_v24, %v2868_v45  ;;  %v2819_v40 = vmul.f32 %v13563_v15, %v2787_v39  ;;  %v2789_v46 = vmax.f32 %v2769_v20, 0.0  ;;  %v2939_v23 = vrot.slane %v10975_v38, 7  ;;  %v11979_v45 = vld [vmem:[%s16023_s28 + $0x28] ss:$16 sps:$4 sm:$0xff]   ;;  %v11984_v38 = vld [vmem:[%s16023_s28 + $0x4c] ss:$16 sps:$4 sm:$0xff]  }
 0x2eb   :  { %v2850_v61 = vadd.f32 %v13566_v18, %v2818_v47  ;;  %v2820_v36 = vmul.f32 %v13559_v10, %v2788_v50  ;;  %v2982_v54 = vld [vmem:[#allocation3] sm:$0xff] }
 0x2ec   :  { %v2851_v58 = vadd.f32 %v13570_v21, %v2819_v40  ;;  %v2821_v52 = vmul.f32 %v13563_v15, %v2789_v46  ;;  %v2667_v60 = vpop.f32.mrb[72].mxu1  ;;  %v13617_v63 = vcombine.low %v2982_v54, %v13603_v31  ;;  %v13620_v1 = vcombine.high %v2982_v54, %v13603_v31  ;;  %v11982_v54 = vld [vmem:[%s16023_s28 + $0x48] ss:$16 sps:$4 sm:$0xff]  }
 0x2ed   :  { %v2870_v2 = vmul.f32 %v2850_v61, %v13158_v35  ;;  %v2852_v3 = vadd.f32 %v13566_v18, %v2820_v36  ;;  %v2770_v59 = vadd.f32 %v13546_v33, %v2667_v60  ;;  %v2669_v7 = vpop.f32.mrb[73].mxu1  ;;  %v2940_v13 = vsel %vm13138_vm9, %v2938_v57, %v2939_v23 }
 0x2ee   :  { %v2871_v14 = vmul.f32 %v2851_v58, %v13158_v35  ;;  %v2853_v11 = vadd.f32 %v13570_v21, %v2821_v52  ;;  %v2771_v42 = vadd.f32 %v13552_v6, %v2669_v7  ;;  %v2671_v16 = vpop.f32.mrb[74].mxu1  ;;  %3458 = vmatprep.mubr.bf16.mxu0 %v13620_v1  ;;  %v2941_v8 = vrot.slane %v2939_v23, 4  ;;  %2974 = vst [vmem:[#allocation3 + $0x10] sm:$0xff] %v2940_v13 }
 0x2ef   :  { %v2872_v19 = vmul.f32 %v2852_v3, %v13169_v26  ;;  %v2790_v22 = vmax.f32 %v2770_v59, 0.0  ;;  %v2772_v25 = vadd.f32 %v13546_v33, %v2671_v16  ;;  %v2673_v27 = vpop.f32.mrb[75].mxu1  ;;  %3459 = vmatmul.mubr.bf16.vlgmr.msra.gmra.mrb[40].mxu0 %v13617_v63  ;;  %v2942_v28 = vrot.slane %v10976_v44, 7  ;;  %v11987_v3 = vld [vmem:[%s16023_s28 + $0x6c] ss:$16 sps:$4 sm:$0xff]  }
 0x2f0   :  { %v10977_v12 = vpack.c.bf16 %v2871_v14, %v2870_v2  ;;  %v2873_v35 = vmul.f32 %v2853_v11, %v13169_v26  ;;  %v2791_v29 = vmax.f32 %v2771_v42, 0.0  ;;  %v2773_v30 = vadd.f32 %v13552_v6, %v2673_v27  ;;  %3510 = vmatpush1.bf16.msra.mxu0 %v11976_v5  ;;  %v2449_v14 = vld [vmem:[#allocation6 + $0x90] sm:$0x3f] }
 0x2f1   :  { %v2822_v17 = vmul.f32 %v13559_v10, %v2790_v22  ;;  %v2792_v34 = vmax.f32 %v2772_v25, 0.0  ;;  %3511 = vmatprep.subr.bf16.mxu0 %v11981_v9  ;;  %v2943_v37 = vsel %vm13138_vm9, %v2941_v8, %v2942_v28  ;;  %v2944_v26 = vrot.slane %v2942_v28, 4 }
 0x2f2   :  { %v10978_v24 = vpack.c.bf16 %v2873_v35, %v2872_v19  ;;  %v2823_v39 = vmul.f32 %v13563_v15, %v2791_v29  ;;  %v2793_v20 = vmax.f32 %v2773_v30, 0.0  ;;  %2975 = vst [vmem:[#allocation3 + $0x18] sm:$0xff] %v2943_v37  ;;  %v13652_v47 = vcombine.high %v2940_v13, %v2943_v37  ;;  %v2450_v19 = vld [vmem:[#allocation6 + $0x98] sm:$0x3f]  ;;  %v11990_v30 = vld [vmem:[%s16023_s28 + $0x8c] ss:$16 sps:$4 sm:$0xff]  }
 0x2f3   :  { %v2854_v50 = vadd.f32 %v13566_v18, %v2822_v17  ;;  %v2824_v44 = vmul.f32 %v13559_v10, %v2792_v34  ;;  %v13656_v40 = vcombine.low %v2940_v13, %v2943_v37  ;;  %v2945_v46 = vrot.slane %v10977_v12, 7  ;;  %v11985_v12 = vld [vmem:[%s16023_s28 + $0x68] ss:$16 sps:$4 sm:$0xff]  }
 0x2f4   :  { %v2855_v23 = vadd.f32 %v13570_v21, %v2823_v39  ;;  %v2825_v61 = vmul.f32 %v13563_v15, %v2793_v20  ;;  %v2677_v36 = vpop.f32.mrb[92].mxu1  ;;  %3512 = vmatpush1.bf16.msra.mxu0 %v11979_v45  ;;  %3468 = vmatprep.mubr.bf16.mxu0 %v13652_v47  ;;  %v2948_v57 = vrot.slane %v10978_v24, 7  ;;  %v3800_v58 = vshrl.u32 %v13620_v1, 16 }
 0x2f5   :  { %v2874_v52 = vmul.f32 %v2854_v50, %v13189_v51  ;;  %v2856_v60 = vadd.f32 %v13566_v18, %v2824_v44  ;;  %v2702_v5 = vadd.f32 %v2677_v36, %v13532_v53  ;;  %v2679_v2 = vpop.f32.mrb[93].mxu1  ;;  %3513 = vmatprep.subr.bf16.mxu0 %v11984_v38  ;;  %v2946_v59 = vsel %vm13138_vm9, %v2944_v26, %v2945_v46  ;;  %v11988_v44 = vld [vmem:[%s16023_s28 + $0x88] ss:$16 sps:$4 sm:$0xff]  }
 0x2f6   :  { %v2875_v7 = vmul.f32 %v2855_v23, %v13189_v51  ;;  %v2857_v9 = vadd.f32 %v13570_v21, %v2825_v61  ;;  %v2703_v13 = vadd.f32 %v2679_v2, %v13537_v56  ;;  %v2681_v11 = vpop.f32.mrb[94].mxu1  ;;  %v2947_v42 = vrot.slane %v2945_v46, 4  ;;  %2976 = vst [vmem:[#allocation3 + $0x20] sm:$0xff] %v2946_v59  ;;  %v11993_v61 = vld [vmem:[%s16023_s28 + $0xac] ss:$16 sps:$4 sm:$0xff]  }
 0x2f7   :  { %v2876_v53 = vmul.f32 %v2856_v60, %v13196_v48  ;;  %v2774_v16 = vadd.f32 %v13546_v33, %v2702_v5  ;;  %v2704_v8 = vadd.f32 %v2681_v11, %v2449_v14  ;;  %v2683_v22 = vpop.f32.mrb[95].mxu1  ;;  %3469 = vmatmul.mubr.bf16.gmra.mrb[44].mxu0 %v13656_v40  ;;  %v2950_v25 = vrot.slane %v2948_v57, 4  ;;  %v11996_v11 = vld [vmem:[%s16023_s28 + $0xcc] ss:$16 sps:$4 sm:$0xff]  }
 0x2f8   :  { %v10979_v27 = vpack.c.bf16 %v2875_v7, %v2874_v52  ;;  %v2877_v51 = vmul.f32 %v2857_v9, %v13196_v48  ;;  %v2775_v28 = vadd.f32 %v13552_v6, %v2703_v13  ;;  %v2705_v56 = vadd.f32 %v2683_v22, %v2450_v19  ;;  %3514 = vmatpush1.bf16.msra.mxu0 %v11982_v54 }
 0x2f9   :  { %v2794_v35 = vmax.f32 %v2774_v16, 0.0  ;;  %2724 = vst [vmem:[#allocation6 + $0x90] sm:$0x3f] %v2704_v8  ;;  %3515 = vmatprep.subr.bf16.mxu0 %v11987_v3  ;;  %v2949_v29 = vsel %vm13138_vm9, %v2947_v42, %v2948_v57  ;;  %v3802_v48 = vshll.u32 %v13620_v1, 16  ;;  %v3807_v45 = vshll.u32 %v13652_v47, 16 }
 0x2fa   :  { %v10980_v17 = vpack.c.bf16 %v2877_v51, %v2876_v53  ;;  %v2795_v34 = vmax.f32 %v2775_v28, 0.0  ;;  %2725 = vst [vmem:[#allocation6 + $0x98] sm:$0x3f] %v2705_v56  ;;  %2977 = vst [vmem:[#allocation3 + $0x28] sm:$0xff] %v2949_v29  ;;  %v13691_v37 = vcombine.high %v2946_v59, %v2949_v29  ;;  %v13693_v38 = vcombine.low %v2946_v59, %v2949_v29 }
 0x2fb   :  { %v2826_v26 = vmul.f32 %v13559_v10, %v2794_v35  ;;  %v2951_v24 = vrot.slane %v10979_v27, 7  ;;  %v3804_v39 = vrot.slane %v3802_v48, 1  ;;  %v3809_v20 = vrot.slane %v3807_v45, 1 }
 0x2fc   :  { %v2827_v50 = vmul.f32 %v13563_v15, %v2795_v34  ;;  %3516 = vmatpush1.bf16.msra.mxu0 %v11985_v12  ;;  %3478 = vmatprep.mubr.bf16.mxu0 %v13691_v37  ;;  %v2954_v46 = vrot.slane %v10980_v17, 7  ;;  %v3823_v42 = vshll.u32 %v13691_v37, 16  ;;  %v3835_v12 = vshrl.u32 %v13691_v37, 16  ;;  %v13748_v17 = vld [vmem:[#allocation3] sm:$0xee] }
 0x2fd   :  { %v2858_v23 = vadd.f32 %v13566_v18, %v2826_v26  ;;  %3517 = vmatprep.subr.bf16.mxu0 %v11990_v30  ;;  %v2952_v36 = vsel %vm13138_vm9, %v2950_v25, %v2951_v24  ;;  %v2953_v54 = vrot.slane %v2951_v24, 4  ;;  %v3805_v57 = vor.u32 %v3804_v39, %v3800_v58  ;;  %v11991_v58 = vld [vmem:[%s16023_s28 + $0xa8] ss:$16 sps:$4 sm:$0xff]  }
 0x2fe   :  { %v2859_v52 = vadd.f32 %v13570_v21, %v2827_v50  ;;  %2978 = vst [vmem:[#allocation3 + $0x30] sm:$0xff] %v2952_v36  ;;  %v3825_v22 = vrot.slane %v3823_v42, 1  ;;  %v2956_v27 = vrot.slane %v2954_v46, 4  ;;  %v11997_v34 = vld [vmem:[%s16023_s28 + $0xe8] ss:$16 sps:$4 sm:$0xff]   ;;  %v4600_v50 = vrot.slane %v13652_v47, 1 }
 0x2ff   :  { %v2878_v60 = vmul.f32 %v2858_v23, %v13212_v49  ;;  %3479 = vmatmul.mubr.bf16.gmra.mrb[48].mxu0 %v13693_v38  ;;  %v2955_v5 = vsel %vm13138_vm9, %v2953_v54, %v2954_v46  ;;  %v13713_v2 = vsel %vm294_vm4, %v3805_v57, %v3809_v20  ;;  %v12005_v23 = vld [vmem:[%s16023_s28 + $0x12c] ss:$16 sps:$4 sm:$0xff]   ;;  %v12003_v54 = vld [vmem:[%s16023_s28 + $0x128] ss:$16 sps:$4 sm:$0xff]  }
 0x300   :  { %v2879_v3 = vmul.f32 %v2859_v52, %v13212_v49  ;;  %v2744_v59 = vld [vmem:[#allocation6 + $0x90] sm:$0x3f]  ;;  %3518 = vmatpush1.bf16.msra.mxu0 %v11988_v44  ;;  %2979 = vst [vmem:[#allocation3 + $0x38] sm:$0xff] %v2955_v5  ;;  %v13719_v7 = vcombine.high %v2952_v36, %v2955_v5  ;;  %v13721_v9 = vcombine.low %v2952_v36, %v2955_v5  ;;  %v3819_v49 = vshrl.u32 %v13652_v47, 16 }
 0x301   :  { %v2776_v13 = vadd.f32 %v13546_v33, %v2744_v59  ;;  %v2745_v14 = vld [vmem:[#allocation6 + $0x98] sm:$0x3f]  ;;  %3519 = vmatprep.subr.bf16.mxu0 %v11993_v61  ;;  %v3837_v48 = vor.u32 %v3835_v12, %v3825_v22  ;;  %v12008_v57 = vld [vmem:[%s16023_s28 + $0x14c] ss:$16 sps:$4 sm:$0xff]  }
 0x302   :  { %v2777_v53 = vadd.f32 %v13552_v6, %v2745_v14  ;;  %3488 = vmatprep.mubr.bf16.mxu0 %v13719_v7  ;;  %v10981_v16 = vpack.c.bf16 %v2879_v3, %v2878_v60  ;;  %v3821_v19 = vor.u32 %v3819_v49, %v3809_v20  ;;  %v11994_v33 = vld [vmem:[%s16023_s28 + $0xc8] ss:$16 sps:$4 sm:$0xff]   ;;  %v11999_v6 = vld [vmem:[%s16023_s28 + $0xec] ss:$16 sps:$4 sm:$0xff]   ;;  %v3839_v35 = vshll.u32 %v13719_v7, 16 }
 0x303   :  { %v2796_v8 = vmax.f32 %v2776_v13, 0.0  ;;  %v10275_v20 = vcombine.high %v13748_v17, %v13603_v31  ;;  %v3851_v5 = vshrl.u32 %v13719_v7, 16  ;;  %v12011_v59 = vld [vmem:[%s16023_s28 + $0x16c] ss:$16 sps:$4 sm:$0xff]   ;;  %v13798_v14 = vld [vmem:[#allocation3 + $0x24] ss:$8 sps:$4 sm:$0xff]  }
 0x304   :  { %v2797_v25 = vmax.f32 %v2777_v53, 0.0  ;;  %3520 = vmatpush1.bf16.msra.mxu0 %v11991_v58  ;;  %v2957_v51 = vrot.slane %v10981_v16, 7  ;;  %v13739_v56 = vsel %vm294_vm4, %v3821_v19, %v3825_v22  ;;  %v3841_v45 = vrot.slane %v3839_v35, 1  ;;  %v12009_v22 = vld [vmem:[%s16023_s28 + $0x168] ss:$16 sps:$4 sm:$0xff]  }
 0x305   :  { %v2828_v28 = vmul.f32 %v13559_v10, %v2796_v8  ;;  %3521 = vmatprep.subr.bf16.mxu0 %v11996_v11  ;;  %v4599_v46 = vrot.slane %v10275_v20, 1  ;;  %v13800_v11 = vld [vmem:[#allocation3 + $0x20] ss:$8 sps:$4 sm:$0xff]  }
 0x306   :  { %v2829_v29 = vmul.f32 %v13563_v15, %v2797_v25  ;;  %v2958_v30 = vsel %vm13138_vm9, %v2956_v27, %v2957_v51  ;;  %v12002_v15 = vld [vmem:[%s16023_s28 + $0x10c] ss:$16 sps:$4 sm:$0xff]   ;;  %v2959_v61 = vrot.slane %v2957_v51, 4  ;;  %v3853_v58 = vor.u32 %v3851_v5, %v3841_v45 }
 0x307   :  { %3489 = vmatmul.mubr.bf16.gmra.mrb[52].mxu0 %v13721_v9  ;;  %v2860_v10 = vadd.f32 %v13566_v18, %v2828_v28  ;;  %2980 = vst [vmem:[#allocation3 + $0x40] sm:$0xff] %v2958_v30  ;;  %v13759_v18 = vsel %vm294_vm4, %v3837_v48, %v3841_v45  ;;  %v13806_v42 = vld [vmem:[#allocation3 + $0x34] ss:$8 sps:$4 sm:$0xff]   ;;  %v13808_v16 = vld [vmem:[#allocation3 + $0x30] ss:$8 sps:$4 sm:$0xff]   ;;  %v5395_v25 = vshrl.u32 %v13798_v14, 16 }
 0x308   :  { %3522 = vmatpush1.bf16.msra.mxu0 %v11994_v33  ;;  %v2861_v26 = vadd.f32 %v13570_v21, %v2829_v29  ;;  %v12000_v21 = vld [vmem:[%s16023_s28 + $0x108] ss:$16 sps:$4 sm:$0xff]   ;;  %v5398_v33 = vshll.u32 %v13798_v14, 16  ;;  %v12014_v27 = vld [vmem:[%s16023_s28 + $0x18c] ss:$16 sps:$4 sm:$0xff]   ;;  %v5386_v51 = vshrl.u32 %v13800_v11, 16 }
 0x309   :  { %3523 = vmatprep.subr.bf16.mxu0 %v11999_v6  ;;  %v2880_v24 = vmul.f32 %v2860_v10, %v13247_v41  ;;  %v5389_v28 = vshll.u32 %v13800_v11, 16  ;;  %v5397_v6 = vrot.slane %v5395_v25, 1  ;;  %v5413_v35 = vshrl.u32 %v13806_v42, 16  ;;  %v12012_v48 = vld [vmem:[%s16023_s28 + $0x188] ss:$16 sps:$4 sm:$0xff]  }
 0x30a   :  { %v2881_v39 = vmul.f32 %v2861_v26, %v13247_v41  ;;  %v13774_v41 = vsel %vm511_vm3, %v4599_v46, %v4600_v50  ;;  %v5400_v12 = vrot.slane %v5398_v33, 2  ;;  %v5416_v29 = vshll.u32 %v13806_v42, 16  ;;  %v12017_v45 = vld [vmem:[%s16023_s28 + $0x1ac] ss:$16 sps:$4 sm:$0xff]   ;;  %v12018_v33 = vld [vmem:[%s16023_s28 + $0x1c8] ss:$16 sps:$4 sm:$0xff]  }
 0x30b   :  { %v5404_v10 = vshrl.u32 %v13808_v16, 16  ;;  %v5407_v20 = vshll.u32 %v13808_v16, 16  ;;  %v12020_v5 = vld [vmem:[%s16023_s28 + $0x1cc] ss:$16 sps:$4 sm:$0xff]  }
 0x30c   :  { %3524 = vmatpush1.bf16.msra.mxu0 %v11997_v34  ;;  %v10982_v44 = vpack.c.bf16 %v2881_v39, %v2880_v24  ;;  %v5415_v34 = vrot.slane %v5413_v35, 1  ;;  %v5418_v26 = vrot.slane %v5416_v29, 2  ;;  %v5391_v24 = vrot.slane %v5389_v28, 2  ;;  %v12023_v28 = vld [vmem:[%s16023_s28 + $0x1ec] ss:$16 sps:$4 sm:$0xff]  }
 0x30d   :  { %3525 = vmatprep.subr.bf16.mxu0 %v12002_v15  ;;  %v5388_v15 = vrot.slane %v5386_v51, 1  ;;  %v5406_v39 = vrot.slane %v5404_v10, 1  ;;  %v13843_v46 = vor.u32 %v5400_v12, %v5397_v6  ;;  %v12021_v6 = vld [vmem:[%s16023_s28 + $0x1e8] ss:$16 sps:$4 sm:$0xff]   ;;  %v12026_v12 = vld [vmem:[%s16023_s28 + $0x204] ss:$16 sps:$4 sm:$0xff]  }
 0x30e   :  { %v2960_v36 = vrot.slane %v10982_v44, 7  ;;  %v13839_v44 = vld [vmem:[#allocation3 + $0x10] ss:$8 sps:$4 sm:$0xff]   ;;  %v12024_v35 = vld [vmem:[%s16023_s28 + $0x200] ss:$16 sps:$4 sm:$0xff]  }
 0x30f   :  { %v12029_v29 = vld [vmem:[%s16023_s28 + $0x224] ss:$16 sps:$4 sm:$0xff]   ;;  %v12027_v10 = vld [vmem:[%s16023_s28 + $0x220] ss:$16 sps:$4 sm:$0xff]  }
 0x310   :  { %3526 = vmatpush1.bf16.msra.mxu0 %v12000_v21  ;;  %v2961_v31 = vsel %vm13138_vm9, %v2959_v61, %v2960_v36  ;;  %v6065_v21 = vld [vmem:[#allocation3] sm:$0xcc] }
 0x311   :  { %2981 = vst [vmem:[#allocation3 + $0x48] sm:$0xff] %v2961_v31  ;;  %3527 = vmatprep.subr.bf16.mxu0 %v12005_v23  ;;  %v13784_v52 = vcombine.high %v2958_v30, %v2961_v31  ;;  %v13786_v60 = vcombine.low %v2958_v30, %v2961_v31  ;;  %v13845_v23 = vor.u32 %v5418_v26, %v5415_v34  ;;  %v5409_v31 = vrot.slane %v5407_v20, 2  ;;  %v12035_v34 = vld [vmem:[%s16023_s28 + $0x264] ss:$16 sps:$4 sm:$0xff]   ;;  %v12033_v26 = vld [vmem:[%s16023_s28 + $0x260] ss:$16 sps:$4 sm:$0xff]  }
 0x312   :  { %v12044_v20 = vld [vmem:[%s16023_s28 + $0x2c4] ss:$16 sps:$4 sm:$0xff]  }
 0x313   :  { %v3855_v3 = vshll.u32 %v13784_v52, 16 }
 0x314   :  { %3528 = vmatpush1.bf16.msra.mxu0 %v12003_v54  ;;  %v12015_v54 = vld [vmem:[%s16023_s28 + $0x1a8] ss:$16 sps:$4 sm:$0xff]  }
 0x315   :  { %3529 = vmatprep.subr.bf16.mxu0 %v12008_v57  ;;  %v13796_v13 = vrot.slane %v3855_v3, 1  ;;  %v13855_v57 = vsel %vm702_vm6, %v13843_v46, %v13845_v23  ;;  %v13860_v3 = vor.u32 %v5391_v24, %v5388_v15  ;;  %v12038_v15 = vld [vmem:[%s16023_s28 + $0x284] ss:$16 sps:$4 sm:$0xff]   ;;  %v12036_v24 = vld [vmem:[%s16023_s28 + $0x280] ss:$16 sps:$4 sm:$0xff]  }
 0x317   :  { %v13804_v49 = vsel %vm294_vm4, %v3853_v58, %v13796_v13  ;;  %v6187_v58 = vrot.slane %v13839_v44, 2 }
 0x318   :  { %v2991_v53 = vld [vmem:[#allocation3 + $0x48] sm:$0x77]  ;;  %3530 = vmatpush1.bf16.msra.mxu0 %v12006_v43  ;;  %v13862_v43 = vor.u32 %v5409_v31, %v5406_v39  ;;  %v12039_v39 = vld [vmem:[%s16023_s28 + $0x2a0] ss:$16 sps:$4 sm:$0xff]  }
 0x319   :  { %v13810_v8 = vcombine.high %v2958_v30, %v2991_v53  ;;  %v13812_v19 = vcombine.low %v2958_v30, %v2991_v53  ;;  %3531 = vmatprep.subr.bf16.mxu0 %v12011_v59  ;;  %v13828_v30 = vld [vmem:[#allocation3 + $0x8] sm:$0xff]  ;;  %v12048_v31 = vld [vmem:[%s16023_s28 + $0x300] ss:$16 sps:$4 sm:$0xff]  }
 0x31a   :  { %v10552_v61 = vcombine.low %v6065_v21, %v13828_v30  ;;  %v10553_v36 = vcombine.high %v6065_v21, %v13828_v30  ;;  %v13869_v25 = vsel %vm702_vm6, %v13860_v3, %v13862_v43  ;;  %v12042_v21 = vld [vmem:[%s16023_s28 + $0x2c0] ss:$16 sps:$4 sm:$0xff]  }
 0x31b   :  { %3498 = vmatprep.mubr.bf16.mxu0 %v13810_v8 }
 0x31c   :  { %3499 = vmatmul.mubr.bf16.gmra.mrb[56].mxu0 %v13812_v19  ;;  %v6186_v59 = vrot.slane %v10552_v61, 2  ;;  %v6189_v53 = vrot.slane %v10553_v36, 2  ;;  %v12045_v61 = vld [vmem:[%s16023_s28 + $0x2e0] ss:$16 sps:$4 sm:$0xff]   ;;  %v12050_v36 = vld [vmem:[%s16023_s28 + $0x304] ss:$16 sps:$4 sm:$0xff]  }
 0x31d   :  { %3541 = vmatprep.mubr.bf16.mxu0 %v13620_v1  ;;  %3532 = vmatpush1.bf16.msra.mxu0 %v12009_v22  ;;  %v13841_v1 = vld [vmem:[#allocation3 + $0x14] ss:$8 sps:$4 sm:$0xff]  }
 0x31e   :  { %3533 = vmatprep.subr.bf16.mxu0 %v12014_v27  ;;  %v6190_v22 = vrot.slane %v13841_v1, 2  ;;  %v13882_v51 = vsel %vm933_vm5, %v6186_v59, %v6187_v58  ;;  %v12054_v59 = vld [vmem:[%s16023_s28 + $0x340] ss:$16 sps:$4 sm:$0xff]  }
 0x320   :  { %v13877_v27 = vsel %vm933_vm5, %v6189_v53, %v6190_v22  ;;  %v12057_v53 = vld [vmem:[%s16023_s28 + $0x360] ss:$16 sps:$4 sm:$0xff]  }
 0x321   :  { %3534 = vmatpush1.bf16.msra.mxu0 %v12012_v48  ;;  %v12032_v48 = vld [vmem:[%s16023_s28 + $0x244] ss:$16 sps:$4 sm:$0xff]  }
 0x322   :  { %3535 = vmatprep.subr.bf16.mxu0 %v12017_v45  ;;  %v12030_v45 = vld [vmem:[%s16023_s28 + $0x240] ss:$16 sps:$4 sm:$0xff]  }
 0x325   :  { %3536 = vmatpush1.bf16.msra.mxu0 %v12015_v54  ;;  %v12051_v54 = vld [vmem:[%s16023_s28 + $0x320] ss:$16 sps:$4 sm:$0xff]  }
 0x326   :  { %3537 = vmatprep.subr.bf16.mxu0 %v12020_v5  ;;  %v12056_v5 = vld [vmem:[%s16023_s28 + $0x344] ss:$16 sps:$4 sm:$0xff]  }
 0x329   :  { %3538 = vmatpush1.bf16.msra.mxu0 %v12018_v33  ;;  %v12062_v33 = vld [vmem:[%s16023_s28 + $0x384] ss:$16 sps:$4 sm:$0xff]  }
 0x32a   :  { %3539 = vmatprep.subr.bf16.mxu0 %v12023_v28  ;;  %v12060_v28 = vld [vmem:[%s16023_s28 + $0x380] ss:$16 sps:$4 sm:$0xff]  }
 0x32d   :  { %3540 = vmatpush1.bf16.msra.mxu0 %v12021_v6  ;;  %v12065_v6 = vld [vmem:[%s16023_s28 + $0x3a4] ss:$16 sps:$4 sm:$0xff]  }
 0x32e   :  { %4195 = vmatprep.subr.bf16.mxu0 %v12026_v12  ;;  %v12063_v12 = vld [vmem:[%s16023_s28 + $0x3a0] ss:$16 sps:$4 sm:$0xff]  }
 0x330   :  { %3542 = vmatmul.mubr.bf16.vlgmr.msra.gmra.mrb[60].mxu0 %v13617_v63 }
 0x331   :  { %3551 = vmatprep.mubr.bf16.mxu0 %v13652_v47  ;;  %4196 = vmatpush1.bf16.msra.mxu0 %v12024_v35  ;;  %v12068_v35 = vld [vmem:[%s16023_s28 + $0x3c4] ss:$16 sps:$4 sm:$0xff]   ;;  %v4602_v47 = vrot.slane %v13800_v11, 1  ;;  %v12182_v11 = vld [vmem:[%s16023_s28 + $0x468] ss:$16 sps:$4 sm:$0xff]  }
 0x332   :  { %4197 = vmatprep.subr.bf16.mxu0 %v12029_v29  ;;  %v3790_v29 = vshll.u32 %v13617_v63, 16 }
 0x335   :  { %4198 = vmatpush1.bf16.msra.mxu0 %v12027_v10  ;;  %v12066_v10 = vld [vmem:[%s16023_s28 + $0x3c0] ss:$16 sps:$4 sm:$0xff]  }
 0x336   :  { %4199 = vmatprep.subr.bf16.mxu0 %v12032_v48  ;;  %v12071_v48 = vld [vmem:[%s16023_s28 + $0x3e4] ss:$16 sps:$4 sm:$0xff]  }
 0x338   :  { %3552 = vmatmul.mubr.bf16.gmra.mrb[64].mxu0 %v13656_v40 }
 0x339   :  { %3561 = vmatprep.mubr.bf16.mxu0 %v13691_v37  ;;  %4200 = vmatpush1.bf16.msra.mxu0 %v12030_v45  ;;  %v12041_v37 = vld [vmem:[%s16023_s28 + $0x2a4] ss:$16 sps:$4 sm:$0xff]   ;;  %v3792_v45 = vrot.slane %v3790_v29, 1  ;;  %v12084_v29 = vld [vmem:[%s16023_s28 + $0x288] ss:$16 sps:$4 sm:$0xff]  }
 0x33a   :  { %4201 = vmatprep.subr.bf16.mxu0 %v12035_v34  ;;  %v3795_v34 = vshll.u32 %v13656_v40, 16 }
 0x33d   :  { %4202 = vmatpush1.bf16.msra.mxu0 %v12033_v26  ;;  %v12069_v26 = vld [vmem:[%s16023_s28 + $0x3e0] ss:$16 sps:$4 sm:$0xff]  }
 0x33e   :  { %4203 = vmatprep.subr.bf16.mxu0 %v12038_v15  ;;  %v3788_v15 = vshrl.u32 %v13617_v63, 16  ;;  %v3815_v63 = vshll.u32 %v13693_v38, 16 }
 0x340   :  { %3562 = vmatmul.mubr.bf16.gmra.mrb[68].mxu0 %v13693_v38 }
 0x341   :  { %3571 = vmatprep.mubr.bf16.mxu0 %v13719_v7  ;;  %4204 = vmatpush1.bf16.msra.mxu0 %v12036_v24  ;;  %v12047_v7 = vld [vmem:[%s16023_s28 + $0x2e4] ss:$16 sps:$4 sm:$0xff]   ;;  %v12074_v24 = vld [vmem:[%s16023_s28 + $0x20c] ss:$16 sps:$4 sm:$0xff]  }
 0x342   :  { %4205 = vmatprep.subr.bf16.mxu0 %v12041_v37  ;;  %v3793_v37 = vor.u32 %v3792_v45, %v3788_v15  ;;  %v3847_v45 = vshll.u32 %v13786_v60, 16 }
 0x344   :  { %v3849_v15 = vrot.slane %v3847_v45, 1  ;;  %v12117_v45 = vld [vmem:[%s16023_s28 + $0x3e8] ss:$16 sps:$4 sm:$0xff]  }
 0x345   :  { %4206 = vmatpush1.bf16.msra.mxu0 %v12039_v39  ;;  %v3797_v39 = vrot.slane %v3795_v34, 1  ;;  %v12092_v34 = vld [vmem:[%s16023_s28 + $0x2cc] ss:$16 sps:$4 sm:$0xff]  }
 0x346   :  { %4207 = vmatprep.subr.bf16.mxu0 %v12044_v20  ;;  %v12072_v20 = vld [vmem:[%s16023_s28 + $0x208] ss:$16 sps:$4 sm:$0xff]  }
 0x348   :  { %3572 = vmatmul.mubr.bf16.gmra.mrb[72].mxu0 %v13721_v9 }
 0x349   :  { %3581 = vmatprep.mubr.bf16.mxu0 %v13810_v8  ;;  %4208 = vmatpush1.bf16.msra.mxu0 %v12042_v21  ;;  %v12053_v8 = vld [vmem:[%s16023_s28 + $0x324] ss:$16 sps:$4 sm:$0xff]   ;;  %v12077_v21 = vld [vmem:[%s16023_s28 + $0x22c] ss:$16 sps:$4 sm:$0xff]  }
 0x34a   :  { %4209 = vmatprep.subr.bf16.mxu0 %v12047_v7  ;;  %v14009_v7 = vsel %vm294_vm4, %v3793_v37, %v3797_v39  ;;  %v12090_v37 = vld [vmem:[%s16023_s28 + $0x2c8] ss:$16 sps:$4 sm:$0xff]  }
 0x34d   :  { %4210 = vmatpush1.bf16.msra.mxu0 %v12045_v61  ;;  %v12075_v61 = vld [vmem:[%s16023_s28 + $0x228] ss:$16 sps:$4 sm:$0xff]  }
 0x34e   :  { %4211 = vmatprep.subr.bf16.mxu0 %v12050_v36  ;;  %v12080_v36 = vld [vmem:[%s16023_s28 + $0x24c] ss:$16 sps:$4 sm:$0xff]  }
 0x350   :  { %3582 = vmatmul.mubr.bf16.gmra.mrb[76].mxu0 %v13812_v19  ;;  %v12059_v19 = vld [vmem:[%s16023_s28 + $0x364] ss:$16 sps:$4 sm:$0xff]  }
 0x351   :  { %4212 = vmatpush1.bf16.msra.mxu0 %v12048_v31  ;;  %4227 = vmatprep.mubr.bf16.mxu0 %v13713_v2  ;;  %v3811_v31 = vshrl.u32 %v13656_v40, 16 }
 0x352   :  { %4213 = vmatprep.subr.bf16.mxu0 %v12053_v8  ;;  %v3817_v8 = vrot.slane %v3815_v63, 1 }
 0x355   :  { %4214 = vmatpush1.bf16.msra.mxu0 %v12051_v54  ;;  %v3813_v54 = vor.u32 %v3811_v31, %v3797_v39  ;;  %v3862_v39 = vshrl.u32 %v13784_v52, 16 }
 0x356   :  { %4215 = vmatprep.subr.bf16.mxu0 %v12056_v5  ;;  %v12078_v5 = vld [vmem:[%s16023_s28 + $0x248] ss:$16 sps:$4 sm:$0xff]  }
 0x357   :  { %v14070_v63 = vor.u32 %v3862_v39, %v13796_v13  ;;  %v12096_v13 = vld [vmem:[%s16023_s28 + $0x308] ss:$16 sps:$4 sm:$0xff]   ;;  %v12134_v39 = vld [vmem:[%s16023_s28 + $0x484] ss:$16 sps:$4 sm:$0xff]  }
 0x359   :  { %4216 = vmatpush1.bf16.msra.mxu0 %v12054_v59  ;;  %v12083_v59 = vld [vmem:[%s16023_s28 + $0x26c] ss:$16 sps:$4 sm:$0xff]  }
 0x35a   :  { %4217 = vmatprep.subr.bf16.mxu0 %v12059_v19  ;;  %v14028_v19 = vsel %vm294_vm4, %v3813_v54, %v3817_v8  ;;  %v12099_v54 = vld [vmem:[%s16023_s28 + $0x328] ss:$16 sps:$4 sm:$0xff]  }
 0x35d   :  { %4218 = vmatpush1.bf16.msra.mxu0 %v12057_v53  ;;  %v3831_v53 = vshll.u32 %v13721_v9, 16 }
 0x35e   :  { %4219 = vmatprep.subr.bf16.mxu0 %v12062_v33  ;;  %v12081_v33 = vld [vmem:[%s16023_s28 + $0x268] ss:$16 sps:$4 sm:$0xff]  }
 0x361   :  { %4220 = vmatpush1.bf16.msra.mxu0 %v12060_v28  ;;  %v12086_v28 = vld [vmem:[%s16023_s28 + $0x28c] ss:$16 sps:$4 sm:$0xff]  }
 0x362   :  { %4221 = vmatprep.subr.bf16.mxu0 %v12065_v6  ;;  %v3827_v6 = vshrl.u32 %v13693_v38, 16  ;;  %v12087_v38 = vld [vmem:[%s16023_s28 + $0x2a8] ss:$16 sps:$4 sm:$0xff]  }
 0x365   :  { %4222 = vmatpush1.bf16.msra.mxu0 %v12063_v12  ;;  %v3833_v12 = vrot.slane %v3831_v53, 1  ;;  %v12107_v53 = vld [vmem:[%s16023_s28 + $0x36c] ss:$16 sps:$4 sm:$0xff]  }
 0x366   :  { %4223 = vmatprep.subr.bf16.mxu0 %v12068_v35  ;;  %v3829_v35 = vor.u32 %v3827_v6, %v3817_v8  ;;  %v12101_v8 = vld [vmem:[%s16023_s28 + $0x32c] ss:$16 sps:$4 sm:$0xff]  }
 0x367   :  { %v12113_v6 = vld [vmem:[%s16023_s28 + $0x3ac] ss:$16 sps:$4 sm:$0xff]  }
 0x369   :  { %4224 = vmatpush1.bf16.msra.mxu0 %v12066_v10  ;;  %v12089_v10 = vld [vmem:[%s16023_s28 + $0x2ac] ss:$16 sps:$4 sm:$0xff]  }
 0x36a   :  { %4225 = vmatprep.subr.bf16.mxu0 %v12071_v48  ;;  %v14047_v48 = vsel %vm294_vm4, %v3829_v35, %v3833_v12  ;;  %v12116_v35 = vld [vmem:[%s16023_s28 + $0x3cc] ss:$16 sps:$4 sm:$0xff]  }
 0x36d   :  { %4226 = vmatpush1.bf16.msra.mxu0 %v12069_v26  ;;  %v3843_v26 = vshrl.u32 %v13721_v9, 16  ;;  %v12093_v9 = vld [vmem:[%s16023_s28 + $0x2e8] ss:$16 sps:$4 sm:$0xff]  }
 0x36e   :  { %4278 = vmatprep.subr.bf16.mxu0 %v12074_v24 }
 0x36f   :  { %v3845_v24 = vor.u32 %v3843_v26, %v3833_v12  ;;  %v12111_v12 = vld [vmem:[%s16023_s28 + $0x3a8] ss:$16 sps:$4 sm:$0xff]   ;;  %v12125_v26 = vld [vmem:[%s16023_s28 + $0x424] ss:$16 sps:$4 sm:$0xff]  }
 0x370   :  { %4228 = vmatmul.mubr.bf16.vlgmr.msra.gmra.mrb[40].mxu0 %v14009_v7 }
 0x371   :  { %4237 = vmatprep.mubr.bf16.mxu0 %v13739_v56  ;;  %4279 = vmatpush1.bf16.msra.mxu0 %v12072_v20  ;;  %v12095_v20 = vld [vmem:[%s16023_s28 + $0x2ec] ss:$16 sps:$4 sm:$0xff]  }
 0x372   :  { %4280 = vmatprep.subr.bf16.mxu0 %v12077_v21  ;;  %v14067_v21 = vsel %vm294_vm4, %v3845_v24, %v3849_v15  ;;  %v12128_v24 = vld [vmem:[%s16023_s28 + $0x444] ss:$16 sps:$4 sm:$0xff]  }
 0x375   :  { %4281 = vmatpush1.bf16.msra.mxu0 %v12075_v61  ;;  %v12098_v61 = vld [vmem:[%s16023_s28 + $0x30c] ss:$16 sps:$4 sm:$0xff]  }
 0x376   :  { %4282 = vmatprep.subr.bf16.mxu0 %v12080_v36  ;;  %v3859_v36 = vshrl.u32 %v13786_v60, 16 }
 0x378   :  { %4238 = vmatmul.mubr.bf16.gmra.mrb[44].mxu0 %v14028_v19  ;;  %v14084_v31 = vor.u32 %v3859_v36, %v3849_v15  ;;  %v12123_v15 = vld [vmem:[%s16023_s28 + $0x420] ss:$16 sps:$4 sm:$0xff]   ;;  %v12146_v36 = vld [vmem:[%s16023_s28 + $0x504] ss:$16 sps:$4 sm:$0xff]  }
 0x379   :  { %4247 = vmatprep.mubr.bf16.mxu0 %v13759_v18  ;;  %4283 = vmatpush1.bf16.msra.mxu0 %v12078_v5  ;;  %v12104_v5 = vld [vmem:[%s16023_s28 + $0x34c] ss:$16 sps:$4 sm:$0xff]  }
 0x37a   :  { %4284 = vmatprep.subr.bf16.mxu0 %v12083_v59  ;;  %v12102_v59 = vld [vmem:[%s16023_s28 + $0x348] ss:$16 sps:$4 sm:$0xff]  }
 0x37d   :  { %4285 = vmatpush1.bf16.msra.mxu0 %v12081_v33  ;;  %v12110_v33 = vld [vmem:[%s16023_s28 + $0x38c] ss:$16 sps:$4 sm:$0xff]  }
 0x37e   :  { %4286 = vmatprep.subr.bf16.mxu0 %v12086_v28  ;;  %v12108_v28 = vld [vmem:[%s16023_s28 + $0x388] ss:$16 sps:$4 sm:$0xff]  }
 0x380   :  { %4248 = vmatmul.mubr.bf16.gmra.mrb[48].mxu0 %v14047_v48 }
 0x381   :  { %4257 = vmatprep.mubr.bf16.mxu0 %v13804_v49  ;;  %4287 = vmatpush1.bf16.msra.mxu0 %v12084_v29  ;;  %v12114_v29 = vld [vmem:[%s16023_s28 + $0x3c8] ss:$16 sps:$4 sm:$0xff]  }
 0x382   :  { %4288 = vmatprep.subr.bf16.mxu0 %v12089_v10  ;;  %v12119_v10 = vld [vmem:[%s16023_s28 + $0x3ec] ss:$16 sps:$4 sm:$0xff]  }
 0x385   :  { %4289 = vmatpush1.bf16.msra.mxu0 %v12087_v38  ;;  %v12122_v38 = vld [vmem:[%s16023_s28 + $0x404] ss:$16 sps:$4 sm:$0xff]  }
 0x386   :  { %4290 = vmatprep.subr.bf16.mxu0 %v12092_v34  ;;  %v12120_v34 = vld [vmem:[%s16023_s28 + $0x400] ss:$16 sps:$4 sm:$0xff]  }
 0x388   :  { %4258 = vmatmul.mubr.bf16.gmra.mrb[52].mxu0 %v14067_v21 }
 0x389   :  { %4267 = vmatprep.mubr.bf16.mxu0 %v14070_v63  ;;  %4291 = vmatpush1.bf16.msra.mxu0 %v12090_v37  ;;  %v12126_v37 = vld [vmem:[%s16023_s28 + $0x440] ss:$16 sps:$4 sm:$0xff]  }
 0x38a   :  { %4292 = vmatprep.subr.bf16.mxu0 %v12095_v20  ;;  %v12132_v20 = vld [vmem:[%s16023_s28 + $0x480] ss:$16 sps:$4 sm:$0xff]  }
 0x38d   :  { %4293 = vmatpush1.bf16.msra.mxu0 %v12093_v9  ;;  %v12140_v9 = vld [vmem:[%s16023_s28 + $0x4c4] ss:$16 sps:$4 sm:$0xff]  }
 0x38e   :  { %4294 = vmatprep.subr.bf16.mxu0 %v12098_v61  ;;  %v12138_v61 = vld [vmem:[%s16023_s28 + $0x4c0] ss:$16 sps:$4 sm:$0xff]  }
 0x390   :  { %4268 = vmatmul.mubr.bf16.gmra.mrb[80].mxu0 %v14084_v31 }
 0x391   :  { %4295 = vmatpush1.bf16.msra.mxu0 %v12096_v13  ;;  %4310 = vmatprep.mubr.bf16.mxu0 %v13713_v2  ;;  %v12105_v2 = vld [vmem:[%s16023_s28 + $0x368] ss:$16 sps:$4 sm:$0xff]   ;;  %v12144_v13 = vld [vmem:[%s16023_s28 + $0x500] ss:$16 sps:$4 sm:$0xff]  }
 0x392   :  { %4296 = vmatprep.subr.bf16.mxu0 %v12101_v8  ;;  %v12152_v8 = vld [vmem:[%s16023_s28 + $0x544] ss:$16 sps:$4 sm:$0xff]  }
 0x395   :  { %4297 = vmatpush1.bf16.msra.mxu0 %v12099_v54  ;;  %v12150_v54 = vld [vmem:[%s16023_s28 + $0x540] ss:$16 sps:$4 sm:$0xff]  }
 0x396   :  { %4298 = vmatprep.subr.bf16.mxu0 %v12104_v5  ;;  %v12153_v5 = vld [vmem:[%s16023_s28 + $0x560] ss:$16 sps:$4 sm:$0xff]  }
 0x399   :  { %4299 = vmatpush1.bf16.msra.mxu0 %v12102_v59  ;;  %v12158_v59 = vld [vmem:[%s16023_s28 + $0x584] ss:$16 sps:$4 sm:$0xff]  }
 0x39a   :  { %4300 = vmatprep.subr.bf16.mxu0 %v12107_v53  ;;  %v12156_v53 = vld [vmem:[%s16023_s28 + $0x580] ss:$16 sps:$4 sm:$0xff]  }
 0x39d   :  { %4301 = vmatpush1.bf16.msra.mxu0 %v12105_v2  ;;  %v12161_v2 = vld [vmem:[%s16023_s28 + $0x5a4] ss:$16 sps:$4 sm:$0xff]  }
 0x39e   :  { %4302 = vmatprep.subr.bf16.mxu0 %v12110_v33  ;;  %v12159_v33 = vld [vmem:[%s16023_s28 + $0x5a0] ss:$16 sps:$4 sm:$0xff]  }
 0x3a1   :  { %4303 = vmatpush1.bf16.msra.mxu0 %v12108_v28  ;;  %v12164_v28 = vld [vmem:[%s16023_s28 + $0x5c4] ss:$16 sps:$4 sm:$0xff]  }
 0x3a2   :  { %4304 = vmatprep.subr.bf16.mxu0 %v12113_v6  ;;  %v12162_v6 = vld [vmem:[%s16023_s28 + $0x5c0] ss:$16 sps:$4 sm:$0xff]  }
 0x3a5   :  { %4305 = vmatpush1.bf16.msra.mxu0 %v12111_v12  ;;  %v12167_v12 = vld [vmem:[%s16023_s28 + $0x5e4] ss:$16 sps:$4 sm:$0xff]  }
 0x3a6   :  { %4306 = vmatprep.subr.bf16.mxu0 %v12116_v35  ;;  %v12626_v35 = vld [vmem:[#allocation3 + $0x8] sm:$0xff] }
 0x3a9   :  { %4307 = vmatpush1.bf16.msra.mxu0 %v12114_v29  ;;  %v10274_v29 = vcombine.low %v13748_v17, %v12626_v35  ;;  %v12168_v17 = vld [vmem:[%s16023_s28 + $0x408] ss:$16 sps:$4 sm:$0xff]   ;;  %v12212_v35 = vld [vmem:[%s16023_s28 + $0x58c] ss:$16 sps:$4 sm:$0xff]  }
 0x3aa   :  { %4308 = vmatprep.subr.bf16.mxu0 %v12119_v10  ;;  %v12165_v10 = vld [vmem:[%s16023_s28 + $0x5e0] ss:$16 sps:$4 sm:$0xff]  }
 0x3ad   :  { %4309 = vmatpush1.bf16.msra.mxu0 %v12117_v45  ;;  %v12170_v45 = vld [vmem:[%s16023_s28 + $0x40c] ss:$16 sps:$4 sm:$0xff]  }
 0x3ae   :  { %4944 = vmatprep.subr.bf16.mxu0 %v12122_v38  ;;  %v4597_v38 = vrot.slane %v13656_v40, 1 }
 0x3b0   :  { %4311 = vmatmul.mubr.bf16.vlgmr.msra.gmra.mrb[60].mxu0 %v14009_v7  ;;  %v12129_v7 = vld [vmem:[%s16023_s28 + $0x460] ss:$16 sps:$4 sm:$0xff]  }
 0x3b1   :  { %4320 = vmatprep.mubr.bf16.mxu0 %v13739_v56  ;;  %4945 = vmatpush1.bf16.msra.mxu0 %v12120_v34  ;;  %v12131_v56 = vld [vmem:[%s16023_s28 + $0x464] ss:$16 sps:$4 sm:$0xff]   ;;  %v4604_v34 = vrot.slane %v13798_v14, 1 }
 0x3b2   :  { %4946 = vmatprep.subr.bf16.mxu0 %v12125_v26  ;;  %v4596_v26 = vrot.slane %v10274_v29, 1  ;;  %v12210_v29 = vld [vmem:[%s16023_s28 + $0x588] ss:$16 sps:$4 sm:$0xff]  }
 0x3b3   :  { %v14259_v40 = vsel %vm511_vm3, %v4600_v50, %v4604_v34  ;;  %v4608_v50 = vrot.slane %v13806_v42, 1  ;;  %v12188_v42 = vld [vmem:[%s16023_s28 + $0x48c] ss:$16 sps:$4 sm:$0xff]  }
 0x3b5   :  { %4947 = vmatpush1.bf16.msra.mxu0 %v12123_v15  ;;  %v12175_v15 = vld [vmem:[%s16023_s28 + $0x42c] ss:$16 sps:$4 sm:$0xff]  }
 0x3b6   :  { %4948 = vmatprep.subr.bf16.mxu0 %v12128_v24 }
 0x3b8   :  { %4321 = vmatmul.mubr.bf16.gmra.mrb[64].mxu0 %v14028_v19  ;;  %v12135_v19 = vld [vmem:[%s16023_s28 + $0x4a0] ss:$16 sps:$4 sm:$0xff]  }
 0x3b9   :  { %4330 = vmatprep.mubr.bf16.mxu0 %v13759_v18  ;;  %4949 = vmatpush1.bf16.msra.mxu0 %v12126_v37  ;;  %v12137_v18 = vld [vmem:[%s16023_s28 + $0x4a4] ss:$16 sps:$4 sm:$0xff]   ;;  %v14251_v37 = vsel %vm511_vm3, %v4596_v26, %v4597_v38 }
 0x3ba   :  { %4950 = vmatprep.subr.bf16.mxu0 %v12131_v56 }
 0x3bd   :  { %4951 = vmatpush1.bf16.msra.mxu0 %v12129_v7  ;;  %v12173_v7 = vld [vmem:[%s16023_s28 + $0x428] ss:$16 sps:$4 sm:$0xff]  }
 0x3be   :  { %4952 = vmatprep.subr.bf16.mxu0 %v12134_v39 }
 0x3c0   :  { %4331 = vmatmul.mubr.bf16.gmra.mrb[68].mxu0 %v14047_v48  ;;  %v12141_v48 = vld [vmem:[%s16023_s28 + $0x4e0] ss:$16 sps:$4 sm:$0xff]  }
 0x3c1   :  { %4340 = vmatprep.mubr.bf16.mxu0 %v13804_v49  ;;  %4953 = vmatpush1.bf16.msra.mxu0 %v12132_v20  ;;  %v12143_v49 = vld [vmem:[%s16023_s28 + $0x4e4] ss:$16 sps:$4 sm:$0xff]   ;;  %v12179_v20 = vld [vmem:[%s16023_s28 + $0x44c] ss:$16 sps:$4 sm:$0xff]  }
 0x3c2   :  { %4954 = vmatprep.subr.bf16.mxu0 %v12137_v18  ;;  %v12177_v18 = vld [vmem:[%s16023_s28 + $0x448] ss:$16 sps:$4 sm:$0xff]  }
 0x3c5   :  { %4955 = vmatpush1.bf16.msra.mxu0 %v12135_v19  ;;  %v12184_v19 = vld [vmem:[%s16023_s28 + $0x46c] ss:$16 sps:$4 sm:$0xff]  }
 0x3c6   :  { %4956 = vmatprep.subr.bf16.mxu0 %v12140_v9  ;;  %v14277_v9 = vsel %vm511_vm3, %v4597_v38, %v4602_v47  ;;  %v12218_v38 = vld [vmem:[%s16023_s28 + $0x5cc] ss:$16 sps:$4 sm:$0xff]  }
 0x3c8   :  { %4341 = vmatmul.mubr.bf16.gmra.mrb[72].mxu0 %v14067_v21  ;;  %v12149_v21 = vld [vmem:[%s16023_s28 + $0x524] ss:$16 sps:$4 sm:$0xff]  }
 0x3c9   :  { %4350 = vmatprep.mubr.bf16.mxu0 %v14070_v63  ;;  %4957 = vmatpush1.bf16.msra.mxu0 %v12138_v61  ;;  %v12147_v63 = vld [vmem:[%s16023_s28 + $0x520] ss:$16 sps:$4 sm:$0xff]   ;;  %v14281_v61 = vsel %vm511_vm3, %v4604_v34, %v4608_v50 }
 0x3ca   :  { %4958 = vmatprep.subr.bf16.mxu0 %v12143_v49  ;;  %v4606_v49 = vrot.slane %v13808_v16, 1 }
 0x3cd   :  { %4959 = vmatpush1.bf16.msra.mxu0 %v12141_v48  ;;  %v14292_v48 = vrot.slane %v13784_v52, 1  ;;  %v12189_v52 = vld [vmem:[%s16023_s28 + $0x4a8] ss:$16 sps:$4 sm:$0xff]  }
 0x3ce   :  { %4960 = vmatprep.subr.bf16.mxu0 %v12146_v36  ;;  %v12186_v36 = vld [vmem:[%s16023_s28 + $0x488] ss:$16 sps:$4 sm:$0xff]  }
 0x3cf   :  { %v14306_v16 = vsel %vm511_vm3, %v4608_v50, %v14292_v48  ;;  %v12227_v50 = vld [vmem:[%s16023_s28 + $0x624] ss:$16 sps:$4 sm:$0xff]  }
 0x3d0   :  { %4351 = vmatmul.mubr.bf16.gmra.mrb[84].mxu0 %v14084_v31  ;;  %v12155_v31 = vld [vmem:[%s16023_s28 + $0x564] ss:$16 sps:$4 sm:$0xff]  }
 0x3d1   :  { %4961 = vmatpush1.bf16.msra.mxu0 %v12144_v13  ;;  %4976 = vmatprep.mubr.bf16.mxu0 %v13774_v41  ;;  %v12191_v13 = vld [vmem:[%s16023_s28 + $0x4ac] ss:$16 sps:$4 sm:$0xff]  }
 0x3d2   :  { %4962 = vmatprep.subr.bf16.mxu0 %v12149_v21  ;;  %v14301_v21 = vsel %vm511_vm3, %v4602_v47, %v4606_v49  ;;  %v12222_v47 = vld [vmem:[%s16023_s28 + $0x600] ss:$16 sps:$4 sm:$0xff]  }
 0x3d5   :  { %4963 = vmatpush1.bf16.msra.mxu0 %v12147_v63  ;;  %v12194_v63 = vld [vmem:[%s16023_s28 + $0x4cc] ss:$16 sps:$4 sm:$0xff]  }
 0x3d6   :  { %4964 = vmatprep.subr.bf16.mxu0 %v12152_v8  ;;  %v14316_v8 = vrot.slane %v13786_v60, 1  ;;  %v12195_v60 = vld [vmem:[%s16023_s28 + $0x4e8] ss:$16 sps:$4 sm:$0xff]  }
 0x3d9   :  { %4965 = vmatpush1.bf16.msra.mxu0 %v12150_v54  ;;  %v12192_v54 = vld [vmem:[%s16023_s28 + $0x4c8] ss:$16 sps:$4 sm:$0xff]  }
 0x3da   :  { %4966 = vmatprep.subr.bf16.mxu0 %v12155_v31  ;;  %v12197_v31 = vld [vmem:[%s16023_s28 + $0x4ec] ss:$16 sps:$4 sm:$0xff]  }
 0x3dd   :  { %4967 = vmatpush1.bf16.msra.mxu0 %v12153_v5  ;;  %v14326_v5 = vsel %vm511_vm3, %v4606_v49, %v14316_v8  ;;  %v12234_v49 = vld [vmem:[%s16023_s28 + $0x680] ss:$16 sps:$4 sm:$0xff]  }
 0x3de   :  { %4968 = vmatprep.subr.bf16.mxu0 %v12158_v59  ;;  %v12200_v59 = vld [vmem:[%s16023_s28 + $0x50c] ss:$16 sps:$4 sm:$0xff]  }
 0x3e1   :  { %4969 = vmatpush1.bf16.msra.mxu0 %v12156_v53  ;;  %v12198_v53 = vld [vmem:[%s16023_s28 + $0x508] ss:$16 sps:$4 sm:$0xff]  }
 0x3e2   :  { %4970 = vmatprep.subr.bf16.mxu0 %v12161_v2  ;;  %v12203_v2 = vld [vmem:[%s16023_s28 + $0x52c] ss:$16 sps:$4 sm:$0xff]  }
 0x3e5   :  { %4971 = vmatpush1.bf16.msra.mxu0 %v12159_v33  ;;  %v12201_v33 = vld [vmem:[%s16023_s28 + $0x528] ss:$16 sps:$4 sm:$0xff]  }
 0x3e6   :  { %4972 = vmatprep.subr.bf16.mxu0 %v12164_v28  ;;  %v12206_v28 = vld [vmem:[%s16023_s28 + $0x54c] ss:$16 sps:$4 sm:$0xff]  }
 0x3e9   :  { %4973 = vmatpush1.bf16.msra.mxu0 %v12162_v6  ;;  %v12204_v6 = vld [vmem:[%s16023_s28 + $0x548] ss:$16 sps:$4 sm:$0xff]  }
 0x3ea   :  { %4974 = vmatprep.subr.bf16.mxu0 %v12167_v12  ;;  %v12209_v12 = vld [vmem:[%s16023_s28 + $0x56c] ss:$16 sps:$4 sm:$0xff]  }
 0x3ed   :  { %4975 = vmatpush1.bf16.msra.mxu0 %v12165_v10  ;;  %v12215_v10 = vld [vmem:[%s16023_s28 + $0x5ac] ss:$16 sps:$4 sm:$0xff]  }
 0x3ee   :  { %5027 = vmatprep.subr.bf16.mxu0 %v12170_v45  ;;  %v12213_v45 = vld [vmem:[%s16023_s28 + $0x5a8] ss:$16 sps:$4 sm:$0xff]  }
 0x3ef   :  { %v14248_v24 = vpop.f32.mrb[56].mxu0 }
 0x3f0   :  { %v14253_v56 = vpop.f32.mrb[57].mxu0  ;;  %4977 = vmatmul.mubr.bf16.vlgmr.msra.gmra.mrb[40].mxu0 %v14251_v37 }
 0x3f1   :  { %v3504_v14 = vpop.f32.mrb[58].mxu0  ;;  %4986 = vmatprep.mubr.bf16.mxu0 %v14259_v40  ;;  %5028 = vmatpush1.bf16.msra.mxu0 %v12168_v17 }
 0x3f2   :  { %3628 = vst [vmem:[#allocation7 + $0x120] sm:$0x3f] %v3504_v14  ;;  %v3506_v39 = vpop.f32.mrb[59].mxu0  ;;  %5029 = vmatprep.subr.bf16.mxu0 %v12175_v15  ;;  %v12216_v15 = vld [vmem:[%s16023_s28 + $0x5c8] ss:$16 sps:$4 sm:$0xff]  }
 0x3f3   :  { %3629 = vst [vmem:[#allocation7 + $0x128] sm:$0x3f] %v3506_v39  ;;  %v12219_v39 = vld [vmem:[%s16023_s28 + $0x5e8] ss:$16 sps:$4 sm:$0xff]  }
 0x3f5   :  { %5030 = vmatpush1.bf16.msra.mxu0 %v12173_v7  ;;  %v12221_v7 = vld [vmem:[%s16023_s28 + $0x5ec] ss:$16 sps:$4 sm:$0xff]  }
 0x3f6   :  { %5031 = vmatprep.subr.bf16.mxu0 %v12179_v20  ;;  %v12224_v20 = vld [vmem:[%s16023_s28 + $0x604] ss:$16 sps:$4 sm:$0xff]  }
 0x3f8   :  { %4987 = vmatmul.mubr.bf16.gmra.mrb[44].mxu0 %v14277_v9 }
 0x3f9   :  { %4996 = vmatprep.mubr.bf16.mxu0 %v14281_v61  ;;  %5032 = vmatpush1.bf16.msra.mxu0 %v12177_v18  ;;  %v12225_v18 = vld [vmem:[%s16023_s28 + $0x620] ss:$16 sps:$4 sm:$0xff]  }
 0x3fa   :  { %5033 = vmatprep.subr.bf16.mxu0 %v12184_v19  ;;  %v12230_v19 = vld [vmem:[%s16023_s28 + $0x644] ss:$16 sps:$4 sm:$0xff]  }
 0x3fd   :  { %5034 = vmatpush1.bf16.msra.mxu0 %v12182_v11  ;;  %v12228_v11 = vld [vmem:[%s16023_s28 + $0x640] ss:$16 sps:$4 sm:$0xff]  }
 0x3fe   :  { %5035 = vmatprep.subr.bf16.mxu0 %v12188_v42  ;;  %v12236_v42 = vld [vmem:[%s16023_s28 + $0x684] ss:$16 sps:$4 sm:$0xff]  }
 0x400   :  { %4997 = vmatmul.mubr.bf16.gmra.mrb[48].mxu0 %v14301_v21 }
 0x401   :  { %5006 = vmatprep.mubr.bf16.mxu0 %v14306_v16  ;;  %5036 = vmatpush1.bf16.msra.mxu0 %v12186_v36  ;;  %v5230_v36 = vld [vmem:[#allocation3] sm:$0xee] }
 0x402   :  { %5037 = vmatprep.subr.bf16.mxu0 %v12191_v13  ;;  %v12242_v13 = vld [vmem:[%s16023_s28 + $0x6c4] ss:$16 sps:$4 sm:$0xff]  }
 0x405   :  { %5038 = vmatpush1.bf16.msra.mxu0 %v12189_v52  ;;  %v10413_v52 = vcombine.high %v5230_v36, %v13828_v30 }
 0x406   :  { %5039 = vmatprep.subr.bf16.mxu0 %v12194_v63  ;;  %v5377_v63 = vshrl.u32 %v13841_v1, 16 }
 0x408   :  { %5007 = vmatmul.mubr.bf16.gmra.mrb[52].mxu0 %v14326_v5 }
 0x409   :  { %5016 = vmatprep.mubr.bf16.mxu0 %v14292_v48  ;;  %5040 = vmatpush1.bf16.msra.mxu0 %v12192_v54  ;;  %v5380_v54 = vshll.u32 %v13841_v1, 16 }
 0x40a   :  { %5041 = vmatprep.subr.bf16.mxu0 %v12197_v31  ;;  %v5369_v31 = vshrl.u32 %v10413_v52, 16 }
 0x40d   :  { %5042 = vmatpush1.bf16.msra.mxu0 %v12195_v60  ;;  %v5372_v60 = vshll.u32 %v10413_v52, 16 }
 0x40e   :  { %5043 = vmatprep.subr.bf16.mxu0 %v12200_v59  ;;  %v5379_v59 = vrot.slane %v5377_v63, 1 }
 0x410   :  { %5017 = vmatmul.mubr.bf16.gmra.mrb[88].mxu0 %v14316_v8 }
 0x411   :  { %5044 = vmatpush1.bf16.msra.mxu0 %v12198_v53  ;;  %5059 = vmatprep.mubr.bf16.mxu0 %v13774_v41  ;;  %v12207_v41 = vld [vmem:[%s16023_s28 + $0x568] ss:$16 sps:$4 sm:$0xff]   ;;  %v5382_v53 = vrot.slane %v5380_v54, 2  ;;  %v12272_v54 = vld [vmem:[%s16023_s28 + $0x7e0] ss:$16 sps:$4 sm:$0xff]  }
 0x412   :  { %5045 = vmatprep.subr.bf16.mxu0 %v12203_v2  ;;  %v12243_v2 = vld [vmem:[%s16023_s28 + $0x6e0] ss:$16 sps:$4 sm:$0xff]  }
 0x415   :  { %5046 = vmatpush1.bf16.msra.mxu0 %v12201_v33  ;;  %v12248_v33 = vld [vmem:[%s16023_s28 + $0x704] ss:$16 sps:$4 sm:$0xff]  }
 0x416   :  { %5047 = vmatprep.subr.bf16.mxu0 %v12206_v28  ;;  %v5371_v28 = vrot.slane %v5369_v31, 1  ;;  %v12277_v31 = vld [vmem:[%s16023_s28 + $0x60c] ss:$16 sps:$4 sm:$0xff]  }
 0x419   :  { %5048 = vmatpush1.bf16.msra.mxu0 %v12204_v6  ;;  %v5374_v6 = vrot.slane %v5372_v60, 2 }
 0x41a   :  { %5049 = vmatprep.subr.bf16.mxu0 %v12209_v12  ;;  %v14449_v12 = vor.u32 %v5382_v53, %v5379_v59  ;;  %v12275_v53 = vld [vmem:[%s16023_s28 + $0x608] ss:$16 sps:$4 sm:$0xff]  }
 0x41d   :  { %5050 = vmatpush1.bf16.msra.mxu0 %v12207_v41  ;;  %v12256_v41 = vld [vmem:[%s16023_s28 + $0x724] ss:$16 sps:$4 sm:$0xff]  }
 0x41e   :  { %5051 = vmatprep.subr.bf16.mxu0 %v12212_v35 }
 0x421   :  { %5052 = vmatpush1.bf16.msra.mxu0 %v12210_v29  ;;  %v12254_v29 = vld [vmem:[%s16023_s28 + $0x720] ss:$16 sps:$4 sm:$0xff]  }
 0x422   :  { %5053 = vmatprep.subr.bf16.mxu0 %v12215_v10  ;;  %v12259_v10 = vld [vmem:[%s16023_s28 + $0x744] ss:$16 sps:$4 sm:$0xff]  }
 0x423   :  { %v14374_v34 = vpop.f32.mrb[76].mxu0 }
 0x424   :  { %v14376_v26 = vpop.f32.mrb[77].mxu0 }
 0x425   :  { %v3587_v17 = vpop.f32.mrb[78].mxu0  ;;  %5054 = vmatpush1.bf16.msra.mxu0 %v12213_v45  ;;  %v12262_v45 = vld [vmem:[%s16023_s28 + $0x764] ss:$16 sps:$4 sm:$0xff]  }
 0x426   :  { %3630 = vst [vmem:[#allocation7 + $0x130] sm:$0x3f] %v3587_v17  ;;  %v3589_v14 = vpop.f32.mrb[79].mxu0  ;;  %5055 = vmatprep.subr.bf16.mxu0 %v12218_v38  ;;  %v12260_v38 = vld [vmem:[%s16023_s28 + $0x760] ss:$16 sps:$4 sm:$0xff]  }
 0x427   :  { %3631 = vst [vmem:[#allocation7 + $0x138] sm:$0x3f] %v3589_v14  ;;  %v12265_v17 = vld [vmem:[%s16023_s28 + $0x784] ss:$16 sps:$4 sm:$0xff]  }
 0x428   :  { %v12268_v14 = vld [vmem:[%s16023_s28 + $0x7a4] ss:$16 sps:$4 sm:$0xff]  }
 0x429   :  { %5056 = vmatpush1.bf16.msra.mxu0 %v12216_v15  ;;  %v12263_v15 = vld [vmem:[%s16023_s28 + $0x780] ss:$16 sps:$4 sm:$0xff]  }
 0x42a   :  { %5057 = vmatprep.subr.bf16.mxu0 %v12221_v7  ;;  %v10412_v7 = vcombine.low %v5230_v36, %v13828_v30  ;;  %v3669_v36 = vld [vmem:[#allocation7 + $0x128] sm:$0x3f] }
 0x42c   :  { %v5352_v30 = vshrl.u32 %v10412_v7, 16 }
 0x42d   :  { %5058 = vmatpush1.bf16.msra.mxu0 %v12219_v39  ;;  %v12266_v39 = vld [vmem:[%s16023_s28 + $0x7a0] ss:$16 sps:$4 sm:$0xff]  }
 0x42e   :  { %5779 = vmatprep.subr.bf16.mxu0 %v12224_v20  ;;  %v12271_v20 = vld [vmem:[%s16023_s28 + $0x7c4] ss:$16 sps:$4 sm:$0xff]  }
 0x430   :  { %5060 = vmatmul.mubr.bf16.vlgmr.msra.gmra.mrb[60].mxu0 %v14251_v37  ;;  %v12233_v37 = vld [vmem:[%s16023_s28 + $0x664] ss:$16 sps:$4 sm:$0xff]  }
 0x431   :  { %5069 = vmatprep.mubr.bf16.mxu0 %v14259_v40  ;;  %5780 = vmatpush1.bf16.msra.mxu0 %v12222_v47  ;;  %v12231_v40 = vld [vmem:[%s16023_s28 + $0x660] ss:$16 sps:$4 sm:$0xff]  }
 0x432   :  { %5781 = vmatprep.subr.bf16.mxu0 %v12227_v50  ;;  %v5360_v50 = vshrl.u32 %v13839_v44, 16 }
 0x434   :  { %v5362_v63 = vrot.slane %v5360_v50, 1  ;;  %v12294_v50 = vld [vmem:[%s16023_s28 + $0x6ac] ss:$16 sps:$4 sm:$0xff]  }
 0x435   :  { %5782 = vmatpush1.bf16.msra.mxu0 %v12225_v18  ;;  %v5363_v18 = vshll.u32 %v13839_v44, 16 }
 0x436   :  { %5783 = vmatprep.subr.bf16.mxu0 %v12230_v19 }
 0x438   :  { %5070 = vmatmul.mubr.bf16.gmra.mrb[64].mxu0 %v14277_v9  ;;  %v12239_v9 = vld [vmem:[%s16023_s28 + $0x6a4] ss:$16 sps:$4 sm:$0xff]  }
 0x439   :  { %5079 = vmatprep.mubr.bf16.mxu0 %v14281_v61  ;;  %5784 = vmatpush1.bf16.msra.mxu0 %v12228_v11  ;;  %v12237_v61 = vld [vmem:[%s16023_s28 + $0x6a0] ss:$16 sps:$4 sm:$0xff]  }
 0x43a   :  { %5785 = vmatprep.subr.bf16.mxu0 %v12233_v37 }
 0x43d   :  { %5786 = vmatpush1.bf16.msra.mxu0 %v12231_v40  ;;  %v3668_v40 = vld [vmem:[#allocation7 + $0x120] sm:$0x3f] }
 0x43e   :  { %5787 = vmatprep.subr.bf16.mxu0 %v12236_v42 }
 0x440   :  { %5080 = vmatmul.mubr.bf16.gmra.mrb[68].mxu0 %v14301_v21  ;;  %v12240_v21 = vld [vmem:[%s16023_s28 + $0x6c0] ss:$16 sps:$4 sm:$0xff]  }
 0x441   :  { %5089 = vmatprep.mubr.bf16.mxu0 %v14306_v16  ;;  %5788 = vmatpush1.bf16.msra.mxu0 %v12234_v49  ;;  %v12245_v16 = vld [vmem:[%s16023_s28 + $0x6e4] ss:$16 sps:$4 sm:$0xff]   ;;  %v12269_v49 = vld [vmem:[%s16023_s28 + $0x7c0] ss:$16 sps:$4 sm:$0xff]  }
 0x442   :  { %5789 = vmatprep.subr.bf16.mxu0 %v12239_v9  ;;  %v5355_v9 = vshll.u32 %v10412_v7, 16 }
 0x445   :  { %5790 = vmatpush1.bf16.msra.mxu0 %v12237_v61 }
 0x446   :  { %5791 = vmatprep.subr.bf16.mxu0 %v12242_v13 }
 0x448   :  { %5090 = vmatmul.mubr.bf16.gmra.mrb[72].mxu0 %v14326_v5  ;;  %v12246_v5 = vld [vmem:[%s16023_s28 + $0x700] ss:$16 sps:$4 sm:$0xff]  }
 0x449   :  { %5099 = vmatprep.mubr.bf16.mxu0 %v14292_v48  ;;  %5792 = vmatpush1.bf16.msra.mxu0 %v12240_v21  ;;  %v5375_v48 = vor.u32 %v5374_v6, %v5371_v28  ;;  %v5354_v21 = vrot.slane %v5352_v30, 1  ;;  %v14527_v28 = vsel %vm702_vm6, %v14449_v12, %v13843_v46  ;;  %v14529_v6 = vld [vmem:[#allocation3 + $0x44] ss:$8 sps:$4 sm:$0xff]  }
 0x44a   :  { %5793 = vmatprep.subr.bf16.mxu0 %v12245_v16  ;;  %v5357_v16 = vrot.slane %v5355_v9, 2  ;;  %v12281_v46 = vld [vmem:[%s16023_s28 + $0x648] ss:$16 sps:$4 sm:$0xff]  }
 0x44b   :  { %v14460_v35 = vsel %vm702_vm6, %v5375_v48, %v14449_v12  ;;  %v12283_v48 = vld [vmem:[%s16023_s28 + $0x64c] ss:$16 sps:$4 sm:$0xff]  }
 0x44c   :  { %v5358_v59 = vor.u32 %v5357_v16, %v5354_v21  ;;  %v12286_v12 = vld [vmem:[%s16023_s28 + $0x66c] ss:$16 sps:$4 sm:$0xff]   ;;  %v12304_v21 = vld [vmem:[%s16023_s28 + $0x708] ss:$16 sps:$4 sm:$0xff]  }
 0x44d   :  { %5794 = vmatpush1.bf16.msra.mxu0 %v12243_v2  ;;  %v12280_v2 = vld [vmem:[%s16023_s28 + $0x62c] ss:$16 sps:$4 sm:$0xff]  }
 0x44e   :  { %5795 = vmatprep.subr.bf16.mxu0 %v12248_v33  ;;  %v12309_v16 = vld [vmem:[%s16023_s28 + $0x72c] ss:$16 sps:$4 sm:$0xff]  }
 0x450   :  { %5100 = vmatmul.mubr.bf16.gmra.mrb[92].mxu0 %v14316_v8  ;;  %v12257_v8 = vld [vmem:[%s16023_s28 + $0x740] ss:$16 sps:$4 sm:$0xff]  }
 0x451   :  { %5796 = vmatpush1.bf16.msra.mxu0 %v12246_v5  ;;  %5811 = vmatprep.mubr.bf16.mxu0 %v14460_v35  ;;  %v12278_v5 = vld [vmem:[%s16023_s28 + $0x628] ss:$16 sps:$4 sm:$0xff]  }
 0x452   :  { %5797 = vmatprep.subr.bf16.mxu0 %v12256_v41  ;;  %v5431_v41 = vshrl.u32 %v14529_v6, 16 }
 0x455   :  { %5798 = vmatpush1.bf16.msra.mxu0 %v12254_v29  ;;  %v5434_v29 = vshll.u32 %v14529_v6, 16 }
 0x456   :  { %5799 = vmatprep.subr.bf16.mxu0 %v12259_v10 }
 0x459   :  { %5800 = vmatpush1.bf16.msra.mxu0 %v12257_v8  ;;  %v14550_v8 = vld [vmem:[#allocation3 + $0x40] ss:$8 sps:$4 sm:$0xff]  }
 0x45a   :  { %5801 = vmatprep.subr.bf16.mxu0 %v12262_v45  ;;  %v5433_v45 = vrot.slane %v5431_v41, 1  ;;  %v5425_v7 = vshll.u32 %v14550_v8, 16  ;;  %v12321_v41 = vld [vmem:[%s16023_s28 + $0x7ac] ss:$16 sps:$4 sm:$0xff]  }
 0x45d   :  { %5802 = vmatpush1.bf16.msra.mxu0 %v12260_v38  ;;  %v5436_v38 = vrot.slane %v5434_v29, 2  ;;  %v12319_v29 = vld [vmem:[%s16023_s28 + $0x7a8] ss:$16 sps:$4 sm:$0xff]  }
 0x45e   :  { %5803 = vmatprep.subr.bf16.mxu0 %v12265_v17  ;;  %v12284_v17 = vld [vmem:[%s16023_s28 + $0x668] ss:$16 sps:$4 sm:$0xff]  }
 0x461   :  { %5804 = vmatpush1.bf16.msra.mxu0 %v12263_v15  ;;  %v5240_v15 = vld [vmem:[#allocation3 + $0x50] sm:$0x11] }
 0x462   :  { %5805 = vmatprep.subr.bf16.mxu0 %v12268_v14  ;;  %v5422_v14 = vshrl.u32 %v14550_v8, 16 }
 0x463   :  { %v4269_v47 = vpop.f32.mrb[80].mxu0 }
 0x464   :  { %v14497_v19 = vadd.f32 %v4269_v47, %v14248_v24  ;;  %v4271_v11 = vpop.f32.mrb[81].mxu0  ;;  %v12274_v24 = vld [vmem:[%s16023_s28 + $0x7e4] ss:$16 sps:$4 sm:$0xff]   ;;  %v12287_v47 = vld [vmem:[%s16023_s28 + $0x688] ss:$16 sps:$4 sm:$0xff]  }
 0x465   :  { %v14500_v37 = vadd.f32 %v4271_v11, %v14253_v56  ;;  %v4273_v42 = vpop.f32.mrb[82].mxu0  ;;  %5806 = vmatpush1.bf16.msra.mxu0 %v12266_v39  ;;  %v5365_v56 = vrot.slane %v5363_v18, 2  ;;  %v5437_v39 = vor.u32 %v5436_v38, %v5433_v45  ;;  %v5424_v18 = vrot.slane %v5422_v14, 1  ;;  %v12322_v14 = vld [vmem:[%s16023_s28 + $0x7c8] ss:$16 sps:$4 sm:$0xff]  }
 0x466   :  { %v4397_v61 = vadd.f32 %v4273_v42, %v3668_v40  ;;  %v4275_v13 = vpop.f32.mrb[83].mxu0  ;;  %5807 = vmatprep.subr.bf16.mxu0 %v12271_v20  ;;  %v10423_v20 = vcombine.high %v5240_v15, %v5240_v15  ;;  %v5427_v11 = vrot.slane %v5425_v7, 2  ;;  %v12292_v42 = vld [vmem:[%s16023_s28 + $0x6a8] ss:$16 sps:$4 sm:$0xff]  }
 0x467   :  { %v4398_v52 = vadd.f32 %v4275_v13, %v3669_v36  ;;  %v5366_v60 = vor.u32 %v5365_v56, %v5362_v63  ;;  %v14571_v30 = vsel %vm702_vm6, %v13845_v23, %v5437_v39  ;;  %v12296_v23 = vld [vmem:[%s16023_s28 + $0x6c8] ss:$16 sps:$4 sm:$0xff]   ;;  %v12302_v13 = vld [vmem:[%s16023_s28 + $0x6ec] ss:$16 sps:$4 sm:$0xff]  }
 0x468   :  { %4437 = vst [vmem:[#allocation7 + $0x120] sm:$0x3f] %v4397_v61  ;;  %v5445_v40 = vshll.u32 %v10423_v20, 16  ;;  %v5428_v9 = vor.u32 %v5427_v11, %v5424_v18  ;;  %v10422_v61 = vcombine.low %v5240_v15, %v5240_v15  ;;  %v12300_v56 = vld [vmem:[%s16023_s28 + $0x6e8] ss:$16 sps:$4 sm:$0xff]  }
 0x469   :  { %4438 = vst [vmem:[#allocation7 + $0x128] sm:$0x3f] %v4398_v52  ;;  %5808 = vmatpush1.bf16.msra.mxu0 %v12269_v49  ;;  %v14521_v33 = vsel %vm702_vm6, %v5358_v59, %v5366_v60  ;;  %v14548_v10 = vsel %vm702_vm6, %v5366_v60, %v13860_v3  ;;  %v12289_v3 = vld [vmem:[%s16023_s28 + $0x68c] ss:$16 sps:$4 sm:$0xff]   ;;  %v12307_v60 = vld [vmem:[%s16023_s28 + $0x728] ss:$16 sps:$4 sm:$0xff]  }
 0x46a   :  { %5809 = vmatprep.subr.bf16.mxu0 %v12274_v24  ;;  %v12298_v49 = vld [vmem:[%s16023_s28 + $0x6cc] ss:$16 sps:$4 sm:$0xff]   ;;  %v5447_v36 = vrot.slane %v5445_v40, 2  ;;  %v14588_v24 = vsel %vm702_vm6, %v13862_v43, %v5428_v9  ;;  %v5440_v52 = vshll.u32 %v10422_v61, 16  ;;  %v12328_v18 = vld [vmem:[%s16023_s28 + $0x800] ss:$16 sps:$4 sm:$0xff]  }
 0x46b   :  { %v12312_v59 = vld [vmem:[%s16023_s28 + $0x74c] ss:$16 sps:$4 sm:$0xff]   ;;  %v12333_v11 = vld [vmem:[%s16023_s28 + $0x824] ss:$16 sps:$4 sm:$0xff]   ;;  %v12331_v40 = vld [vmem:[%s16023_s28 + $0x820] ss:$16 sps:$4 sm:$0xff]  }
 0x46c   :  { %v14592_v63 = vsel %vm702_vm6, %v5437_v39, %v5447_v36  ;;  %v5442_v43 = vrot.slane %v5440_v52, 2  ;;  %v3670_v15 = vld [vmem:[#allocation7 + $0x130] sm:$0x3f]  ;;  %v3671_v39 = vld [vmem:[#allocation7 + $0x138] sm:$0x3f] }
 0x46d   :  { %5810 = vmatpush1.bf16.msra.mxu0 %v12272_v54  ;;  %v12306_v54 = vld [vmem:[%s16023_s28 + $0x70c] ss:$16 sps:$4 sm:$0xff]   ;;  %v12340_v61 = vld [vmem:[%s16023_s28 + $0x880] ss:$16 sps:$4 sm:$0xff]   ;;  %v12348_v36 = vld [vmem:[%s16023_s28 + $0x8c4] ss:$16 sps:$4 sm:$0xff]  }
 0x46e   :  { %5862 = vmatprep.subr.bf16.mxu0 %v12277_v31  ;;  %v14608_v31 = vsel %vm702_vm6, %v5428_v9, %v5442_v43  ;;  %v12342_v9 = vld [vmem:[%s16023_s28 + $0x884] ss:$16 sps:$4 sm:$0xff]   ;;  %v12352_v52 = vld [vmem:[%s16023_s28 + $0x900] ss:$16 sps:$4 sm:$0xff]  }
 0x46f   :  { %v12365_v43 = vld [vmem:[%s16023_s28 + $0x964] ss:$16 sps:$4 sm:$0xff]  }
 0x470   :  { %5812 = vmatmul.mubr.bf16.vlgmr.msra.gmra.mrb[40].mxu0 %v14521_v33 }
 0x471   :  { %5821 = vmatprep.mubr.bf16.mxu0 %v14527_v28  ;;  %5863 = vmatpush1.bf16.msra.mxu0 %v12275_v53  ;;  %v12310_v53 = vld [vmem:[%s16023_s28 + $0x748] ss:$16 sps:$4 sm:$0xff]  }
 0x472   :  { %5864 = vmatprep.subr.bf16.mxu0 %v12280_v2  ;;  %v12315_v2 = vld [vmem:[%s16023_s28 + $0x76c] ss:$16 sps:$4 sm:$0xff]  }
 0x475   :  { %5865 = vmatpush1.bf16.msra.mxu0 %v12278_v5  ;;  %v12318_v5 = vld [vmem:[%s16023_s28 + $0x78c] ss:$16 sps:$4 sm:$0xff]  }
 0x476   :  { %5866 = vmatprep.subr.bf16.mxu0 %v12283_v48  ;;  %v12316_v48 = vld [vmem:[%s16023_s28 + $0x788] ss:$16 sps:$4 sm:$0xff]  }
 0x478   :  { %5822 = vmatmul.mubr.bf16.gmra.mrb[44].mxu0 %v14548_v10 }
 0x479   :  { %5831 = vmatprep.mubr.bf16.mxu0 %v13855_v57  ;;  %5867 = vmatpush1.bf16.msra.mxu0 %v12281_v46  ;;  %v12324_v46 = vld [vmem:[%s16023_s28 + $0x7cc] ss:$16 sps:$4 sm:$0xff]  }
 0x47a   :  { %5868 = vmatprep.subr.bf16.mxu0 %v12286_v12 }
 0x47d   :  { %5869 = vmatpush1.bf16.msra.mxu0 %v12284_v17 }
 0x47e   :  { %5870 = vmatprep.subr.bf16.mxu0 %v12289_v3 }
 0x480   :  { %5832 = vmatmul.mubr.bf16.gmra.mrb[48].mxu0 %v13869_v25 }
 0x481   :  { %5841 = vmatprep.mubr.bf16.mxu0 %v14571_v30  ;;  %5871 = vmatpush1.bf16.msra.mxu0 %v12287_v47 }
 0x482   :  { %5872 = vmatprep.subr.bf16.mxu0 %v12294_v50  ;;  %v12330_v50 = vld [vmem:[%s16023_s28 + $0x804] ss:$16 sps:$4 sm:$0xff]  }
 0x485   :  { %5873 = vmatpush1.bf16.msra.mxu0 %v12292_v42  ;;  %v12336_v42 = vld [vmem:[%s16023_s28 + $0x844] ss:$16 sps:$4 sm:$0xff]  }
 0x486   :  { %5874 = vmatprep.subr.bf16.mxu0 %v12298_v49  ;;  %v12334_v49 = vld [vmem:[%s16023_s28 + $0x840] ss:$16 sps:$4 sm:$0xff]  }
 0x488   :  { %5842 = vmatmul.mubr.bf16.gmra.mrb[52].mxu0 %v14588_v24 }
 0x489   :  { %5851 = vmatprep.mubr.bf16.mxu0 %v14592_v63  ;;  %5875 = vmatpush1.bf16.msra.mxu0 %v12296_v23  ;;  %v12346_v23 = vld [vmem:[%s16023_s28 + $0x8c0] ss:$16 sps:$4 sm:$0xff]  }
 0x48a   :  { %5876 = vmatprep.subr.bf16.mxu0 %v12302_v13  ;;  %v12354_v13 = vld [vmem:[%s16023_s28 + $0x904] ss:$16 sps:$4 sm:$0xff]  }
 0x48d   :  { %5877 = vmatpush1.bf16.msra.mxu0 %v12300_v56  ;;  %v12362_v56 = vld [vmem:[%s16023_s28 + $0x944] ss:$16 sps:$4 sm:$0xff]  }
 0x48e   :  { %5878 = vmatprep.subr.bf16.mxu0 %v12306_v54  ;;  %v12360_v54 = vld [vmem:[%s16023_s28 + $0x940] ss:$16 sps:$4 sm:$0xff]  }
 0x490   :  { %5852 = vmatmul.mubr.bf16.gmra.mrb[96].mxu0 %v14608_v31 }
 0x491   :  { %5879 = vmatpush1.bf16.msra.mxu0 %v12304_v21  ;;  %5894 = vmatprep.mubr.bf16.mxu0 %v14460_v35  ;;  %v12313_v35 = vld [vmem:[%s16023_s28 + $0x768] ss:$16 sps:$4 sm:$0xff]   ;;  %v12363_v21 = vld [vmem:[%s16023_s28 + $0x960] ss:$16 sps:$4 sm:$0xff]  }
 0x492   :  { %5880 = vmatprep.subr.bf16.mxu0 %v12309_v16  ;;  %v12368_v16 = vld [vmem:[%s16023_s28 + $0x984] ss:$16 sps:$4 sm:$0xff]  }
 0x495   :  { %5881 = vmatpush1.bf16.msra.mxu0 %v12307_v60  ;;  %v12371_v60 = vld [vmem:[%s16023_s28 + $0x9a4] ss:$16 sps:$4 sm:$0xff]  }
 0x496   :  { %5882 = vmatprep.subr.bf16.mxu0 %v12312_v59  ;;  %v12369_v59 = vld [vmem:[%s16023_s28 + $0x9a0] ss:$16 sps:$4 sm:$0xff]  }
 0x499   :  { %5883 = vmatpush1.bf16.msra.mxu0 %v12310_v53  ;;  %v12374_v53 = vld [vmem:[%s16023_s28 + $0x9c4] ss:$16 sps:$4 sm:$0xff]  }
 0x49a   :  { %5884 = vmatprep.subr.bf16.mxu0 %v12315_v2 }
 0x49d   :  { %5885 = vmatpush1.bf16.msra.mxu0 %v12313_v35 }
 0x49e   :  { %5886 = vmatprep.subr.bf16.mxu0 %v12318_v5 }
 0x4a1   :  { %5887 = vmatpush1.bf16.msra.mxu0 %v12316_v48 }
 0x4a2   :  { %5888 = vmatprep.subr.bf16.mxu0 %v12321_v41  ;;  %v4477_v41 = vld [vmem:[#allocation7 + $0x120] sm:$0x3f] }
 0x4a3   :  { %v4352_v12 = vpop.f32.mrb[84].mxu0 }
 0x4a4   :  { %v14643_v45 = vadd.f32 %v4352_v12, %v14374_v34  ;;  %v4354_v38 = vpop.f32.mrb[85].mxu0  ;;  %v12327_v34 = vld [vmem:[%s16023_s28 + $0x7ec] ss:$16 sps:$4 sm:$0xff]  }
 0x4a5   :  { %v14646_v17 = vadd.f32 %v4354_v38, %v14376_v26  ;;  %v4356_v3 = vpop.f32.mrb[86].mxu0  ;;  %5889 = vmatpush1.bf16.msra.mxu0 %v12319_v29  ;;  %v12325_v26 = vld [vmem:[%s16023_s28 + $0x7e8] ss:$16 sps:$4 sm:$0xff]  }
 0x4a6   :  { %v4399_v7 = vadd.f32 %v4356_v3, %v3670_v15  ;;  %v4358_v20 = vpop.f32.mrb[87].mxu0  ;;  %5890 = vmatprep.subr.bf16.mxu0 %v12324_v46  ;;  %v12372_v46 = vld [vmem:[%s16023_s28 + $0x9c0] ss:$16 sps:$4 sm:$0xff]   ;;  %v4478_v38 = vld [vmem:[#allocation7 + $0x128] sm:$0x3f] }
 0x4a7   :  { %v4400_v47 = vadd.f32 %v4358_v20, %v3671_v39  ;;  %v12434_v39 = vld [vmem:[%s15988_s9] ss:$8 sps:$4 sm:$0xff]   ;;  %v12436_v20 = vld [vmem:[%s15988_s9 + $0x4] ss:$8 sps:$4 sm:$0xff]  }
 0x4a8   :  { %4439 = vst [vmem:[#allocation7 + $0x130] sm:$0x3f] %v4399_v7  ;;  %v12380_v7 = vld [vmem:[%s16023_s28 + $0x80c] ss:$16 sps:$4 sm:$0xff]   ;;  %7330 = vmatprep.subr.bf16.mxu1 %v12436_v20 }
 0x4a9   :  { %4440 = vst [vmem:[#allocation7 + $0x138] sm:$0x3f] %v4400_v47  ;;  %5891 = vmatpush1.bf16.msra.mxu0 %v12322_v14  ;;  %v12381_v14 = vld [vmem:[#allocation3 + $0x24] ss:$8 sps:$4 sm:$0xff]   ;;  %v12439_v47 = vld [vmem:[%s15988_s9 + $0x14] ss:$8 sps:$4 sm:$0xff]   ;;  %7331 = vmatpush1.bf16.msra.mxu1 %v12434_v39 }
 0x4aa   :  { %5892 = vmatprep.subr.bf16.mxu0 %v12327_v34  ;;  %v6194_v34 = vrot.slane %v12381_v14, 2  ;;  %7332 = vmatprep.subr.bf16.mxu1 %v12439_v47  ;;  %v12416_v14 = vld [vmem:[%s16023_s28 + $0x948] ss:$16 sps:$4 sm:$0xff]   ;;  %v12427_v20 = vld [vmem:[%s16023_s28 + $0x9ac] ss:$16 sps:$4 sm:$0xff]  }
 0x4ab   :  { %v12422_v39 = vld [vmem:[%s16023_s28 + $0x988] ss:$16 sps:$4 sm:$0xff]   ;;  %v12430_v47 = vld [vmem:[%s16023_s28 + $0x9cc] ss:$16 sps:$4 sm:$0xff]  }
 0x4ad   :  { %5893 = vmatpush1.bf16.msra.mxu0 %v12325_v26  ;;  %v12378_v26 = vld [vmem:[%s16023_s28 + $0x808] ss:$16 sps:$4 sm:$0xff]  }
 0x4ae   :  { %6538 = vmatprep.subr.bf16.mxu0 %v12330_v50  ;;  %v12385_v50 = vld [vmem:[%s16023_s28 + $0x82c] ss:$16 sps:$4 sm:$0xff]  }
 0x4b0   :  { %5895 = vmatmul.mubr.bf16.vlgmr.msra.gmra.mrb[60].mxu0 %v14521_v33  ;;  %v12339_v33 = vld [vmem:[%s16023_s28 + $0x864] ss:$16 sps:$4 sm:$0xff]  }
 0x4b1   :  { %5904 = vmatprep.mubr.bf16.mxu0 %v14527_v28  ;;  %6539 = vmatpush1.bf16.msra.mxu0 %v12328_v18  ;;  %v12337_v28 = vld [vmem:[%s16023_s28 + $0x860] ss:$16 sps:$4 sm:$0xff]   ;;  %v12386_v18 = vld [vmem:[#allocation3 + $0x20] ss:$8 sps:$4 sm:$0xff]  }
 0x4b2   :  { %6540 = vmatprep.subr.bf16.mxu0 %v12333_v11  ;;  %v12390_v11 = vld [vmem:[#allocation3 + $0x34] ss:$8 sps:$4 sm:$0xff]   ;;  %v6192_v1 = vrot.slane %v12386_v18, 2 }
 0x4b5   :  { %6541 = vmatpush1.bf16.msra.mxu0 %v12331_v40  ;;  %v12437_v40 = vld [vmem:[%s15988_s9 + $0x10] ss:$8 sps:$4 sm:$0xff]  }
 0x4b6   :  { %6542 = vmatprep.subr.bf16.mxu0 %v12336_v42  ;;  %v12383_v42 = vld [vmem:[%s16023_s28 + $0x828] ss:$16 sps:$4 sm:$0xff]   ;;  %7333 = vmatpush1.bf16.msra.mxu1 %v12437_v40  ;;  %v4479_v40 = vld [vmem:[#allocation7 + $0x130] sm:$0x3f] }
 0x4b8   :  { %5905 = vmatmul.mubr.bf16.gmra.mrb[64].mxu0 %v14548_v10  ;;  %v12343_v10 = vld [vmem:[%s16023_s28 + $0x8a0] ss:$16 sps:$4 sm:$0xff]  }
 0x4b9   :  { %5914 = vmatprep.mubr.bf16.mxu0 %v13855_v57  ;;  %6543 = vmatpush1.bf16.msra.mxu0 %v12334_v49  ;;  %v12345_v57 = vld [vmem:[%s16023_s28 + $0x8a4] ss:$16 sps:$4 sm:$0xff]  }
 0x4ba   :  { %6544 = vmatprep.subr.bf16.mxu0 %v12339_v33  ;;  %v12442_v49 = vld [vmem:[%s15988_s9 + $0x24] ss:$8 sps:$4 sm:$0xff]   ;;  %v14800_v33 = vsel %vm933_vm5, %v6190_v22, %v6194_v34  ;;  %v12387_v22 = vld [vmem:[%s16023_s28 + $0x848] ss:$16 sps:$4 sm:$0xff]  }
 0x4bb   :  { %7334 = vmatprep.subr.bf16.mxu1 %v12442_v49  ;;  %v12428_v49 = vld [vmem:[%s16023_s28 + $0x9c8] ss:$16 sps:$4 sm:$0xff]  }
 0x4bd   :  { %6545 = vmatpush1.bf16.msra.mxu0 %v12337_v28  ;;  %v12389_v28 = vld [vmem:[%s16023_s28 + $0x84c] ss:$16 sps:$4 sm:$0xff]  }
 0x4be   :  { %6546 = vmatprep.subr.bf16.mxu0 %v12342_v9  ;;  %v12440_v9 = vld [vmem:[%s15988_s9 + $0x20] ss:$8 sps:$4 sm:$0xff]  }
 0x4bf   :  { %7335 = vmatpush1.bf16.msra.mxu1 %v12440_v9  ;;  %v4480_v9 = vld [vmem:[#allocation7 + $0x138] sm:$0x3f] }
 0x4c0   :  { %5915 = vmatmul.mubr.bf16.gmra.mrb[68].mxu0 %v13869_v25  ;;  %v12351_v25 = vld [vmem:[%s16023_s28 + $0x8e4] ss:$16 sps:$4 sm:$0xff]  }
 0x4c1   :  { %5924 = vmatprep.mubr.bf16.mxu0 %v14571_v30  ;;  %6547 = vmatpush1.bf16.msra.mxu0 %v12340_v61  ;;  %v12349_v30 = vld [vmem:[%s16023_s28 + $0x8e0] ss:$16 sps:$4 sm:$0xff]   ;;  %v12445_v61 = vld [vmem:[%s15988_s9 + $0x34] ss:$8 sps:$4 sm:$0xff]  }
 0x4c2   :  { %6548 = vmatprep.subr.bf16.mxu0 %v12345_v57  ;;  %v6198_v57 = vrot.slane %v12390_v11, 2  ;;  %7336 = vmatprep.subr.bf16.mxu1 %v12445_v61 }
 0x4c5   :  { %6549 = vmatpush1.bf16.msra.mxu0 %v12343_v10  ;;  %v12394_v10 = vld [vmem:[%s16023_s28 + $0x86c] ss:$16 sps:$4 sm:$0xff]  }
 0x4c6   :  { %6550 = vmatprep.subr.bf16.mxu0 %v12348_v36  ;;  %v12443_v36 = vld [vmem:[%s15988_s9 + $0x30] ss:$8 sps:$4 sm:$0xff]  }
 0x4c7   :  { %7337 = vmatpush1.bf16.msra.mxu1 %v12443_v36  ;;  %v12449_v36 = vld [vmem:[%s15988_s9 + $0x50] ss:$8 sps:$4 sm:$0xff]  }
 0x4c8   :  { %5925 = vmatmul.mubr.bf16.gmra.mrb[72].mxu0 %v14588_v24  ;;  %v12359_v24 = vld [vmem:[%s16023_s28 + $0x924] ss:$16 sps:$4 sm:$0xff]  }
 0x4c9   :  { %5934 = vmatprep.mubr.bf16.mxu0 %v14592_v63  ;;  %6551 = vmatpush1.bf16.msra.mxu0 %v12346_v23  ;;  %v12357_v63 = vld [vmem:[%s16023_s28 + $0x920] ss:$16 sps:$4 sm:$0xff]   ;;  %v12395_v23 = vld [vmem:[#allocation3 + $0x30] ss:$8 sps:$4 sm:$0xff]  }
 0x4ca   :  { %6552 = vmatprep.subr.bf16.mxu0 %v12351_v25  ;;  %v14824_v25 = vsel %vm933_vm5, %v6187_v58, %v6192_v1  ;;  %v6196_v44 = vrot.slane %v12395_v23, 2  ;;  %v12396_v58 = vld [vmem:[%s16023_s28 + $0x888] ss:$16 sps:$4 sm:$0xff]   ;;  %v12454_v23 = vld [vmem:[%s15988_s9 + $0x64] ss:$8 sps:$4 sm:$0xff]  }
 0x4cd   :  { %6553 = vmatpush1.bf16.msra.mxu0 %v12349_v30  ;;  %v12392_v30 = vld [vmem:[%s16023_s28 + $0x868] ss:$16 sps:$4 sm:$0xff]  }
 0x4ce   :  { %6554 = vmatprep.subr.bf16.mxu0 %v12354_v13  ;;  %v14831_v13 = vsel %vm933_vm5, %v6194_v34, %v6198_v57  ;;  %v12425_v34 = vld [vmem:[%s16023_s28 + $0x9a8] ss:$16 sps:$4 sm:$0xff]  }
 0x4d0   :  { %5935 = vmatmul.mubr.bf16.gmra.mrb[100].mxu0 %v14608_v31  ;;  %v12366_v31 = vld [vmem:[%s16023_s28 + $0x980] ss:$16 sps:$4 sm:$0xff]  }
 0x4d1   :  { %6555 = vmatpush1.bf16.msra.mxu0 %v12352_v52  ;;  %6570 = vmatprep.mubr.bf16.mxu0 %v13877_v27  ;;  %v12398_v52 = vld [vmem:[%s16023_s28 + $0x88c] ss:$16 sps:$4 sm:$0xff]  }
 0x4d2   :  { %6556 = vmatprep.subr.bf16.mxu0 %v12359_v24  ;;  %v6075_v24 = vld [vmem:[#allocation3 + $0x50] sm:$0x11] }
 0x4d5   :  { %6557 = vmatpush1.bf16.msra.mxu0 %v12357_v63  ;;  %v6202_v63 = vrot.slane %v14529_v6, 2  ;;  %v12404_v6 = vld [vmem:[%s16023_s28 + $0x8cc] ss:$16 sps:$4 sm:$0xff]  }
 0x4d6   :  { %6558 = vmatprep.subr.bf16.mxu0 %v12362_v56  ;;  %v12401_v56 = vld [vmem:[%s16023_s28 + $0x8ac] ss:$16 sps:$4 sm:$0xff]  }
 0x4d9   :  { %6559 = vmatpush1.bf16.msra.mxu0 %v12360_v54  ;;  %v14845_v54 = vsel %vm933_vm5, %v6192_v1, %v6196_v44 }
 0x4da   :  { %6560 = vmatprep.subr.bf16.mxu0 %v12365_v43  ;;  %v12399_v43 = vld [vmem:[%s16023_s28 + $0x8a8] ss:$16 sps:$4 sm:$0xff]  }
 0x4dd   :  { %6561 = vmatpush1.bf16.msra.mxu0 %v12363_v21  ;;  %v14852_v21 = vsel %vm933_vm5, %v6198_v57, %v6202_v63  ;;  %v12448_v57 = vld [vmem:[%s15988_s9 + $0x44] ss:$8 sps:$4 sm:$0xff]  }
 0x4de   :  { %6562 = vmatprep.subr.bf16.mxu0 %v12368_v16  ;;  %v10563_v16 = vcombine.high %v6075_v24, %v6075_v24  ;;  %7338 = vmatprep.subr.bf16.mxu1 %v12448_v57 }
 0x4e1   :  { %6563 = vmatpush1.bf16.msra.mxu0 %v12366_v31  ;;  %v6200_v31 = vrot.slane %v14550_v8, 2  ;;  %v12406_v8 = vld [vmem:[%s16023_s28 + $0x8e8] ss:$16 sps:$4 sm:$0xff]  }
 0x4e2   :  { %6564 = vmatprep.subr.bf16.mxu0 %v12371_v60  ;;  %v6206_v60 = vrot.slane %v10563_v16, 2  ;;  %v12473_v16 = vld [vmem:[%s15988_s9 + $0xd0] ss:$8 sps:$4 sm:$0xff]  }
 0x4e3   :  { %v5018_v2 = vpop.f32.mrb[88].mxu0 }
 0x4e4   :  { %v14755_v35 = vadd.f32 %v5018_v2, %v14497_v19  ;;  %v5020_v5 = vpop.f32.mrb[89].mxu0  ;;  %v12377_v19 = vld [vmem:[%s16023_s28 + $0x9e4] ss:$16 sps:$4 sm:$0xff]   ;;  %v14866_v2 = vsel %vm933_vm5, %v6196_v44, %v6200_v31  ;;  %v12455_v44 = vld [vmem:[%s15988_s9 + $0x70] ss:$8 sps:$4 sm:$0xff]  }
 0x4e5   :  { %v14758_v48 = vadd.f32 %v5020_v5, %v14500_v37  ;;  %v5022_v29 = vpop.f32.mrb[90].mxu0  ;;  %6565 = vmatpush1.bf16.msra.mxu0 %v12369_v59  ;;  %v12375_v37 = vld [vmem:[%s16023_s28 + $0x9e0] ss:$16 sps:$4 sm:$0xff]   ;;  %v12402_v59 = vld [vmem:[%s16023_s28 + $0x8c8] ss:$16 sps:$4 sm:$0xff]   ;;  %v10562_v5 = vcombine.low %v6075_v24, %v6075_v24 }
 0x4e6   :  { %v5146_v12 = vadd.f32 %v5022_v29, %v4477_v41  ;;  %v5024_v15 = vpop.f32.mrb[91].mxu0  ;;  %6566 = vmatprep.subr.bf16.mxu0 %v12374_v53  ;;  %v12408_v53 = vld [vmem:[%s16023_s28 + $0x8ec] ss:$16 sps:$4 sm:$0xff]   ;;  %v14870_v41 = vsel %vm933_vm5, %v6202_v63, %v6206_v60  ;;  %v12461_v24 = vld [vmem:[%s15988_s9 + $0x90] ss:$8 sps:$4 sm:$0xff]  }
 0x4e7   :  { %v5147_v3 = vadd.f32 %v5024_v15, %v4478_v38  ;;  %v12412_v29 = vld [vmem:[%s16023_s28 + $0x90c] ss:$16 sps:$4 sm:$0xff]  }
 0x4e8   :  { %5186 = vst [vmem:[#allocation7 + $0x120] sm:$0x3f] %v5146_v12  ;;  %v12410_v12 = vld [vmem:[%s16023_s28 + $0x908] ss:$16 sps:$4 sm:$0xff]   ;;  %v12415_v38 = vld [vmem:[%s16023_s28 + $0x92c] ss:$16 sps:$4 sm:$0xff]  }
 0x4e9   :  { %5187 = vst [vmem:[#allocation7 + $0x128] sm:$0x3f] %v5147_v3  ;;  %6567 = vmatpush1.bf16.msra.mxu0 %v12372_v46  ;;  %v6204_v46 = vrot.slane %v10562_v5, 2  ;;  %v12418_v3 = vld [vmem:[%s16023_s28 + $0x94c] ss:$16 sps:$4 sm:$0xff]  }
 0x4ea   :  { %6568 = vmatprep.subr.bf16.mxu0 %v12377_v19  ;;  %v12413_v19 = vld [vmem:[%s16023_s28 + $0x928] ss:$16 sps:$4 sm:$0xff]   ;;  %v12469_v63 = vld [vmem:[%s15988_s9 + $0xb4] ss:$8 sps:$4 sm:$0xff]  }
 0x4eb   :  { %v14886_v15 = vsel %vm933_vm5, %v6200_v31, %v6204_v46  ;;  %v12476_v31 = vld [vmem:[%s15988_s9 + $0xe0] ss:$8 sps:$4 sm:$0xff]   ;;  %v12481_v60 = vld [vmem:[%s15988_s9 + $0xf4] ss:$8 sps:$4 sm:$0xff]  }
 0x4ed   :  { %6569 = vmatpush1.bf16.msra.mxu0 %v12375_v37  ;;  %v12421_v37 = vld [vmem:[%s16023_s28 + $0x96c] ss:$16 sps:$4 sm:$0xff]  }
 0x4ee   :  { %6621 = vmatprep.subr.bf16.mxu0 %v12380_v7  ;;  %v12424_v7 = vld [vmem:[%s16023_s28 + $0x98c] ss:$16 sps:$4 sm:$0xff]  }
 0x4f0   :  { %6571 = vmatmul.mubr.bf16.vlgmr.msra.gmra.mrb[40].mxu0 %v13882_v51 }
 0x4f1   :  { %6580 = vmatprep.mubr.bf16.mxu0 %v14800_v33  ;;  %6622 = vmatpush1.bf16.msra.mxu0 %v12378_v26 }
 0x4f2   :  { %6623 = vmatprep.subr.bf16.mxu0 %v12385_v50 }
 0x4f5   :  { %6624 = vmatpush1.bf16.msra.mxu0 %v12383_v42 }
 0x4f6   :  { %6625 = vmatprep.subr.bf16.mxu0 %v12389_v28 }
 0x4f8   :  { %6581 = vmatmul.mubr.bf16.gmra.mrb[44].mxu0 %v14824_v25 }
 0x4f9   :  { %6590 = vmatprep.mubr.bf16.mxu0 %v14831_v13  ;;  %6626 = vmatpush1.bf16.msra.mxu0 %v12387_v22  ;;  %v12446_v22 = vld [vmem:[%s15988_s9 + $0x40] ss:$8 sps:$4 sm:$0xff]  }
 0x4fa   :  { %6627 = vmatprep.subr.bf16.mxu0 %v12394_v10  ;;  %v12451_v10 = vld [vmem:[%s15988_s9 + $0x54] ss:$8 sps:$4 sm:$0xff]   ;;  %7339 = vmatpush1.bf16.msra.mxu1 %v12446_v22 }
 0x4fb   :  { %7340 = vmatprep.subr.bf16.mxu1 %v12451_v10 }
 0x4fd   :  { %6628 = vmatpush1.bf16.msra.mxu0 %v12392_v30  ;;  %v12452_v30 = vld [vmem:[%s15988_s9 + $0x60] ss:$8 sps:$4 sm:$0xff]  }
 0x4fe   :  { %6629 = vmatprep.subr.bf16.mxu0 %v12398_v52  ;;  %7341 = vmatpush1.bf16.msra.mxu1 %v12449_v36  ;;  %v12457_v52 = vld [vmem:[%s15988_s9 + $0x74] ss:$8 sps:$4 sm:$0xff]  }
 0x4ff   :  { %7342 = vmatprep.subr.bf16.mxu1 %v12454_v23  ;;  %v12482_v23 = vld [vmem:[%s15988_s9 + $0x100] ss:$8 sps:$4 sm:$0xff]  }
 0x500   :  { %6591 = vmatmul.mubr.bf16.gmra.mrb[48].mxu0 %v14845_v54 }
 0x501   :  { %6600 = vmatprep.mubr.bf16.mxu0 %v14852_v21  ;;  %6630 = vmatpush1.bf16.msra.mxu0 %v12396_v58  ;;  %v12463_v58 = vld [vmem:[%s15988_s9 + $0x94] ss:$8 sps:$4 sm:$0xff]  }
 0x502   :  { %6631 = vmatprep.subr.bf16.mxu0 %v12401_v56  ;;  %7343 = vmatpush1.bf16.msra.mxu1 %v12452_v30  ;;  %v12467_v56 = vld [vmem:[%s15988_s9 + $0xb0] ss:$8 sps:$4 sm:$0xff]  }
 0x503   :  { %7344 = vmatprep.subr.bf16.mxu1 %v12457_v52  ;;  %v12487_v52 = vld [vmem:[%s15988_s9 + $0x114] ss:$8 sps:$4 sm:$0xff]  }
 0x505   :  { %6632 = vmatpush1.bf16.msra.mxu0 %v12399_v43  ;;  %v12470_v43 = vld [vmem:[%s15988_s9 + $0xc0] ss:$8 sps:$4 sm:$0xff]  }
 0x506   :  { %6633 = vmatprep.subr.bf16.mxu0 %v12404_v6  ;;  %7345 = vmatpush1.bf16.msra.mxu1 %v12455_v44  ;;  %v12478_v6 = vld [vmem:[%s15988_s9 + $0xe4] ss:$8 sps:$4 sm:$0xff]  }
 0x508   :  { %6601 = vmatmul.mubr.bf16.gmra.mrb[52].mxu0 %v14866_v2 }
 0x509   :  { %6610 = vmatprep.mubr.bf16.mxu0 %v14870_v41  ;;  %6634 = vmatpush1.bf16.msra.mxu0 %v12402_v59  ;;  %v12479_v59 = vld [vmem:[%s15988_s9 + $0xf0] ss:$8 sps:$4 sm:$0xff]  }
 0x50a   :  { %6635 = vmatprep.subr.bf16.mxu0 %v12408_v53  ;;  %v12484_v53 = vld [vmem:[%s15988_s9 + $0x104] ss:$8 sps:$4 sm:$0xff]  }
 0x50d   :  { %6636 = vmatpush1.bf16.msra.mxu0 %v12406_v8 }
 0x50e   :  { %6637 = vmatprep.subr.bf16.mxu0 %v12412_v29  ;;  %v5226_v29 = vld [vmem:[#allocation7 + $0x120] sm:$0x3f] }
 0x510   :  { %6611 = vmatmul.mubr.bf16.gmra.mrb[104].mxu0 %v14886_v15 }
 0x511   :  { %6638 = vmatpush1.bf16.msra.mxu0 %v12410_v12  ;;  %6653 = vmatprep.mubr.bf16.mxu0 %v13877_v27  ;;  %v12419_v27 = vld [vmem:[%s16023_s28 + $0x968] ss:$16 sps:$4 sm:$0xff]  }
 0x512   :  { %6639 = vmatprep.subr.bf16.mxu0 %v12415_v38  ;;  %v5227_v38 = vld [vmem:[#allocation7 + $0x128] sm:$0x3f] }
 0x515   :  { %6640 = vmatpush1.bf16.msra.mxu0 %v12413_v19 }
 0x516   :  { %6641 = vmatprep.subr.bf16.mxu0 %v12418_v3 }
 0x519   :  { %6642 = vmatpush1.bf16.msra.mxu0 %v12416_v14 }
 0x51a   :  { %6643 = vmatprep.subr.bf16.mxu0 %v12421_v37 }
 0x51d   :  { %6644 = vmatpush1.bf16.msra.mxu0 %v12419_v27 }
 0x51e   :  { %6645 = vmatprep.subr.bf16.mxu0 %v12424_v7 }
 0x521   :  { %6646 = vmatpush1.bf16.msra.mxu0 %v12422_v39 }
 0x522   :  { %6647 = vmatprep.subr.bf16.mxu0 %v12427_v20 }
 0x523   :  { %v5101_v26 = vpop.f32.mrb[92].mxu0 }
 0x524   :  { %v14921_v50 = vadd.f32 %v5101_v26, %v14643_v45  ;;  %v5103_v18 = vpop.f32.mrb[93].mxu0  ;;  %v12433_v45 = vld [vmem:[%s16023_s28 + $0x9ec] ss:$16 sps:$4 sm:$0xff]  }
 0x525   :  { %v14924_v11 = vadd.f32 %v5103_v18, %v14646_v17  ;;  %v5105_v42 = vpop.f32.mrb[94].mxu0  ;;  %6648 = vmatpush1.bf16.msra.mxu0 %v12425_v34  ;;  %v12431_v17 = vld [vmem:[%s16023_s28 + $0x9e8] ss:$16 sps:$4 sm:$0xff]  }
 0x526   :  { %v5148_v28 = vadd.f32 %v5105_v42, %v4479_v40  ;;  %v5107_v61 = vpop.f32.mrb[95].mxu0  ;;  %6649 = vmatprep.subr.bf16.mxu0 %v12430_v47  ;;  %v15035_v47 = vld [vmem:[%s15989_s8] sm:$0xf] }
 0x527   :  { %v5149_v1 = vadd.f32 %v5107_v61, %v4480_v9  ;;  %v15039_v26 = vrot.slane %v15035_v47, %v13535_v55 }
 0x528   :  { %5188 = vst [vmem:[#allocation7 + $0x130] sm:$0x3f] %v5148_v28 }
 0x529   :  { %5189 = vst [vmem:[#allocation7 + $0x138] sm:$0x3f] %v5149_v1  ;;  %6650 = vmatpush1.bf16.msra.mxu0 %v12428_v49 }
 0x52a   :  { %6651 = vmatprep.subr.bf16.mxu0 %v12433_v45 }
 0x52d   :  { %6652 = vmatpush1.bf16.msra.mxu0 %v12431_v17 }
 0x52f   :  { %v5228_v27 = vld [vmem:[#allocation7 + $0x130] sm:$0x3f] }
 0x530   :  { %6654 = vmatmul.mubr.bf16.vlgmr.msra.gmra.mrb[60].mxu0 %v13882_v51  ;;  %v12460_v51 = vld [vmem:[%s15988_s9 + $0x84] ss:$8 sps:$4 sm:$0xff]  }
 0x531   :  { %6663 = vmatprep.mubr.bf16.mxu0 %v14800_v33  ;;  %v12458_v33 = vld [vmem:[%s15988_s9 + $0x80] ss:$8 sps:$4 sm:$0xff]   ;;  %7346 = vmatprep.subr.bf16.mxu1 %v12460_v51 }
 0x532   :  { %7347 = vmatpush1.bf16.msra.mxu1 %v12458_v33  ;;  %v5229_v39 = vld [vmem:[#allocation7 + $0x138] sm:$0x3f] }
 0x533   :  { %7348 = vmatprep.subr.bf16.mxu1 %v12463_v58 }
 0x536   :  { %7349 = vmatpush1.bf16.msra.mxu1 %v12461_v24 }
 0x538   :  { %6664 = vmatmul.mubr.bf16.gmra.mrb[64].mxu0 %v14824_v25  ;;  %v12466_v25 = vld [vmem:[%s15988_s9 + $0xa4] ss:$8 sps:$4 sm:$0xff]  }
 0x539   :  { %6673 = vmatprep.mubr.bf16.mxu0 %v14831_v13  ;;  %v12464_v13 = vld [vmem:[%s15988_s9 + $0xa0] ss:$8 sps:$4 sm:$0xff]   ;;  %7350 = vmatprep.subr.bf16.mxu1 %v12466_v25  ;;  %v12485_v25 = vld [vmem:[%s15988_s9 + $0x110] ss:$8 sps:$4 sm:$0xff]  }
 0x53a   :  { %7351 = vmatpush1.bf16.msra.mxu1 %v12464_v13 }
 0x53b   :  { %7352 = vmatprep.subr.bf16.mxu1 %v12469_v63 }
 0x53e   :  { %7353 = vmatpush1.bf16.msra.mxu1 %v12467_v56 }
 0x540   :  { %6674 = vmatmul.mubr.bf16.gmra.mrb[68].mxu0 %v14845_v54  ;;  %v12472_v54 = vld [vmem:[%s15988_s9 + $0xc4] ss:$8 sps:$4 sm:$0xff]  }
 0x541   :  { %6683 = vmatprep.mubr.bf16.mxu0 %v14852_v21  ;;  %7354 = vmatprep.subr.bf16.mxu1 %v12472_v54  ;;  %v12475_v21 = vld [vmem:[%s15988_s9 + $0xd4] ss:$8 sps:$4 sm:$0xff]   ;;  %v12490_v54 = vld [vmem:[%s15988_s9 + $0x124] ss:$8 sps:$4 sm:$0xff]  }
 0x542   :  { %7355 = vmatpush1.bf16.msra.mxu1 %v12470_v43 }
 0x543   :  { %7356 = vmatprep.subr.bf16.mxu1 %v12475_v21 }
 0x546   :  { %7357 = vmatpush1.bf16.msra.mxu1 %v12473_v16 }
 0x547   :  { %7358 = vmatprep.subr.bf16.mxu1 %v12478_v6 }
 0x548   :  { %6684 = vmatmul.mubr.bf16.gmra.mrb[72].mxu0 %v14866_v2 }
 0x549   :  { %6693 = vmatprep.mubr.bf16.mxu0 %v14870_v41 }
 0x54a   :  { %7359 = vmatpush1.bf16.msra.mxu1 %v12476_v31 }
 0x54b   :  { %7360 = vmatprep.subr.bf16.mxu1 %v12481_v60  ;;  %v12488_v60 = vld [vmem:[%s15988_s9 + $0x120] ss:$8 sps:$4 sm:$0xff]  }
 0x54e   :  { %7361 = vmatpush1.bf16.msra.mxu1 %v12479_v59 }
 0x54f   :  { %7413 = vmatprep.subr.bf16.mxu1 %v12484_v53  ;;  %v12493_v53 = vld [vmem:[%s15988_s9 + $0x134] ss:$8 sps:$4 sm:$0xff]  }
 0x550   :  { %6694 = vmatmul.mubr.bf16.gmra.mrb[108].mxu0 %v14886_v15 }
 0x551   :  { %9285 = vmatprep.mubr.f32.mxu0 %v12633_v0 }
 0x563   :  { %v5853_v2 = vpop.f32.mrb[96].mxu0 }
 0x564   :  { %v15021_v5 = vadd.f32 %v5853_v2, %v14755_v35  ;;  %v5855_v41 = vpop.f32.mrb[97].mxu0 }
 0x565   :  { %v15024_v8 = vadd.f32 %v5855_v41, %v14758_v48  ;;  %v5857_v46 = vpop.f32.mrb[98].mxu0 }
 0x566   :  { %v5981_v12 = vadd.f32 %v5857_v46, %v5226_v29  ;;  %v5859_v15 = vpop.f32.mrb[99].mxu0 }
 0x567   :  { %v5982_v19 = vadd.f32 %v5859_v15, %v5227_v38  ;;  %v12491_v38 = vld [vmem:[%s15988_s9 + $0x130] ss:$8 sps:$4 sm:$0xff]  }
 0x568   :  { %6021 = vst [vmem:[#allocation7 + $0x120] sm:$0x3f] %v5981_v12 }
 0x569   :  { %6022 = vst [vmem:[#allocation7 + $0x128] sm:$0x3f] %v5982_v19 }
 0x5a3   :  { %v5936_v3 = vpop.f32.mrb[100].mxu0 }
 0x5a4   :  { %v15027_v14 = vadd.f32 %v5936_v3, %v14921_v50  ;;  %v5938_v37 = vpop.f32.mrb[101].mxu0  ;;  %v15043_v50 = vrot.slane %v15035_v47, %v13543_v62 }
 0x5a5   :  { %v15030_v35 = vadd.f32 %v5938_v37, %v14924_v11  ;;  %v5940_v7 = vpop.f32.mrb[102].mxu0  ;;  %v12496_v37 = vld [vmem:[%s15988_s9 + $0x144] ss:$8 sps:$4 sm:$0xff]  }
 0x5a6   :  { %v5983_v48 = vadd.f32 %v5940_v7, %v5228_v27  ;;  %v5942_v20 = vpop.f32.mrb[103].mxu0 }
 0x5a7   :  { %v5984_v34 = vadd.f32 %v5942_v20, %v5229_v39 }
 0x5a8   :  { %6023 = vst [vmem:[#allocation7 + $0x130] sm:$0x3f] %v5983_v48 }
 0x5a9   :  { %6024 = vst [vmem:[#allocation7 + $0x138] sm:$0x3f] %v5984_v34  ;;  %v12494_v34 = vld [vmem:[%s15988_s9 + $0x140] ss:$8 sps:$4 sm:$0xff]  }
 0x5c3   :  { %v6572_v18 = vpop.f32.mrb[40].mxu0 }
 0x5c4   :  { %v6574_v11 = vpop.f32.mrb[41].mxu0  ;;  %v6846_v40 = vadd.f32 %v15039_v26, %v6572_v18 }
 0x5c5   :  { %v6576_v42 = vpop.f32.mrb[42].mxu0  ;;  %v6847_v49 = vadd.f32 %v15043_v50, %v6574_v11  ;;  %v12499_v11 = vld [vmem:[%s15988_s9 + $0x154] ss:$8 sps:$4 sm:$0xff]  }
 0x5c6   :  { %v6578_v28 = vpop.f32.mrb[43].mxu0  ;;  %v6850_v9 = vadd.f32 %v15039_v26, %v6576_v42  ;;  %v6886_v45 = vmax.f32 %v6846_v40, 0.0 }
 0x5c7   :  { %v6851_v61 = vadd.f32 %v15043_v50, %v6578_v28  ;;  %v6887_v17 = vmax.f32 %v6847_v49, 0.0 }
 0x5c8   :  { %v6890_v1 = vmax.f32 %v6850_v9, 0.0 }
 0x5c9   :  { %v6891_v22 = vmax.f32 %v6851_v61, 0.0  ;;  %v12497_v61 = vld [vmem:[%s15988_s9 + $0x150] ss:$8 sps:$4 sm:$0xff]  }
 0x5ca   :  { %v6926_v57 = vpack.c.bf16 %v6890_v1, %v6886_v45 }
 0x5cb   :  { %v6582_v10 = vpop.f32.mrb[44].mxu0  ;;  %v6927_v36 = vpack.c.bf16 %v6891_v22, %v6887_v17  ;;  %v12502_v22 = vld [vmem:[%s15988_s9 + $0x164] ss:$8 sps:$4 sm:$0xff]  }
 0x5cc   :  { %v6584_v30 = vpop.f32.mrb[45].mxu0  ;;  %v6854_v44 = vadd.f32 %v15039_v26, %v6582_v10 }
 0x5cd   :  { %v6586_v51 = vpop.f32.mrb[46].mxu0  ;;  %7362 = vmatprep.mubr.bf16.mxu1 %v6927_v36  ;;  %v6855_v33 = vadd.f32 %v15043_v50, %v6584_v30 }
 0x5ce   :  { %v6588_v58 = vpop.f32.mrb[47].mxu0  ;;  %7363 = vmatmul.mubr.bf16.vlgmr.msra.gmra.mrb[96].mxu1 %v6926_v57  ;;  %v6858_v24 = vadd.f32 %v15039_v26, %v6586_v51  ;;  %v6894_v63 = vmax.f32 %v6854_v44, 0.0 }
 0x5cf   :  { %7414 = vmatpush1.bf16.msra.mxu1 %v12482_v23  ;;  %v6859_v13 = vadd.f32 %v15043_v50, %v6588_v58  ;;  %v6895_v43 = vmax.f32 %v6855_v33, 0.0  ;;  %v12505_v33 = vld [vmem:[%s15988_s9 + $0x174] ss:$8 sps:$4 sm:$0xff]  }
 0x5d0   :  { %7415 = vmatprep.subr.bf16.mxu1 %v12487_v52  ;;  %v6898_v56 = vmax.f32 %v6858_v24, 0.0  ;;  %v12500_v52 = vld [vmem:[%s15988_s9 + $0x160] ss:$8 sps:$4 sm:$0xff]   ;;  %v6061_v24 = vld [vmem:[#allocation7 + $0x120] sm:$0x3f] }
 0x5d1   :  { %v6899_v21 = vmax.f32 %v6859_v13, 0.0 }
 0x5d2   :  { %v6930_v16 = vpack.c.bf16 %v6898_v56, %v6894_v63  ;;  %v6062_v63 = vld [vmem:[#allocation7 + $0x128] sm:$0x3f] }
 0x5d3   :  { %v6592_v6 = vpop.f32.mrb[48].mxu0  ;;  %7416 = vmatpush1.bf16.msra.mxu1 %v12485_v25  ;;  %v6931_v31 = vpack.c.bf16 %v6899_v21, %v6895_v43  ;;  %v12508_v43 = vld [vmem:[%s15988_s9 + $0x184] ss:$8 sps:$4 sm:$0xff]   ;;  %v12511_v21 = vld [vmem:[%s15988_s9 + $0x194] ss:$8 sps:$4 sm:$0xff]  }
 0x5d4   :  { %v6594_v59 = vpop.f32.mrb[49].mxu0  ;;  %7417 = vmatprep.subr.bf16.mxu1 %v12490_v54  ;;  %v6862_v2 = vadd.f32 %v15039_v26, %v6592_v6 }
 0x5d5   :  { %v6596_v41 = vpop.f32.mrb[50].mxu0  ;;  %7372 = vmatprep.mubr.bf16.mxu1 %v6931_v31  ;;  %v6863_v29 = vadd.f32 %v15043_v50, %v6594_v59  ;;  %v12509_v31 = vld [vmem:[%s15988_s9 + $0x190] ss:$8 sps:$4 sm:$0xff]  }
 0x5d6   :  { %v6598_v46 = vpop.f32.mrb[51].mxu0  ;;  %7373 = vmatmul.mubr.bf16.gmra.mrb[100].mxu1 %v6930_v16  ;;  %v6866_v12 = vadd.f32 %v15039_v26, %v6596_v41  ;;  %v6902_v19 = vmax.f32 %v6862_v2, 0.0  ;;  %v12514_v2 = vld [vmem:[%s15988_s9 + $0x1a4] ss:$8 sps:$4 sm:$0xff]  }
 0x5d7   :  { %7418 = vmatpush1.bf16.msra.mxu1 %v12488_v60  ;;  %v6867_v15 = vadd.f32 %v15043_v50, %v6598_v46  ;;  %v6903_v27 = vmax.f32 %v6863_v29, 0.0 }
 0x5d8   :  { %7419 = vmatprep.subr.bf16.mxu1 %v12493_v53  ;;  %v6906_v3 = vmax.f32 %v6866_v12, 0.0 }
 0x5d9   :  { %v6907_v7 = vmax.f32 %v6867_v15, 0.0 }
 0x5da   :  { %v6934_v48 = vpack.c.bf16 %v6906_v3, %v6902_v19 }
 0x5db   :  { %v6602_v39 = vpop.f32.mrb[52].mxu0  ;;  %7420 = vmatpush1.bf16.msra.mxu1 %v12491_v38  ;;  %v6935_v20 = vpack.c.bf16 %v6907_v7, %v6903_v27  ;;  %v12512_v38 = vld [vmem:[%s15988_s9 + $0x1a0] ss:$8 sps:$4 sm:$0xff]   ;;  %v12523_v7 = vld [vmem:[%s15988_s9 + $0x1d4] ss:$8 sps:$4 sm:$0xff]  }
 0x5dc   :  { %v6604_v18 = vpop.f32.mrb[53].mxu0  ;;  %7421 = vmatprep.subr.bf16.mxu1 %v12496_v37  ;;  %v6870_v40 = vadd.f32 %v15039_v26, %v6602_v39  ;;  %v12520_v37 = vld [vmem:[%s15988_s9 + $0x1c4] ss:$8 sps:$4 sm:$0xff]   ;;  %v12518_v27 = vld [vmem:[%s15988_s9 + $0x1c0] ss:$8 sps:$4 sm:$0xff]   ;;  %v6840_v39 = vsub.s32 3, %v13530_v32 }
 0x5dd   :  { %v6606_v42 = vpop.f32.mrb[54].mxu0  ;;  %7382 = vmatprep.mubr.bf16.mxu1 %v6935_v20  ;;  %v6871_v49 = vadd.f32 %v15043_v50, %v6604_v18  ;;  %v12521_v20 = vld [vmem:[%s15988_s9 + $0x1d0] ss:$8 sps:$4 sm:$0xff]  }
 0x5de   :  { %v6608_v28 = vpop.f32.mrb[55].mxu0  ;;  %7383 = vmatmul.mubr.bf16.gmra.mrb[104].mxu1 %v6934_v48  ;;  %v6874_v9 = vadd.f32 %v15039_v26, %v6606_v42  ;;  %v6910_v1 = vmax.f32 %v6870_v40, 0.0  ;;  %v6836_v48 = vsub.s32 2, %v13530_v32  ;;  %v12524_v32 = vld [vmem:[%s15988_s9 + $0x1e0] ss:$8 sps:$4 sm:$0xff]  }
 0x5df   :  { %7422 = vmatpush1.bf16.msra.mxu1 %v12494_v34  ;;  %v6875_v45 = vadd.f32 %v15043_v50, %v6608_v28  ;;  %v6911_v57 = vmax.f32 %v6871_v49, 0.0  ;;  %v12526_v34 = vld [vmem:[%s15988_s9 + $0x1e4] ss:$8 sps:$4 sm:$0xff]   ;;  %v12529_v49 = vld [vmem:[%s15988_s9 + $0x1f4] ss:$8 sps:$4 sm:$0xff]  }
 0x5e0   :  { %7423 = vmatprep.subr.bf16.mxu1 %v12499_v11  ;;  %v6914_v17 = vmax.f32 %v6874_v9, 0.0  ;;  %v15154_v18 = vrot.slane %v15035_v47, %v6836_v48  ;;  %v15157_v11 = vrot.slane %v15035_v47, %v6840_v39 }
 0x5e1   :  { %v6915_v10 = vmax.f32 %v6875_v45, 0.0 }
 0x5e2   :  { %v6938_v36 = vpack.c.bf16 %v6914_v17, %v6910_v1  ;;  %v12527_v1 = vld [vmem:[%s15988_s9 + $0x1f0] ss:$8 sps:$4 sm:$0xff]  }
 0x5e3   :  { %v6612_v23 = vpop.f32.mrb[104].mxu0  ;;  %7424 = vmatpush1.bf16.msra.mxu1 %v12497_v61  ;;  %v6939_v30 = vpack.c.bf16 %v6915_v10, %v6911_v57 }
 0x5e4   :  { %v6736_v44 = vadd.f32 %v6612_v23, %v15021_v5  ;;  %v6614_v51 = vpop.f32.mrb[105].mxu0  ;;  %7425 = vmatprep.subr.bf16.mxu1 %v12502_v22  ;;  %v12503_v5 = vld [vmem:[%s15988_s9 + $0x170] ss:$8 sps:$4 sm:$0xff]  }
 0x5e5   :  { %v6737_v58 = vadd.f32 %v6614_v51, %v15024_v8  ;;  %v6616_v25 = vpop.f32.mrb[106].mxu0  ;;  %7392 = vmatprep.mubr.bf16.mxu1 %v6939_v30  ;;  %v12506_v8 = vld [vmem:[%s15988_s9 + $0x180] ss:$8 sps:$4 sm:$0xff]  }
 0x5e6   :  { %v6740_v13 = vadd.f32 %v6616_v25, %v6061_v24  ;;  %v6618_v56 = vpop.f32.mrb[107].mxu0  ;;  %7393 = vmatmul.mubr.bf16.gmra.mrb[108].mxu1 %v6938_v36  ;;  %v6878_v59 = vadd.f32 %v15039_v26, %v6736_v44 }
 0x5e7   :  { %v6741_v54 = vadd.f32 %v6618_v56, %v6062_v63  ;;  %7426 = vmatpush1.bf16.msra.mxu1 %v12500_v52  ;;  %v6879_v16 = vadd.f32 %v15043_v50, %v6737_v58 }
 0x5e8   :  { %6780 = vst [vmem:[#allocation7 + $0x120] sm:$0x3f] %v6740_v13  ;;  %7427 = vmatprep.subr.bf16.mxu1 %v12505_v33  ;;  %v6918_v15 = vmax.f32 %v6878_v59, 0.0 }
 0x5e9   :  { %6781 = vst [vmem:[#allocation7 + $0x128] sm:$0x3f] %v6741_v54  ;;  %v6919_v46 = vmax.f32 %v6879_v16, 0.0 }
 0x5eb   :  { %7428 = vmatpush1.bf16.msra.mxu1 %v12503_v5 }
 0x5ec   :  { %7429 = vmatprep.subr.bf16.mxu1 %v12508_v43 }
 0x5ef   :  { %7430 = vmatpush1.bf16.msra.mxu1 %v12506_v8  ;;  %v6820_v6 = vld [vmem:[#allocation7 + $0x120] sm:$0x3f] }
 0x5f0   :  { %v6821_v60 = vld [vmem:[#allocation7 + $0x128] sm:$0x3f]  ;;  %v6882_v53 = vadd.f32 %v15039_v26, %v6820_v6  ;;  %7431 = vmatprep.subr.bf16.mxu1 %v12511_v21 }
 0x5f1   :  { %v6883_v41 = vadd.f32 %v15043_v50, %v6821_v60  ;;  %v12517_v26 = vld [vmem:[%s15988_s9 + $0x1b4] ss:$8 sps:$4 sm:$0xff]   ;;  %v12515_v50 = vld [vmem:[%s15988_s9 + $0x1b0] ss:$8 sps:$4 sm:$0xff]  }
 0x5f2   :  { %v6922_v29 = vmax.f32 %v6882_v53, 0.0 }
 0x5f3   :  { %v6923_v12 = vmax.f32 %v6883_v41, 0.0  ;;  %7432 = vmatpush1.bf16.msra.mxu1 %v12509_v31 }
 0x5f4   :  { %7433 = vmatprep.subr.bf16.mxu1 %v12514_v2  ;;  %v6942_v3 = vpack.c.bf16 %v6922_v29, %v6918_v15 }
 0x5f5   :  { %v6943_v19 = vpack.c.bf16 %v6923_v12, %v6919_v46 }
 0x5f7   :  { %7402 = vmatprep.mubr.bf16.mxu1 %v6943_v19  ;;  %7434 = vmatpush1.bf16.msra.mxu1 %v12512_v38 }
 0x5f8   :  { %7403 = vmatmul.mubr.bf16.gmra.mrb[112].mxu1 %v6942_v3  ;;  %7435 = vmatprep.subr.bf16.mxu1 %v12517_v26 }
 0x5fb   :  { %7436 = vmatpush1.bf16.msra.mxu1 %v12515_v50 }
 0x5fc   :  { %7437 = vmatprep.subr.bf16.mxu1 %v12520_v37 }
 0x5ff   :  { %7438 = vmatpush1.bf16.msra.mxu1 %v12518_v27 }
 0x600   :  { %7439 = vmatprep.subr.bf16.mxu1 %v12523_v7 }
 0x603   :  { %v6655_v40 = vpop.f32.mrb[60].mxu0  ;;  %7440 = vmatpush1.bf16.msra.mxu1 %v12521_v20 }
 0x604   :  { %v6657_v42 = vpop.f32.mrb[61].mxu0  ;;  %7441 = vmatprep.subr.bf16.mxu1 %v12526_v34  ;;  %v6848_v28 = vadd.f32 %v15154_v18, %v6655_v40 }
 0x605   :  { %v6659_v9 = vpop.f32.mrb[62].mxu0  ;;  %v6849_v61 = vadd.f32 %v15157_v11, %v6657_v42 }
 0x606   :  { %v6661_v45 = vpop.f32.mrb[63].mxu0  ;;  %v6852_v47 = vadd.f32 %v15154_v18, %v6659_v9  ;;  %v6888_v22 = vmax.f32 %v6848_v28, 0.0 }
 0x607   :  { %7442 = vmatpush1.bf16.msra.mxu1 %v12524_v32  ;;  %v6853_v17 = vadd.f32 %v15157_v11, %v6661_v45  ;;  %v6889_v10 = vmax.f32 %v6849_v61, 0.0  ;;  %v6063_v45 = vld [vmem:[#allocation7 + $0x130] sm:$0x3f] }
 0x608   :  { %7443 = vmatprep.subr.bf16.mxu1 %v12529_v49  ;;  %v6892_v57 = vmax.f32 %v6852_v47, 0.0 }
 0x609   :  { %v6893_v36 = vmax.f32 %v6853_v17, 0.0  ;;  %v6064_v17 = vld [vmem:[#allocation7 + $0x138] sm:$0x3f] }
 0x60a   :  { %v6928_v23 = vpack.c.bf16 %v6892_v57, %v6888_v22 }
 0x60b   :  { %v6665_v30 = vpop.f32.mrb[64].mxu0  ;;  %7444 = vmatpush1.bf16.msra.mxu1 %v12527_v1  ;;  %v6929_v52 = vpack.c.bf16 %v6893_v36, %v6889_v10 }
 0x60c   :  { %v6667_v44 = vpop.f32.mrb[65].mxu0  ;;  %v6856_v51 = vadd.f32 %v15154_v18, %v6665_v30 }
 0x60d   :  { %v6669_v33 = vpop.f32.mrb[66].mxu0  ;;  %7445 = vmatprep.mubr.bf16.mxu1 %v6929_v52  ;;  %v6857_v58 = vadd.f32 %v15157_v11, %v6667_v44 }
 0x60e   :  { %v6671_v24 = vpop.f32.mrb[67].mxu0  ;;  %7446 = vmatmul.mubr.bf16.vlgmr.msra.gmra.mrb[96].mxu1 %v6928_v23  ;;  %v6860_v25 = vadd.f32 %v15154_v18, %v6669_v33  ;;  %v6896_v63 = vmax.f32 %v6856_v51, 0.0 }
 0x60f   :  { %v6861_v13 = vadd.f32 %v15157_v11, %v6671_v24  ;;  %v6897_v54 = vmax.f32 %v6857_v58, 0.0 }
 0x610   :  { %v6900_v56 = vmax.f32 %v6860_v25, 0.0  ;;  %v7496_v25 = vld [vmem:[%s15992_s10] sm:$0x3] }
 0x611   :  { %v6901_v5 = vmax.f32 %v6861_v13, 0.0  ;;  %v15201_v13 = vrot.slane %v7496_v25, %v13543_v62 }
 0x612   :  { %v6932_v43 = vpack.c.bf16 %v6900_v56, %v6896_v63 }
 0x613   :  { %v6675_v8 = vpop.f32.mrb[68].mxu0  ;;  %v6933_v21 = vpack.c.bf16 %v6901_v5, %v6897_v54 }
 0x614   :  { %v6677_v16 = vpop.f32.mrb[69].mxu0  ;;  %v6864_v6 = vadd.f32 %v15154_v18, %v6675_v8 }
 0x615   :  { %v6679_v31 = vpop.f32.mrb[70].mxu0  ;;  %7455 = vmatprep.mubr.bf16.mxu1 %v6933_v21  ;;  %v6865_v60 = vadd.f32 %v15157_v11, %v6677_v16 }
 0x616   :  { %v6681_v59 = vpop.f32.mrb[71].mxu0  ;;  %7456 = vmatmul.mubr.bf16.gmra.mrb[100].mxu1 %v6932_v43  ;;  %v6868_v53 = vadd.f32 %v15154_v18, %v6679_v31  ;;  %v6904_v41 = vmax.f32 %v6864_v6, 0.0 }
 0x617   :  { %v6869_v2 = vadd.f32 %v15157_v11, %v6681_v59  ;;  %v6905_v46 = vmax.f32 %v6865_v60, 0.0 }
 0x618   :  { %v6908_v29 = vmax.f32 %v6868_v53, 0.0 }
 0x619   :  { %v6909_v12 = vmax.f32 %v6869_v2, 0.0 }
 0x61a   :  { %v6936_v38 = vpack.c.bf16 %v6908_v29, %v6904_v41 }
 0x61b   :  { %v6685_v15 = vpop.f32.mrb[72].mxu0  ;;  %v6937_v26 = vpack.c.bf16 %v6909_v12, %v6905_v46 }
 0x61c   :  { %v6687_v19 = vpop.f32.mrb[73].mxu0  ;;  %v6872_v3 = vadd.f32 %v15154_v18, %v6685_v15 }
 0x61d   :  { %v6689_v50 = vpop.f32.mrb[74].mxu0  ;;  %7465 = vmatprep.mubr.bf16.mxu1 %v6937_v26  ;;  %v6873_v37 = vadd.f32 %v15157_v11, %v6687_v19 }
 0x61e   :  { %v6691_v27 = vpop.f32.mrb[75].mxu0  ;;  %7466 = vmatmul.mubr.bf16.gmra.mrb[104].mxu1 %v6936_v38  ;;  %v6876_v7 = vadd.f32 %v15154_v18, %v6689_v50  ;;  %v6912_v39 = vmax.f32 %v6872_v3, 0.0 }
 0x61f   :  { %v6877_v48 = vadd.f32 %v15157_v11, %v6691_v27  ;;  %v6913_v34 = vmax.f32 %v6873_v37, 0.0 }
 0x620   :  { %v6916_v20 = vmax.f32 %v6876_v7, 0.0 }
 0x621   :  { %v6917_v40 = vmax.f32 %v6877_v48, 0.0 }
 0x622   :  { %v6940_v32 = vpack.c.bf16 %v6916_v20, %v6912_v39 }
 0x623   :  { %v6695_v42 = vpop.f32.mrb[108].mxu0  ;;  %v6941_v49 = vpack.c.bf16 %v6917_v40, %v6913_v34 }
 0x624   :  { %v6738_v28 = vadd.f32 %v6695_v42, %v15027_v14  ;;  %v6697_v9 = vpop.f32.mrb[109].mxu0 }
 0x625   :  { %v6739_v61 = vadd.f32 %v6697_v9, %v15030_v35  ;;  %v6699_v47 = vpop.f32.mrb[110].mxu0  ;;  %7475 = vmatprep.mubr.bf16.mxu1 %v6941_v49 }
 0x626   :  { %v6742_v1 = vadd.f32 %v6699_v47, %v6063_v45  ;;  %v6701_v22 = vpop.f32.mrb[111].mxu0  ;;  %7476 = vmatmul.mubr.bf16.gmra.mrb[108].mxu1 %v6940_v32  ;;  %v6880_v30 = vadd.f32 %v15154_v18, %v6738_v28 }
 0x627   :  { %v6743_v57 = vadd.f32 %v6701_v22, %v6064_v17  ;;  %v6881_v10 = vadd.f32 %v15157_v11, %v6739_v61 }
 0x628   :  { %6782 = vst [vmem:[#allocation7 + $0x130] sm:$0x3f] %v6742_v1  ;;  %v6920_v33 = vmax.f32 %v6880_v30, 0.0 }
 0x629   :  { %6783 = vst [vmem:[#allocation7 + $0x138] sm:$0x3f] %v6743_v57  ;;  %v6921_v44 = vmax.f32 %v6881_v10, 0.0 }
 0x62f   :  { %v6822_v36 = vld [vmem:[#allocation7 + $0x130] sm:$0x3f] }
 0x630   :  { %v6823_v23 = vld [vmem:[#allocation7 + $0x138] sm:$0x3f]  ;;  %v6884_v14 = vadd.f32 %v15154_v18, %v6822_v36  ;;  %v7528_v18 = vld [vmem:[%s15993_s11] sm:$0x3] }
 0x631   :  { %v6885_v35 = vadd.f32 %v15157_v11, %v6823_v23  ;;  %v15198_v11 = vrot.slane %v7496_v25, %v13535_v55  ;;  %v15205_v54 = vrot.slane %v7528_v18, %v13535_v55  ;;  %v15209_v8 = vrot.slane %v7528_v18, %v13543_v62 }
 0x632   :  { %v6924_v52 = vmax.f32 %v6884_v14, 0.0 }
 0x633   :  { %v6925_v51 = vmax.f32 %v6885_v35, 0.0 }
 0x634   :  { %v6944_v24 = vpack.c.bf16 %v6924_v52, %v6920_v33 }
 0x635   :  { %v6945_v58 = vpack.c.bf16 %v6925_v51, %v6921_v44 }
 0x637   :  { %7485 = vmatprep.mubr.bf16.mxu1 %v6945_v58 }
 0x638   :  { %7486 = vmatmul.mubr.bf16.gmra.mrb[112].mxu1 %v6944_v24 }
 0x639   :  { %7647 = vmatprep.mubr.bf16.mxu1 %v12635_v4 }
 0x6e1   :  { %v7447_v63 = vpop.f32.mrb[96].mxu1 }
 0x6e2   :  { %v7508_v56 = vmul.f32 %v15198_v11, %v7447_v63  ;;  %v7449_v5 = vpop.f32.mrb[97].mxu1 }
 0x6e3   :  { %v7509_v43 = vmul.f32 %v15201_v13, %v7449_v5  ;;  %v7451_v21 = vpop.f32.mrb[98].mxu1 }
 0x6e4   :  { %v7510_v16 = vmul.f32 %v15198_v11, %v7451_v21  ;;  %v7453_v6 = vpop.f32.mrb[99].mxu1  ;;  %v7540_v60 = vadd.f32 %v15205_v54, %v7508_v56 }
 0x6e5   :  { %v7511_v31 = vmul.f32 %v15201_v13, %v7453_v6  ;;  %v7541_v53 = vadd.f32 %v15209_v8, %v7509_v43 }
 0x6e6   :  { %v7542_v59 = vadd.f32 %v15205_v54, %v7510_v16 }
 0x6e7   :  { %v7543_v2 = vadd.f32 %v15209_v8, %v7511_v31 }
 0x6e8   :  { %v7567_v41 = vpack.c.bf16 %v7542_v59, %v7540_v60 }
 0x6e9   :  { %v7457_v29 = vpop.f32.mrb[100].mxu1  ;;  %v7568_v46 = vpack.c.bf16 %v7543_v2, %v7541_v53 }
 0x6ea   :  { %v7512_v12 = vmul.f32 %v15198_v11, %v7457_v29  ;;  %v7459_v38 = vpop.f32.mrb[101].mxu1 }
 0x6eb   :  { %v7513_v15 = vmul.f32 %v15201_v13, %v7459_v38  ;;  %v7461_v26 = vpop.f32.mrb[102].mxu1  ;;  %7615 = vmatprep.subr.bf16.mxu1 %v7568_v46  ;;  %v12534_v46 = vld [vmem:[%s15991_s12 + $0x40] sm:$0xff]   ;;  %v12538_v38 = vld [vmem:[%s15991_s12 + $0x50] sm:$0xff]  }
 0x6ec   :  { %v7514_v19 = vmul.f32 %v15198_v11, %v7461_v26  ;;  %v7463_v3 = vpop.f32.mrb[103].mxu1  ;;  %7616 = vmatpush1.bf16.msra.mxu1 %v7567_v41  ;;  %v7544_v37 = vadd.f32 %v15205_v54, %v7512_v12  ;;  %v12539_v26 = vld [vmem:[%s15991_s12 + $0x10] sm:$0xff]  }
 0x6ed   :  { %v7515_v50 = vmul.f32 %v15201_v13, %v7463_v3  ;;  %v7545_v7 = vadd.f32 %v15209_v8, %v7513_v15  ;;  %v12531_v15 = vld [vmem:[%s15990_s20 + $0x8] sm:$0xff]   ;;  %v12541_v3 = vld [vmem:[%s15991_s12 + $0x18] sm:$0xff]  }
 0x6ee   :  { %v7546_v27 = vadd.f32 %v15205_v54, %v7514_v19  ;;  %v12540_v19 = vld [vmem:[%s15991_s12 + $0x58] sm:$0xff]  }
 0x6ef   :  { %v7547_v48 = vadd.f32 %v15209_v8, %v7515_v50  ;;  %v12532_v50 = vld [vmem:[%s15990_s20 + $0x10] sm:$0xff]  }
 0x6f0   :  { %v7569_v39 = vpack.c.bf16 %v7546_v27, %v7544_v37  ;;  %v12533_v37 = vld [vmem:[%s15990_s20 + $0x18] ss:$0 sps:$4 sm:$0x11]   ;;  %v12542_v27 = vld [vmem:[%s15991_s12 + $0x60] sm:$0xff]  }
 0x6f1   :  { %v7467_v20 = vpop.f32.mrb[104].mxu1  ;;  %v7570_v34 = vpack.c.bf16 %v7547_v48, %v7545_v7  ;;  %v12543_v7 = vld [vmem:[%s15991_s12 + $0x20] sm:$0xff]   ;;  %v12545_v48 = vld [vmem:[%s15991_s12 + $0x28] sm:$0xff]  }
 0x6f2   :  { %v7516_v40 = vmul.f32 %v15198_v11, %v7467_v20  ;;  %v7469_v32 = vpop.f32.mrb[105].mxu1  ;;  %v12547_v20 = vld [vmem:[%s15991_s12 + $0x30] sm:$0xff]  }
 0x6f3   :  { %v7517_v42 = vmul.f32 %v15201_v13, %v7469_v32  ;;  %v7471_v49 = vpop.f32.mrb[106].mxu1  ;;  %7617 = vmatprep.subr.bf16.mxu1 %v7570_v34  ;;  %v12548_v34 = vld [vmem:[%s15991_s12 + $0x78] sm:$0xff]   ;;  %v12550_v32 = vld [vmem:[%s15991_s12 + $0xc0] sm:$0xff]  }
 0x6f4   :  { %v7518_v28 = vmul.f32 %v15198_v11, %v7471_v49  ;;  %v7473_v9 = vpop.f32.mrb[107].mxu1  ;;  %7618 = vmatpush1.bf16.msra.mxu1 %v7569_v39  ;;  %v7548_v45 = vadd.f32 %v15205_v54, %v7516_v40  ;;  %v12546_v39 = vld [vmem:[%s15991_s12 + $0x70] sm:$0xff]   ;;  %v12549_v40 = vld [vmem:[%s15991_s12 + $0x38] sm:$0xff]  }
 0x6f5   :  { %v7519_v61 = vmul.f32 %v15201_v13, %v7473_v9  ;;  %v7549_v1 = vadd.f32 %v15209_v8, %v7517_v42 }
 0x6f6   :  { %v7550_v47 = vadd.f32 %v15205_v54, %v7518_v28 }
 0x6f7   :  { %v7551_v17 = vadd.f32 %v15209_v8, %v7519_v61 }
 0x6f8   :  { %v7571_v22 = vpack.c.bf16 %v7550_v47, %v7548_v45 }
 0x6f9   :  { %v7477_v57 = vpop.f32.mrb[108].mxu1  ;;  %v7572_v10 = vpack.c.bf16 %v7551_v17, %v7549_v1  ;;  %v12551_v17 = vld [vmem:[%s15991_s12 + $0x80] sm:$0xff]  }
 0x6fa   :  { %v7520_v36 = vmul.f32 %v15198_v11, %v7477_v57  ;;  %v7479_v23 = vpop.f32.mrb[109].mxu1 }
 0x6fb   :  { %v7521_v30 = vmul.f32 %v15201_v13, %v7479_v23  ;;  %v7481_v14 = vpop.f32.mrb[110].mxu1  ;;  %7619 = vmatprep.subr.bf16.mxu1 %v7572_v10 }
 0x6fc   :  { %v7522_v35 = vmul.f32 %v15198_v11, %v7481_v14  ;;  %v7483_v52 = vpop.f32.mrb[111].mxu1  ;;  %7620 = vmatpush1.bf16.msra.mxu1 %v7571_v22  ;;  %v7552_v51 = vadd.f32 %v15205_v54, %v7520_v36  ;;  %v12552_v22 = vld [vmem:[%s15991_s12 + $0xc8] sm:$0xff]  }
 0x6fd   :  { %v7523_v44 = vmul.f32 %v15201_v13, %v7483_v52  ;;  %v7553_v58 = vadd.f32 %v15209_v8, %v7521_v30  ;;  %v12553_v14 = vld [vmem:[%s15991_s12 + $0x88] sm:$0xff]  }
 0x6fe   :  { %v7554_v33 = vadd.f32 %v15205_v54, %v7522_v35  ;;  %v12554_v35 = vld [vmem:[%s15991_s12 + $0xd0] sm:$0xff]  }
 0x6ff   :  { %v7555_v24 = vadd.f32 %v15209_v8, %v7523_v44 }
 0x700   :  { %v7573_v25 = vpack.c.bf16 %v7554_v33, %v7552_v51 }
 0x701   :  { %v7574_v18 = vpack.c.bf16 %v7555_v24, %v7553_v58 }
 0x703   :  { %7621 = vmatprep.subr.bf16.mxu1 %v7574_v18 }
 0x704   :  { %7622 = vmatpush1.bf16.msra.mxu1 %v7573_v25 }
 0x70b   :  { %v7487_v63 = vpop.f32.mrb[112].mxu1 }
 0x70c   :  { %v7524_v56 = vmul.f32 %v15198_v11, %v7487_v63  ;;  %v7489_v5 = vpop.f32.mrb[113].mxu1 }
 0x70d   :  { %v7525_v43 = vmul.f32 %v15201_v13, %v7489_v5  ;;  %v7491_v21 = vpop.f32.mrb[114].mxu1 }
 0x70e   :  { %v7526_v16 = vmul.f32 %v15198_v11, %v7491_v21  ;;  %v7493_v6 = vpop.f32.mrb[115].mxu1  ;;  %v7556_v60 = vadd.f32 %v15205_v54, %v7524_v56  ;;  %v12530_v11 = vld [vmem:[%s15990_s20] sm:$0xff]  }
 0x70f   :  { %v7527_v31 = vmul.f32 %v15201_v13, %v7493_v6  ;;  %v7557_v53 = vadd.f32 %v15209_v8, %v7525_v43  ;;  %v12535_v13 = vld [vmem:[%s15991_s12] sm:$0xff]  }
 0x710   :  { %v7558_v59 = vadd.f32 %v15205_v54, %v7526_v16  ;;  %v12536_v54 = vld [vmem:[%s15991_s12 + $0x48] sm:$0xff]  }
 0x711   :  { %v7559_v2 = vadd.f32 %v15209_v8, %v7527_v31  ;;  %v12537_v8 = vld [vmem:[%s15991_s12 + $0x8] sm:$0xff]   ;;  %v12555_v31 = vld [vmem:[%s15991_s12 + $0x90] sm:$0xff]  }
 0x712   :  { %v7575_v41 = vpack.c.bf16 %v7558_v59, %v7556_v60 }
 0x713   :  { %v7576_v29 = vpack.c.bf16 %v7559_v2, %v7557_v53  ;;  %v12556_v53 = vld [vmem:[%s15991_s12 + $0xd8] sm:$0xff]  }
 0x714   :  { %v7610_v12 = vsel %vm511_vm3, %v7575_v41, 0 }
 0x715   :  { %10696 = vmatprep.subr.msk.bf16.mxu1 %vm511_vm3, %v7576_v29 }
 0x716   :  { %7624 = vmatpush1.bf16.msra.mxu1 %v7610_v12 }
 0x717   :  { %11030 = vmatprep.subr.bf16.mxu1 %v12534_v46 }
 0x719   :  { %10697 = vmatmul.mubr.msk.bf16.vlgmr.msra.gmra.mrb[116].mxu1 %vm7595_vm10, %v12530_v11 }
 0x71a   :  { %7657 = vmatprep.mubr.bf16.mxu1 %v12635_v4  ;;  %11031 = vmatpush3.bf16.msra.mxu1 %v12535_v13 }
 0x71b   :  { %11032 = vmatprep.subr.bf16.mxu1 %v12536_v54 }
 0x71e   :  { %11033 = vmatpush3.bf16.msra.mxu1 %v12537_v8 }
 0x71f   :  { %11034 = vmatprep.subr.bf16.mxu1 %v12538_v38 }
 0x721   :  { %10698 = vmatmul.mubr.msk.bf16.gmra.mrb[120].mxu1 %vm7595_vm10, %v12531_v15 }
 0x722   :  { %7667 = vmatprep.mubr.bf16.mxu1 %v12635_v4  ;;  %11035 = vmatpush3.bf16.msra.mxu1 %v12539_v26 }
 0x723   :  { %11036 = vmatprep.subr.bf16.mxu1 %v12540_v19 }
 0x726   :  { %11037 = vmatpush3.bf16.msra.mxu1 %v12541_v3 }
 0x727   :  { %11038 = vmatprep.subr.bf16.mxu1 %v12542_v27  ;;  %v12557_v27 = vld [vmem:[%s15991_s12 + $0x98] sm:$0xff]  }
 0x729   :  { %10699 = vmatmul.mubr.msk.bf16.gmra.mrb[124].mxu1 %vm7595_vm10, %v12532_v50 }
 0x72a   :  { %7677 = vmatprep.mubr.bf16.mxu1 %v12635_v4  ;;  %11039 = vmatpush3.bf16.msra.mxu1 %v12543_v7  ;;  %v12544_v4 = vld [vmem:[%s15991_s12 + $0x68] sm:$0xff]  }
 0x72b   :  { %11040 = vmatprep.subr.bf16.mxu1 %v12544_v4 }
 0x72e   :  { %11041 = vmatpush3.bf16.msra.mxu1 %v12545_v48 }
 0x72f   :  { %11042 = vmatprep.subr.bf16.mxu1 %v12546_v39 }
 0x731   :  { %10700 = vmatmul.mubr.msk.bf16.gmra.mrb[128].mxu1 %vm7595_vm10, %v12533_v37 }
 0x732   :  { %11043 = vmatpush3.bf16.msra.mxu1 %v12547_v20  ;;  %v12558_v20 = vld [vmem:[%s15991_s12 + $0xe0] sm:$0xff]  }
 0x733   :  { %11044 = vmatprep.subr.bf16.mxu1 %v12548_v34 }
 0x736   :  { %11045 = vmatpush3.bf16.msra.mxu1 %v12549_v40 }
 0x737   :  { %11064 = vmatprep.subr.bf16.mxu1 %v12550_v32 }
 0x7ec   :  { %v7649_v42 = vpop.f32.mrb[116].mxu1 }
 0x7ed   :  { %v7651_v49 = vpop.f32.mrb[117].mxu1 }
 0x7ee   :  { %v10983_v28 = vpack.c.bf16 %v7651_v49, %v7649_v42  ;;  %v7653_v9 = vpop.f32.mrb[118].mxu1 }
 0x7ef   :  { %v7655_v61 = vpop.f32.mrb[119].mxu1  ;;  %v12627_v47 = vpack.c.bf16 %v7653_v9, %v7649_v42 }
 0x7f0   :  { %7730 = vst [vmem:[#allocation4] sm:$0xff] %v10983_v28  ;;  %v15321_v45 = vpack.c.bf16 %v7655_v61, %v7653_v9  ;;  %v12628_v1 = vpack.c.bf16 %v7655_v61, %v7651_v49 }
 0x7f1   :  { %v8038_v36 = vshll.u32 %v12627_v47, 16  ;;  %v8036_v25 = vshrl.u32 %v12627_v47, 16 }
 0x7f2   :  { %7933 = vmatprep.mubr.bf16.mxu1 %v12628_v1  ;;  %v8050_v10 = vshll.u32 %v12628_v1, 16  ;;  %v8048_v33 = vshrl.u32 %v12628_v1, 16 }
 0x7f3   :  { %7934 = vmatmul.mubr.bf16.vlgmr.msra.gmra.mrb[132].mxu1 %v12627_v47  ;;  %v8040_v44 = vrot.slane %v8038_v36, 1  ;;  %v12560_v36 = vld [vmem:[%s15991_s12 + $0xe8] sm:$0xff]  }
 0x7f4   :  { %v7659_v57 = vpop.f32.mrb[120].mxu1  ;;  %11065 = vmatpush3.bf16.msra.mxu1 %v12551_v17  ;;  %v8052_v52 = vrot.slane %v8050_v10, 1  ;;  %v12559_v17 = vld [vmem:[%s15991_s12 + $0xa0] sm:$0xff]  }
 0x7f5   :  { %v7661_v23 = vpop.f32.mrb[121].mxu1  ;;  %11066 = vmatprep.subr.bf16.mxu1 %v12552_v22  ;;  %v8041_v60 = vor.u32 %v8040_v44, %v8036_v25 }
 0x7f6   :  { %v7663_v30 = vpop.f32.mrb[122].mxu1  ;;  %v8053_v56 = vor.u32 %v8052_v52, %v8048_v33 }
 0x7f7   :  { %v7665_v51 = vpop.f32.mrb[123].mxu1  ;;  %v8258_v58 = vld [vmem:[#allocation4] sm:$0xee]  ;;  %v15345_v6 = vpack.c.bf16 %v7663_v30, %v7659_v57 }
 0x7f8   :  { %v8508_v24 = vld [vmem:[#allocation4] sm:$0xee]  ;;  %v10816_v18 = vcombine.low %v8258_v58, %v15321_v45  ;;  %v10817_v5 = vcombine.high %v8258_v58, %v15321_v45  ;;  %11067 = vmatpush3.bf16.msra.mxu1 %v12553_v14  ;;  %v15343_v16 = vpack.c.bf16 %v7665_v51, %v7661_v23 }
 0x7f9   :  { %v15336_v63 = vld [vmem:[#allocation4] sm:$0xcc]  ;;  %v15340_v43 = vcombine.low %v8508_v24, %v15321_v45  ;;  %v10871_v21 = vcombine.high %v8508_v24, %v15321_v45  ;;  %11068 = vmatprep.subr.bf16.mxu1 %v12554_v35  ;;  %v8043_v13 = vshll.u32 %v15345_v6, 16  ;;  %v8322_v15 = vrot.slane %v15345_v6, 1 }
 0x7fa   :  { %v10926_v59 = vcombine.low %v15336_v63, %v15321_v45  ;;  %v8321_v2 = vrot.slane %v10816_v18, 1  ;;  %v10927_v46 = vcombine.high %v15336_v63, %v15321_v45  ;;  %7941 = vmatprep.mubr.bf16.mxu1 %v15343_v16  ;;  %v8055_v11 = vshll.u32 %v15343_v16, 16 }
 0x7fb   :  { %v8595_v41 = vshrl.u32 %v10871_v21, 16  ;;  %v8598_v29 = vshll.u32 %v10871_v21, 16  ;;  %v8324_v54 = vrot.slane %v10817_v5, 1  ;;  %v8578_v8 = vshrl.u32 %v15340_v43, 16  ;;  %7942 = vmatmul.mubr.bf16.gmra.mrb[136].mxu1 %v15345_v6 }
 0x7fc   :  { %v7669_v12 = vpop.f32.mrb[124].mxu1  ;;  %v8325_v26 = vrot.slane %v15343_v16, 1  ;;  %11069 = vmatpush3.bf16.msra.mxu1 %v12555_v31  ;;  %v8057_v7 = vrot.slane %v8055_v11, 1  ;;  %v8045_v4 = vrot.slane %v8043_v13, 1  ;;  %v8603_v48 = vshrl.u32 %v15343_v16, 16 }
 0x7fd   :  { %v7671_v38 = vpop.f32.mrb[125].mxu1  ;;  %v8597_v19 = vrot.slane %v8595_v41, 1  ;;  %v8600_v3 = vrot.slane %v8598_v29, 2  ;;  %11070 = vmatprep.subr.bf16.mxu1 %v12556_v53  ;;  %v15377_v40 = vsel %vm511_vm3, %v8321_v2, %v8322_v15  ;;  %v8059_v28 = vshrl.u32 %v15345_v6, 16  ;;  %v12562_v2 = vld [vmem:[%s15991_s12 + $0xf0] sm:$0xff]  }
 0x7fe   :  { %v15364_v50 = vpack.c.bf16 %v7671_v38, %v7669_v12  ;;  %v7673_v37 = vpop.f32.mrb[126].mxu1  ;;  %v15374_v34 = vsel %vm511_vm3, %v8324_v54, %v8325_v26  ;;  %v15380_v42 = vsel %vm294_vm4, %v8053_v56, %v8057_v7  ;;  %v15383_v49 = vsel %vm294_vm4, %v8041_v60, %v8045_v4 }
 0x7ff   :  { %v7675_v39 = vpop.f32.mrb[127].mxu1  ;;  %v8069_v9 = vor.u32 %v8603_v48, %v8057_v7  ;;  %v8601_v61 = vor.u32 %v8600_v3, %v8597_v19  ;;  %v8605_v47 = vrot.slane %v8603_v48, 1  ;;  %v8608_v1 = vrot.slane %v8055_v11, 2 }
 0x800   :  { %v10988_v32 = vpack.c.bf16 %v7675_v39, %v7673_v37  ;;  %11071 = vmatpush3.bf16.msra.mxu1 %v12557_v27  ;;  %v15389_v22 = vpack.c.bf16 %v7675_v39, %v7671_v38  ;;  %v15391_v57 = vpack.c.bf16 %v7673_v37, %v7669_v12  ;;  %v8581_v10 = vshll.u32 %v15340_v43, 16  ;;  %v12561_v43 = vld [vmem:[%s15991_s12 + $0xa8] sm:$0xff]   ;;  %v12564_v39 = vld [vmem:[%s15991_s12 + $0xf8] sm:$0xff]  }
 0x801   :  { %11072 = vmatprep.subr.bf16.mxu1 %v12558_v20  ;;  %v8061_v23 = vor.u32 %v8059_v28, %v8045_v4  ;;  %v8609_v30 = vor.u32 %v8608_v1, %v8605_v47  ;;  %v8580_v14 = vrot.slane %v8578_v8, 1  ;;  %v8588_v60 = vrot.slane %v8059_v28, 1  ;;  %v12563_v4 = vld [vmem:[%s15991_s12 + $0xb0] sm:$0xff]  }
 0x802   :  { %7735 = vst [vmem:[#allocation4 + $0x28] sm:$0xff] %v10988_v32  ;;  %v8071_v52 = vshll.u32 %v15389_v22, 16  ;;  %v8063_v44 = vshll.u32 %v15391_v57, 16  ;;  %v8078_v51 = vshrl.u32 %v15389_v22, 16  ;;  %v8075_v33 = vshrl.u32 %v15391_v57, 16 }
 0x803   :  { %v8329_v24 = vrot.slane %v15389_v22, 1  ;;  %v8327_v25 = vrot.slane %v15391_v57, 1  ;;  %v15404_v18 = vsel %vm702_vm6, %v8601_v61, %v8609_v30  ;;  %v8583_v56 = vrot.slane %v8581_v10, 2  ;;  %v12567_v10 = vld [vmem:[%s15991_s12 + $0x100] sm:$0xff]  }
 0x804   :  { %v7679_v35 = vpop.f32.mrb[128].mxu1  ;;  %11073 = vmatpush3.bf16.msra.mxu1 %v12559_v17  ;;  %v8073_v21 = vrot.slane %v8071_v52, 1  ;;  %v15409_v31 = vrot.slane %v8063_v44, 1  ;;  %v8591_v12 = vrot.slane %v8043_v13, 2  ;;  %v8886_v54 = vrot.slane %v15345_v6, 2 }
 0x805   :  { %v7681_v58 = vpop.f32.mrb[129].mxu1  ;;  %11074 = vmatprep.subr.bf16.mxu1 %v12560_v36  ;;  %v15417_v41 = vsel %vm511_vm3, %v8325_v26, %v8329_v24  ;;  %v15422_v29 = vsel %vm511_vm3, %v8322_v15, %v8327_v25  ;;  %v8584_v19 = vor.u32 %v8583_v56, %v8580_v14  ;;  %v8885_v26 = vrot.slane %v10926_v59, 2  ;;  %v12568_v36 = vld [vmem:[%s15991_s12 + $0x148] sm:$0xff]   ;;  %v12571_v14 = vld [vmem:[%s15991_s12 + $0x110] sm:$0xff]  }
 0x806   :  { %v10989_v5 = vpack.c.bf16 %v7681_v58, %v7679_v35  ;;  %v7683_v53 = vpop.f32.mrb[130].mxu1  ;;  %v8074_v8 = vsel %vm294_vm4, %v8069_v9, %v8073_v21  ;;  %v8066_v38 = vsel %vm294_vm4, %v8061_v23, %v15409_v31  ;;  %v8592_v37 = vor.u32 %v8591_v12, %v8588_v60  ;;  %v12569_v23 = vld [vmem:[%s15991_s12 + $0x108] sm:$0xff]   ;;  %v12575_v58 = vld [vmem:[%s15991_s12 + $0x120] sm:$0xff]   ;;  %v12586_v12 = vld [vmem:[%s15991_s12 + $0x1d0] sm:$0xff]  }
 0x807   :  { %v7684_v11 = vpop.f32.mrb[131].mxu1  ;;  %v8623_v15 = vrot.slane %v8078_v51, 1  ;;  %v8626_v13 = vrot.slane %v8071_v52, 2  ;;  %v8614_v6 = vrot.slane %v8075_v33, 1  ;;  %v8617_v48 = vrot.slane %v8063_v44, 2  ;;  %v12573_v52 = vld [vmem:[%s15991_s12 + $0x118] sm:$0xff]  }
 0x808   :  { %7736 = vst [vmem:[#allocation4 + $0x30] sm:$0x11] %v10989_v5  ;;  %11075 = vmatpush3.bf16.msra.mxu1 %v12561_v43  ;;  %v8888_v59 = vrot.slane %v10927_v46, 2  ;;  %v15447_v20 = vsel %vm702_vm6, %v8584_v19, %v8592_v37  ;;  %v15453_v28 = vsel %vm933_vm5, %v8885_v26, %v8886_v54  ;;  %v8893_v45 = vrot.slane %v15389_v22, 2  ;;  %v12574_v44 = vld [vmem:[%s15991_s12 + $0x160] sm:$0xff]   ;;  %v12576_v56 = vld [vmem:[%s15991_s12 + $0x168] sm:$0xff]  }
 0x809   :  { %v7742_v3 = vld [vmem:[#allocation4 + $0x28] sm:$0x77]  ;;  %11076 = vmatprep.subr.bf16.mxu1 %v12562_v2  ;;  %v15449_v32 = vor.u32 %v8626_v13, %v8623_v15  ;;  %v15455_v9 = vor.u32 %v8617_v48, %v8614_v6  ;;  %v8891_v63 = vrot.slane %v15391_v57, 2  ;;  %v8080_v35 = vor.u32 %v8078_v51, %v8073_v21  ;;  %v12580_v21 = vld [vmem:[%s15991_s12 + $0x178] sm:$0xff]   ;;  %v12583_v60 = vld [vmem:[%s15991_s12 + $0x180] sm:$0xff]  }
 0x80a   :  { %v10713_v27 = vcombine.high %v15364_v50, %v7742_v3  ;;  %v10712_v7 = vcombine.low %v15364_v50, %v7742_v3  ;;  %v8889_v50 = vrot.slane %v15343_v16, 2  ;;  %v12565_v16 = vld [vmem:[%s15991_s12 + $0xb8] sm:$0xff]   ;;  %v8077_v51 = vor.u32 %v8075_v33, %v15409_v31  ;;  %v12577_v5 = vld [vmem:[%s15991_s12 + $0x128] sm:$0xff]   ;;  %v12578_v43 = vld [vmem:[%s15991_s12 + $0x170] sm:$0xff]  }
 0x80b   :  { %v15461_v46 = vsel %vm702_vm6, %v8609_v30, %v15449_v32  ;;  %v15472_v47 = vsel %vm702_vm6, %v8592_v37, %v15455_v9  ;;  %v15482_v17 = vsel %vm933_vm5, %v8886_v54, %v8891_v63  ;;  %v12570_v30 = vld [vmem:[%s15991_s12 + $0x150] sm:$0xff]   ;;  %v12582_v31 = vld [vmem:[%s15991_s12 + $0x1c0] sm:$0xff]   ;;  %v12584_v53 = vld [vmem:[%s15991_s12 + $0x1c8] sm:$0xff]  }
 0x80c   :  { %7949 = vmatprep.mubr.bf16.mxu1 %v10713_v27  ;;  %v15464_v61 = vsel %vm933_vm5, %v8888_v59, %v8889_v50  ;;  %11077 = vmatpush3.bf16.msra.mxu1 %v12563_v4  ;;  %v15477_v1 = vsel %vm933_vm5, %v8889_v50, %v8893_v45  ;;  %v12579_v33 = vld [vmem:[%s15991_s12 + $0x130] sm:$0xff]   ;;  %v12585_v2 = vld [vmem:[%s15991_s12 + $0x188] sm:$0xff]   ;;  %v12590_v54 = vld [vmem:[%s15991_s12 + $0x1e0] sm:$0xff]  }
 0x80d   :  { %7950 = vmatmul.mubr.bf16.gmra.mrb[140].mxu1 %v10712_v7  ;;  %11078 = vmatprep.subr.bf16.mxu1 %v12564_v39  ;;  %v12587_v11 = vld [vmem:[%s15991_s12 + $0x190] sm:$0xff]   ;;  %v12598_v3 = vld [vmem:[%s15991_s12 + $0x240] sm:$0xff]   ;;  %v12600_v13 = vld [vmem:[%s15991_s12 + $0x248] sm:$0xff]  }
 0x80e   :  { %8215 = vmatprep.mubr.bf16.mxu1 %v15380_v42  ;;  %v12566_v42 = vld [vmem:[%s15991_s12 + $0x140] sm:$0xff]   ;;  %v12595_v19 = vld [vmem:[%s15991_s12 + $0x1b0] sm:$0xff]   ;;  %v12601_v27 = vld [vmem:[%s15991_s12 + $0x208] sm:$0xff]  }
 0x80f   :  { %v8514_v26 = vld [vmem:[#allocation4 + $0x30] sm:$0x11]  ;;  %v12599_v15 = vld [vmem:[%s15991_s12 + $0x200] sm:$0xff]  }
 0x810   :  { %11079 = vmatpush3.bf16.msra.mxu1 %v12565_v16  ;;  %v10877_v37 = vcombine.high %v8514_v26, %v8514_v26  ;;  %v12602_v7 = vld [vmem:[%s15991_s12 + $0x250] sm:$0xff]   ;;  %v10876_v4 = vcombine.low %v8514_v26, %v8514_v26  ;;  %v12605_v39 = vld [vmem:[%s15991_s12 + $0x258] sm:$0xff]   ;;  %v12608_v16 = vld [vmem:[%s15991_s12 + $0x260] sm:$0xff]  }
 0x811   :  { %11098 = vmatprep.subr.bf16.mxu1 %v12566_v42  ;;  %v12604_v59 = vld [vmem:[%s15991_s12 + $0x210] sm:$0xff]   ;;  %v9095_v26 = vld [vmem:[%s15994_s21] sm:$0xff] }
 0x812   :  { %v8635_v6 = vshll.u32 %v10877_v37, 16 }
 0x814   :  { %v8637_v48 = vrot.slane %v8635_v6, 2 }
 0x815   :  { %8216 = vmatmul.mubr.bf16.vlgmr.msra.gmra.mrb[144].mxu1 %v15383_v49  ;;  %v12572_v49 = vld [vmem:[%s15991_s12 + $0x158] sm:$0xff]  }
 0x816   :  { %8223 = vmatprep.mubr.bf16.mxu1 %v8074_v8  ;;  %11099 = vmatpush3.bf16.msra.mxu1 %v12567_v10  ;;  %v12591_v8 = vld [vmem:[%s15991_s12 + $0x1a0] sm:$0xff]   ;;  %v8638_v50 = vsel %vm702_vm6, %v15449_v32, %v8637_v48  ;;  %v12610_v32 = vld [vmem:[%s15991_s12 + $0x268] sm:$0xff]  }
 0x817   :  { %11100 = vmatprep.subr.bf16.mxu1 %v12568_v36  ;;  %v12611_v36 = vld [vmem:[%s15991_s12 + $0x228] sm:$0xff]  }
 0x81a   :  { %11101 = vmatpush3.bf16.msra.mxu1 %v12569_v23  ;;  %v12612_v23 = vld [vmem:[%s15991_s12 + $0x270] sm:$0xff]  }
 0x81b   :  { %11102 = vmatprep.subr.bf16.mxu1 %v12570_v30  ;;  %v12613_v30 = vld [vmem:[%s15991_s12 + $0x230] sm:$0xff]  }
 0x81d   :  { %8224 = vmatmul.mubr.bf16.gmra.mrb[148].mxu1 %v8066_v38  ;;  %v12594_v38 = vld [vmem:[%s15991_s12 + $0x1f0] sm:$0xff]  }
 0x81e   :  { %8231 = vmatprep.mubr.bf16.mxu1 %v8080_v35  ;;  %11103 = vmatpush3.bf16.msra.mxu1 %v12571_v14  ;;  %v8822_v14 = vld [vmem:[#allocation4 + $0x30] sm:$0x11] }
 0x81f   :  { %11104 = vmatprep.subr.bf16.mxu1 %v12572_v49  ;;  %v10933_v49 = vcombine.high %v8822_v14, %v8822_v14 }
 0x821   :  { %v8897_v35 = vrot.slane %v10933_v49, 2 }
 0x822   :  { %11105 = vmatpush3.bf16.msra.mxu1 %v12573_v52  ;;  %v10932_v52 = vcombine.low %v8822_v14, %v8822_v14  ;;  %v9209_v14 = vld [vmem:[%s15995_s14 + $0x38] sm:$0xff] }
 0x823   :  { %11106 = vmatprep.subr.bf16.mxu1 %v12574_v44  ;;  %v8898_v44 = vsel %vm933_vm5, %v8893_v45, %v8897_v35 }
 0x825   :  { %8232 = vmatmul.mubr.bf16.gmra.mrb[152].mxu1 %v8077_v51 }
 0x826   :  { %11107 = vmatpush3.bf16.msra.mxu1 %v12575_v58  ;;  %8465 = vmatprep.mubr.bf16.mxu1 %v15374_v34  ;;  %v12581_v34 = vld [vmem:[%s15991_s12 + $0x138] sm:$0xff]   ;;  %v8895_v58 = vrot.slane %v10932_v52, 2  ;;  %v9206_v52 = vld [vmem:[%s15995_s14 + $0x20] sm:$0xff] }
 0x827   :  { %11108 = vmatprep.subr.bf16.mxu1 %v12576_v56 }
 0x828   :  { %v8896_v51 = vsel %vm933_vm5, %v8891_v63, %v8895_v58  ;;  %v9208_v58 = vld [vmem:[%s15995_s14 + $0x30] sm:$0xff] }
 0x82a   :  { %11109 = vmatpush3.bf16.msra.mxu1 %v12577_v5 }
 0x82b   :  { %11110 = vmatprep.subr.bf16.mxu1 %v12578_v43 }
 0x82e   :  { %11111 = vmatpush3.bf16.msra.mxu1 %v12579_v33 }
 0x82f   :  { %11112 = vmatprep.subr.bf16.mxu1 %v12580_v21 }
 0x832   :  { %11113 = vmatpush3.bf16.msra.mxu1 %v12581_v34 }
 0x833   :  { %11132 = vmatprep.subr.bf16.mxu1 %v12582_v31 }
 0x835   :  { %8466 = vmatmul.mubr.bf16.vlgmr.msra.gmra.mrb[156].mxu1 %v15377_v40  ;;  %v12588_v40 = vld [vmem:[%s15991_s12 + $0x1d8] sm:$0xff]  }
 0x836   :  { %8473 = vmatprep.mubr.bf16.mxu1 %v15417_v41  ;;  %11133 = vmatpush3.bf16.msra.mxu1 %v12583_v60  ;;  %v12589_v41 = vld [vmem:[%s15991_s12 + $0x198] sm:$0xff]  }
 0x837   :  { %11134 = vmatprep.subr.bf16.mxu1 %v12584_v53 }
 0x83a   :  { %11135 = vmatpush3.bf16.msra.mxu1 %v12585_v2 }
 0x83b   :  { %11136 = vmatprep.subr.bf16.mxu1 %v12586_v12 }
 0x83d   :  { %8474 = vmatmul.mubr.bf16.gmra.mrb[160].mxu1 %v15422_v29  ;;  %v12593_v29 = vld [vmem:[%s15991_s12 + $0x1a8] sm:$0xff]  }
 0x83e   :  { %8481 = vmatprep.mubr.bf16.mxu1 %v8329_v24  ;;  %11137 = vmatpush3.bf16.msra.mxu1 %v12587_v11  ;;  %v12592_v24 = vld [vmem:[%s15991_s12 + $0x1e8] sm:$0xff]  }
 0x83f   :  { %11138 = vmatprep.subr.bf16.mxu1 %v12588_v40 }
 0x842   :  { %11139 = vmatpush3.bf16.msra.mxu1 %v12589_v41 }
 0x843   :  { %11140 = vmatprep.subr.bf16.mxu1 %v12590_v54 }
 0x845   :  { %8482 = vmatmul.mubr.bf16.gmra.mrb[164].mxu1 %v8327_v25  ;;  %v12596_v25 = vld [vmem:[%s15991_s12 + $0x1f8] sm:$0xff]  }
 0x846   :  { %11141 = vmatpush3.bf16.msra.mxu1 %v12591_v8  ;;  %8773 = vmatprep.mubr.bf16.mxu1 %v15404_v18  ;;  %v12597_v18 = vld [vmem:[%s15991_s12 + $0x1b8] sm:$0xff]  }
 0x847   :  { %11142 = vmatprep.subr.bf16.mxu1 %v12592_v24 }
 0x84a   :  { %11143 = vmatpush3.bf16.msra.mxu1 %v12593_v29 }
 0x84b   :  { %11144 = vmatprep.subr.bf16.mxu1 %v12594_v38 }
 0x84e   :  { %11145 = vmatpush3.bf16.msra.mxu1 %v12595_v19 }
 0x84f   :  { %11146 = vmatprep.subr.bf16.mxu1 %v12596_v25 }
 0x852   :  { %11147 = vmatpush3.bf16.msra.mxu1 %v12597_v18 }
 0x853   :  { %11166 = vmatprep.subr.bf16.mxu1 %v12598_v3 }
 0x855   :  { %8774 = vmatmul.mubr.bf16.vlgmr.msra.gmra.mrb[168].mxu1 %v15447_v20  ;;  %v8630_v20 = vshll.u32 %v10876_v4, 16 }
 0x856   :  { %8781 = vmatprep.mubr.bf16.mxu1 %v15461_v46  ;;  %11167 = vmatpush3.bf16.msra.mxu1 %v12599_v15  ;;  %v12606_v46 = vld [vmem:[%s15991_s12 + $0x218] sm:$0xff]  }
 0x857   :  { %11168 = vmatprep.subr.bf16.mxu1 %v12600_v13  ;;  %v8632_v42 = vrot.slane %v8630_v20, 2  ;;  %v9203_v20 = vld [vmem:[%s15995_s14 + $0x8] sm:$0xff] }
 0x859   :  { %v8633_v10 = vsel %vm702_vm6, %v15455_v9, %v8632_v42  ;;  %v12614_v9 = vld [vmem:[%s15991_s12 + $0x278] sm:$0xff]  }
 0x85a   :  { %11169 = vmatpush3.bf16.msra.mxu1 %v12601_v27 }
 0x85b   :  { %11170 = vmatprep.subr.bf16.mxu1 %v12602_v7 }
 0x85d   :  { %8782 = vmatmul.mubr.bf16.gmra.mrb[172].mxu1 %v15472_v47  ;;  %v12609_v47 = vld [vmem:[%s15991_s12 + $0x220] sm:$0xff]  }
 0x85e   :  { %8789 = vmatprep.mubr.bf16.mxu1 %v8638_v50  ;;  %11171 = vmatpush3.bf16.msra.mxu1 %v12604_v59  ;;  %v9205_v50 = vld [vmem:[%s15995_s14 + $0x18] sm:$0xff] }
 0x85f   :  { %11172 = vmatprep.subr.bf16.mxu1 %v12605_v39  ;;  %v11424_v42 = vpack.c.bf16 %v9205_v50, %v9203_v20 }
 0x861   :  { %11425 = vmatprep.subr.bf16.mxu0 %v11424_v42 }
 0x862   :  { %11173 = vmatpush3.bf16.msra.mxu1 %v12606_v46 }
 0x863   :  { %11174 = vmatprep.subr.bf16.mxu1 %v12608_v16 }
 0x865   :  { %8790 = vmatmul.mubr.bf16.gmra.mrb[176].mxu1 %v8633_v10 }
 0x866   :  { %11175 = vmatpush3.bf16.msra.mxu1 %v12609_v47  ;;  %9033 = vmatprep.mubr.bf16.mxu1 %v15464_v61  ;;  %v12615_v61 = vld [vmem:[%s15991_s12 + $0x238] sm:$0xff]   ;;  %v9202_v47 = vld [vmem:[%s15995_s14] sm:$0xff] }
 0x867   :  { %11176 = vmatprep.subr.bf16.mxu1 %v12610_v32 }
 0x86a   :  { %11177 = vmatpush3.bf16.msra.mxu1 %v12611_v36  ;;  %v9204_v36 = vld [vmem:[%s15995_s14 + $0x10] sm:$0xff] }
 0x86b   :  { %11178 = vmatprep.subr.bf16.mxu1 %v12612_v23 }
 0x86e   :  { %11179 = vmatpush3.bf16.msra.mxu1 %v12613_v30 }
 0x86f   :  { %11180 = vmatprep.subr.bf16.mxu1 %v12614_v9  ;;  %v11426_v9 = vpack.c.bf16 %v9204_v36, %v9202_v47 }
 0x871   :  { %11427 = vmatpush1.bf16.msra.mxu0 %v11426_v9 }
 0x872   :  { %11181 = vmatpush3.bf16.msra.mxu1 %v12615_v61  ;;  %v9207_v61 = vld [vmem:[%s15995_s14 + $0x28] sm:$0xff] }
 0x873   :  { %v11428_v35 = vpack.c.bf16 %v9209_v14, %v9207_v61 }
 0x875   :  { %9034 = vmatmul.mubr.bf16.vlgmr.msra.gmra.mrb[180].mxu1 %v15453_v28  ;;  %11429 = vmatprep.subr.bf16.mxu0 %v11428_v35 }
 0x876   :  { %9041 = vmatprep.mubr.bf16.mxu1 %v15477_v1 }
 0x87d   :  { %9042 = vmatmul.mubr.bf16.gmra.mrb[184].mxu1 %v15482_v17 }
 0x87e   :  { %9049 = vmatprep.mubr.bf16.mxu1 %v8898_v44 }
 0x885   :  { %9050 = vmatmul.mubr.bf16.gmra.mrb[188].mxu1 %v8896_v51  ;;  %v11430_v51 = vpack.c.bf16 %v9208_v58, %v9206_v52 }
 0x886   :  { %11369 = vmatprep.mubr.msk.f32.mxu1 %vm9099_vm13, %v9095_v26 }
 0x887   :  { %11431 = vmatpush1.bf16.msra.mxu0 %v11430_v51 }
 0x8c6   :  { %v11046_v56 = vpop.f32.mrb[132].mxu1 }
 0x8c7   :  { %v11047_v28 = vpop.f32.mrb[133].mxu1 }
 0x8c8   :  { %v11048_v5 = vadd.f32 %v11047_v28, %v11046_v56  ;;  %v11049_v1 = vpop.f32.mrb[134].mxu1  ;;  %v9211_v56 = vld [vmem:[%s15995_s14 + $0x48] sm:$0xff]  ;;  %v9213_v28 = vld [vmem:[%s15995_s14 + $0x58] sm:$0xff] }
 0x8c9   :  { %v11050_v43 = vpop.f32.mrb[135].mxu1 }
 0x8ca   :  { %7959 = vst.msk [vmem:[#allocation8] sm:$0xff] %vm7958_vm11, %v11048_v5  ;;  %v11051_v17 = vadd.f32 %v11050_v43, %v11049_v1  ;;  %v11432_v5 = vpack.c.bf16 %v9213_v28, %v9211_v56  ;;  %v9210_v1 = vld [vmem:[%s15995_s14 + $0x40] sm:$0xff]  ;;  %v9212_v43 = vld [vmem:[%s15995_s14 + $0x50] sm:$0xff] }
 0x8cc   :  { %7960 = vst.msk [vmem:[#allocation8 + $0x8] sm:$0xff] %vm7958_vm11, %v11051_v17  ;;  %v11434_v17 = vpack.c.bf16 %v9212_v43, %v9210_v1  ;;  %11433 = vmatprep.subr.bf16.mxu0 %v11432_v5 }
 0x8ce   :  { %v11052_v22 = vpop.f32.mrb[136].mxu1  ;;  %11435 = vmatpush1.bf16.msra.mxu0 %v11434_v17 }
 0x8cf   :  { %v11053_v45 = vpop.f32.mrb[137].mxu1 }
 0x8d0   :  { %v11054_v33 = vadd.f32 %v11053_v45, %v11052_v22  ;;  %v11055_v21 = vpop.f32.mrb[138].mxu1 }
 0x8d1   :  { %v11056_v34 = vpop.f32.mrb[139].mxu1  ;;  %v7966_v8 = vld [vmem:[#allocation8] sm:$0xff] }
 0x8d2   :  { %7961 = vst.msk [vmem:[#allocation8 + $0x10] sm:$0xff] %vm7958_vm11, %v11054_v33  ;;  %v11057_v57 = vadd.f32 %v11056_v34, %v11055_v21 }
 0x8d3   :  { %v7967_v19 = vld [vmem:[#allocation8 + $0x8] sm:$0xff] }
 0x8d4   :  { %7962 = vst.msk [vmem:[#allocation8 + $0x18] sm:$0xff] %vm7958_vm11, %v11057_v57 }
 0x8d9   :  { %v7968_v13 = vld [vmem:[#allocation8 + $0x10] sm:$0xff] }
 0x8db   :  { %v7969_v4 = vld [vmem:[#allocation8 + $0x18] sm:$0xff] }
 0x8e0   :  { %v11058_v63 = vpop.f32.mrb[140].mxu1 }
 0x8e1   :  { %v11059_v31 = vpop.f32.mrb[141].mxu1 }
 0x8e2   :  { %v11060_v60 = vadd.f32 %v11059_v31, %v11058_v63  ;;  %v11061_v53 = vpop.f32.mrb[142].mxu1 }
 0x8e3   :  { %v11062_v2 = vpop.f32.mrb[143].mxu1 }
 0x8e4   :  { %7963 = vst.msk [vmem:[#allocation8 + $0x20] sm:$0xff] %vm7958_vm11, %v11060_v60  ;;  %v11063_v12 = vadd.f32 %v11062_v2, %v11061_v53 }
 0x8e6   :  { %7965 = vst.msk [vmem:[#allocation8 + $0x28] sm:$0x3f] %vm7964_vm12, %v11063_v12 }
 0x8e8   :  { %v11080_v11 = vpop.f32.mrb[144].mxu1 }
 0x8e9   :  { %v11081_v40 = vpop.f32.mrb[145].mxu1 }
 0x8ea   :  { %v11082_v41 = vadd.f32 %v11081_v40, %v11080_v11  ;;  %v11083_v54 = vpop.f32.mrb[146].mxu1 }
 0x8eb   :  { %v11084_v24 = vpop.f32.mrb[147].mxu1  ;;  %v7970_v32 = vld [vmem:[#allocation8 + $0x20] sm:$0xff] }
 0x8ec   :  { %v8240_v29 = vadd.f32 %v11082_v41, %v7966_v8  ;;  %v11085_v38 = vadd.f32 %v11084_v24, %v11083_v54 }
 0x8ed   :  { %v7971_v49 = vld [vmem:[#allocation8 + $0x28] sm:$0x3f] }
 0x8ee   :  { %8246 = vst.msk [vmem:[#allocation8] sm:$0xff] %vm7958_vm11, %v8240_v29  ;;  %v8241_v25 = vadd.f32 %v11085_v38, %v7967_v19 }
 0x8f0   :  { %8247 = vst.msk [vmem:[#allocation8 + $0x8] sm:$0xff] %vm7958_vm11, %v8241_v25  ;;  %v11086_v18 = vpop.f32.mrb[148].mxu1 }
 0x8f1   :  { %v11087_v3 = vpop.f32.mrb[149].mxu1 }
 0x8f2   :  { %v11088_v37 = vadd.f32 %v11087_v3, %v11086_v18  ;;  %v11089_v15 = vpop.f32.mrb[150].mxu1 }
 0x8f3   :  { %v11090_v6 = vpop.f32.mrb[151].mxu1 }
 0x8f4   :  { %v8242_v27 = vadd.f32 %v11088_v37, %v7968_v13  ;;  %v11091_v7 = vadd.f32 %v11090_v6, %v11089_v15 }
 0x8f5   :  { %v8252_v34 = vld [vmem:[#allocation8] sm:$0xff] }
 0x8f6   :  { %8248 = vst.msk [vmem:[#allocation8 + $0x10] sm:$0xff] %vm7958_vm11, %v8242_v27  ;;  %v8243_v48 = vadd.f32 %v11091_v7, %v7969_v4 }
 0x8f7   :  { %v8253_v60 = vld [vmem:[#allocation8 + $0x8] sm:$0xff] }
 0x8f8   :  { %8249 = vst.msk [vmem:[#allocation8 + $0x18] sm:$0xff] %vm7958_vm11, %v8243_v48  ;;  %v11092_v59 = vpop.f32.mrb[152].mxu1 }
 0x8f9   :  { %v11093_v39 = vpop.f32.mrb[153].mxu1 }
 0x8fa   :  { %v11094_v46 = vadd.f32 %v11093_v39, %v11092_v59  ;;  %v11095_v16 = vpop.f32.mrb[154].mxu1 }
 0x8fb   :  { %v11096_v10 = vpop.f32.mrb[155].mxu1 }
 0x8fc   :  { %v8244_v23 = vadd.f32 %v11094_v46, %v7970_v32  ;;  %v11097_v30 = vadd.f32 %v11096_v10, %v11095_v16 }
 0x8fd   :  { %v8254_v41 = vld [vmem:[#allocation8 + $0x10] sm:$0xff] }
 0x8fe   :  { %8250 = vst.msk [vmem:[#allocation8 + $0x20] sm:$0xff] %vm7958_vm11, %v8244_v23  ;;  %v8245_v44 = vadd.f32 %v11097_v30, %v7971_v49 }
 0x8ff   :  { %v8255_v29 = vld [vmem:[#allocation8 + $0x18] sm:$0xff] }
 0x900   :  { %8251 = vst.msk [vmem:[#allocation8 + $0x28] sm:$0x3f] %vm7964_vm12, %v8245_v44 }
 0x905   :  { %v8256_v3 = vld [vmem:[#allocation8 + $0x20] sm:$0xff] }
 0x907   :  { %v8257_v6 = vld [vmem:[#allocation8 + $0x28] sm:$0x3f] }
 0x908   :  { %v11114_v22 = vpop.f32.mrb[156].mxu1 }
 0x909   :  { %v11115_v45 = vpop.f32.mrb[157].mxu1 }
 0x90a   :  { %v11116_v33 = vadd.f32 %v11115_v45, %v11114_v22  ;;  %v11117_v21 = vpop.f32.mrb[158].mxu1 }
 0x90b   :  { %v11118_v57 = vpop.f32.mrb[159].mxu1 }
 0x90c   :  { %v8490_v63 = vadd.f32 %v11116_v33, %v8252_v34  ;;  %v11119_v31 = vadd.f32 %v11118_v57, %v11117_v21 }
 0x90e   :  { %8496 = vst.msk [vmem:[#allocation8] sm:$0xff] %vm7958_vm11, %v8490_v63  ;;  %v8491_v53 = vadd.f32 %v11119_v31, %v8253_v60 }
 0x910   :  { %8497 = vst.msk [vmem:[#allocation8 + $0x8] sm:$0xff] %vm7958_vm11, %v8491_v53  ;;  %v11120_v2 = vpop.f32.mrb[160].mxu1 }
 0x911   :  { %v11121_v12 = vpop.f32.mrb[161].mxu1 }
 0x912   :  { %v11122_v11 = vadd.f32 %v11121_v12, %v11120_v2  ;;  %v11123_v40 = vpop.f32.mrb[162].mxu1 }
 0x913   :  { %v11124_v54 = vpop.f32.mrb[163].mxu1 }
 0x914   :  { %v8492_v8 = vadd.f32 %v11122_v11, %v8254_v41  ;;  %v11125_v24 = vadd.f32 %v11124_v54, %v11123_v40  ;;  %v10950_v54 = vld [vmem:[%s15996_s13] ss:$0 sm:$0xff] }
 0x915   :  { %v8502_v39 = vld [vmem:[#allocation8] sm:$0xff] }
 0x916   :  { %8498 = vst.msk [vmem:[#allocation8 + $0x10] sm:$0xff] %vm7958_vm11, %v8492_v8  ;;  %v8493_v38 = vadd.f32 %v11125_v24, %v8255_v29 }
 0x917   :  { %v8503_v16 = vld [vmem:[#allocation8 + $0x8] sm:$0xff] }
 0x918   :  { %8499 = vst.msk [vmem:[#allocation8 + $0x18] sm:$0xff] %vm7958_vm11, %v8493_v38  ;;  %v11126_v19 = vpop.f32.mrb[164].mxu1 }
 0x919   :  { %v11127_v25 = vpop.f32.mrb[165].mxu1 }
 0x91a   :  { %v11128_v18 = vadd.f32 %v11127_v25, %v11126_v19  ;;  %v11129_v26 = vpop.f32.mrb[166].mxu1 }
 0x91b   :  { %v11130_v37 = vpop.f32.mrb[167].mxu1 }
 0x91c   :  { %v8494_v15 = vadd.f32 %v11128_v18, %v8256_v3  ;;  %v11131_v13 = vadd.f32 %v11130_v37, %v11129_v26 }
 0x91d   :  { %v8504_v23 = vld [vmem:[#allocation8 + $0x10] sm:$0xff] }
 0x91e   :  { %8500 = vst.msk [vmem:[#allocation8 + $0x20] sm:$0xff] %vm7958_vm11, %v8494_v15  ;;  %v8495_v27 = vadd.f32 %v11131_v13, %v8257_v6 }
 0x91f   :  { %v8505_v14 = vld [vmem:[#allocation8 + $0x18] sm:$0xff] }
 0x920   :  { %8501 = vst.msk [vmem:[#allocation8 + $0x28] sm:$0x3f] %vm7964_vm12, %v8495_v27 }
 0x925   :  { %v8506_v51 = vld [vmem:[#allocation8 + $0x20] sm:$0xff] }
 0x927   :  { %v8507_v1 = vld [vmem:[#allocation8 + $0x28] sm:$0x3f] }
 0x928   :  { %v11148_v7 = vpop.f32.mrb[168].mxu1 }
 0x929   :  { %v11149_v4 = vpop.f32.mrb[169].mxu1 }
 0x92a   :  { %v11150_v48 = vadd.f32 %v11149_v4, %v11148_v7  ;;  %v11151_v59 = vpop.f32.mrb[170].mxu1 }
 0x92b   :  { %v11152_v20 = vpop.f32.mrb[171].mxu1 }
 0x92c   :  { %v8798_v50 = vadd.f32 %v11150_v48, %v8502_v39  ;;  %v11153_v46 = vadd.f32 %v11152_v20, %v11151_v59 }
 0x92e   :  { %8804 = vst.msk [vmem:[#allocation8] sm:$0xff] %vm7958_vm11, %v8798_v50  ;;  %v8799_v42 = vadd.f32 %v11153_v46, %v8503_v16 }
 0x930   :  { %8805 = vst.msk [vmem:[#allocation8 + $0x8] sm:$0xff] %vm7958_vm11, %v8799_v42  ;;  %v11154_v47 = vpop.f32.mrb[172].mxu1 }
 0x931   :  { %v11155_v32 = vpop.f32.mrb[173].mxu1 }
 0x932   :  { %v11156_v10 = vadd.f32 %v11155_v32, %v11154_v47  ;;  %v11157_v36 = vpop.f32.mrb[174].mxu1 }
 0x933   :  { %v11158_v30 = vpop.f32.mrb[175].mxu1 }
 0x934   :  { %v8800_v9 = vadd.f32 %v11156_v10, %v8504_v23  ;;  %v11159_v61 = vadd.f32 %v11158_v30, %v11157_v36 }
 0x935   :  { %v8810_v21 = vld [vmem:[#allocation8] sm:$0xff] }
 0x936   :  { %8806 = vst.msk [vmem:[#allocation8 + $0x10] sm:$0xff] %vm7958_vm11, %v8800_v9  ;;  %v8801_v49 = vadd.f32 %v11159_v61, %v8505_v14  ;;  %v9306_v14 = vld [vmem:[%s15995_s14 + $0x88] sm:$0xff] }
 0x937   :  { %v8811_v31 = vld [vmem:[#allocation8 + $0x8] sm:$0xff] }
 0x938   :  { %8807 = vst.msk [vmem:[#allocation8 + $0x18] sm:$0xff] %vm7958_vm11, %v8801_v49  ;;  %v11160_v35 = vpop.f32.mrb[176].mxu1  ;;  %v9308_v49 = vld [vmem:[%s15995_s14 + $0x98] sm:$0xff] }
 0x939   :  { %v11161_v52 = vpop.f32.mrb[177].mxu1 }
 0x93a   :  { %v11162_v44 = vadd.f32 %v11161_v52, %v11160_v35  ;;  %v11163_v58 = vpop.f32.mrb[178].mxu1 }
 0x93b   :  { %v11164_v56 = vpop.f32.mrb[179].mxu1 }
 0x93c   :  { %v8802_v28 = vadd.f32 %v11162_v44, %v8506_v51  ;;  %v11165_v5 = vadd.f32 %v11164_v56, %v11163_v58  ;;  %v11440_v58 = vpack.c.bf16 %v9308_v49, %v9306_v14  ;;  %v9305_v51 = vld [vmem:[%s15995_s14 + $0x80] sm:$0xff]  ;;  %v9307_v56 = vld [vmem:[%s15995_s14 + $0x90] sm:$0xff] }
 0x93d   :  { %v8812_v40 = vld [vmem:[#allocation8 + $0x10] sm:$0xff]  ;;  %v9411_v49 = vld [vmem:[%s15995_s14 + $0x170] sm:$0xff] }
 0x93e   :  { %8808 = vst.msk [vmem:[#allocation8 + $0x20] sm:$0xff] %vm7958_vm11, %v8802_v28  ;;  %v8803_v43 = vadd.f32 %v11165_v5, %v8507_v1  ;;  %v9310_v28 = vld [vmem:[%s15995_s14 + $0xa8] sm:$0xff]  ;;  %v9312_v5 = vld [vmem:[%s15995_s14 + $0xb8] sm:$0xff]  ;;  %v9409_v14 = vld [vmem:[%s15995_s14 + $0x160] sm:$0xff] }
 0x93f   :  { %v8813_v29 = vld [vmem:[#allocation8 + $0x18] sm:$0xff] }
 0x940   :  { %8809 = vst.msk [vmem:[#allocation8 + $0x28] sm:$0x3f] %vm7964_vm12, %v8803_v43  ;;  %v9096_v1 = vld [vmem:[%s15994_s21 + $0x8] sm:$0xff]  ;;  %v11442_v43 = vpack.c.bf16 %v9307_v56, %v9305_v51  ;;  %v9489_v51 = vld [vmem:[%s15995_s14 + $0x180] sm:$0xff]  ;;  %v9491_v56 = vld [vmem:[%s15995_s14 + $0x190] sm:$0xff] }
 0x945   :  { %v8814_v7 = vld [vmem:[#allocation8 + $0x20] sm:$0xff] }
 0x947   :  { %v8815_v20 = vld [vmem:[#allocation8 + $0x28] sm:$0x3f] }
 0x948   :  { %v11182_v17 = vpop.f32.mrb[180].mxu1 }
 0x949   :  { %v11183_v22 = vpop.f32.mrb[181].mxu1 }
 0x94a   :  { %v11184_v45 = vadd.f32 %v11183_v22, %v11182_v17  ;;  %v11185_v33 = vpop.f32.mrb[182].mxu1  ;;  %v9097_v17 = vld [vmem:[%s15994_s21 + $0x10] sm:$0xff]  ;;  %v11444_v22 = vpack.c.bf16 %v9312_v5, %v9310_v28  ;;  %v9494_v28 = vld [vmem:[%s15995_s14 + $0x1a8] sm:$0xff]  ;;  %v9496_v5 = vld [vmem:[%s15995_s14 + $0x1b8] sm:$0xff] }
 0x94b   :  { %v11186_v34 = vpop.f32.mrb[183].mxu1 }
 0x94c   :  { %v9058_v57 = vadd.f32 %v11184_v45, %v8810_v21  ;;  %v11187_v63 = vadd.f32 %v11186_v34, %v11185_v33  ;;  %v9309_v45 = vld [vmem:[%s15995_s14 + $0xa0] sm:$0xff]  ;;  %v9311_v33 = vld [vmem:[%s15995_s14 + $0xb0] sm:$0xff]  ;;  %v9314_v21 = vld [vmem:[%s15995_s14 + $0xc8] sm:$0xff] }
 0x94d   :  { %v9316_v34 = vld [vmem:[%s15995_s14 + $0xd8] sm:$0xff] }
 0x94e   :  { %9064 = vst.msk [vmem:[#allocation8] sm:$0xff] %vm7958_vm11, %v9058_v57  ;;  %v9059_v60 = vadd.f32 %v11187_v63, %v8811_v31  ;;  %v9098_v57 = vld [vmem:[%s15994_s21 + $0x18] sm:$0xff]  ;;  %v11446_v63 = vpack.c.bf16 %v9311_v33, %v9309_v45  ;;  %v11448_v31 = vpack.c.bf16 %v9316_v34, %v9314_v21  ;;  %v9498_v45 = vld [vmem:[%s15995_s14 + $0x1c8] sm:$0xff] }
 0x94f   :  { %v9500_v33 = vld [vmem:[%s15995_s14 + $0x1d8] sm:$0xff] }
 0x950   :  { %9065 = vst.msk [vmem:[#allocation8 + $0x8] sm:$0xff] %vm7958_vm11, %v9059_v60  ;;  %v11188_v53 = vpop.f32.mrb[184].mxu1  ;;  %v9313_v60 = vld [vmem:[%s15995_s14 + $0xc0] sm:$0xff]  ;;  %v11480_v34 = vpack.c.bf16 %v9500_v33, %v9498_v45 }
 0x951   :  { %v11189_v2 = vpop.f32.mrb[185].mxu1 }
 0x952   :  { %v11190_v12 = vadd.f32 %v11189_v2, %v11188_v53  ;;  %v11191_v11 = vpop.f32.mrb[186].mxu1  ;;  %v9315_v53 = vld [vmem:[%s15995_s14 + $0xd0] sm:$0xff]  ;;  %v9318_v2 = vld [vmem:[%s15995_s14 + $0xe8] sm:$0xff] }
 0x953   :  { %v11192_v41 = vpop.f32.mrb[187].mxu1 }
 0x954   :  { %v9060_v8 = vadd.f32 %v11190_v12, %v8812_v40  ;;  %v11193_v24 = vadd.f32 %v11192_v41, %v11191_v11  ;;  %v9320_v12 = vld [vmem:[%s15995_s14 + $0xf8] sm:$0xff]  ;;  %v11450_v11 = vpack.c.bf16 %v9315_v53, %v9313_v60  ;;  %v9317_v41 = vld [vmem:[%s15995_s14 + $0xe0] sm:$0xff] }
 0x955   :  { %v9070_v38 = vld [vmem:[#allocation8] sm:$0xff]  ;;  %v11452_v40 = vpack.c.bf16 %v9320_v12, %v9318_v2  ;;  %v9504_v60 = vld [vmem:[%s15995_s14 + $0x1f8] sm:$0xff]  ;;  %v9501_v12 = vld [vmem:[%s15995_s14 + $0x1e0] sm:$0xff] }
 0x956   :  { %9066 = vst.msk [vmem:[#allocation8 + $0x10] sm:$0xff] %vm7958_vm11, %v9060_v8  ;;  %v9061_v19 = vadd.f32 %v11193_v24, %v8813_v29  ;;  %v9083_v25 = vadd.f32 %v10950_v54, %v9070_v38  ;;  %v9398_v24 = vld [vmem:[%s15995_s14 + $0x108] sm:$0xff]  ;;  %v9400_v29 = vld [vmem:[%s15995_s14 + $0x118] sm:$0xff] }
 0x957   :  { %v9071_v18 = vld [vmem:[#allocation8 + $0x8] sm:$0xff]  ;;  %v9215_v38 = vld [vmem:[%s15995_s14 + $0x68] sm:$0xff] }
 0x958   :  { %9067 = vst.msk [vmem:[#allocation8 + $0x18] sm:$0xff] %vm7958_vm11, %v9061_v19  ;;  %v11194_v26 = vpop.f32.mrb[188].mxu1  ;;  %v9084_v3 = vadd.f32 %v10950_v54, %v9071_v18  ;;  %v9089_v6 = vmax.f32 %v9083_v25, 0.0  ;;  %v11456_v19 = vpack.c.bf16 %v9400_v29, %v9398_v24  ;;  %v9217_v25 = vld [vmem:[%s15995_s14 + $0x78] sm:$0xff]  ;;  %v9611_v24 = vld [vmem:[%s15997_s18 + $0x10] sm:$0xff] }
 0x959   :  { %v11195_v37 = vpop.f32.mrb[189].mxu1  ;;  %v11436_v18 = vpack.c.bf16 %v9217_v25, %v9215_v38  ;;  %v9612_v38 = vld [vmem:[%s15997_s18 + $0x18] sm:$0xff]  ;;  %v9614_v25 = vld [vmem:[%s15997_s18 + $0x28] sm:$0xff] }
 0x95a   :  { %v11196_v15 = vadd.f32 %v11195_v37, %v11194_v26  ;;  %v11197_v13 = vpop.f32.mrb[190].mxu1  ;;  %v9090_v27 = vmax.f32 %v9084_v3, 0.0  ;;  %v9214_v26 = vld [vmem:[%s15995_s14 + $0x60] sm:$0xff]  ;;  %v9216_v3 = vld [vmem:[%s15995_s14 + $0x70] sm:$0xff] }
 0x95b   :  { %v11198_v4 = vpop.f32.mrb[191].mxu1  ;;  %v11438_v37 = vpack.c.bf16 %v9216_v3, %v9214_v26  ;;  %11437 = vmatprep.subr.bf16.mxu0 %v11436_v18  ;;  %v9615_v26 = vld [vmem:[%s15997_s18 + $0x30] sm:$0xff]  ;;  %v9616_v3 = vld [vmem:[%s15997_s18 + $0x38] sm:$0xff] }
 0x95c   :  { %v9062_v48 = vadd.f32 %v11196_v15, %v8814_v7  ;;  %v11199_v59 = vadd.f32 %v11198_v4, %v11197_v13  ;;  %v11410_v39 = vpack.c.bf16 %v9090_v27, %v9089_v6  ;;  %v9397_v15 = vld [vmem:[%s15995_s14 + $0x100] sm:$0xff]  ;;  %v9399_v13 = vld [vmem:[%s15995_s14 + $0x110] sm:$0xff]  ;;  %v9402_v6 = vld [vmem:[%s15995_s14 + $0x128] sm:$0xff] }
 0x95d   :  { %v9072_v50 = vld [vmem:[#allocation8 + $0x10] sm:$0xff]  ;;  %11439 = vmatpush1.bf16.msra.mxu0 %v11438_v37  ;;  %v11458_v7 = vpack.c.bf16 %v9399_v13, %v9397_v15  ;;  %v11498_v37 = vpack.c.bf16 %v9616_v3, %v9615_v26  ;;  %v9618_v13 = vld [vmem:[%s15997_s18 + $0x48] sm:$0xff] }
 0x95e   :  { %9068 = vst.msk [vmem:[#allocation8 + $0x20] sm:$0xff] %vm7958_vm11, %v9062_v48  ;;  %v9063_v46 = vadd.f32 %v11199_v59, %v8815_v20  ;;  %11411 = vmatprep.subr.bf16.mxu1 %v11410_v39  ;;  %v9085_v16 = vadd.f32 %v10950_v54, %v9072_v50  ;;  %v9404_v27 = vld [vmem:[%s15995_s14 + $0x138] sm:$0xff]  ;;  %v9401_v48 = vld [vmem:[%s15995_s14 + $0x120] sm:$0xff]  ;;  %v9403_v59 = vld [vmem:[%s15995_s14 + $0x130] sm:$0xff] }
 0x95f   :  { %11413 = vmatpush3.bf16.msra.mxu1 %v11410_v39  ;;  %v9073_v42 = vld [vmem:[#allocation8 + $0x18] sm:$0xff]  ;;  %v11460_v4 = vpack.c.bf16 %v9404_v27, %v9402_v6  ;;  %v9408_v50 = vld [vmem:[%s15995_s14 + $0x158] sm:$0xff]  ;;  %v9619_v27 = vld [vmem:[%s15997_s18 + $0x50] sm:$0xff] }
 0x960   :  { %9069 = vst.msk [vmem:[#allocation8 + $0x28] sm:$0x3f] %vm7964_vm12, %v9063_v46  ;;  %v9086_v47 = vadd.f32 %v10950_v54, %v9073_v42  ;;  %v9091_v32 = vmax.f32 %v9085_v16, 0.0  ;;  %v9406_v20 = vld [vmem:[%s15995_s14 + $0x148] sm:$0xff]  ;;  %v11462_v16 = vpack.c.bf16 %v9403_v59, %v9401_v48  ;;  %v9617_v15 = vld [vmem:[%s15997_s18 + $0x40] sm:$0xff] }
 0x961   :  { %v11464_v42 = vpack.c.bf16 %v9408_v50, %v9406_v20  ;;  %v11501_v6 = vpack.c.bf16 %v9618_v13, %v9617_v15  ;;  %v9621_v48 = vld [vmem:[%s15997_s18 + $0x60] sm:$0xff]  ;;  %v9622_v59 = vld [vmem:[%s15997_s18 + $0x68] sm:$0xff]  ;;  %v9624_v50 = vld [vmem:[%s15997_s18 + $0x78] sm:$0xff] }
 0x962   :  { %v9092_v10 = vmax.f32 %v9086_v47, 0.0  ;;  %v9405_v47 = vld [vmem:[%s15995_s14 + $0x140] sm:$0xff]  ;;  %v11507_v20 = vpack.c.bf16 %v9622_v59, %v9621_v48 }
 0x964   :  { %v11414_v36 = vpack.c.bf16 %v9092_v10, %v9091_v32  ;;  %v9407_v32 = vld [vmem:[%s15995_s14 + $0x150] sm:$0xff]  ;;  %v9410_v10 = vld [vmem:[%s15995_s14 + $0x168] sm:$0xff] }
 0x965   :  { %v9074_v23 = vld [vmem:[#allocation8 + $0x20] sm:$0xff] }
 0x966   :  { %11415 = vmatprep.subr.bf16.mxu1 %v11414_v36  ;;  %v9087_v30 = vadd.f32 %v10950_v54, %v9074_v23 }
 0x967   :  { %11417 = vmatpush3.bf16.msra.mxu1 %v11414_v36  ;;  %v9075_v9 = vld [vmem:[#allocation8 + $0x28] sm:$0x3f] }
 0x968   :  { %v9088_v61 = vadd.f32 %v10950_v54, %v9075_v9  ;;  %v9093_v35 = vmax.f32 %v9087_v30, 0.0  ;;  %v9319_v54 = vld [vmem:[%s15995_s14 + $0xf0] sm:$0xff]  ;;  %v9412_v36 = vld [vmem:[%s15995_s14 + $0x178] sm:$0xff]  ;;  %v11466_v9 = vpack.c.bf16 %v9407_v32, %v9405_v47  ;;  %v9201_v47 = vld [vmem:[%s15998_s15] sm:$0x3] }
 0x969   :  { %v11454_v8 = vpack.c.bf16 %v9319_v54, %v9317_v41  ;;  %v12637_v41 = vmov 0.0|0.0   ;;  %v9609_v54 = vld [vmem:[%s15997_s18] sm:$0xff]  ;;  %v9296_v32 = vrot.slane %v9201_v47, %v13535_v55 }
 0x96a   :  { %v9094_v52 = vmax.f32 %v9088_v61, 0.0  ;;  %v11468_v61 = vpack.c.bf16 %v9412_v36, %v9410_v10  ;;  %v9300_v10 = vrot.slane %v9201_v47, %v13543_v62 }
 0x96c   :  { %v11418_v44 = vpack.c.bf16 %v9094_v52, %v9093_v35  ;;  %v9490_v35 = vld [vmem:[%s15995_s14 + $0x188] sm:$0xff]  ;;  %v9492_v52 = vld [vmem:[%s15995_s14 + $0x198] sm:$0xff] }
 0x96e   :  { %11420 = vmatprep.subr.msk.bf16.mxu1 %vm11419_vm15, %v11418_v44 }
 0x96f   :  { %11423 = vmatpush3.bf16.msk.msra.mxu1 %vm11419_vm15, %v11418_v44  ;;  %v11470_v44 = vpack.c.bf16 %v9411_v49, %v9409_v14  ;;  %v10960_v14 = vld [vmem:[%s15999_s16] ss:$0 sm:$0xff] }
 0x970   :  { %11441 = vmatprep.subr.bf16.mxu1 %v11440_v58  ;;  %v11472_v58 = vpack.c.bf16 %v9492_v52, %v9490_v35  ;;  %v10961_v35 = vld [vmem:[%s16000_s17] ss:$0 sm:$0xff] }
 0x972   :  { %11370 = vmatmul.mubr.msk.f32.vlgmr.msra.gmra.mrb[192].mxu1 %vm9099_vm13, %v9096_v1  ;;  %v11474_v1 = vpack.c.bf16 %v9491_v56, %v9489_v51 }
 0x973   :  { %11372 = vmatprep.mubr.msk.f32.mxu1 %vm9099_vm13, %v9097_v17  ;;  %11443 = vmatpush1.bf16.msra.mxu1 %v11442_v43  ;;  %v11476_v43 = vpack.c.bf16 %v9496_v5, %v9494_v28  ;;  %v9493_v17 = vld [vmem:[%s15995_s14 + $0x1a0] sm:$0xff] }
 0x974   :  { %11445 = vmatprep.subr.bf16.mxu1 %v11444_v22  ;;  %v9495_v22 = vld [vmem:[%s15995_s14 + $0x1b0] sm:$0xff]  ;;  %v10962_v28 = vld [vmem:[%s16001_s19] ss:$0 sm:$0xff] }
 0x975   :  { %v11478_v21 = vpack.c.bf16 %v9495_v22, %v9493_v17 }
 0x976   :  { %11373 = vmatmul.mubr.msk.f32.gmra.mrb[194].mxu1 %vm9099_vm13, %v9098_v57  ;;  %v9497_v57 = vld [vmem:[%s15995_s14 + $0x1c0] sm:$0xff] }
 0x977   :  { %11447 = vmatpush1.bf16.msra.mxu1 %v11446_v63  ;;  %9388 = vmatprep.mubr.f32.mxu1 %v12633_v0  ;;  %v9499_v63 = vld [vmem:[%s15995_s14 + $0x1d0] sm:$0xff] }
 0x978   :  { %11449 = vmatprep.subr.bf16.mxu1 %v11448_v31  ;;  %v9502_v31 = vld [vmem:[%s15995_s14 + $0x1e8] sm:$0xff]  ;;  %v11482_v53 = vpack.c.bf16 %v9499_v63, %v9497_v57 }
 0x979   :  { %v11484_v2 = vpack.c.bf16 %v9504_v60, %v9502_v31 }
 0x97b   :  { %11451 = vmatpush1.bf16.msra.mxu1 %v11450_v11  ;;  %v9503_v11 = vld [vmem:[%s15995_s14 + $0x1f0] sm:$0xff] }
 0x97c   :  { %11453 = vmatprep.subr.bf16.mxu1 %v11452_v40  ;;  %v11486_v40 = vpack.c.bf16 %v9503_v11, %v9501_v12 }
 0x97f   :  { %11455 = vmatpush1.bf16.msra.mxu1 %v11454_v8  ;;  %v9610_v8 = vld [vmem:[%s15997_s18 + $0x8] sm:$0xff] }
 0x980   :  { %11457 = vmatprep.subr.bf16.mxu1 %v11456_v19  ;;  %v11489_v29 = vpack.c.bf16 %v9610_v8, %v9609_v54  ;;  %v9613_v19 = vld [vmem:[%s15997_s18 + $0x20] sm:$0xff] }
 0x981   :  { %v11495_v18 = vpack.c.bf16 %v9614_v25, %v9613_v19 }
 0xa45   :  { %v11371_v39 = vpop.f32.mrb[192].mxu1 }
 0xa46   :  { %10957 = vmatmul.mubr.msk.f32.vlgmr.msra.gmra.mrb[196].mxu1 %vm7958_vm11, %v11371_v39  ;;  %v9182_v46 = vpop.f32.mrb[193].mxu1  ;;  %v9623_v39 = vld [vmem:[%s15997_s18 + $0x70] sm:$0xff] }
 0xa47   :  { %11459 = vmatpush1.bf16.msra.mxu1 %v11458_v7  ;;  %10956 = vmatmul.mubr.msk.f32.vlgmr.msra.gmra.mrb[112].mxu0 %vm7958_vm11, %v9182_v46  ;;  %v9620_v7 = vld [vmem:[%s15997_s18 + $0x58] sm:$0xff]  ;;  %v11510_v46 = vpack.c.bf16 %v9624_v50, %v9623_v39 }
 0xa48   :  { %11461 = vmatprep.subr.bf16.mxu1 %v11460_v4  ;;  %9480 = vmatprep.mubr.f32.mxu1 %v12633_v0  ;;  %v11504_v4 = vpack.c.bf16 %v9620_v7, %v9619_v27 }
 0xa49   :  { %v11374_v23 = vpop.f32.mrb[194].mxu1 }
 0xa4a   :  { %v9192_v30 = vpop.f32.mrb[195].mxu1 }
 0xa4b   :  { %11463 = vmatpush1.bf16.msra.mxu1 %v11462_v16 }
 0xa4c   :  { %11465 = vmatprep.subr.bf16.mxu1 %v11464_v42 }
 0xa4f   :  { %11467 = vmatpush1.bf16.msra.mxu1 %v11466_v9 }
 0xa50   :  { %11469 = vmatprep.subr.bf16.mxu1 %v11468_v61 }
 0xa53   :  { %11471 = vmatpush1.bf16.msra.mxu1 %v11470_v44 }
 0xa54   :  { %11473 = vmatprep.subr.bf16.mxu1 %v11472_v58 }
 0xa56   :  { %10958 = vmatmul.mubr.msk.f32.vlgmr.msra.gmra.mrb[196].mxu1 %vm7958_vm11, %v9192_v30 }
 0xa57   :  { %11475 = vmatpush1.bf16.msra.mxu1 %v11474_v1  ;;  %9572 = vmatprep.mubr.f32.mxu1 %v12633_v0 }
 0xa58   :  { %11477 = vmatprep.subr.bf16.mxu1 %v11476_v43 }
 0xa5b   :  { %11479 = vmatpush1.bf16.msra.mxu1 %v11478_v21 }
 0xa5c   :  { %11481 = vmatprep.subr.bf16.mxu1 %v11480_v34 }
 0xa5f   :  { %11483 = vmatpush1.bf16.msra.mxu1 %v11482_v53 }
 0xa60   :  { %11485 = vmatprep.subr.bf16.mxu1 %v11484_v2 }
 0xa63   :  { %11487 = vmatpush1.bf16.msra.mxu1 %v11486_v40 }
 0xa64   :  { %11488 = vmatprep.subr.bf16.mxu1 %v12637_v41 }
 0xa66   :  { %10959 = vmatmul.mubr.msk.f32.vlgmr.msra.gmra.mrb[196].mxu1 %vm7958_vm11, %v11374_v23 }
 0xa67   :  { %11407 = vmatprep.mubr.msk.f32.mxu1 %vm12634_vm0, %v12633_v0  ;;  %11490 = vmatpush3.bf16.msra.mxu1 %v11489_v29  ;;  %v11492_v0 = vpack.c.bf16 %v9612_v38, %v9611_v24 }
 0xa68   :  { %11491 = vmatprep.subr.bf16.mxu1 %v12637_v41 }
 0xa6b   :  { %11493 = vmatpush3.bf16.msra.mxu1 %v11492_v0 }
 0xa6c   :  { %11494 = vmatprep.subr.bf16.mxu1 %v12637_v41 }
 0xa6f   :  { %11496 = vmatpush3.bf16.msra.mxu1 %v11495_v18 }
 0xa70   :  { %11497 = vmatprep.subr.bf16.mxu1 %v12637_v41 }
 0xa73   :  { %11499 = vmatpush3.bf16.msra.mxu1 %v11498_v37 }
 0xa74   :  { %11500 = vmatprep.subr.bf16.mxu1 %v12637_v41 }
 0xa77   :  { %11502 = vmatpush3.bf16.msra.mxu1 %v11501_v6 }
 0xa78   :  { %11503 = vmatprep.subr.bf16.mxu1 %v12637_v41 }
 0xa7b   :  { %11505 = vmatpush3.bf16.msra.mxu1 %v11504_v4 }
 0xa7c   :  { %11506 = vmatprep.subr.bf16.mxu1 %v12637_v41 }
 0xa7f   :  { %11508 = vmatpush3.bf16.msra.mxu1 %v11507_v20 }
 0xa80   :  { %11509 = vmatprep.subr.bf16.mxu1 %v12637_v41 }
 0xa83   :  { %11511 = vmatpush3.bf16.msra.mxu1 %v11510_v46 }
 0xb1a   :  { %v9287_v16 = vpop.f32.mrb[112].mxu0 }
 0xb1b   :  { %v9289_v42 = vpop.f32.mrb[113].mxu0  ;;  %v9303_v36 = vadd.f32 %v9296_v32, %v9287_v16 }
 0xb1c   :  { %v9304_v23 = vadd.f32 %v9300_v10, %v9289_v42 }
 0xb39   :  { %v9574_v30 = vpop.f32.mrb[196].mxu1 }
 0xb3a   :  { %v11513_v9 = vadd.f32 %v9574_v30, %v9303_v36  ;;  %v9576_v61 = vpop.f32.mrb[197].mxu1 }
 0xb3b   :  { %v11515_v49 = vadd.f32 %v9576_v61, %v9304_v23 }
 0xb3c   :  { %9581 = vmax.xlane.f32.xlu0 %v11513_v9 }
 0xb3d   :  { %v9599_v52 = vmul.f32 %v11515_v49, %v10960_v14 }
 0xb3f   :  { %v9607_v44 = vadd.f32 %v10961_v35, %v9599_v52 }
 0xb41   :  { %v9608_v55 = vmax.f32 %v9607_v44, 0.0 }
 0xb43   :  { %11408 = vmatmul.mubr.f32.vlgmr.msra.gmra.mrb[198].mxu1 %v9608_v55 }
 0xbc9   :  { %v9582_v62 = vpop.xlane.xlu0 %9581 }
 0xbca   :  { %v9583_v58 = vsub.f32 %v11513_v9, %v9582_v62 }
 0xbcc   :  { %v9584_v51 = vmul.f32 1.442695, %v9583_v58 }
 0xbce   :  { %12618 = vpow2.f32 %v9584_v51 }
 0xbd8   :  { %v12619_v56 = vpop.eup %12618 }
 0xbd9   :  { %9586 = vadd.xlane.f32.xlu0 %v12619_v56 }
 0xc16   :  { %v9698_v5 = vpop.f32.mrb[198].mxu1 }
 0xc17   :  { %v9699_v1 = vadd.f32 %v10962_v28, %v9698_v5  ;;  %v11409_v43 = vpop.f32.mrb[199].mxu1 }
 0xc19   :  { %9702 = vmax.xlane.f32.xlu1 %v9699_v1 }
 0xc66   :  { %v9587_v17 = vpop.xlane.xlu0 %9586 }
 0xc67   :  { %12620 = vlog2.f32 %v9587_v17 }
 0xc71   :  { %v12621_v22 = vpop.eup %12620 }
 0xc72   :  { %v9589_v45 = vmul.f32 0.6931472, %v12621_v22 }
 0xc74   :  { %v9590_v33 = vadd.f32 %v9589_v45, %v9582_v62 }
 0xc76   :  { %v9591_v21 = vsub.f32 %v11513_v9, %v9590_v33 }
 0xc78   :  { %9713 = vst [vmem:[%s16002_s23] sm:$0xff] %v9591_v21 }
 0xca6   :  { %v9703_v34 = vpop.xlane.xlu1 %9702 }
 0xca7   :  { %v9704_v57 = vsub.f32 %v9699_v1, %v9703_v34 }
 0xca9   :  { %v9705_v63 = vmul.f32 1.442695, %v9704_v57 }
 0xcab   :  { %12622 = vpow2.f32 %v9705_v63 }
 0xcb5   :  { %v12623_v31 = vpop.eup %12622 }
 0xcb6   :  { %9707 = vadd.xlane.f32.xlu0 %v12623_v31 }
 0xd43   :  { %v9708_v60 = vpop.xlane.xlu0 %9707 }
 0xd44   :  { %12624 = vlog2.f32 %v9708_v60 }
 0xd4e   :  { %v12625_v53 = vpop.eup %12624 }
 0xd4f   :  { %v9710_v2 = vmul.f32 0.6931472, %v12625_v53 }
 0xd51   :  { %v9711_v12 = vadd.f32 %v9710_v2, %v9703_v34 }
 0xd53   :  { %v9712_v11 = vsub.f32 %v9699_v1, %v9711_v12 }
 0xd55   :  { %9714 = vst [vmem:[%s16002_s23 + $0x8] sm:$0xff] %v9712_v11 }

</bundles_post_ra>
